<compile_context>
chip_gen: v7x
topology: tpu7x:2x2x1
jax: 0.10.0
libtpu: 0.0.40
codegen_flags: <defaults>
</compile_context>

<pallas_src>
import functools

import jax
import jax.numpy as jnp
from jax import lax
from jax.experimental import pallas as pl
from jax.experimental.pallas import tpu as pltpu


# ---------------------------------------------------------------------------
# In-kernel helpers
# ---------------------------------------------------------------------------
def _orthonormalize_rows(yt):
    """Orthonormalize the rows of a rank-major block Y^T of shape (bb, R, D).

    Unrolled modified Gram-Schmidt over the small static rank R.  All work is
    lane reductions (XLU) + elementwise (VPU) + one rsqrt per row (EUP); no
    divides, no Cholesky (so no NaNs from a non-PD Gram on ill-conditioned Y).
    """
    bb, r, d = yt.shape
    rows = []
    for j in range(r):
        v = yt[:, j:j + 1, :]                                    # (bb, 1, D)
        for q in rows:                                           # MGS sweeps
            v = v - jnp.sum(q * v, axis=-1, keepdims=True) * q
        inv_norm = lax.rsqrt(jnp.sum(v * v, axis=-1, keepdims=True) + 1e-30)
        rows.append(v * inv_norm)
    # Reassemble (bb, R, D) with iota/select (avoids sublane-unaligned concats).
    row_idx = lax.broadcasted_iota(jnp.int32, (bb, r, d), 1)
    qt = jnp.zeros((bb, r, d), jnp.float32)
    for j, v in enumerate(rows):
        qt = jnp.where(row_idx == j, jnp.broadcast_to(v, (bb, r, d)), qt)
    return qt


# ---------------------------------------------------------------------------
# Pallas kernels
# ---------------------------------------------------------------------------
def _rangefinder_kernel(x_ref, gt_ref, qt_ref, bt_ref, *, niter):
    """Fused svd_lowrank range-finder + power iterations, x resident in VMEM.

    x_ref : (bb, M, N)  input block (read once, reused by all 6 contractions)
    gt_ref: (1,  R, M)  shared Gaussian test matrix G^T (constant block index)
    qt_ref: (bb, R, N)  final orthonormal basis Q^T
    bt_ref: (bb, R, M)  B^T with B = x Q, rank-major
    """
    x = x_ref[...]
    bb = x.shape[0]
    gt = jnp.broadcast_to(gt_ref[...], (bb,) + gt_ref.shape[1:])   # once, tiny

    # Y^T = G^T x (R, N): canonical MXU A@B contraction over M.
    yt = jnp.einsum("brm,bmn->brn", gt, x, preferred_element_type=jnp.float32)
    qt = _orthonormalize_rows(yt)
    for _ in range(niter):
        # Y^T = Q^T x^T (contract N = lane axis of both): MXU trans-B path,
        # no transposed copy of x is ever materialized.
        yt = jnp.einsum("brn,bmn->brm", qt, x, preferred_element_type=jnp.float32)
        qt = _orthonormalize_rows(yt)
        yt = jnp.einsum("brm,bmn->brn", qt, x, preferred_element_type=jnp.float32)
        qt = _orthonormalize_rows(yt)
    qt_ref[...] = qt
    # B^T = Q^T x^T (the old, dead Gram output of this step is gone).
    bt_ref[...] = jnp.einsum("brn,bmn->brm", qt, x,
                             preferred_element_type=jnp.float32)


def _finalize_kernel(ub_ref, s_ref, vh_ref, qt_ref, u_ref, v_ref):
    """u = U*sqrt(S); v = (Q Vh^T)*sqrt(S).  sqrt on EUP, no divides."""
    sq = jnp.sqrt(s_ref[...])                                   # (bb, 1, R)
    u_ref[...] = ub_ref[...] * sq                               # (bb, M, R)
    # V^T = Vh Q^T computed rank-major so the MXU output is lane-dense (N),
    # then a single tiny in-kernel transpose into the module's (N, R) layout.
    vt = jnp.einsum("brk,bkn->brn", vh_ref[...], qt_ref[...],
                    preferred_element_type=jnp.float32)         # (bb, R, N)
    v_ref[...] = jnp.transpose(vt, (0, 2, 1)) * sq              # (bb, N, R)


# ---------------------------------------------------------------------------
# Generation-aware sizing
# ---------------------------------------------------------------------------
def _tpu_vmem_capacity():
    try:
        return int(pltpu.get_tpu_info().vmem_capacity_bytes)
    except Exception:
        return 64 * 1024 * 1024       # conservative fallback (v7x per-TC VMEM)


def _num_tensorcores():
    """Heuristic TensorCores-per-chip (v7x has 2; v5e/v6e have 1)."""
    try:
        kind = jax.devices()[0].device_kind.lower()
    except Exception:
        return 1
    return 2 if "v7" in kind else 1


def _pick_block_batch(batch, m, n, r, vmem_cap, num_tc):
    """Batch elements per grid step + vmem_limit_bytes, sized from the real
    double-buffered working set against the reported VMEM capacity."""
    d = max(m, n)
    per_elem = 4 * (2 * m * n              # x block, double-buffered
                    + 2 * r * (m + n)      # qt / bt outputs, double-buffered
                    + 16 * r * d)          # in-kernel temporaries (yt, MGS)
    budget = max(per_elem, int(vmem_cap * 0.4))
    cap = max(1, budget // per_elem)
    if num_tc >= 2 and batch >= 2:
        # Keep >= 2 grid steps only where a 2nd step maps to real hardware
        # (both v7x TensorCores under dimension_semantics=("parallel",)).
        cap = min(cap, max(1, (batch + 1) // 2))
    block_b = max(1, min(batch, cap))
    grid_b = (batch + block_b - 1) // block_b
    working = per_elem * block_b + 2 * 4 * r * m + (4 << 20)
    vmem_limit = int(max(16 << 20, min(working, int(vmem_cap * 0.75))))
    return block_b, grid_b, vmem_limit


# ---------------------------------------------------------------------------
# pallas_call wrappers
# ---------------------------------------------------------------------------
def _rangefinder(x, gt, *, niter, block_b, vmem_limit):
    bp, m, n = x.shape
    r = gt.shape[1]
    kernel = functools.partial(_rangefinder_kernel, niter=niter)
    return pl.pallas_call(
        kernel,
        out_shape=(
            jax.ShapeDtypeStruct((bp, r, n), jnp.float32),    # Q^T
            jax.ShapeDtypeStruct((bp, r, m), jnp.float32),    # B^T = (x Q)^T
        ),
        grid_spec=pltpu.PrefetchScalarGridSpec(
            num_scalar_prefetch=0,
            grid=(bp // block_b,),
            in_specs=[
                pl.BlockSpec((block_b, m, n), lambda i: (i, 0, 0)),
                # shared G^T: constant block index -> fetched once, resident
                pl.BlockSpec((1, r, m), lambda i: (0, 0, 0)),
            ],
            out_specs=[
                pl.BlockSpec((block_b, r, n), lambda i: (i, 0, 0)),
                pl.BlockSpec((block_b, r, m), lambda i: (i, 0, 0)),
            ],
        ),
        compiler_params=pltpu.CompilerParams(
            dimension_semantics=("parallel",),
            vmem_limit_bytes=vmem_limit),
    )(x, gt)


def _finalize(u_b, s3, vh_b, qt, *, block_b, vmem_limit):
    bp, m, r = u_b.shape
    n = qt.shape[2]
    return pl.pallas_call(
        _finalize_kernel,
        out_shape=(
            jax.ShapeDtypeStruct((bp, m, r), jnp.float32),
            jax.ShapeDtypeStruct((bp, n, r), jnp.float32),
        ),
        grid_spec=pltpu.PrefetchScalarGridSpec(
            num_scalar_prefetch=0,
            grid=(bp // block_b,),
            in_specs=[
                pl.BlockSpec((block_b, m, r), lambda i: (i, 0, 0)),
                pl.BlockSpec((block_b, 1, r), lambda i: (i, 0, 0)),
                pl.BlockSpec((block_b, r, r), lambda i: (i, 0, 0)),
                pl.BlockSpec((block_b, r, n), lambda i: (i, 0, 0)),
            ],
            out_specs=[
                pl.BlockSpec((block_b, m, r), lambda i: (i, 0, 0)),
                pl.BlockSpec((block_b, n, r), lambda i: (i, 0, 0)),
            ],
        ),
        compiler_params=pltpu.CompilerParams(
            dimension_semantics=("parallel",),
            vmem_limit_bytes=vmem_limit),
    )(u_b, s3, vh_b, qt)


# ---------------------------------------------------------------------------
# Forward (SVDInit.forward) and pure-JAX reference
# ---------------------------------------------------------------------------
def svd_init_forward(x, rank, niter=2):
    """Pallas implementation of SVDInit.forward: randomized low-rank SVD of
    each batched matrix, then u *= sqrt(s), v *= sqrt(s)."""
    b, m, n = x.shape
    r = rank
    if not (m < n or n > r):
        # TODO(synk): torch.svd_lowrank's other branch (M >= N and N <= rank)
        # is not implemented.
        raise NotImplementedError(
            "svd_init_forward implements torch.svd_lowrank's A^H branch "
            "(requires M < N or N > rank).")

    x = x.astype(jnp.float32)

    vmem_cap = _tpu_vmem_capacity()
    num_tc = _num_tensorcores()
    block_b, grid_b, vmem_limit = _pick_block_batch(b, m, n, r, vmem_cap, num_tc)
    bp = block_b * grid_b
    if bp != b:
        # Pad non-divisible batches once (replicating the last matrix keeps
        # every block well conditioned); padded results are sliced off below.
        x = jnp.concatenate([x, jnp.broadcast_to(x[-1:], (bp - b, m, n))], axis=0)

    # Gaussian range-finder test matrix, shared across the batch like torch's
    # torch.manual_seed(42); torch.randn(M, R).
    # TODO(synk): torch's CPU RNG stream cannot be reproduced in JAX; a fixed
    # JAX key stands in for torch.manual_seed(42).
    g = jax.random.normal(jax.random.PRNGKey(42), (m, r), dtype=jnp.float32)
    gt = jnp.transpose(g)[None]                                   # (1, R, M)

    # One fused Pallas call: range-finder + niter power iterations + B = x Q.
    qt, bt = _rangefinder(x, gt, niter=niter, block_b=block_b,
                          vmem_limit=vmem_limit)

    # Small dense SVD of B (M x R).
    # TODO(synk): dense SVD panel factorization has no clean Pallas
    # equivalent; kept on XLA (jnp.linalg).
    u_b, s, vh_b = jnp.linalg.svd(jnp.transpose(bt, (0, 2, 1)),
                                  full_matrices=False)

    # Fused finalize: u = U*sqrt(s), v = (Q Vh^T)*sqrt(s), emitted directly in
    # the module's (B, M, R) / (B, N, R) return layout.
    u, v = _finalize(u_b, s[:, None, :], vh_b, qt, block_b=block_b,
                     vmem_limit=vmem_limit)
    return u[:b], v[:b]


def svd_init_reference(x, rank, niter=2):
    """Pure-JAX mirror of torch.svd_lowrank (Householder QR) + SVDInit scaling."""
    g = jax.random.normal(jax.random.PRNGKey(42), (x.shape[1], rank),
                          dtype=jnp.float32)
    y = jnp.einsum("bmn,mr->bnr", x, g)                  # x^T G
    q_mat = jnp.linalg.qr(y)[0]
    for _ in range(niter):
        y = jnp.einsum("bmn,bnr->bmr", x, q_mat)         # x Q
        q_mat = jnp.linalg.qr(y)[0]
        y = jnp.einsum("bmn,bmr->bnr", x, q_mat)         # x^T Q
        q_mat = jnp.linalg.qr(y)[0]
    b_small = jnp.einsum("bmn,bnr->bmr", x, q_mat)       # (B, M, R)
    u_b, s, vh_b = jnp.linalg.svd(b_small, full_matrices=False)
    v = jnp.einsum("bnk,brk->bnr", q_mat, vh_b)          # Q @ Vh^T
    sq = jnp.sqrt(s)[:, None, :]
    return u_b * sq, v * sq


if __name__ == "__main__":
    # size=(M, N)=(64, 32), rank=8, batched input (B, M, N).
    B, M, N, R = 2, 64, 32, 8
    x = jax.random.normal(jax.random.PRNGKey(0), (B, M, N), dtype=jnp.float32)

    fwd = jax.jit(functools.partial(svd_init_forward, rank=R))
    u, v = fwd(x)
    u = jax.block_until_ready(u)
    v = jax.block_until_ready(v)
    assert u.shape == (B, M, R) and v.shape == (B, N, R)

    u_ref, v_ref = svd_init_reference(x, R)

    # SVD columns are defined only up to a sign (torch vs JAX would differ the
    # same way); align paired signs before the elementwise comparison.
    sign = jnp.sign(jnp.sum(u * u_ref, axis=1, keepdims=True))
    sign = jnp.where(sign == 0, 1.0, sign)
    assert jnp.allclose(u * sign, u_ref, atol=5e-3, rtol=5e-3), "u mismatch"
    assert jnp.allclose(v * sign, v_ref, atol=5e-3, rtol=5e-3), "v mismatch"

    # Sign-invariant check: the implied rank-R reconstruction u @ v^T agrees.
    rec = jnp.einsum("bmr,bnr->bmn", u, v)
    rec_ref = jnp.einsum("bmr,bnr->bmn", u_ref, v_ref)
    assert jnp.allclose(rec, rec_ref, atol=2e-3, rtol=2e-3), "reconstruction mismatch"

    print("KERNEL_OK")
</pallas_src>

<mosaic_0001>
module attributes {stable_mosaic.version = 11 : i64} {
  func.func @_rangefinder_kernel(%arg0: i32, %arg1: memref<2x64x32xf32, #tpu.memory_space<vmem>>, %arg2: memref<1x8x64xf32, #tpu.memory_space<vmem>>, %arg3: memref<2x8x32xf32, #tpu.memory_space<vmem>>, %arg4: memref<2x8x64xf32, #tpu.memory_space<vmem>>) attributes {dimension_semantics = [#tpu.dimension_semantics<parallel>], iteration_bounds = array<i64: 1>, scalar_prefetch = 0 : i64, scratch_operands = 0 : i64, tpu.core_type = #tpu.core_type<tc>, window_params = [{transform_indices = @transform_0, window_bounds = array<i64: 2, 64, 32>}, {pipeline_mode = #tpu.pipeline_mode<synchronous>, transform_indices = @transform_1, window_bounds = array<i64: 1, 8, 64>}, {transform_indices = @transform_2, window_bounds = array<i64: 2, 8, 32>}, {transform_indices = @transform_3, window_bounds = array<i64: 2, 8, 64>}]} {
    %c0 = arith.constant 0 : index
    %c0_0 = arith.constant 0 : index
    %c0_1 = arith.constant 0 : index
    %0 = vector.load %arg1[%c0, %c0_0, %c0_1] : memref<2x64x32xf32, #tpu.memory_space<vmem>>, vector<2x64x32xf32>
    %c0_2 = arith.constant 0 : index
    %c0_3 = arith.constant 0 : index
    %c0_4 = arith.constant 0 : index
    %1 = vector.load %arg2[%c0_2, %c0_3, %c0_4] : memref<1x8x64xf32, #tpu.memory_space<vmem>>, vector<1x8x64xf32>
    %2 = vector.shape_cast %1 : vector<1x8x64xf32> to vector<1x8x64xf32>
    %3 = vector.broadcast %2 : vector<1x8x64xf32> to vector<2x8x64xf32>
    "tpu.trace_start"() <{level = 10 : i32, message = "brm,bmn->brn"}> : () -> ()
    %cst = arith.constant dense<0.000000e+00> : vector<2x8x32xf32>
    %4 = tpu.matmul %3, %0, %cst {dimension_numbers = #tpu.dot_dimension_numbers<[2], [1], [1], [2], [0, 0, 0, 1, 1, 2], [0], [0]>} : vector<2x8x64xf32>, vector<2x64x32xf32>, vector<2x8x32xf32> -> vector<2x8x32xf32>
    "tpu.trace_stop"() : () -> ()
    %5 = vector.extract_strided_slice %4 {offsets = [0, 0, 0], sizes = [2, 1, 32], strides = [1, 1, 1]} : vector<2x8x32xf32> to vector<2x1x32xf32>
    %6 = arith.mulf %5, %5 : vector<2x1x32xf32>
    %cst_5 = arith.constant dense<0.000000e+00> : vector<2x1xf32>
    %7 = vector.multi_reduction <add>, %6, %cst_5 [2] : vector<2x1x32xf32> to vector<2x1xf32>
    %8 = vector.shape_cast %7 : vector<2x1xf32> to vector<2x1x1xf32>
    %cst_6 = arith.constant 1.000000e-30 : f32
    %9 = vector.broadcast %cst_6 : f32 to vector<2x1x1xf32>
    %10 = arith.addf %8, %9 : vector<2x1x1xf32>
    %11 = math.rsqrt %10 : vector<2x1x1xf32>
    %12 = vector.broadcast %11 : vector<2x1x1xf32> to vector<2x1x32xf32>
    %13 = arith.mulf %5, %12 : vector<2x1x32xf32>
    %14 = vector.extract_strided_slice %4 {offsets = [0, 1, 0], sizes = [2, 1, 32], strides = [1, 1, 1]} : vector<2x8x32xf32> to vector<2x1x32xf32>
    %15 = arith.mulf %13, %14 : vector<2x1x32xf32>
    %cst_7 = arith.constant dense<0.000000e+00> : vector<2x1xf32>
    %16 = vector.multi_reduction <add>, %15, %cst_7 [2] : vector<2x1x32xf32> to vector<2x1xf32>
    %17 = vector.shape_cast %16 : vector<2x1xf32> to vector<2x1x1xf32>
    %18 = vector.broadcast %17 : vector<2x1x1xf32> to vector<2x1x32xf32>
    %19 = arith.mulf %18, %13 : vector<2x1x32xf32>
    %20 = arith.subf %14, %19 : vector<2x1x32xf32>
    %21 = arith.mulf %20, %20 : vector<2x1x32xf32>
    %cst_8 = arith.constant dense<0.000000e+00> : vector<2x1xf32>
    %22 = vector.multi_reduction <add>, %21, %cst_8 [2] : vector<2x1x32xf32> to vector<2x1xf32>
    %23 = vector.shape_cast %22 : vector<2x1xf32> to vector<2x1x1xf32>
    %cst_9 = arith.constant 1.000000e-30 : f32
    %24 = vector.broadcast %cst_9 : f32 to vector<2x1x1xf32>
    %25 = arith.addf %23, %24 : vector<2x1x1xf32>
    %26 = math.rsqrt %25 : vector<2x1x1xf32>
    %27 = vector.broadcast %26 : vector<2x1x1xf32> to vector<2x1x32xf32>
    %28 = arith.mulf %20, %27 : vector<2x1x32xf32>
    %29 = vector.extract_strided_slice %4 {offsets = [0, 2, 0], sizes = [2, 1, 32], strides = [1, 1, 1]} : vector<2x8x32xf32> to vector<2x1x32xf32>
    %30 = arith.mulf %13, %29 : vector<2x1x32xf32>
    %cst_10 = arith.constant dense<0.000000e+00> : vector<2x1xf32>
    %31 = vector.multi_reduction <add>, %30, %cst_10 [2] : vector<2x1x32xf32> to vector<2x1xf32>
    %32 = vector.shape_cast %31 : vector<2x1xf32> to vector<2x1x1xf32>
    %33 = vector.broadcast %32 : vector<2x1x1xf32> to vector<2x1x32xf32>
    %34 = arith.mulf %33, %13 : vector<2x1x32xf32>
    %35 = arith.subf %29, %34 : vector<2x1x32xf32>
    %36 = arith.mulf %28, %35 : vector<2x1x32xf32>
    %cst_11 = arith.constant dense<0.000000e+00> : vector<2x1xf32>
    %37 = vector.multi_reduction <add>, %36, %cst_11 [2] : vector<2x1x32xf32> to vector<2x1xf32>
    %38 = vector.shape_cast %37 : vector<2x1xf32> to vector<2x1x1xf32>
    %39 = vector.broadcast %38 : vector<2x1x1xf32> to vector<2x1x32xf32>
    %40 = arith.mulf %39, %28 : vector<2x1x32xf32>
    %41 = arith.subf %35, %40 : vector<2x1x32xf32>
    %42 = arith.mulf %41, %41 : vector<2x1x32xf32>
    %cst_12 = arith.constant dense<0.000000e+00> : vector<2x1xf32>
    %43 = vector.multi_reduction <add>, %42, %cst_12 [2] : vector<2x1x32xf32> to vector<2x1xf32>
    %44 = vector.shape_cast %43 : vector<2x1xf32> to vector<2x1x1xf32>
    %cst_13 = arith.constant 1.000000e-30 : f32
    %45 = vector.broadcast %cst_13 : f32 to vector<2x1x1xf32>
    %46 = arith.addf %44, %45 : vector<2x1x1xf32>
    %47 = math.rsqrt %46 : vector<2x1x1xf32>
    %48 = vector.broadcast %47 : vector<2x1x1xf32> to vector<2x1x32xf32>
    %49 = arith.mulf %41, %48 : vector<2x1x32xf32>
    %50 = vector.extract_strided_slice %4 {offsets = [0, 3, 0], sizes = [2, 1, 32], strides = [1, 1, 1]} : vector<2x8x32xf32> to vector<2x1x32xf32>
    %51 = arith.mulf %13, %50 : vector<2x1x32xf32>
    %cst_14 = arith.constant dense<0.000000e+00> : vector<2x1xf32>
    %52 = vector.multi_reduction <add>, %51, %cst_14 [2] : vector<2x1x32xf32> to vector<2x1xf32>
    %53 = vector.shape_cast %52 : vector<2x1xf32> to vector<2x1x1xf32>
    %54 = vector.broadcast %53 : vector<2x1x1xf32> to vector<2x1x32xf32>
    %55 = arith.mulf %54, %13 : vector<2x1x32xf32>
    %56 = arith.subf %50, %55 : vector<2x1x32xf32>
    %57 = arith.mulf %28, %56 : vector<2x1x32xf32>
    %cst_15 = arith.constant dense<0.000000e+00> : vector<2x1xf32>
    %58 = vector.multi_reduction <add>, %57, %cst_15 [2] : vector<2x1x32xf32> to vector<2x1xf32>
    %59 = vector.shape_cast %58 : vector<2x1xf32> to vector<2x1x1xf32>
    %60 = vector.broadcast %59 : vector<2x1x1xf32> to vector<2x1x32xf32>
    %61 = arith.mulf %60, %28 : vector<2x1x32xf32>
    %62 = arith.subf %56, %61 : vector<2x1x32xf32>
    %63 = arith.mulf %49, %62 : vector<2x1x32xf32>
    %cst_16 = arith.constant dense<0.000000e+00> : vector<2x1xf32>
    %64 = vector.multi_reduction <add>, %63, %cst_16 [2] : vector<2x1x32xf32> to vector<2x1xf32>
    %65 = vector.shape_cast %64 : vector<2x1xf32> to vector<2x1x1xf32>
    %66 = vector.broadcast %65 : vector<2x1x1xf32> to vector<2x1x32xf32>
    %67 = arith.mulf %66, %49 : vector<2x1x32xf32>
    %68 = arith.subf %62, %67 : vector<2x1x32xf32>
    %69 = arith.mulf %68, %68 : vector<2x1x32xf32>
    %cst_17 = arith.constant dense<0.000000e+00> : vector<2x1xf32>
    %70 = vector.multi_reduction <add>, %69, %cst_17 [2] : vector<2x1x32xf32> to vector<2x1xf32>
    %71 = vector.shape_cast %70 : vector<2x1xf32> to vector<2x1x1xf32>
    %cst_18 = arith.constant 1.000000e-30 : f32
    %72 = vector.broadcast %cst_18 : f32 to vector<2x1x1xf32>
    %73 = arith.addf %71, %72 : vector<2x1x1xf32>
    %74 = math.rsqrt %73 : vector<2x1x1xf32>
    %75 = vector.broadcast %74 : vector<2x1x1xf32> to vector<2x1x32xf32>
    %76 = arith.mulf %68, %75 : vector<2x1x32xf32>
    %77 = vector.extract_strided_slice %4 {offsets = [0, 4, 0], sizes = [2, 1, 32], strides = [1, 1, 1]} : vector<2x8x32xf32> to vector<2x1x32xf32>
    %78 = arith.mulf %13, %77 : vector<2x1x32xf32>
    %cst_19 = arith.constant dense<0.000000e+00> : vector<2x1xf32>
    %79 = vector.multi_reduction <add>, %78, %cst_19 [2] : vector<2x1x32xf32> to vector<2x1xf32>
    %80 = vector.shape_cast %79 : vector<2x1xf32> to vector<2x1x1xf32>
    %81 = vector.broadcast %80 : vector<2x1x1xf32> to vector<2x1x32xf32>
    %82 = arith.mulf %81, %13 : vector<2x1x32xf32>
    %83 = arith.subf %77, %82 : vector<2x1x32xf32>
    %84 = arith.mulf %28, %83 : vector<2x1x32xf32>
    %cst_20 = arith.constant dense<0.000000e+00> : vector<2x1xf32>
    %85 = vector.multi_reduction <add>, %84, %cst_20 [2] : vector<2x1x32xf32> to vector<2x1xf32>
    %86 = vector.shape_cast %85 : vector<2x1xf32> to vector<2x1x1xf32>
    %87 = vector.broadcast %86 : vector<2x1x1xf32> to vector<2x1x32xf32>
    %88 = arith.mulf %87, %28 : vector<2x1x32xf32>
    %89 = arith.subf %83, %88 : vector<2x1x32xf32>
    %90 = arith.mulf %49, %89 : vector<2x1x32xf32>
    %cst_21 = arith.constant dense<0.000000e+00> : vector<2x1xf32>
    %91 = vector.multi_reduction <add>, %90, %cst_21 [2] : vector<2x1x32xf32> to vector<2x1xf32>
    %92 = vector.shape_cast %91 : vector<2x1xf32> to vector<2x1x1xf32>
    %93 = vector.broadcast %92 : vector<2x1x1xf32> to vector<2x1x32xf32>
    %94 = arith.mulf %93, %49 : vector<2x1x32xf32>
    %95 = arith.subf %89, %94 : vector<2x1x32xf32>
    %96 = arith.mulf %76, %95 : vector<2x1x32xf32>
    %cst_22 = arith.constant dense<0.000000e+00> : vector<2x1xf32>
    %97 = vector.multi_reduction <add>, %96, %cst_22 [2] : vector<2x1x32xf32> to vector<2x1xf32>
    %98 = vector.shape_cast %97 : vector<2x1xf32> to vector<2x1x1xf32>
    %99 = vector.broadcast %98 : vector<2x1x1xf32> to vector<2x1x32xf32>
    %100 = arith.mulf %99, %76 : vector<2x1x32xf32>
    %101 = arith.subf %95, %100 : vector<2x1x32xf32>
    %102 = arith.mulf %101, %101 : vector<2x1x32xf32>
    %cst_23 = arith.constant dense<0.000000e+00> : vector<2x1xf32>
    %103 = vector.multi_reduction <add>, %102, %cst_23 [2] : vector<2x1x32xf32> to vector<2x1xf32>
    %104 = vector.shape_cast %103 : vector<2x1xf32> to vector<2x1x1xf32>
    %cst_24 = arith.constant 1.000000e-30 : f32
    %105 = vector.broadcast %cst_24 : f32 to vector<2x1x1xf32>
    %106 = arith.addf %104, %105 : vector<2x1x1xf32>
    %107 = math.rsqrt %106 : vector<2x1x1xf32>
    %108 = vector.broadcast %107 : vector<2x1x1xf32> to vector<2x1x32xf32>
    %109 = arith.mulf %101, %108 : vector<2x1x32xf32>
    %110 = vector.extract_strided_slice %4 {offsets = [0, 5, 0], sizes = [2, 1, 32], strides = [1, 1, 1]} : vector<2x8x32xf32> to vector<2x1x32xf32>
    %111 = arith.mulf %13, %110 : vector<2x1x32xf32>
    %cst_25 = arith.constant dense<0.000000e+00> : vector<2x1xf32>
    %112 = vector.multi_reduction <add>, %111, %cst_25 [2] : vector<2x1x32xf32> to vector<2x1xf32>
    %113 = vector.shape_cast %112 : vector<2x1xf32> to vector<2x1x1xf32>
    %114 = vector.broadcast %113 : vector<2x1x1xf32> to vector<2x1x32xf32>
    %115 = arith.mulf %114, %13 : vector<2x1x32xf32>
    %116 = arith.subf %110, %115 : vector<2x1x32xf32>
    %117 = arith.mulf %28, %116 : vector<2x1x32xf32>
    %cst_26 = arith.constant dense<0.000000e+00> : vector<2x1xf32>
    %118 = vector.multi_reduction <add>, %117, %cst_26 [2] : vector<2x1x32xf32> to vector<2x1xf32>
    %119 = vector.shape_cast %118 : vector<2x1xf32> to vector<2x1x1xf32>
    %120 = vector.broadcast %119 : vector<2x1x1xf32> to vector<2x1x32xf32>
    %121 = arith.mulf %120, %28 : vector<2x1x32xf32>
    %122 = arith.subf %116, %121 : vector<2x1x32xf32>
    %123 = arith.mulf %49, %122 : vector<2x1x32xf32>
    %cst_27 = arith.constant dense<0.000000e+00> : vector<2x1xf32>
    %124 = vector.multi_reduction <add>, %123, %cst_27 [2] : vector<2x1x32xf32> to vector<2x1xf32>
    %125 = vector.shape_cast %124 : vector<2x1xf32> to vector<2x1x1xf32>
    %126 = vector.broadcast %125 : vector<2x1x1xf32> to vector<2x1x32xf32>
    %127 = arith.mulf %126, %49 : vector<2x1x32xf32>
    %128 = arith.subf %122, %127 : vector<2x1x32xf32>
    %129 = arith.mulf %76, %128 : vector<2x1x32xf32>
    %cst_28 = arith.constant dense<0.000000e+00> : vector<2x1xf32>
    %130 = vector.multi_reduction <add>, %129, %cst_28 [2] : vector<2x1x32xf32> to vector<2x1xf32>
    %131 = vector.shape_cast %130 : vector<2x1xf32> to vector<2x1x1xf32>
    %132 = vector.broadcast %131 : vector<2x1x1xf32> to vector<2x1x32xf32>
    %133 = arith.mulf %132, %76 : vector<2x1x32xf32>
    %134 = arith.subf %128, %133 : vector<2x1x32xf32>
    %135 = arith.mulf %109, %134 : vector<2x1x32xf32>
    %cst_29 = arith.constant dense<0.000000e+00> : vector<2x1xf32>
    %136 = vector.multi_reduction <add>, %135, %cst_29 [2] : vector<2x1x32xf32> to vector<2x1xf32>
    %137 = vector.shape_cast %136 : vector<2x1xf32> to vector<2x1x1xf32>
    %138 = vector.broadcast %137 : vector<2x1x1xf32> to vector<2x1x32xf32>
    %139 = arith.mulf %138, %109 : vector<2x1x32xf32>
    %140 = arith.subf %134, %139 : vector<2x1x32xf32>
    %141 = arith.mulf %140, %140 : vector<2x1x32xf32>
    %cst_30 = arith.constant dense<0.000000e+00> : vector<2x1xf32>
    %142 = vector.multi_reduction <add>, %141, %cst_30 [2] : vector<2x1x32xf32> to vector<2x1xf32>
    %143 = vector.shape_cast %142 : vector<2x1xf32> to vector<2x1x1xf32>
    %cst_31 = arith.constant 1.000000e-30 : f32
    %144 = vector.broadcast %cst_31 : f32 to vector<2x1x1xf32>
    %145 = arith.addf %143, %144 : vector<2x1x1xf32>
    %146 = math.rsqrt %145 : vector<2x1x1xf32>
    %147 = vector.broadcast %146 : vector<2x1x1xf32> to vector<2x1x32xf32>
    %148 = arith.mulf %140, %147 : vector<2x1x32xf32>
    %149 = vector.extract_strided_slice %4 {offsets = [0, 6, 0], sizes = [2, 1, 32], strides = [1, 1, 1]} : vector<2x8x32xf32> to vector<2x1x32xf32>
    %150 = arith.mulf %13, %149 : vector<2x1x32xf32>
    %cst_32 = arith.constant dense<0.000000e+00> : vector<2x1xf32>
    %151 = vector.multi_reduction <add>, %150, %cst_32 [2] : vector<2x1x32xf32> to vector<2x1xf32>
    %152 = vector.shape_cast %151 : vector<2x1xf32> to vector<2x1x1xf32>
    %153 = vector.broadcast %152 : vector<2x1x1xf32> to vector<2x1x32xf32>
    %154 = arith.mulf %153, %13 : vector<2x1x32xf32>
    %155 = arith.subf %149, %154 : vector<2x1x32xf32>
    %156 = arith.mulf %28, %155 : vector<2x1x32xf32>
    %cst_33 = arith.constant dense<0.000000e+00> : vector<2x1xf32>
    %157 = vector.multi_reduction <add>, %156, %cst_33 [2] : vector<2x1x32xf32> to vector<2x1xf32>
    %158 = vector.shape_cast %157 : vector<2x1xf32> to vector<2x1x1xf32>
    %159 = vector.broadcast %158 : vector<2x1x1xf32> to vector<2x1x32xf32>
    %160 = arith.mulf %159, %28 : vector<2x1x32xf32>
    %161 = arith.subf %155, %160 : vector<2x1x32xf32>
    %162 = arith.mulf %49, %161 : vector<2x1x32xf32>
    %cst_34 = arith.constant dense<0.000000e+00> : vector<2x1xf32>
    %163 = vector.multi_reduction <add>, %162, %cst_34 [2] : vector<2x1x32xf32> to vector<2x1xf32>
    %164 = vector.shape_cast %163 : vector<2x1xf32> to vector<2x1x1xf32>
    %165 = vector.broadcast %164 : vector<2x1x1xf32> to vector<2x1x32xf32>
    %166 = arith.mulf %165, %49 : vector<2x1x32xf32>
    %167 = arith.subf %161, %166 : vector<2x1x32xf32>
    %168 = arith.mulf %76, %167 : vector<2x1x32xf32>
    %cst_35 = arith.constant dense<0.000000e+00> : vector<2x1xf32>
    %169 = vector.multi_reduction <add>, %168, %cst_35 [2] : vector<2x1x32xf32> to vector<2x1xf32>
    %170 = vector.shape_cast %169 : vector<2x1xf32> to vector<2x1x1xf32>
    %171 = vector.broadcast %170 : vector<2x1x1xf32> to vector<2x1x32xf32>
    %172 = arith.mulf %171, %76 : vector<2x1x32xf32>
    %173 = arith.subf %167, %172 : vector<2x1x32xf32>
    %174 = arith.mulf %109, %173 : vector<2x1x32xf32>
    %cst_36 = arith.constant dense<0.000000e+00> : vector<2x1xf32>
    %175 = vector.multi_reduction <add>, %174, %cst_36 [2] : vector<2x1x32xf32> to vector<2x1xf32>
    %176 = vector.shape_cast %175 : vector<2x1xf32> to vector<2x1x1xf32>
    %177 = vector.broadcast %176 : vector<2x1x1xf32> to vector<2x1x32xf32>
    %178 = arith.mulf %177, %109 : vector<2x1x32xf32>
    %179 = arith.subf %173, %178 : vector<2x1x32xf32>
    %180 = arith.mulf %148, %179 : vector<2x1x32xf32>
    %cst_37 = arith.constant dense<0.000000e+00> : vector<2x1xf32>
    %181 = vector.multi_reduction <add>, %180, %cst_37 [2] : vector<2x1x32xf32> to vector<2x1xf32>
    %182 = vector.shape_cast %181 : vector<2x1xf32> to vector<2x1x1xf32>
    %183 = vector.broadcast %182 : vector<2x1x1xf32> to vector<2x1x32xf32>
    %184 = arith.mulf %183, %148 : vector<2x1x32xf32>
    %185 = arith.subf %179, %184 : vector<2x1x32xf32>
    %186 = arith.mulf %185, %185 : vector<2x1x32xf32>
    %cst_38 = arith.constant dense<0.000000e+00> : vector<2x1xf32>
    %187 = vector.multi_reduction <add>, %186, %cst_38 [2] : vector<2x1x32xf32> to vector<2x1xf32>
    %188 = vector.shape_cast %187 : vector<2x1xf32> to vector<2x1x1xf32>
    %cst_39 = arith.constant 1.000000e-30 : f32
    %189 = vector.broadcast %cst_39 : f32 to vector<2x1x1xf32>
    %190 = arith.addf %188, %189 : vector<2x1x1xf32>
    %191 = math.rsqrt %190 : vector<2x1x1xf32>
    %192 = vector.broadcast %191 : vector<2x1x1xf32> to vector<2x1x32xf32>
    %193 = arith.mulf %185, %192 : vector<2x1x32xf32>
    %194 = vector.extract_strided_slice %4 {offsets = [0, 7, 0], sizes = [2, 1, 32], strides = [1, 1, 1]} : vector<2x8x32xf32> to vector<2x1x32xf32>
    %195 = arith.mulf %13, %194 : vector<2x1x32xf32>
    %cst_40 = arith.constant dense<0.000000e+00> : vector<2x1xf32>
    %196 = vector.multi_reduction <add>, %195, %cst_40 [2] : vector<2x1x32xf32> to vector<2x1xf32>
    %197 = vector.shape_cast %196 : vector<2x1xf32> to vector<2x1x1xf32>
    %198 = vector.broadcast %197 : vector<2x1x1xf32> to vector<2x1x32xf32>
    %199 = arith.mulf %198, %13 : vector<2x1x32xf32>
    %200 = arith.subf %194, %199 : vector<2x1x32xf32>
    %201 = arith.mulf %28, %200 : vector<2x1x32xf32>
    %cst_41 = arith.constant dense<0.000000e+00> : vector<2x1xf32>
    %202 = vector.multi_reduction <add>, %201, %cst_41 [2] : vector<2x1x32xf32> to vector<2x1xf32>
    %203 = vector.shape_cast %202 : vector<2x1xf32> to vector<2x1x1xf32>
    %204 = vector.broadcast %203 : vector<2x1x1xf32> to vector<2x1x32xf32>
    %205 = arith.mulf %204, %28 : vector<2x1x32xf32>
    %206 = arith.subf %200, %205 : vector<2x1x32xf32>
    %207 = arith.mulf %49, %206 : vector<2x1x32xf32>
    %cst_42 = arith.constant dense<0.000000e+00> : vector<2x1xf32>
    %208 = vector.multi_reduction <add>, %207, %cst_42 [2] : vector<2x1x32xf32> to vector<2x1xf32>
    %209 = vector.shape_cast %208 : vector<2x1xf32> to vector<2x1x1xf32>
    %210 = vector.broadcast %209 : vector<2x1x1xf32> to vector<2x1x32xf32>
    %211 = arith.mulf %210, %49 : vector<2x1x32xf32>
    %212 = arith.subf %206, %211 : vector<2x1x32xf32>
    %213 = arith.mulf %76, %212 : vector<2x1x32xf32>
    %cst_43 = arith.constant dense<0.000000e+00> : vector<2x1xf32>
    %214 = vector.multi_reduction <add>, %213, %cst_43 [2] : vector<2x1x32xf32> to vector<2x1xf32>
    %215 = vector.shape_cast %214 : vector<2x1xf32> to vector<2x1x1xf32>
    %216 = vector.broadcast %215 : vector<2x1x1xf32> to vector<2x1x32xf32>
    %217 = arith.mulf %216, %76 : vector<2x1x32xf32>
    %218 = arith.subf %212, %217 : vector<2x1x32xf32>
    %219 = arith.mulf %109, %218 : vector<2x1x32xf32>
    %cst_44 = arith.constant dense<0.000000e+00> : vector<2x1xf32>
    %220 = vector.multi_reduction <add>, %219, %cst_44 [2] : vector<2x1x32xf32> to vector<2x1xf32>
    %221 = vector.shape_cast %220 : vector<2x1xf32> to vector<2x1x1xf32>
    %222 = vector.broadcast %221 : vector<2x1x1xf32> to vector<2x1x32xf32>
    %223 = arith.mulf %222, %109 : vector<2x1x32xf32>
    %224 = arith.subf %218, %223 : vector<2x1x32xf32>
    %225 = arith.mulf %148, %224 : vector<2x1x32xf32>
    %cst_45 = arith.constant dense<0.000000e+00> : vector<2x1xf32>
    %226 = vector.multi_reduction <add>, %225, %cst_45 [2] : vector<2x1x32xf32> to vector<2x1xf32>
    %227 = vector.shape_cast %226 : vector<2x1xf32> to vector<2x1x1xf32>
    %228 = vector.broadcast %227 : vector<2x1x1xf32> to vector<2x1x32xf32>
    %229 = arith.mulf %228, %148 : vector<2x1x32xf32>
    %230 = arith.subf %224, %229 : vector<2x1x32xf32>
    %231 = arith.mulf %193, %230 : vector<2x1x32xf32>
    %cst_46 = arith.constant dense<0.000000e+00> : vector<2x1xf32>
    %232 = vector.multi_reduction <add>, %231, %cst_46 [2] : vector<2x1x32xf32> to vector<2x1xf32>
    %233 = vector.shape_cast %232 : vector<2x1xf32> to vector<2x1x1xf32>
    %234 = vector.broadcast %233 : vector<2x1x1xf32> to vector<2x1x32xf32>
    %235 = arith.mulf %234, %193 : vector<2x1x32xf32>
    %236 = arith.subf %230, %235 : vector<2x1x32xf32>
    %237 = arith.mulf %236, %236 : vector<2x1x32xf32>
    %cst_47 = arith.constant dense<0.000000e+00> : vector<2x1xf32>
    %238 = vector.multi_reduction <add>, %237, %cst_47 [2] : vector<2x1x32xf32> to vector<2x1xf32>
    %239 = vector.shape_cast %238 : vector<2x1xf32> to vector<2x1x1xf32>
    %cst_48 = arith.constant 1.000000e-30 : f32
    %240 = vector.broadcast %cst_48 : f32 to vector<2x1x1xf32>
    %241 = arith.addf %239, %240 : vector<2x1x1xf32>
    %242 = math.rsqrt %241 : vector<2x1x1xf32>
    %243 = vector.broadcast %242 : vector<2x1x1xf32> to vector<2x1x32xf32>
    %244 = arith.mulf %236, %243 : vector<2x1x32xf32>
    %245 = tpu.iota {dimensions = array<i32: 1>} : vector<2x8x32xi32>
    %cst_49 = arith.constant 0.000000e+00 : f32
    %246 = vector.broadcast %cst_49 : f32 to vector<2x8x32xf32>
    %c0_i32 = arith.constant 0 : i32
    %247 = vector.broadcast %c0_i32 : i32 to vector<2x8x32xi32>
    %248 = arith.cmpi eq, %245, %247 : vector<2x8x32xi32>
    %249 = vector.shape_cast %13 : vector<2x1x32xf32> to vector<2x1x32xf32>
    %250 = vector.broadcast %249 : vector<2x1x32xf32> to vector<2x8x32xf32>
    %251 = arith.select %248, %250, %246 : vector<2x8x32xi1>, vector<2x8x32xf32>
    %c1_i32 = arith.constant 1 : i32
    %252 = vector.broadcast %c1_i32 : i32 to vector<2x8x32xi32>
    %253 = arith.cmpi eq, %245, %252 : vector<2x8x32xi32>
    %254 = vector.shape_cast %28 : vector<2x1x32xf32> to vector<2x1x32xf32>
    %255 = vector.broadcast %254 : vector<2x1x32xf32> to vector<2x8x32xf32>
    %256 = arith.select %253, %255, %251 : vector<2x8x32xi1>, vector<2x8x32xf32>
    %c2_i32 = arith.constant 2 : i32
    %257 = vector.broadcast %c2_i32 : i32 to vector<2x8x32xi32>
    %258 = arith.cmpi eq, %245, %257 : vector<2x8x32xi32>
    %259 = vector.shape_cast %49 : vector<2x1x32xf32> to vector<2x1x32xf32>
    %260 = vector.broadcast %259 : vector<2x1x32xf32> to vector<2x8x32xf32>
    %261 = arith.select %258, %260, %256 : vector<2x8x32xi1>, vector<2x8x32xf32>
    %c3_i32 = arith.constant 3 : i32
    %262 = vector.broadcast %c3_i32 : i32 to vector<2x8x32xi32>
    %263 = arith.cmpi eq, %245, %262 : vector<2x8x32xi32>
    %264 = vector.shape_cast %76 : vector<2x1x32xf32> to vector<2x1x32xf32>
    %265 = vector.broadcast %264 : vector<2x1x32xf32> to vector<2x8x32xf32>
    %266 = arith.select %263, %265, %261 : vector<2x8x32xi1>, vector<2x8x32xf32>
    %c4_i32 = arith.constant 4 : i32
    %267 = vector.broadcast %c4_i32 : i32 to vector<2x8x32xi32>
    %268 = arith.cmpi eq, %245, %267 : vector<2x8x32xi32>
    %269 = vector.shape_cast %109 : vector<2x1x32xf32> to vector<2x1x32xf32>
    %270 = vector.broadcast %269 : vector<2x1x32xf32> to vector<2x8x32xf32>
    %271 = arith.select %268, %270, %266 : vector<2x8x32xi1>, vector<2x8x32xf32>
    %c5_i32 = arith.constant 5 : i32
    %272 = vector.broadcast %c5_i32 : i32 to vector<2x8x32xi32>
    %273 = arith.cmpi eq, %245, %272 : vector<2x8x32xi32>
    %274 = vector.shape_cast %148 : vector<2x1x32xf32> to vector<2x1x32xf32>
    %275 = vector.broadcast %274 : vector<2x1x32xf32> to vector<2x8x32xf32>
    %276 = arith.select %273, %275, %271 : vector<2x8x32xi1>, vector<2x8x32xf32>
    %c6_i32 = arith.constant 6 : i32
    %277 = vector.broadcast %c6_i32 : i32 to vector<2x8x32xi32>
    %278 = arith.cmpi eq, %245, %277 : vector<2x8x32xi32>
    %279 = vector.shape_cast %193 : vector<2x1x32xf32> to vector<2x1x32xf32>
    %280 = vector.broadcast %279 : vector<2x1x32xf32> to vector<2x8x32xf32>
    %281 = arith.select %278, %280, %276 : vector<2x8x32xi1>, vector<2x8x32xf32>
    %c7_i32 = arith.constant 7 : i32
    %282 = vector.broadcast %c7_i32 : i32 to vector<2x8x32xi32>
    %283 = arith.cmpi eq, %245, %282 : vector<2x8x32xi32>
    %284 = vector.shape_cast %244 : vector<2x1x32xf32> to vector<2x1x32xf32>
    %285 = vector.broadcast %284 : vector<2x1x32xf32> to vector<2x8x32xf32>
    %286 = arith.select %283, %285, %281 : vector<2x8x32xi1>, vector<2x8x32xf32>
    "tpu.trace_start"() <{level = 10 : i32, message = "brn,bmn->brm"}> : () -> ()
    %cst_50 = arith.constant dense<0.000000e+00> : vector<2x8x64xf32>
    %287 = tpu.matmul %286, %0, %cst_50 {dimension_numbers = #tpu.dot_dimension_numbers<[2], [2], [1], [1], [0, 0, 0, 1, 1, 1], [0], [0]>} : vector<2x8x32xf32>, vector<2x64x32xf32>, vector<2x8x64xf32> -> vector<2x8x64xf32>
    "tpu.trace_stop"() : () -> ()
    %288 = vector.extract_strided_slice %287 {offsets = [0, 0, 0], sizes = [2, 1, 64], strides = [1, 1, 1]} : vector<2x8x64xf32> to vector<2x1x64xf32>
    %289 = arith.mulf %288, %288 : vector<2x1x64xf32>
    %cst_51 = arith.constant dense<0.000000e+00> : vector<2x1xf32>
    %290 = vector.multi_reduction <add>, %289, %cst_51 [2] : vector<2x1x64xf32> to vector<2x1xf32>
    %291 = vector.shape_cast %290 : vector<2x1xf32> to vector<2x1x1xf32>
    %cst_52 = arith.constant 1.000000e-30 : f32
    %292 = vector.broadcast %cst_52 : f32 to vector<2x1x1xf32>
    %293 = arith.addf %291, %292 : vector<2x1x1xf32>
    %294 = math.rsqrt %293 : vector<2x1x1xf32>
    %295 = vector.broadcast %294 : vector<2x1x1xf32> to vector<2x1x64xf32>
    %296 = arith.mulf %288, %295 : vector<2x1x64xf32>
    %297 = vector.extract_strided_slice %287 {offsets = [0, 1, 0], sizes = [2, 1, 64], strides = [1, 1, 1]} : vector<2x8x64xf32> to vector<2x1x64xf32>
    %298 = arith.mulf %296, %297 : vector<2x1x64xf32>
    %cst_53 = arith.constant dense<0.000000e+00> : vector<2x1xf32>
    %299 = vector.multi_reduction <add>, %298, %cst_53 [2] : vector<2x1x64xf32> to vector<2x1xf32>
    %300 = vector.shape_cast %299 : vector<2x1xf32> to vector<2x1x1xf32>
    %301 = vector.broadcast %300 : vector<2x1x1xf32> to vector<2x1x64xf32>
    %302 = arith.mulf %301, %296 : vector<2x1x64xf32>
    %303 = arith.subf %297, %302 : vector<2x1x64xf32>
    %304 = arith.mulf %303, %303 : vector<2x1x64xf32>
    %cst_54 = arith.constant dense<0.000000e+00> : vector<2x1xf32>
    %305 = vector.multi_reduction <add>, %304, %cst_54 [2] : vector<2x1x64xf32> to vector<2x1xf32>
    %306 = vector.shape_cast %305 : vector<2x1xf32> to vector<2x1x1xf32>
    %cst_55 = arith.constant 1.000000e-30 : f32
    %307 = vector.broadcast %cst_55 : f32 to vector<2x1x1xf32>
    %308 = arith.addf %306, %307 : vector<2x1x1xf32>
    %309 = math.rsqrt %308 : vector<2x1x1xf32>
    %310 = vector.broadcast %309 : vector<2x1x1xf32> to vector<2x1x64xf32>
    %311 = arith.mulf %303, %310 : vector<2x1x64xf32>
    %312 = vector.extract_strided_slice %287 {offsets = [0, 2, 0], sizes = [2, 1, 64], strides = [1, 1, 1]} : vector<2x8x64xf32> to vector<2x1x64xf32>
    %313 = arith.mulf %296, %312 : vector<2x1x64xf32>
    %cst_56 = arith.constant dense<0.000000e+00> : vector<2x1xf32>
    %314 = vector.multi_reduction <add>, %313, %cst_56 [2] : vector<2x1x64xf32> to vector<2x1xf32>
    %315 = vector.shape_cast %314 : vector<2x1xf32> to vector<2x1x1xf32>
    %316 = vector.broadcast %315 : vector<2x1x1xf32> to vector<2x1x64xf32>
    %317 = arith.mulf %316, %296 : vector<2x1x64xf32>
    %318 = arith.subf %312, %317 : vector<2x1x64xf32>
    %319 = arith.mulf %311, %318 : vector<2x1x64xf32>
    %cst_57 = arith.constant dense<0.000000e+00> : vector<2x1xf32>
    %320 = vector.multi_reduction <add>, %319, %cst_57 [2] : vector<2x1x64xf32> to vector<2x1xf32>
    %321 = vector.shape_cast %320 : vector<2x1xf32> to vector<2x1x1xf32>
    %322 = vector.broadcast %321 : vector<2x1x1xf32> to vector<2x1x64xf32>
    %323 = arith.mulf %322, %311 : vector<2x1x64xf32>
    %324 = arith.subf %318, %323 : vector<2x1x64xf32>
    %325 = arith.mulf %324, %324 : vector<2x1x64xf32>
    %cst_58 = arith.constant dense<0.000000e+00> : vector<2x1xf32>
    %326 = vector.multi_reduction <add>, %325, %cst_58 [2] : vector<2x1x64xf32> to vector<2x1xf32>
    %327 = vector.shape_cast %326 : vector<2x1xf32> to vector<2x1x1xf32>
    %cst_59 = arith.constant 1.000000e-30 : f32
    %328 = vector.broadcast %cst_59 : f32 to vector<2x1x1xf32>
    %329 = arith.addf %327, %328 : vector<2x1x1xf32>
    %330 = math.rsqrt %329 : vector<2x1x1xf32>
    %331 = vector.broadcast %330 : vector<2x1x1xf32> to vector<2x1x64xf32>
    %332 = arith.mulf %324, %331 : vector<2x1x64xf32>
    %333 = vector.extract_strided_slice %287 {offsets = [0, 3, 0], sizes = [2, 1, 64], strides = [1, 1, 1]} : vector<2x8x64xf32> to vector<2x1x64xf32>
    %334 = arith.mulf %296, %333 : vector<2x1x64xf32>
    %cst_60 = arith.constant dense<0.000000e+00> : vector<2x1xf32>
    %335 = vector.multi_reduction <add>, %334, %cst_60 [2] : vector<2x1x64xf32> to vector<2x1xf32>
    %336 = vector.shape_cast %335 : vector<2x1xf32> to vector<2x1x1xf32>
    %337 = vector.broadcast %336 : vector<2x1x1xf32> to vector<2x1x64xf32>
    %338 = arith.mulf %337, %296 : vector<2x1x64xf32>
    %339 = arith.subf %333, %338 : vector<2x1x64xf32>
    %340 = arith.mulf %311, %339 : vector<2x1x64xf32>
    %cst_61 = arith.constant dense<0.000000e+00> : vector<2x1xf32>
    %341 = vector.multi_reduction <add>, %340, %cst_61 [2] : vector<2x1x64xf32> to vector<2x1xf32>
    %342 = vector.shape_cast %341 : vector<2x1xf32> to vector<2x1x1xf32>
    %343 = vector.broadcast %342 : vector<2x1x1xf32> to vector<2x1x64xf32>
    %344 = arith.mulf %343, %311 : vector<2x1x64xf32>
    %345 = arith.subf %339, %344 : vector<2x1x64xf32>
    %346 = arith.mulf %332, %345 : vector<2x1x64xf32>
    %cst_62 = arith.constant dense<0.000000e+00> : vector<2x1xf32>
    %347 = vector.multi_reduction <add>, %346, %cst_62 [2] : vector<2x1x64xf32> to vector<2x1xf32>
    %348 = vector.shape_cast %347 : vector<2x1xf32> to vector<2x1x1xf32>
    %349 = vector.broadcast %348 : vector<2x1x1xf32> to vector<2x1x64xf32>
    %350 = arith.mulf %349, %332 : vector<2x1x64xf32>
    %351 = arith.subf %345, %350 : vector<2x1x64xf32>
    %352 = arith.mulf %351, %351 : vector<2x1x64xf32>
    %cst_63 = arith.constant dense<0.000000e+00> : vector<2x1xf32>
    %353 = vector.multi_reduction <add>, %352, %cst_63 [2] : vector<2x1x64xf32> to vector<2x1xf32>
    %354 = vector.shape_cast %353 : vector<2x1xf32> to vector<2x1x1xf32>
    %cst_64 = arith.constant 1.000000e-30 : f32
    %355 = vector.broadcast %cst_64 : f32 to vector<2x1x1xf32>
    %356 = arith.addf %354, %355 : vector<2x1x1xf32>
    %357 = math.rsqrt %356 : vector<2x1x1xf32>
    %358 = vector.broadcast %357 : vector<2x1x1xf32> to vector<2x1x64xf32>
    %359 = arith.mulf %351, %358 : vector<2x1x64xf32>
    %360 = vector.extract_strided_slice %287 {offsets = [0, 4, 0], sizes = [2, 1, 64], strides = [1, 1, 1]} : vector<2x8x64xf32> to vector<2x1x64xf32>
    %361 = arith.mulf %296, %360 : vector<2x1x64xf32>
    %cst_65 = arith.constant dense<0.000000e+00> : vector<2x1xf32>
    %362 = vector.multi_reduction <add>, %361, %cst_65 [2] : vector<2x1x64xf32> to vector<2x1xf32>
    %363 = vector.shape_cast %362 : vector<2x1xf32> to vector<2x1x1xf32>
    %364 = vector.broadcast %363 : vector<2x1x1xf32> to vector<2x1x64xf32>
    %365 = arith.mulf %364, %296 : vector<2x1x64xf32>
    %366 = arith.subf %360, %365 : vector<2x1x64xf32>
    %367 = arith.mulf %311, %366 : vector<2x1x64xf32>
    %cst_66 = arith.constant dense<0.000000e+00> : vector<2x1xf32>
    %368 = vector.multi_reduction <add>, %367, %cst_66 [2] : vector<2x1x64xf32> to vector<2x1xf32>
    %369 = vector.shape_cast %368 : vector<2x1xf32> to vector<2x1x1xf32>
    %370 = vector.broadcast %369 : vector<2x1x1xf32> to vector<2x1x64xf32>
    %371 = arith.mulf %370, %311 : vector<2x1x64xf32>
    %372 = arith.subf %366, %371 : vector<2x1x64xf32>
    %373 = arith.mulf %332, %372 : vector<2x1x64xf32>
    %cst_67 = arith.constant dense<0.000000e+00> : vector<2x1xf32>
    %374 = vector.multi_reduction <add>, %373, %cst_67 [2] : vector<2x1x64xf32> to vector<2x1xf32>
    %375 = vector.shape_cast %374 : vector<2x1xf32> to vector<2x1x1xf32>
    %376 = vector.broadcast %375 : vector<2x1x1xf32> to vector<2x1x64xf32>
    %377 = arith.mulf %376, %332 : vector<2x1x64xf32>
    %378 = arith.subf %372, %377 : vector<2x1x64xf32>
    %379 = arith.mulf %359, %378 : vector<2x1x64xf32>
    %cst_68 = arith.constant dense<0.000000e+00> : vector<2x1xf32>
    %380 = vector.multi_reduction <add>, %379, %cst_68 [2] : vector<2x1x64xf32> to vector<2x1xf32>
    %381 = vector.shape_cast %380 : vector<2x1xf32> to vector<2x1x1xf32>
    %382 = vector.broadcast %381 : vector<2x1x1xf32> to vector<2x1x64xf32>
    %383 = arith.mulf %382, %359 : vector<2x1x64xf32>
    %384 = arith.subf %378, %383 : vector<2x1x64xf32>
    %385 = arith.mulf %384, %384 : vector<2x1x64xf32>
    %cst_69 = arith.constant dense<0.000000e+00> : vector<2x1xf32>
    %386 = vector.multi_reduction <add>, %385, %cst_69 [2] : vector<2x1x64xf32> to vector<2x1xf32>
    %387 = vector.shape_cast %386 : vector<2x1xf32> to vector<2x1x1xf32>
    %cst_70 = arith.constant 1.000000e-30 : f32
    %388 = vector.broadcast %cst_70 : f32 to vector<2x1x1xf32>
    %389 = arith.addf %387, %388 : vector<2x1x1xf32>
    %390 = math.rsqrt %389 : vector<2x1x1xf32>
    %391 = vector.broadcast %390 : vector<2x1x1xf32> to vector<2x1x64xf32>
    %392 = arith.mulf %384, %391 : vector<2x1x64xf32>
    %393 = vector.extract_strided_slice %287 {offsets = [0, 5, 0], sizes = [2, 1, 64], strides = [1, 1, 1]} : vector<2x8x64xf32> to vector<2x1x64xf32>
    %394 = arith.mulf %296, %393 : vector<2x1x64xf32>
    %cst_71 = arith.constant dense<0.000000e+00> : vector<2x1xf32>
    %395 = vector.multi_reduction <add>, %394, %cst_71 [2] : vector<2x1x64xf32> to vector<2x1xf32>
    %396 = vector.shape_cast %395 : vector<2x1xf32> to vector<2x1x1xf32>
    %397 = vector.broadcast %396 : vector<2x1x1xf32> to vector<2x1x64xf32>
    %398 = arith.mulf %397, %296 : vector<2x1x64xf32>
    %399 = arith.subf %393, %398 : vector<2x1x64xf32>
    %400 = arith.mulf %311, %399 : vector<2x1x64xf32>
    %cst_72 = arith.constant dense<0.000000e+00> : vector<2x1xf32>
    %401 = vector.multi_reduction <add>, %400, %cst_72 [2] : vector<2x1x64xf32> to vector<2x1xf32>
    %402 = vector.shape_cast %401 : vector<2x1xf32> to vector<2x1x1xf32>
    %403 = vector.broadcast %402 : vector<2x1x1xf32> to vector<2x1x64xf32>
    %404 = arith.mulf %403, %311 : vector<2x1x64xf32>
    %405 = arith.subf %399, %404 : vector<2x1x64xf32>
    %406 = arith.mulf %332, %405 : vector<2x1x64xf32>
    %cst_73 = arith.constant dense<0.000000e+00> : vector<2x1xf32>
    %407 = vector.multi_reduction <add>, %406, %cst_73 [2] : vector<2x1x64xf32> to vector<2x1xf32>
    %408 = vector.shape_cast %407 : vector<2x1xf32> to vector<2x1x1xf32>
    %409 = vector.broadcast %408 : vector<2x1x1xf32> to vector<2x1x64xf32>
    %410 = arith.mulf %409, %332 : vector<2x1x64xf32>
    %411 = arith.subf %405, %410 : vector<2x1x64xf32>
    %412 = arith.mulf %359, %411 : vector<2x1x64xf32>
    %cst_74 = arith.constant dense<0.000000e+00> : vector<2x1xf32>
    %413 = vector.multi_reduction <add>, %412, %cst_74 [2] : vector<2x1x64xf32> to vector<2x1xf32>
    %414 = vector.shape_cast %413 : vector<2x1xf32> to vector<2x1x1xf32>
    %415 = vector.broadcast %414 : vector<2x1x1xf32> to vector<2x1x64xf32>
    %416 = arith.mulf %415, %359 : vector<2x1x64xf32>
    %417 = arith.subf %411, %416 : vector<2x1x64xf32>
    %418 = arith.mulf %392, %417 : vector<2x1x64xf32>
    %cst_75 = arith.constant dense<0.000000e+00> : vector<2x1xf32>
    %419 = vector.multi_reduction <add>, %418, %cst_75 [2] : vector<2x1x64xf32> to vector<2x1xf32>
    %420 = vector.shape_cast %419 : vector<2x1xf32> to vector<2x1x1xf32>
    %421 = vector.broadcast %420 : vector<2x1x1xf32> to vector<2x1x64xf32>
    %422 = arith.mulf %421, %392 : vector<2x1x64xf32>
    %423 = arith.subf %417, %422 : vector<2x1x64xf32>
    %424 = arith.mulf %423, %423 : vector<2x1x64xf32>
    %cst_76 = arith.constant dense<0.000000e+00> : vector<2x1xf32>
    %425 = vector.multi_reduction <add>, %424, %cst_76 [2] : vector<2x1x64xf32> to vector<2x1xf32>
    %426 = vector.shape_cast %425 : vector<2x1xf32> to vector<2x1x1xf32>
    %cst_77 = arith.constant 1.000000e-30 : f32
    %427 = vector.broadcast %cst_77 : f32 to vector<2x1x1xf32>
    %428 = arith.addf %426, %427 : vector<2x1x1xf32>
    %429 = math.rsqrt %428 : vector<2x1x1xf32>
    %430 = vector.broadcast %429 : vector<2x1x1xf32> to vector<2x1x64xf32>
    %431 = arith.mulf %423, %430 : vector<2x1x64xf32>
    %432 = vector.extract_strided_slice %287 {offsets = [0, 6, 0], sizes = [2, 1, 64], strides = [1, 1, 1]} : vector<2x8x64xf32> to vector<2x1x64xf32>
    %433 = arith.mulf %296, %432 : vector<2x1x64xf32>
    %cst_78 = arith.constant dense<0.000000e+00> : vector<2x1xf32>
    %434 = vector.multi_reduction <add>, %433, %cst_78 [2] : vector<2x1x64xf32> to vector<2x1xf32>
    %435 = vector.shape_cast %434 : vector<2x1xf32> to vector<2x1x1xf32>
    %436 = vector.broadcast %435 : vector<2x1x1xf32> to vector<2x1x64xf32>
    %437 = arith.mulf %436, %296 : vector<2x1x64xf32>
    %438 = arith.subf %432, %437 : vector<2x1x64xf32>
    %439 = arith.mulf %311, %438 : vector<2x1x64xf32>
    %cst_79 = arith.constant dense<0.000000e+00> : vector<2x1xf32>
    %440 = vector.multi_reduction <add>, %439, %cst_79 [2] : vector<2x1x64xf32> to vector<2x1xf32>
    %441 = vector.shape_cast %440 : vector<2x1xf32> to vector<2x1x1xf32>
    %442 = vector.broadcast %441 : vector<2x1x1xf32> to vector<2x1x64xf32>
    %443 = arith.mulf %442, %311 : vector<2x1x64xf32>
    %444 = arith.subf %438, %443 : vector<2x1x64xf32>
    %445 = arith.mulf %332, %444 : vector<2x1x64xf32>
    %cst_80 = arith.constant dense<0.000000e+00> : vector<2x1xf32>
    %446 = vector.multi_reduction <add>, %445, %cst_80 [2] : vector<2x1x64xf32> to vector<2x1xf32>
    %447 = vector.shape_cast %446 : vector<2x1xf32> to vector<2x1x1xf32>
    %448 = vector.broadcast %447 : vector<2x1x1xf32> to vector<2x1x64xf32>
    %449 = arith.mulf %448, %332 : vector<2x1x64xf32>
    %450 = arith.subf %444, %449 : vector<2x1x64xf32>
    %451 = arith.mulf %359, %450 : vector<2x1x64xf32>
    %cst_81 = arith.constant dense<0.000000e+00> : vector<2x1xf32>
    %452 = vector.multi_reduction <add>, %451, %cst_81 [2] : vector<2x1x64xf32> to vector<2x1xf32>
    %453 = vector.shape_cast %452 : vector<2x1xf32> to vector<2x1x1xf32>
    %454 = vector.broadcast %453 : vector<2x1x1xf32> to vector<2x1x64xf32>
    %455 = arith.mulf %454, %359 : vector<2x1x64xf32>
    %456 = arith.subf %450, %455 : vector<2x1x64xf32>
    %457 = arith.mulf %392, %456 : vector<2x1x64xf32>
    %cst_82 = arith.constant dense<0.000000e+00> : vector<2x1xf32>
    %458 = vector.multi_reduction <add>, %457, %cst_82 [2] : vector<2x1x64xf32> to vector<2x1xf32>
    %459 = vector.shape_cast %458 : vector<2x1xf32> to vector<2x1x1xf32>
    %460 = vector.broadcast %459 : vector<2x1x1xf32> to vector<2x1x64xf32>
    %461 = arith.mulf %460, %392 : vector<2x1x64xf32>
    %462 = arith.subf %456, %461 : vector<2x1x64xf32>
    %463 = arith.mulf %431, %462 : vector<2x1x64xf32>
    %cst_83 = arith.constant dense<0.000000e+00> : vector<2x1xf32>
    %464 = vector.multi_reduction <add>, %463, %cst_83 [2] : vector<2x1x64xf32> to vector<2x1xf32>
    %465 = vector.shape_cast %464 : vector<2x1xf32> to vector<2x1x1xf32>
    %466 = vector.broadcast %465 : vector<2x1x1xf32> to vector<2x1x64xf32>
    %467 = arith.mulf %466, %431 : vector<2x1x64xf32>
    %468 = arith.subf %462, %467 : vector<2x1x64xf32>
    %469 = arith.mulf %468, %468 : vector<2x1x64xf32>
    %cst_84 = arith.constant dense<0.000000e+00> : vector<2x1xf32>
    %470 = vector.multi_reduction <add>, %469, %cst_84 [2] : vector<2x1x64xf32> to vector<2x1xf32>
    %471 = vector.shape_cast %470 : vector<2x1xf32> to vector<2x1x1xf32>
    %cst_85 = arith.constant 1.000000e-30 : f32
    %472 = vector.broadcast %cst_85 : f32 to vector<2x1x1xf32>
    %473 = arith.addf %471, %472 : vector<2x1x1xf32>
    %474 = math.rsqrt %473 : vector<2x1x1xf32>
    %475 = vector.broadcast %474 : vector<2x1x1xf32> to vector<2x1x64xf32>
    %476 = arith.mulf %468, %475 : vector<2x1x64xf32>
    %477 = vector.extract_strided_slice %287 {offsets = [0, 7, 0], sizes = [2, 1, 64], strides = [1, 1, 1]} : vector<2x8x64xf32> to vector<2x1x64xf32>
    %478 = arith.mulf %296, %477 : vector<2x1x64xf32>
    %cst_86 = arith.constant dense<0.000000e+00> : vector<2x1xf32>
    %479 = vector.multi_reduction <add>, %478, %cst_86 [2] : vector<2x1x64xf32> to vector<2x1xf32>
    %480 = vector.shape_cast %479 : vector<2x1xf32> to vector<2x1x1xf32>
    %481 = vector.broadcast %480 : vector<2x1x1xf32> to vector<2x1x64xf32>
    %482 = arith.mulf %481, %296 : vector<2x1x64xf32>
    %483 = arith.subf %477, %482 : vector<2x1x64xf32>
    %484 = arith.mulf %311, %483 : vector<2x1x64xf32>
    %cst_87 = arith.constant dense<0.000000e+00> : vector<2x1xf32>
    %485 = vector.multi_reduction <add>, %484, %cst_87 [2] : vector<2x1x64xf32> to vector<2x1xf32>
    %486 = vector.shape_cast %485 : vector<2x1xf32> to vector<2x1x1xf32>
    %487 = vector.broadcast %486 : vector<2x1x1xf32> to vector<2x1x64xf32>
    %488 = arith.mulf %487, %311 : vector<2x1x64xf32>
    %489 = arith.subf %483, %488 : vector<2x1x64xf32>
    %490 = arith.mulf %332, %489 : vector<2x1x64xf32>
    %cst_88 = arith.constant dense<0.000000e+00> : vector<2x1xf32>
    %491 = vector.multi_reduction <add>, %490, %cst_88 [2] : vector<2x1x64xf32> to vector<2x1xf32>
    %492 = vector.shape_cast %491 : vector<2x1xf32> to vector<2x1x1xf32>
    %493 = vector.broadcast %492 : vector<2x1x1xf32> to vector<2x1x64xf32>
    %494 = arith.mulf %493, %332 : vector<2x1x64xf32>
    %495 = arith.subf %489, %494 : vector<2x1x64xf32>
    %496 = arith.mulf %359, %495 : vector<2x1x64xf32>
    %cst_89 = arith.constant dense<0.000000e+00> : vector<2x1xf32>
    %497 = vector.multi_reduction <add>, %496, %cst_89 [2] : vector<2x1x64xf32> to vector<2x1xf32>
    %498 = vector.shape_cast %497 : vector<2x1xf32> to vector<2x1x1xf32>
    %499 = vector.broadcast %498 : vector<2x1x1xf32> to vector<2x1x64xf32>
    %500 = arith.mulf %499, %359 : vector<2x1x64xf32>
    %501 = arith.subf %495, %500 : vector<2x1x64xf32>
    %502 = arith.mulf %392, %501 : vector<2x1x64xf32>
    %cst_90 = arith.constant dense<0.000000e+00> : vector<2x1xf32>
    %503 = vector.multi_reduction <add>, %502, %cst_90 [2] : vector<2x1x64xf32> to vector<2x1xf32>
    %504 = vector.shape_cast %503 : vector<2x1xf32> to vector<2x1x1xf32>
    %505 = vector.broadcast %504 : vector<2x1x1xf32> to vector<2x1x64xf32>
    %506 = arith.mulf %505, %392 : vector<2x1x64xf32>
    %507 = arith.subf %501, %506 : vector<2x1x64xf32>
    %508 = arith.mulf %431, %507 : vector<2x1x64xf32>
    %cst_91 = arith.constant dense<0.000000e+00> : vector<2x1xf32>
    %509 = vector.multi_reduction <add>, %508, %cst_91 [2] : vector<2x1x64xf32> to vector<2x1xf32>
    %510 = vector.shape_cast %509 : vector<2x1xf32> to vector<2x1x1xf32>
    %511 = vector.broadcast %510 : vector<2x1x1xf32> to vector<2x1x64xf32>
    %512 = arith.mulf %511, %431 : vector<2x1x64xf32>
    %513 = arith.subf %507, %512 : vector<2x1x64xf32>
    %514 = arith.mulf %476, %513 : vector<2x1x64xf32>
    %cst_92 = arith.constant dense<0.000000e+00> : vector<2x1xf32>
    %515 = vector.multi_reduction <add>, %514, %cst_92 [2] : vector<2x1x64xf32> to vector<2x1xf32>
    %516 = vector.shape_cast %515 : vector<2x1xf32> to vector<2x1x1xf32>
    %517 = vector.broadcast %516 : vector<2x1x1xf32> to vector<2x1x64xf32>
    %518 = arith.mulf %517, %476 : vector<2x1x64xf32>
    %519 = arith.subf %513, %518 : vector<2x1x64xf32>
    %520 = arith.mulf %519, %519 : vector<2x1x64xf32>
    %cst_93 = arith.constant dense<0.000000e+00> : vector<2x1xf32>
    %521 = vector.multi_reduction <add>, %520, %cst_93 [2] : vector<2x1x64xf32> to vector<2x1xf32>
    %522 = vector.shape_cast %521 : vector<2x1xf32> to vector<2x1x1xf32>
    %cst_94 = arith.constant 1.000000e-30 : f32
    %523 = vector.broadcast %cst_94 : f32 to vector<2x1x1xf32>
    %524 = arith.addf %522, %523 : vector<2x1x1xf32>
    %525 = math.rsqrt %524 : vector<2x1x1xf32>
    %526 = vector.broadcast %525 : vector<2x1x1xf32> to vector<2x1x64xf32>
    %527 = arith.mulf %519, %526 : vector<2x1x64xf32>
    %528 = tpu.iota {dimensions = array<i32: 1>} : vector<2x8x64xi32>
    %cst_95 = arith.constant 0.000000e+00 : f32
    %529 = vector.broadcast %cst_95 : f32 to vector<2x8x64xf32>
    %c0_i32_96 = arith.constant 0 : i32
    %530 = vector.broadcast %c0_i32_96 : i32 to vector<2x8x64xi32>
    %531 = arith.cmpi eq, %528, %530 : vector<2x8x64xi32>
    %532 = vector.shape_cast %296 : vector<2x1x64xf32> to vector<2x1x64xf32>
    %533 = vector.broadcast %532 : vector<2x1x64xf32> to vector<2x8x64xf32>
    %534 = arith.select %531, %533, %529 : vector<2x8x64xi1>, vector<2x8x64xf32>
    %c1_i32_97 = arith.constant 1 : i32
    %535 = vector.broadcast %c1_i32_97 : i32 to vector<2x8x64xi32>
    %536 = arith.cmpi eq, %528, %535 : vector<2x8x64xi32>
    %537 = vector.shape_cast %311 : vector<2x1x64xf32> to vector<2x1x64xf32>
    %538 = vector.broadcast %537 : vector<2x1x64xf32> to vector<2x8x64xf32>
    %539 = arith.select %536, %538, %534 : vector<2x8x64xi1>, vector<2x8x64xf32>
    %c2_i32_98 = arith.constant 2 : i32
    %540 = vector.broadcast %c2_i32_98 : i32 to vector<2x8x64xi32>
    %541 = arith.cmpi eq, %528, %540 : vector<2x8x64xi32>
    %542 = vector.shape_cast %332 : vector<2x1x64xf32> to vector<2x1x64xf32>
    %543 = vector.broadcast %542 : vector<2x1x64xf32> to vector<2x8x64xf32>
    %544 = arith.select %541, %543, %539 : vector<2x8x64xi1>, vector<2x8x64xf32>
    %c3_i32_99 = arith.constant 3 : i32
    %545 = vector.broadcast %c3_i32_99 : i32 to vector<2x8x64xi32>
    %546 = arith.cmpi eq, %528, %545 : vector<2x8x64xi32>
    %547 = vector.shape_cast %359 : vector<2x1x64xf32> to vector<2x1x64xf32>
    %548 = vector.broadcast %547 : vector<2x1x64xf32> to vector<2x8x64xf32>
    %549 = arith.select %546, %548, %544 : vector<2x8x64xi1>, vector<2x8x64xf32>
    %c4_i32_100 = arith.constant 4 : i32
    %550 = vector.broadcast %c4_i32_100 : i32 to vector<2x8x64xi32>
    %551 = arith.cmpi eq, %528, %550 : vector<2x8x64xi32>
    %552 = vector.shape_cast %392 : vector<2x1x64xf32> to vector<2x1x64xf32>
    %553 = vector.broadcast %552 : vector<2x1x64xf32> to vector<2x8x64xf32>
    %554 = arith.select %551, %553, %549 : vector<2x8x64xi1>, vector<2x8x64xf32>
    %c5_i32_101 = arith.constant 5 : i32
    %555 = vector.broadcast %c5_i32_101 : i32 to vector<2x8x64xi32>
    %556 = arith.cmpi eq, %528, %555 : vector<2x8x64xi32>
    %557 = vector.shape_cast %431 : vector<2x1x64xf32> to vector<2x1x64xf32>
    %558 = vector.broadcast %557 : vector<2x1x64xf32> to vector<2x8x64xf32>
    %559 = arith.select %556, %558, %554 : vector<2x8x64xi1>, vector<2x8x64xf32>
    %c6_i32_102 = arith.constant 6 : i32
    %560 = vector.broadcast %c6_i32_102 : i32 to vector<2x8x64xi32>
    %561 = arith.cmpi eq, %528, %560 : vector<2x8x64xi32>
    %562 = vector.shape_cast %476 : vector<2x1x64xf32> to vector<2x1x64xf32>
    %563 = vector.broadcast %562 : vector<2x1x64xf32> to vector<2x8x64xf32>
    %564 = arith.select %561, %563, %559 : vector<2x8x64xi1>, vector<2x8x64xf32>
    %c7_i32_103 = arith.constant 7 : i32
    %565 = vector.broadcast %c7_i32_103 : i32 to vector<2x8x64xi32>
    %566 = arith.cmpi eq, %528, %565 : vector<2x8x64xi32>
    %567 = vector.shape_cast %527 : vector<2x1x64xf32> to vector<2x1x64xf32>
    %568 = vector.broadcast %567 : vector<2x1x64xf32> to vector<2x8x64xf32>
    %569 = arith.select %566, %568, %564 : vector<2x8x64xi1>, vector<2x8x64xf32>
    "tpu.trace_start"() <{level = 10 : i32, message = "brm,bmn->brn"}> : () -> ()
    %cst_104 = arith.constant dense<0.000000e+00> : vector<2x8x32xf32>
    %570 = tpu.matmul %569, %0, %cst_104 {dimension_numbers = #tpu.dot_dimension_numbers<[2], [1], [1], [2], [0, 0, 0, 1, 1, 2], [0], [0]>} : vector<2x8x64xf32>, vector<2x64x32xf32>, vector<2x8x32xf32> -> vector<2x8x32xf32>
    "tpu.trace_stop"() : () -> ()
    %571 = vector.extract_strided_slice %570 {offsets = [0, 0, 0], sizes = [2, 1, 32], strides = [1, 1, 1]} : vector<2x8x32xf32> to vector<2x1x32xf32>
    %572 = arith.mulf %571, %571 : vector<2x1x32xf32>
    %cst_105 = arith.constant dense<0.000000e+00> : vector<2x1xf32>
    %573 = vector.multi_reduction <add>, %572, %cst_105 [2] : vector<2x1x32xf32> to vector<2x1xf32>
    %574 = vector.shape_cast %573 : vector<2x1xf32> to vector<2x1x1xf32>
    %cst_106 = arith.constant 1.000000e-30 : f32
    %575 = vector.broadcast %cst_106 : f32 to vector<2x1x1xf32>
    %576 = arith.addf %574, %575 : vector<2x1x1xf32>
    %577 = math.rsqrt %576 : vector<2x1x1xf32>
    %578 = vector.broadcast %577 : vector<2x1x1xf32> to vector<2x1x32xf32>
    %579 = arith.mulf %571, %578 : vector<2x1x32xf32>
    %580 = vector.extract_strided_slice %570 {offsets = [0, 1, 0], sizes = [2, 1, 32], strides = [1, 1, 1]} : vector<2x8x32xf32> to vector<2x1x32xf32>
    %581 = arith.mulf %579, %580 : vector<2x1x32xf32>
    %cst_107 = arith.constant dense<0.000000e+00> : vector<2x1xf32>
    %582 = vector.multi_reduction <add>, %581, %cst_107 [2] : vector<2x1x32xf32> to vector<2x1xf32>
    %583 = vector.shape_cast %582 : vector<2x1xf32> to vector<2x1x1xf32>
    %584 = vector.broadcast %583 : vector<2x1x1xf32> to vector<2x1x32xf32>
    %585 = arith.mulf %584, %579 : vector<2x1x32xf32>
    %586 = arith.subf %580, %585 : vector<2x1x32xf32>
    %587 = arith.mulf %586, %586 : vector<2x1x32xf32>
    %cst_108 = arith.constant dense<0.000000e+00> : vector<2x1xf32>
    %588 = vector.multi_reduction <add>, %587, %cst_108 [2] : vector<2x1x32xf32> to vector<2x1xf32>
    %589 = vector.shape_cast %588 : vector<2x1xf32> to vector<2x1x1xf32>
    %cst_109 = arith.constant 1.000000e-30 : f32
    %590 = vector.broadcast %cst_109 : f32 to vector<2x1x1xf32>
    %591 = arith.addf %589, %590 : vector<2x1x1xf32>
    %592 = math.rsqrt %591 : vector<2x1x1xf32>
    %593 = vector.broadcast %592 : vector<2x1x1xf32> to vector<2x1x32xf32>
    %594 = arith.mulf %586, %593 : vector<2x1x32xf32>
    %595 = vector.extract_strided_slice %570 {offsets = [0, 2, 0], sizes = [2, 1, 32], strides = [1, 1, 1]} : vector<2x8x32xf32> to vector<2x1x32xf32>
    %596 = arith.mulf %579, %595 : vector<2x1x32xf32>
    %cst_110 = arith.constant dense<0.000000e+00> : vector<2x1xf32>
    %597 = vector.multi_reduction <add>, %596, %cst_110 [2] : vector<2x1x32xf32> to vector<2x1xf32>
    %598 = vector.shape_cast %597 : vector<2x1xf32> to vector<2x1x1xf32>
    %599 = vector.broadcast %598 : vector<2x1x1xf32> to vector<2x1x32xf32>
    %600 = arith.mulf %599, %579 : vector<2x1x32xf32>
    %601 = arith.subf %595, %600 : vector<2x1x32xf32>
    %602 = arith.mulf %594, %601 : vector<2x1x32xf32>
    %cst_111 = arith.constant dense<0.000000e+00> : vector<2x1xf32>
    %603 = vector.multi_reduction <add>, %602, %cst_111 [2] : vector<2x1x32xf32> to vector<2x1xf32>
    %604 = vector.shape_cast %603 : vector<2x1xf32> to vector<2x1x1xf32>
    %605 = vector.broadcast %604 : vector<2x1x1xf32> to vector<2x1x32xf32>
    %606 = arith.mulf %605, %594 : vector<2x1x32xf32>
    %607 = arith.subf %601, %606 : vector<2x1x32xf32>
    %608 = arith.mulf %607, %607 : vector<2x1x32xf32>
    %cst_112 = arith.constant dense<0.000000e+00> : vector<2x1xf32>
    %609 = vector.multi_reduction <add>, %608, %cst_112 [2] : vector<2x1x32xf32> to vector<2x1xf32>
    %610 = vector.shape_cast %609 : vector<2x1xf32> to vector<2x1x1xf32>
    %cst_113 = arith.constant 1.000000e-30 : f32
    %611 = vector.broadcast %cst_113 : f32 to vector<2x1x1xf32>
    %612 = arith.addf %610, %611 : vector<2x1x1xf32>
    %613 = math.rsqrt %612 : vector<2x1x1xf32>
    %614 = vector.broadcast %613 : vector<2x1x1xf32> to vector<2x1x32xf32>
    %615 = arith.mulf %607, %614 : vector<2x1x32xf32>
    %616 = vector.extract_strided_slice %570 {offsets = [0, 3, 0], sizes = [2, 1, 32], strides = [1, 1, 1]} : vector<2x8x32xf32> to vector<2x1x32xf32>
    %617 = arith.mulf %579, %616 : vector<2x1x32xf32>
    %cst_114 = arith.constant dense<0.000000e+00> : vector<2x1xf32>
    %618 = vector.multi_reduction <add>, %617, %cst_114 [2] : vector<2x1x32xf32> to vector<2x1xf32>
    %619 = vector.shape_cast %618 : vector<2x1xf32> to vector<2x1x1xf32>
    %620 = vector.broadcast %619 : vector<2x1x1xf32> to vector<2x1x32xf32>
    %621 = arith.mulf %620, %579 : vector<2x1x32xf32>
    %622 = arith.subf %616, %621 : vector<2x1x32xf32>
    %623 = arith.mulf %594, %622 : vector<2x1x32xf32>
    %cst_115 = arith.constant dense<0.000000e+00> : vector<2x1xf32>
    %624 = vector.multi_reduction <add>, %623, %cst_115 [2] : vector<2x1x32xf32> to vector<2x1xf32>
    %625 = vector.shape_cast %624 : vector<2x1xf32> to vector<2x1x1xf32>
    %626 = vector.broadcast %625 : vector<2x1x1xf32> to vector<2x1x32xf32>
    %627 = arith.mulf %626, %594 : vector<2x1x32xf32>
    %628 = arith.subf %622, %627 : vector<2x1x32xf32>
    %629 = arith.mulf %615, %628 : vector<2x1x32xf32>
    %cst_116 = arith.constant dense<0.000000e+00> : vector<2x1xf32>
    %630 = vector.multi_reduction <add>, %629, %cst_116 [2] : vector<2x1x32xf32> to vector<2x1xf32>
    %631 = vector.shape_cast %630 : vector<2x1xf32> to vector<2x1x1xf32>
    %632 = vector.broadcast %631 : vector<2x1x1xf32> to vector<2x1x32xf32>
    %633 = arith.mulf %632, %615 : vector<2x1x32xf32>
    %634 = arith.subf %628, %633 : vector<2x1x32xf32>
    %635 = arith.mulf %634, %634 : vector<2x1x32xf32>
    %cst_117 = arith.constant dense<0.000000e+00> : vector<2x1xf32>
    %636 = vector.multi_reduction <add>, %635, %cst_117 [2] : vector<2x1x32xf32> to vector<2x1xf32>
    %637 = vector.shape_cast %636 : vector<2x1xf32> to vector<2x1x1xf32>
    %cst_118 = arith.constant 1.000000e-30 : f32
    %638 = vector.broadcast %cst_118 : f32 to vector<2x1x1xf32>
    %639 = arith.addf %637, %638 : vector<2x1x1xf32>
    %640 = math.rsqrt %639 : vector<2x1x1xf32>
    %641 = vector.broadcast %640 : vector<2x1x1xf32> to vector<2x1x32xf32>
    %642 = arith.mulf %634, %641 : vector<2x1x32xf32>
    %643 = vector.extract_strided_slice %570 {offsets = [0, 4, 0], sizes = [2, 1, 32], strides = [1, 1, 1]} : vector<2x8x32xf32> to vector<2x1x32xf32>
    %644 = arith.mulf %579, %643 : vector<2x1x32xf32>
    %cst_119 = arith.constant dense<0.000000e+00> : vector<2x1xf32>
    %645 = vector.multi_reduction <add>, %644, %cst_119 [2] : vector<2x1x32xf32> to vector<2x1xf32>
    %646 = vector.shape_cast %645 : vector<2x1xf32> to vector<2x1x1xf32>
    %647 = vector.broadcast %646 : vector<2x1x1xf32> to vector<2x1x32xf32>
    %648 = arith.mulf %647, %579 : vector<2x1x32xf32>
    %649 = arith.subf %643, %648 : vector<2x1x32xf32>
    %650 = arith.mulf %594, %649 : vector<2x1x32xf32>
    %cst_120 = arith.constant dense<0.000000e+00> : vector<2x1xf32>
    %651 = vector.multi_reduction <add>, %650, %cst_120 [2] : vector<2x1x32xf32> to vector<2x1xf32>
    %652 = vector.shape_cast %651 : vector<2x1xf32> to vector<2x1x1xf32>
    %653 = vector.broadcast %652 : vector<2x1x1xf32> to vector<2x1x32xf32>
    %654 = arith.mulf %653, %594 : vector<2x1x32xf32>
    %655 = arith.subf %649, %654 : vector<2x1x32xf32>
    %656 = arith.mulf %615, %655 : vector<2x1x32xf32>
    %cst_121 = arith.constant dense<0.000000e+00> : vector<2x1xf32>
    %657 = vector.multi_reduction <add>, %656, %cst_121 [2] : vector<2x1x32xf32> to vector<2x1xf32>
    %658 = vector.shape_cast %657 : vector<2x1xf32> to vector<2x1x1xf32>
    %659 = vector.broadcast %658 : vector<2x1x1xf32> to vector<2x1x32xf32>
    %660 = arith.mulf %659, %615 : vector<2x1x32xf32>
    %661 = arith.subf %655, %660 : vector<2x1x32xf32>
    %662 = arith.mulf %642, %661 : vector<2x1x32xf32>
    %cst_122 = arith.constant dense<0.000000e+00> : vector<2x1xf32>
    %663 = vector.multi_reduction <add>, %662, %cst_122 [2] : vector<2x1x32xf32> to vector<2x1xf32>
    %664 = vector.shape_cast %663 : vector<2x1xf32> to vector<2x1x1xf32>
    %665 = vector.broadcast %664 : vector<2x1x1xf32> to vector<2x1x32xf32>
    %666 = arith.mulf %665, %642 : vector<2x1x32xf32>
    %667 = arith.subf %661, %666 : vector<2x1x32xf32>
    %668 = arith.mulf %667, %667 : vector<2x1x32xf32>
    %cst_123 = arith.constant dense<0.000000e+00> : vector<2x1xf32>
    %669 = vector.multi_reduction <add>, %668, %cst_123 [2] : vector<2x1x32xf32> to vector<2x1xf32>
    %670 = vector.shape_cast %669 : vector<2x1xf32> to vector<2x1x1xf32>
    %cst_124 = arith.constant 1.000000e-30 : f32
    %671 = vector.broadcast %cst_124 : f32 to vector<2x1x1xf32>
    %672 = arith.addf %670, %671 : vector<2x1x1xf32>
    %673 = math.rsqrt %672 : vector<2x1x1xf32>
    %674 = vector.broadcast %673 : vector<2x1x1xf32> to vector<2x1x32xf32>
    %675 = arith.mulf %667, %674 : vector<2x1x32xf32>
    %676 = vector.extract_strided_slice %570 {offsets = [0, 5, 0], sizes = [2, 1, 32], strides = [1, 1, 1]} : vector<2x8x32xf32> to vector<2x1x32xf32>
    %677 = arith.mulf %579, %676 : vector<2x1x32xf32>
    %cst_125 = arith.constant dense<0.000000e+00> : vector<2x1xf32>
    %678 = vector.multi_reduction <add>, %677, %cst_125 [2] : vector<2x1x32xf32> to vector<2x1xf32>
    %679 = vector.shape_cast %678 : vector<2x1xf32> to vector<2x1x1xf32>
    %680 = vector.broadcast %679 : vector<2x1x1xf32> to vector<2x1x32xf32>
    %681 = arith.mulf %680, %579 : vector<2x1x32xf32>
    %682 = arith.subf %676, %681 : vector<2x1x32xf32>
    %683 = arith.mulf %594, %682 : vector<2x1x32xf32>
    %cst_126 = arith.constant dense<0.000000e+00> : vector<2x1xf32>
    %684 = vector.multi_reduction <add>, %683, %cst_126 [2] : vector<2x1x32xf32> to vector<2x1xf32>
    %685 = vector.shape_cast %684 : vector<2x1xf32> to vector<2x1x1xf32>
    %686 = vector.broadcast %685 : vector<2x1x1xf32> to vector<2x1x32xf32>
    %687 = arith.mulf %686, %594 : vector<2x1x32xf32>
    %688 = arith.subf %682, %687 : vector<2x1x32xf32>
    %689 = arith.mulf %615, %688 : vector<2x1x32xf32>
    %cst_127 = arith.constant dense<0.000000e+00> : vector<2x1xf32>
    %690 = vector.multi_reduction <add>, %689, %cst_127 [2] : vector<2x1x32xf32> to vector<2x1xf32>
    %691 = vector.shape_cast %690 : vector<2x1xf32> to vector<2x1x1xf32>
    %692 = vector.broadcast %691 : vector<2x1x1xf32> to vector<2x1x32xf32>
    %693 = arith.mulf %692, %615 : vector<2x1x32xf32>
    %694 = arith.subf %688, %693 : vector<2x1x32xf32>
    %695 = arith.mulf %642, %694 : vector<2x1x32xf32>
    %cst_128 = arith.constant dense<0.000000e+00> : vector<2x1xf32>
    %696 = vector.multi_reduction <add>, %695, %cst_128 [2] : vector<2x1x32xf32> to vector<2x1xf32>
    %697 = vector.shape_cast %696 : vector<2x1xf32> to vector<2x1x1xf32>
    %698 = vector.broadcast %697 : vector<2x1x1xf32> to vector<2x1x32xf32>
    %699 = arith.mulf %698, %642 : vector<2x1x32xf32>
    %700 = arith.subf %694, %699 : vector<2x1x32xf32>
    %701 = arith.mulf %675, %700 : vector<2x1x32xf32>
    %cst_129 = arith.constant dense<0.000000e+00> : vector<2x1xf32>
    %702 = vector.multi_reduction <add>, %701, %cst_129 [2] : vector<2x1x32xf32> to vector<2x1xf32>
    %703 = vector.shape_cast %702 : vector<2x1xf32> to vector<2x1x1xf32>
    %704 = vector.broadcast %703 : vector<2x1x1xf32> to vector<2x1x32xf32>
    %705 = arith.mulf %704, %675 : vector<2x1x32xf32>
    %706 = arith.subf %700, %705 : vector<2x1x32xf32>
    %707 = arith.mulf %706, %706 : vector<2x1x32xf32>
    %cst_130 = arith.constant dense<0.000000e+00> : vector<2x1xf32>
    %708 = vector.multi_reduction <add>, %707, %cst_130 [2] : vector<2x1x32xf32> to vector<2x1xf32>
    %709 = vector.shape_cast %708 : vector<2x1xf32> to vector<2x1x1xf32>
    %cst_131 = arith.constant 1.000000e-30 : f32
    %710 = vector.broadcast %cst_131 : f32 to vector<2x1x1xf32>
    %711 = arith.addf %709, %710 : vector<2x1x1xf32>
    %712 = math.rsqrt %711 : vector<2x1x1xf32>
    %713 = vector.broadcast %712 : vector<2x1x1xf32> to vector<2x1x32xf32>
    %714 = arith.mulf %706, %713 : vector<2x1x32xf32>
    %715 = vector.extract_strided_slice %570 {offsets = [0, 6, 0], sizes = [2, 1, 32], strides = [1, 1, 1]} : vector<2x8x32xf32> to vector<2x1x32xf32>
    %716 = arith.mulf %579, %715 : vector<2x1x32xf32>
    %cst_132 = arith.constant dense<0.000000e+00> : vector<2x1xf32>
    %717 = vector.multi_reduction <add>, %716, %cst_132 [2] : vector<2x1x32xf32> to vector<2x1xf32>
    %718 = vector.shape_cast %717 : vector<2x1xf32> to vector<2x1x1xf32>
    %719 = vector.broadcast %718 : vector<2x1x1xf32> to vector<2x1x32xf32>
    %720 = arith.mulf %719, %579 : vector<2x1x32xf32>
    %721 = arith.subf %715, %720 : vector<2x1x32xf32>
    %722 = arith.mulf %594, %721 : vector<2x1x32xf32>
    %cst_133 = arith.constant dense<0.000000e+00> : vector<2x1xf32>
    %723 = vector.multi_reduction <add>, %722, %cst_133 [2] : vector<2x1x32xf32> to vector<2x1xf32>
    %724 = vector.shape_cast %723 : vector<2x1xf32> to vector<2x1x1xf32>
    %725 = vector.broadcast %724 : vector<2x1x1xf32> to vector<2x1x32xf32>
    %726 = arith.mulf %725, %594 : vector<2x1x32xf32>
    %727 = arith.subf %721, %726 : vector<2x1x32xf32>
    %728 = arith.mulf %615, %727 : vector<2x1x32xf32>
    %cst_134 = arith.constant dense<0.000000e+00> : vector<2x1xf32>
    %729 = vector.multi_reduction <add>, %728, %cst_134 [2] : vector<2x1x32xf32> to vector<2x1xf32>
    %730 = vector.shape_cast %729 : vector<2x1xf32> to vector<2x1x1xf32>
    %731 = vector.broadcast %730 : vector<2x1x1xf32> to vector<2x1x32xf32>
    %732 = arith.mulf %731, %615 : vector<2x1x32xf32>
    %733 = arith.subf %727, %732 : vector<2x1x32xf32>
    %734 = arith.mulf %642, %733 : vector<2x1x32xf32>
    %cst_135 = arith.constant dense<0.000000e+00> : vector<2x1xf32>
    %735 = vector.multi_reduction <add>, %734, %cst_135 [2] : vector<2x1x32xf32> to vector<2x1xf32>
    %736 = vector.shape_cast %735 : vector<2x1xf32> to vector<2x1x1xf32>
    %737 = vector.broadcast %736 : vector<2x1x1xf32> to vector<2x1x32xf32>
    %738 = arith.mulf %737, %642 : vector<2x1x32xf32>
    %739 = arith.subf %733, %738 : vector<2x1x32xf32>
    %740 = arith.mulf %675, %739 : vector<2x1x32xf32>
    %cst_136 = arith.constant dense<0.000000e+00> : vector<2x1xf32>
    %741 = vector.multi_reduction <add>, %740, %cst_136 [2] : vector<2x1x32xf32> to vector<2x1xf32>
    %742 = vector.shape_cast %741 : vector<2x1xf32> to vector<2x1x1xf32>
    %743 = vector.broadcast %742 : vector<2x1x1xf32> to vector<2x1x32xf32>
    %744 = arith.mulf %743, %675 : vector<2x1x32xf32>
    %745 = arith.subf %739, %744 : vector<2x1x32xf32>
    %746 = arith.mulf %714, %745 : vector<2x1x32xf32>
    %cst_137 = arith.constant dense<0.000000e+00> : vector<2x1xf32>
    %747 = vector.multi_reduction <add>, %746, %cst_137 [2] : vector<2x1x32xf32> to vector<2x1xf32>
    %748 = vector.shape_cast %747 : vector<2x1xf32> to vector<2x1x1xf32>
    %749 = vector.broadcast %748 : vector<2x1x1xf32> to vector<2x1x32xf32>
    %750 = arith.mulf %749, %714 : vector<2x1x32xf32>
    %751 = arith.subf %745, %750 : vector<2x1x32xf32>
    %752 = arith.mulf %751, %751 : vector<2x1x32xf32>
    %cst_138 = arith.constant dense<0.000000e+00> : vector<2x1xf32>
    %753 = vector.multi_reduction <add>, %752, %cst_138 [2] : vector<2x1x32xf32> to vector<2x1xf32>
    %754 = vector.shape_cast %753 : vector<2x1xf32> to vector<2x1x1xf32>
    %cst_139 = arith.constant 1.000000e-30 : f32
    %755 = vector.broadcast %cst_139 : f32 to vector<2x1x1xf32>
    %756 = arith.addf %754, %755 : vector<2x1x1xf32>
    %757 = math.rsqrt %756 : vector<2x1x1xf32>
    %758 = vector.broadcast %757 : vector<2x1x1xf32> to vector<2x1x32xf32>
    %759 = arith.mulf %751, %758 : vector<2x1x32xf32>
    %760 = vector.extract_strided_slice %570 {offsets = [0, 7, 0], sizes = [2, 1, 32], strides = [1, 1, 1]} : vector<2x8x32xf32> to vector<2x1x32xf32>
    %761 = arith.mulf %579, %760 : vector<2x1x32xf32>
    %cst_140 = arith.constant dense<0.000000e+00> : vector<2x1xf32>
    %762 = vector.multi_reduction <add>, %761, %cst_140 [2] : vector<2x1x32xf32> to vector<2x1xf32>
    %763 = vector.shape_cast %762 : vector<2x1xf32> to vector<2x1x1xf32>
    %764 = vector.broadcast %763 : vector<2x1x1xf32> to vector<2x1x32xf32>
    %765 = arith.mulf %764, %579 : vector<2x1x32xf32>
    %766 = arith.subf %760, %765 : vector<2x1x32xf32>
    %767 = arith.mulf %594, %766 : vector<2x1x32xf32>
    %cst_141 = arith.constant dense<0.000000e+00> : vector<2x1xf32>
    %768 = vector.multi_reduction <add>, %767, %cst_141 [2] : vector<2x1x32xf32> to vector<2x1xf32>
    %769 = vector.shape_cast %768 : vector<2x1xf32> to vector<2x1x1xf32>
    %770 = vector.broadcast %769 : vector<2x1x1xf32> to vector<2x1x32xf32>
    %771 = arith.mulf %770, %594 : vector<2x1x32xf32>
    %772 = arith.subf %766, %771 : vector<2x1x32xf32>
    %773 = arith.mulf %615, %772 : vector<2x1x32xf32>
    %cst_142 = arith.constant dense<0.000000e+00> : vector<2x1xf32>
    %774 = vector.multi_reduction <add>, %773, %cst_142 [2] : vector<2x1x32xf32> to vector<2x1xf32>
    %775 = vector.shape_cast %774 : vector<2x1xf32> to vector<2x1x1xf32>
    %776 = vector.broadcast %775 : vector<2x1x1xf32> to vector<2x1x32xf32>
    %777 = arith.mulf %776, %615 : vector<2x1x32xf32>
    %778 = arith.subf %772, %777 : vector<2x1x32xf32>
    %779 = arith.mulf %642, %778 : vector<2x1x32xf32>
    %cst_143 = arith.constant dense<0.000000e+00> : vector<2x1xf32>
    %780 = vector.multi_reduction <add>, %779, %cst_143 [2] : vector<2x1x32xf32> to vector<2x1xf32>
    %781 = vector.shape_cast %780 : vector<2x1xf32> to vector<2x1x1xf32>
    %782 = vector.broadcast %781 : vector<2x1x1xf32> to vector<2x1x32xf32>
    %783 = arith.mulf %782, %642 : vector<2x1x32xf32>
    %784 = arith.subf %778, %783 : vector<2x1x32xf32>
    %785 = arith.mulf %675, %784 : vector<2x1x32xf32>
    %cst_144 = arith.constant dense<0.000000e+00> : vector<2x1xf32>
    %786 = vector.multi_reduction <add>, %785, %cst_144 [2] : vector<2x1x32xf32> to vector<2x1xf32>
    %787 = vector.shape_cast %786 : vector<2x1xf32> to vector<2x1x1xf32>
    %788 = vector.broadcast %787 : vector<2x1x1xf32> to vector<2x1x32xf32>
    %789 = arith.mulf %788, %675 : vector<2x1x32xf32>
    %790 = arith.subf %784, %789 : vector<2x1x32xf32>
    %791 = arith.mulf %714, %790 : vector<2x1x32xf32>
    %cst_145 = arith.constant dense<0.000000e+00> : vector<2x1xf32>
    %792 = vector.multi_reduction <add>, %791, %cst_145 [2] : vector<2x1x32xf32> to vector<2x1xf32>
    %793 = vector.shape_cast %792 : vector<2x1xf32> to vector<2x1x1xf32>
    %794 = vector.broadcast %793 : vector<2x1x1xf32> to vector<2x1x32xf32>
    %795 = arith.mulf %794, %714 : vector<2x1x32xf32>
    %796 = arith.subf %790, %795 : vector<2x1x32xf32>
    %797 = arith.mulf %759, %796 : vector<2x1x32xf32>
    %cst_146 = arith.constant dense<0.000000e+00> : vector<2x1xf32>
    %798 = vector.multi_reduction <add>, %797, %cst_146 [2] : vector<2x1x32xf32> to vector<2x1xf32>
    %799 = vector.shape_cast %798 : vector<2x1xf32> to vector<2x1x1xf32>
    %800 = vector.broadcast %799 : vector<2x1x1xf32> to vector<2x1x32xf32>
    %801 = arith.mulf %800, %759 : vector<2x1x32xf32>
    %802 = arith.subf %796, %801 : vector<2x1x32xf32>
    %803 = arith.mulf %802, %802 : vector<2x1x32xf32>
    %cst_147 = arith.constant dense<0.000000e+00> : vector<2x1xf32>
    %804 = vector.multi_reduction <add>, %803, %cst_147 [2] : vector<2x1x32xf32> to vector<2x1xf32>
    %805 = vector.shape_cast %804 : vector<2x1xf32> to vector<2x1x1xf32>
    %cst_148 = arith.constant 1.000000e-30 : f32
    %806 = vector.broadcast %cst_148 : f32 to vector<2x1x1xf32>
    %807 = arith.addf %805, %806 : vector<2x1x1xf32>
    %808 = math.rsqrt %807 : vector<2x1x1xf32>
    %809 = vector.broadcast %808 : vector<2x1x1xf32> to vector<2x1x32xf32>
    %810 = arith.mulf %802, %809 : vector<2x1x32xf32>
    %811 = tpu.iota {dimensions = array<i32: 1>} : vector<2x8x32xi32>
    %cst_149 = arith.constant 0.000000e+00 : f32
    %812 = vector.broadcast %cst_149 : f32 to vector<2x8x32xf32>
    %c0_i32_150 = arith.constant 0 : i32
    %813 = vector.broadcast %c0_i32_150 : i32 to vector<2x8x32xi32>
    %814 = arith.cmpi eq, %811, %813 : vector<2x8x32xi32>
    %815 = vector.shape_cast %579 : vector<2x1x32xf32> to vector<2x1x32xf32>
    %816 = vector.broadcast %815 : vector<2x1x32xf32> to vector<2x8x32xf32>
    %817 = arith.select %814, %816, %812 : vector<2x8x32xi1>, vector<2x8x32xf32>
    %c1_i32_151 = arith.constant 1 : i32
    %818 = vector.broadcast %c1_i32_151 : i32 to vector<2x8x32xi32>
    %819 = arith.cmpi eq, %811, %818 : vector<2x8x32xi32>
    %820 = vector.shape_cast %594 : vector<2x1x32xf32> to vector<2x1x32xf32>
    %821 = vector.broadcast %820 : vector<2x1x32xf32> to vector<2x8x32xf32>
    %822 = arith.select %819, %821, %817 : vector<2x8x32xi1>, vector<2x8x32xf32>
    %c2_i32_152 = arith.constant 2 : i32
    %823 = vector.broadcast %c2_i32_152 : i32 to vector<2x8x32xi32>
    %824 = arith.cmpi eq, %811, %823 : vector<2x8x32xi32>
    %825 = vector.shape_cast %615 : vector<2x1x32xf32> to vector<2x1x32xf32>
    %826 = vector.broadcast %825 : vector<2x1x32xf32> to vector<2x8x32xf32>
    %827 = arith.select %824, %826, %822 : vector<2x8x32xi1>, vector<2x8x32xf32>
    %c3_i32_153 = arith.constant 3 : i32
    %828 = vector.broadcast %c3_i32_153 : i32 to vector<2x8x32xi32>
    %829 = arith.cmpi eq, %811, %828 : vector<2x8x32xi32>
    %830 = vector.shape_cast %642 : vector<2x1x32xf32> to vector<2x1x32xf32>
    %831 = vector.broadcast %830 : vector<2x1x32xf32> to vector<2x8x32xf32>
    %832 = arith.select %829, %831, %827 : vector<2x8x32xi1>, vector<2x8x32xf32>
    %c4_i32_154 = arith.constant 4 : i32
    %833 = vector.broadcast %c4_i32_154 : i32 to vector<2x8x32xi32>
    %834 = arith.cmpi eq, %811, %833 : vector<2x8x32xi32>
    %835 = vector.shape_cast %675 : vector<2x1x32xf32> to vector<2x1x32xf32>
    %836 = vector.broadcast %835 : vector<2x1x32xf32> to vector<2x8x32xf32>
    %837 = arith.select %834, %836, %832 : vector<2x8x32xi1>, vector<2x8x32xf32>
    %c5_i32_155 = arith.constant 5 : i32
    %838 = vector.broadcast %c5_i32_155 : i32 to vector<2x8x32xi32>
    %839 = arith.cmpi eq, %811, %838 : vector<2x8x32xi32>
    %840 = vector.shape_cast %714 : vector<2x1x32xf32> to vector<2x1x32xf32>
    %841 = vector.broadcast %840 : vector<2x1x32xf32> to vector<2x8x32xf32>
    %842 = arith.select %839, %841, %837 : vector<2x8x32xi1>, vector<2x8x32xf32>
    %c6_i32_156 = arith.constant 6 : i32
    %843 = vector.broadcast %c6_i32_156 : i32 to vector<2x8x32xi32>
    %844 = arith.cmpi eq, %811, %843 : vector<2x8x32xi32>
    %845 = vector.shape_cast %759 : vector<2x1x32xf32> to vector<2x1x32xf32>
    %846 = vector.broadcast %845 : vector<2x1x32xf32> to vector<2x8x32xf32>
    %847 = arith.select %844, %846, %842 : vector<2x8x32xi1>, vector<2x8x32xf32>
    %c7_i32_157 = arith.constant 7 : i32
    %848 = vector.broadcast %c7_i32_157 : i32 to vector<2x8x32xi32>
    %849 = arith.cmpi eq, %811, %848 : vector<2x8x32xi32>
    %850 = vector.shape_cast %810 : vector<2x1x32xf32> to vector<2x1x32xf32>
    %851 = vector.broadcast %850 : vector<2x1x32xf32> to vector<2x8x32xf32>
    %852 = arith.select %849, %851, %847 : vector<2x8x32xi1>, vector<2x8x32xf32>
    "tpu.trace_start"() <{level = 10 : i32, message = "brn,bmn->brm"}> : () -> ()
    %cst_158 = arith.constant dense<0.000000e+00> : vector<2x8x64xf32>
    %853 = tpu.matmul %852, %0, %cst_158 {dimension_numbers = #tpu.dot_dimension_numbers<[2], [2], [1], [1], [0, 0, 0, 1, 1, 1], [0], [0]>} : vector<2x8x32xf32>, vector<2x64x32xf32>, vector<2x8x64xf32> -> vector<2x8x64xf32>
    "tpu.trace_stop"() : () -> ()
    %854 = vector.extract_strided_slice %853 {offsets = [0, 0, 0], sizes = [2, 1, 64], strides = [1, 1, 1]} : vector<2x8x64xf32> to vector<2x1x64xf32>
    %855 = arith.mulf %854, %854 : vector<2x1x64xf32>
    %cst_159 = arith.constant dense<0.000000e+00> : vector<2x1xf32>
    %856 = vector.multi_reduction <add>, %855, %cst_159 [2] : vector<2x1x64xf32> to vector<2x1xf32>
    %857 = vector.shape_cast %856 : vector<2x1xf32> to vector<2x1x1xf32>
    %cst_160 = arith.constant 1.000000e-30 : f32
    %858 = vector.broadcast %cst_160 : f32 to vector<2x1x1xf32>
    %859 = arith.addf %857, %858 : vector<2x1x1xf32>
    %860 = math.rsqrt %859 : vector<2x1x1xf32>
    %861 = vector.broadcast %860 : vector<2x1x1xf32> to vector<2x1x64xf32>
    %862 = arith.mulf %854, %861 : vector<2x1x64xf32>
    %863 = vector.extract_strided_slice %853 {offsets = [0, 1, 0], sizes = [2, 1, 64], strides = [1, 1, 1]} : vector<2x8x64xf32> to vector<2x1x64xf32>
    %864 = arith.mulf %862, %863 : vector<2x1x64xf32>
    %cst_161 = arith.constant dense<0.000000e+00> : vector<2x1xf32>
    %865 = vector.multi_reduction <add>, %864, %cst_161 [2] : vector<2x1x64xf32> to vector<2x1xf32>
    %866 = vector.shape_cast %865 : vector<2x1xf32> to vector<2x1x1xf32>
    %867 = vector.broadcast %866 : vector<2x1x1xf32> to vector<2x1x64xf32>
    %868 = arith.mulf %867, %862 : vector<2x1x64xf32>
    %869 = arith.subf %863, %868 : vector<2x1x64xf32>
    %870 = arith.mulf %869, %869 : vector<2x1x64xf32>
    %cst_162 = arith.constant dense<0.000000e+00> : vector<2x1xf32>
    %871 = vector.multi_reduction <add>, %870, %cst_162 [2] : vector<2x1x64xf32> to vector<2x1xf32>
    %872 = vector.shape_cast %871 : vector<2x1xf32> to vector<2x1x1xf32>
    %cst_163 = arith.constant 1.000000e-30 : f32
    %873 = vector.broadcast %cst_163 : f32 to vector<2x1x1xf32>
    %874 = arith.addf %872, %873 : vector<2x1x1xf32>
    %875 = math.rsqrt %874 : vector<2x1x1xf32>
    %876 = vector.broadcast %875 : vector<2x1x1xf32> to vector<2x1x64xf32>
    %877 = arith.mulf %869, %876 : vector<2x1x64xf32>
    %878 = vector.extract_strided_slice %853 {offsets = [0, 2, 0], sizes = [2, 1, 64], strides = [1, 1, 1]} : vector<2x8x64xf32> to vector<2x1x64xf32>
    %879 = arith.mulf %862, %878 : vector<2x1x64xf32>
    %cst_164 = arith.constant dense<0.000000e+00> : vector<2x1xf32>
    %880 = vector.multi_reduction <add>, %879, %cst_164 [2] : vector<2x1x64xf32> to vector<2x1xf32>
    %881 = vector.shape_cast %880 : vector<2x1xf32> to vector<2x1x1xf32>
    %882 = vector.broadcast %881 : vector<2x1x1xf32> to vector<2x1x64xf32>
    %883 = arith.mulf %882, %862 : vector<2x1x64xf32>
    %884 = arith.subf %878, %883 : vector<2x1x64xf32>
    %885 = arith.mulf %877, %884 : vector<2x1x64xf32>
    %cst_165 = arith.constant dense<0.000000e+00> : vector<2x1xf32>
    %886 = vector.multi_reduction <add>, %885, %cst_165 [2] : vector<2x1x64xf32> to vector<2x1xf32>
    %887 = vector.shape_cast %886 : vector<2x1xf32> to vector<2x1x1xf32>
    %888 = vector.broadcast %887 : vector<2x1x1xf32> to vector<2x1x64xf32>
    %889 = arith.mulf %888, %877 : vector<2x1x64xf32>
    %890 = arith.subf %884, %889 : vector<2x1x64xf32>
    %891 = arith.mulf %890, %890 : vector<2x1x64xf32>
    %cst_166 = arith.constant dense<0.000000e+00> : vector<2x1xf32>
    %892 = vector.multi_reduction <add>, %891, %cst_166 [2] : vector<2x1x64xf32> to vector<2x1xf32>
    %893 = vector.shape_cast %892 : vector<2x1xf32> to vector<2x1x1xf32>
    %cst_167 = arith.constant 1.000000e-30 : f32
    %894 = vector.broadcast %cst_167 : f32 to vector<2x1x1xf32>
    %895 = arith.addf %893, %894 : vector<2x1x1xf32>
    %896 = math.rsqrt %895 : vector<2x1x1xf32>
    %897 = vector.broadcast %896 : vector<2x1x1xf32> to vector<2x1x64xf32>
    %898 = arith.mulf %890, %897 : vector<2x1x64xf32>
    %899 = vector.extract_strided_slice %853 {offsets = [0, 3, 0], sizes = [2, 1, 64], strides = [1, 1, 1]} : vector<2x8x64xf32> to vector<2x1x64xf32>
    %900 = arith.mulf %862, %899 : vector<2x1x64xf32>
    %cst_168 = arith.constant dense<0.000000e+00> : vector<2x1xf32>
    %901 = vector.multi_reduction <add>, %900, %cst_168 [2] : vector<2x1x64xf32> to vector<2x1xf32>
    %902 = vector.shape_cast %901 : vector<2x1xf32> to vector<2x1x1xf32>
    %903 = vector.broadcast %902 : vector<2x1x1xf32> to vector<2x1x64xf32>
    %904 = arith.mulf %903, %862 : vector<2x1x64xf32>
    %905 = arith.subf %899, %904 : vector<2x1x64xf32>
    %906 = arith.mulf %877, %905 : vector<2x1x64xf32>
    %cst_169 = arith.constant dense<0.000000e+00> : vector<2x1xf32>
    %907 = vector.multi_reduction <add>, %906, %cst_169 [2] : vector<2x1x64xf32> to vector<2x1xf32>
    %908 = vector.shape_cast %907 : vector<2x1xf32> to vector<2x1x1xf32>
    %909 = vector.broadcast %908 : vector<2x1x1xf32> to vector<2x1x64xf32>
    %910 = arith.mulf %909, %877 : vector<2x1x64xf32>
    %911 = arith.subf %905, %910 : vector<2x1x64xf32>
    %912 = arith.mulf %898, %911 : vector<2x1x64xf32>
    %cst_170 = arith.constant dense<0.000000e+00> : vector<2x1xf32>
    %913 = vector.multi_reduction <add>, %912, %cst_170 [2] : vector<2x1x64xf32> to vector<2x1xf32>
    %914 = vector.shape_cast %913 : vector<2x1xf32> to vector<2x1x1xf32>
    %915 = vector.broadcast %914 : vector<2x1x1xf32> to vector<2x1x64xf32>
    %916 = arith.mulf %915, %898 : vector<2x1x64xf32>
    %917 = arith.subf %911, %916 : vector<2x1x64xf32>
    %918 = arith.mulf %917, %917 : vector<2x1x64xf32>
    %cst_171 = arith.constant dense<0.000000e+00> : vector<2x1xf32>
    %919 = vector.multi_reduction <add>, %918, %cst_171 [2] : vector<2x1x64xf32> to vector<2x1xf32>
    %920 = vector.shape_cast %919 : vector<2x1xf32> to vector<2x1x1xf32>
    %cst_172 = arith.constant 1.000000e-30 : f32
    %921 = vector.broadcast %cst_172 : f32 to vector<2x1x1xf32>
    %922 = arith.addf %920, %921 : vector<2x1x1xf32>
    %923 = math.rsqrt %922 : vector<2x1x1xf32>
    %924 = vector.broadcast %923 : vector<2x1x1xf32> to vector<2x1x64xf32>
    %925 = arith.mulf %917, %924 : vector<2x1x64xf32>
    %926 = vector.extract_strided_slice %853 {offsets = [0, 4, 0], sizes = [2, 1, 64], strides = [1, 1, 1]} : vector<2x8x64xf32> to vector<2x1x64xf32>
    %927 = arith.mulf %862, %926 : vector<2x1x64xf32>
    %cst_173 = arith.constant dense<0.000000e+00> : vector<2x1xf32>
    %928 = vector.multi_reduction <add>, %927, %cst_173 [2] : vector<2x1x64xf32> to vector<2x1xf32>
    %929 = vector.shape_cast %928 : vector<2x1xf32> to vector<2x1x1xf32>
    %930 = vector.broadcast %929 : vector<2x1x1xf32> to vector<2x1x64xf32>
    %931 = arith.mulf %930, %862 : vector<2x1x64xf32>
    %932 = arith.subf %926, %931 : vector<2x1x64xf32>
    %933 = arith.mulf %877, %932 : vector<2x1x64xf32>
    %cst_174 = arith.constant dense<0.000000e+00> : vector<2x1xf32>
    %934 = vector.multi_reduction <add>, %933, %cst_174 [2] : vector<2x1x64xf32> to vector<2x1xf32>
    %935 = vector.shape_cast %934 : vector<2x1xf32> to vector<2x1x1xf32>
    %936 = vector.broadcast %935 : vector<2x1x1xf32> to vector<2x1x64xf32>
    %937 = arith.mulf %936, %877 : vector<2x1x64xf32>
    %938 = arith.subf %932, %937 : vector<2x1x64xf32>
    %939 = arith.mulf %898, %938 : vector<2x1x64xf32>
    %cst_175 = arith.constant dense<0.000000e+00> : vector<2x1xf32>
    %940 = vector.multi_reduction <add>, %939, %cst_175 [2] : vector<2x1x64xf32> to vector<2x1xf32>
    %941 = vector.shape_cast %940 : vector<2x1xf32> to vector<2x1x1xf32>
    %942 = vector.broadcast %941 : vector<2x1x1xf32> to vector<2x1x64xf32>
    %943 = arith.mulf %942, %898 : vector<2x1x64xf32>
    %944 = arith.subf %938, %943 : vector<2x1x64xf32>
    %945 = arith.mulf %925, %944 : vector<2x1x64xf32>
    %cst_176 = arith.constant dense<0.000000e+00> : vector<2x1xf32>
    %946 = vector.multi_reduction <add>, %945, %cst_176 [2] : vector<2x1x64xf32> to vector<2x1xf32>
    %947 = vector.shape_cast %946 : vector<2x1xf32> to vector<2x1x1xf32>
    %948 = vector.broadcast %947 : vector<2x1x1xf32> to vector<2x1x64xf32>
    %949 = arith.mulf %948, %925 : vector<2x1x64xf32>
    %950 = arith.subf %944, %949 : vector<2x1x64xf32>
    %951 = arith.mulf %950, %950 : vector<2x1x64xf32>
    %cst_177 = arith.constant dense<0.000000e+00> : vector<2x1xf32>
    %952 = vector.multi_reduction <add>, %951, %cst_177 [2] : vector<2x1x64xf32> to vector<2x1xf32>
    %953 = vector.shape_cast %952 : vector<2x1xf32> to vector<2x1x1xf32>
    %cst_178 = arith.constant 1.000000e-30 : f32
    %954 = vector.broadcast %cst_178 : f32 to vector<2x1x1xf32>
    %955 = arith.addf %953, %954 : vector<2x1x1xf32>
    %956 = math.rsqrt %955 : vector<2x1x1xf32>
    %957 = vector.broadcast %956 : vector<2x1x1xf32> to vector<2x1x64xf32>
    %958 = arith.mulf %950, %957 : vector<2x1x64xf32>
    %959 = vector.extract_strided_slice %853 {offsets = [0, 5, 0], sizes = [2, 1, 64], strides = [1, 1, 1]} : vector<2x8x64xf32> to vector<2x1x64xf32>
    %960 = arith.mulf %862, %959 : vector<2x1x64xf32>
    %cst_179 = arith.constant dense<0.000000e+00> : vector<2x1xf32>
    %961 = vector.multi_reduction <add>, %960, %cst_179 [2] : vector<2x1x64xf32> to vector<2x1xf32>
    %962 = vector.shape_cast %961 : vector<2x1xf32> to vector<2x1x1xf32>
    %963 = vector.broadcast %962 : vector<2x1x1xf32> to vector<2x1x64xf32>
    %964 = arith.mulf %963, %862 : vector<2x1x64xf32>
    %965 = arith.subf %959, %964 : vector<2x1x64xf32>
    %966 = arith.mulf %877, %965 : vector<2x1x64xf32>
    %cst_180 = arith.constant dense<0.000000e+00> : vector<2x1xf32>
    %967 = vector.multi_reduction <add>, %966, %cst_180 [2] : vector<2x1x64xf32> to vector<2x1xf32>
    %968 = vector.shape_cast %967 : vector<2x1xf32> to vector<2x1x1xf32>
    %969 = vector.broadcast %968 : vector<2x1x1xf32> to vector<2x1x64xf32>
    %970 = arith.mulf %969, %877 : vector<2x1x64xf32>
    %971 = arith.subf %965, %970 : vector<2x1x64xf32>
    %972 = arith.mulf %898, %971 : vector<2x1x64xf32>
    %cst_181 = arith.constant dense<0.000000e+00> : vector<2x1xf32>
    %973 = vector.multi_reduction <add>, %972, %cst_181 [2] : vector<2x1x64xf32> to vector<2x1xf32>
    %974 = vector.shape_cast %973 : vector<2x1xf32> to vector<2x1x1xf32>
    %975 = vector.broadcast %974 : vector<2x1x1xf32> to vector<2x1x64xf32>
    %976 = arith.mulf %975, %898 : vector<2x1x64xf32>
    %977 = arith.subf %971, %976 : vector<2x1x64xf32>
    %978 = arith.mulf %925, %977 : vector<2x1x64xf32>
    %cst_182 = arith.constant dense<0.000000e+00> : vector<2x1xf32>
    %979 = vector.multi_reduction <add>, %978, %cst_182 [2] : vector<2x1x64xf32> to vector<2x1xf32>
    %980 = vector.shape_cast %979 : vector<2x1xf32> to vector<2x1x1xf32>
    %981 = vector.broadcast %980 : vector<2x1x1xf32> to vector<2x1x64xf32>
    %982 = arith.mulf %981, %925 : vector<2x1x64xf32>
    %983 = arith.subf %977, %982 : vector<2x1x64xf32>
    %984 = arith.mulf %958, %983 : vector<2x1x64xf32>
    %cst_183 = arith.constant dense<0.000000e+00> : vector<2x1xf32>
    %985 = vector.multi_reduction <add>, %984, %cst_183 [2] : vector<2x1x64xf32> to vector<2x1xf32>
    %986 = vector.shape_cast %985 : vector<2x1xf32> to vector<2x1x1xf32>
    %987 = vector.broadcast %986 : vector<2x1x1xf32> to vector<2x1x64xf32>
    %988 = arith.mulf %987, %958 : vector<2x1x64xf32>
    %989 = arith.subf %983, %988 : vector<2x1x64xf32>
    %990 = arith.mulf %989, %989 : vector<2x1x64xf32>
    %cst_184 = arith.constant dense<0.000000e+00> : vector<2x1xf32>
    %991 = vector.multi_reduction <add>, %990, %cst_184 [2] : vector<2x1x64xf32> to vector<2x1xf32>
    %992 = vector.shape_cast %991 : vector<2x1xf32> to vector<2x1x1xf32>
    %cst_185 = arith.constant 1.000000e-30 : f32
    %993 = vector.broadcast %cst_185 : f32 to vector<2x1x1xf32>
    %994 = arith.addf %992, %993 : vector<2x1x1xf32>
    %995 = math.rsqrt %994 : vector<2x1x1xf32>
    %996 = vector.broadcast %995 : vector<2x1x1xf32> to vector<2x1x64xf32>
    %997 = arith.mulf %989, %996 : vector<2x1x64xf32>
    %998 = vector.extract_strided_slice %853 {offsets = [0, 6, 0], sizes = [2, 1, 64], strides = [1, 1, 1]} : vector<2x8x64xf32> to vector<2x1x64xf32>
    %999 = arith.mulf %862, %998 : vector<2x1x64xf32>
    %cst_186 = arith.constant dense<0.000000e+00> : vector<2x1xf32>
    %1000 = vector.multi_reduction <add>, %999, %cst_186 [2] : vector<2x1x64xf32> to vector<2x1xf32>
    %1001 = vector.shape_cast %1000 : vector<2x1xf32> to vector<2x1x1xf32>
    %1002 = vector.broadcast %1001 : vector<2x1x1xf32> to vector<2x1x64xf32>
    %1003 = arith.mulf %1002, %862 : vector<2x1x64xf32>
    %1004 = arith.subf %998, %1003 : vector<2x1x64xf32>
    %1005 = arith.mulf %877, %1004 : vector<2x1x64xf32>
    %cst_187 = arith.constant dense<0.000000e+00> : vector<2x1xf32>
    %1006 = vector.multi_reduction <add>, %1005, %cst_187 [2] : vector<2x1x64xf32> to vector<2x1xf32>
    %1007 = vector.shape_cast %1006 : vector<2x1xf32> to vector<2x1x1xf32>
    %1008 = vector.broadcast %1007 : vector<2x1x1xf32> to vector<2x1x64xf32>
    %1009 = arith.mulf %1008, %877 : vector<2x1x64xf32>
    %1010 = arith.subf %1004, %1009 : vector<2x1x64xf32>
    %1011 = arith.mulf %898, %1010 : vector<2x1x64xf32>
    %cst_188 = arith.constant dense<0.000000e+00> : vector<2x1xf32>
    %1012 = vector.multi_reduction <add>, %1011, %cst_188 [2] : vector<2x1x64xf32> to vector<2x1xf32>
    %1013 = vector.shape_cast %1012 : vector<2x1xf32> to vector<2x1x1xf32>
    %1014 = vector.broadcast %1013 : vector<2x1x1xf32> to vector<2x1x64xf32>
    %1015 = arith.mulf %1014, %898 : vector<2x1x64xf32>
    %1016 = arith.subf %1010, %1015 : vector<2x1x64xf32>
    %1017 = arith.mulf %925, %1016 : vector<2x1x64xf32>
    %cst_189 = arith.constant dense<0.000000e+00> : vector<2x1xf32>
    %1018 = vector.multi_reduction <add>, %1017, %cst_189 [2] : vector<2x1x64xf32> to vector<2x1xf32>
    %1019 = vector.shape_cast %1018 : vector<2x1xf32> to vector<2x1x1xf32>
    %1020 = vector.broadcast %1019 : vector<2x1x1xf32> to vector<2x1x64xf32>
    %1021 = arith.mulf %1020, %925 : vector<2x1x64xf32>
    %1022 = arith.subf %1016, %1021 : vector<2x1x64xf32>
    %1023 = arith.mulf %958, %1022 : vector<2x1x64xf32>
    %cst_190 = arith.constant dense<0.000000e+00> : vector<2x1xf32>
    %1024 = vector.multi_reduction <add>, %1023, %cst_190 [2] : vector<2x1x64xf32> to vector<2x1xf32>
    %1025 = vector.shape_cast %1024 : vector<2x1xf32> to vector<2x1x1xf32>
    %1026 = vector.broadcast %1025 : vector<2x1x1xf32> to vector<2x1x64xf32>
    %1027 = arith.mulf %1026, %958 : vector<2x1x64xf32>
    %1028 = arith.subf %1022, %1027 : vector<2x1x64xf32>
    %1029 = arith.mulf %997, %1028 : vector<2x1x64xf32>
    %cst_191 = arith.constant dense<0.000000e+00> : vector<2x1xf32>
    %1030 = vector.multi_reduction <add>, %1029, %cst_191 [2] : vector<2x1x64xf32> to vector<2x1xf32>
    %1031 = vector.shape_cast %1030 : vector<2x1xf32> to vector<2x1x1xf32>
    %1032 = vector.broadcast %1031 : vector<2x1x1xf32> to vector<2x1x64xf32>
    %1033 = arith.mulf %1032, %997 : vector<2x1x64xf32>
    %1034 = arith.subf %1028, %1033 : vector<2x1x64xf32>
    %1035 = arith.mulf %1034, %1034 : vector<2x1x64xf32>
    %cst_192 = arith.constant dense<0.000000e+00> : vector<2x1xf32>
    %1036 = vector.multi_reduction <add>, %1035, %cst_192 [2] : vector<2x1x64xf32> to vector<2x1xf32>
    %1037 = vector.shape_cast %1036 : vector<2x1xf32> to vector<2x1x1xf32>
    %cst_193 = arith.constant 1.000000e-30 : f32
    %1038 = vector.broadcast %cst_193 : f32 to vector<2x1x1xf32>
    %1039 = arith.addf %1037, %1038 : vector<2x1x1xf32>
    %1040 = math.rsqrt %1039 : vector<2x1x1xf32>
    %1041 = vector.broadcast %1040 : vector<2x1x1xf32> to vector<2x1x64xf32>
    %1042 = arith.mulf %1034, %1041 : vector<2x1x64xf32>
    %1043 = vector.extract_strided_slice %853 {offsets = [0, 7, 0], sizes = [2, 1, 64], strides = [1, 1, 1]} : vector<2x8x64xf32> to vector<2x1x64xf32>
    %1044 = arith.mulf %862, %1043 : vector<2x1x64xf32>
    %cst_194 = arith.constant dense<0.000000e+00> : vector<2x1xf32>
    %1045 = vector.multi_reduction <add>, %1044, %cst_194 [2] : vector<2x1x64xf32> to vector<2x1xf32>
    %1046 = vector.shape_cast %1045 : vector<2x1xf32> to vector<2x1x1xf32>
    %1047 = vector.broadcast %1046 : vector<2x1x1xf32> to vector<2x1x64xf32>
    %1048 = arith.mulf %1047, %862 : vector<2x1x64xf32>
    %1049 = arith.subf %1043, %1048 : vector<2x1x64xf32>
    %1050 = arith.mulf %877, %1049 : vector<2x1x64xf32>
    %cst_195 = arith.constant dense<0.000000e+00> : vector<2x1xf32>
    %1051 = vector.multi_reduction <add>, %1050, %cst_195 [2] : vector<2x1x64xf32> to vector<2x1xf32>
    %1052 = vector.shape_cast %1051 : vector<2x1xf32> to vector<2x1x1xf32>
    %1053 = vector.broadcast %1052 : vector<2x1x1xf32> to vector<2x1x64xf32>
    %1054 = arith.mulf %1053, %877 : vector<2x1x64xf32>
    %1055 = arith.subf %1049, %1054 : vector<2x1x64xf32>
    %1056 = arith.mulf %898, %1055 : vector<2x1x64xf32>
    %cst_196 = arith.constant dense<0.000000e+00> : vector<2x1xf32>
    %1057 = vector.multi_reduction <add>, %1056, %cst_196 [2] : vector<2x1x64xf32> to vector<2x1xf32>
    %1058 = vector.shape_cast %1057 : vector<2x1xf32> to vector<2x1x1xf32>
    %1059 = vector.broadcast %1058 : vector<2x1x1xf32> to vector<2x1x64xf32>
    %1060 = arith.mulf %1059, %898 : vector<2x1x64xf32>
    %1061 = arith.subf %1055, %1060 : vector<2x1x64xf32>
    %1062 = arith.mulf %925, %1061 : vector<2x1x64xf32>
    %cst_197 = arith.constant dense<0.000000e+00> : vector<2x1xf32>
    %1063 = vector.multi_reduction <add>, %1062, %cst_197 [2] : vector<2x1x64xf32> to vector<2x1xf32>
    %1064 = vector.shape_cast %1063 : vector<2x1xf32> to vector<2x1x1xf32>
    %1065 = vector.broadcast %1064 : vector<2x1x1xf32> to vector<2x1x64xf32>
    %1066 = arith.mulf %1065, %925 : vector<2x1x64xf32>
    %1067 = arith.subf %1061, %1066 : vector<2x1x64xf32>
    %1068 = arith.mulf %958, %1067 : vector<2x1x64xf32>
    %cst_198 = arith.constant dense<0.000000e+00> : vector<2x1xf32>
    %1069 = vector.multi_reduction <add>, %1068, %cst_198 [2] : vector<2x1x64xf32> to vector<2x1xf32>
    %1070 = vector.shape_cast %1069 : vector<2x1xf32> to vector<2x1x1xf32>
    %1071 = vector.broadcast %1070 : vector<2x1x1xf32> to vector<2x1x64xf32>
    %1072 = arith.mulf %1071, %958 : vector<2x1x64xf32>
    %1073 = arith.subf %1067, %1072 : vector<2x1x64xf32>
    %1074 = arith.mulf %997, %1073 : vector<2x1x64xf32>
    %cst_199 = arith.constant dense<0.000000e+00> : vector<2x1xf32>
    %1075 = vector.multi_reduction <add>, %1074, %cst_199 [2] : vector<2x1x64xf32> to vector<2x1xf32>
    %1076 = vector.shape_cast %1075 : vector<2x1xf32> to vector<2x1x1xf32>
    %1077 = vector.broadcast %1076 : vector<2x1x1xf32> to vector<2x1x64xf32>
    %1078 = arith.mulf %1077, %997 : vector<2x1x64xf32>
    %1079 = arith.subf %1073, %1078 : vector<2x1x64xf32>
    %1080 = arith.mulf %1042, %1079 : vector<2x1x64xf32>
    %cst_200 = arith.constant dense<0.000000e+00> : vector<2x1xf32>
    %1081 = vector.multi_reduction <add>, %1080, %cst_200 [2] : vector<2x1x64xf32> to vector<2x1xf32>
    %1082 = vector.shape_cast %1081 : vector<2x1xf32> to vector<2x1x1xf32>
    %1083 = vector.broadcast %1082 : vector<2x1x1xf32> to vector<2x1x64xf32>
    %1084 = arith.mulf %1083, %1042 : vector<2x1x64xf32>
    %1085 = arith.subf %1079, %1084 : vector<2x1x64xf32>
    %1086 = arith.mulf %1085, %1085 : vector<2x1x64xf32>
    %cst_201 = arith.constant dense<0.000000e+00> : vector<2x1xf32>
    %1087 = vector.multi_reduction <add>, %1086, %cst_201 [2] : vector<2x1x64xf32> to vector<2x1xf32>
    %1088 = vector.shape_cast %1087 : vector<2x1xf32> to vector<2x1x1xf32>
    %cst_202 = arith.constant 1.000000e-30 : f32
    %1089 = vector.broadcast %cst_202 : f32 to vector<2x1x1xf32>
    %1090 = arith.addf %1088, %1089 : vector<2x1x1xf32>
    %1091 = math.rsqrt %1090 : vector<2x1x1xf32>
    %1092 = vector.broadcast %1091 : vector<2x1x1xf32> to vector<2x1x64xf32>
    %1093 = arith.mulf %1085, %1092 : vector<2x1x64xf32>
    %1094 = tpu.iota {dimensions = array<i32: 1>} : vector<2x8x64xi32>
    %cst_203 = arith.constant 0.000000e+00 : f32
    %1095 = vector.broadcast %cst_203 : f32 to vector<2x8x64xf32>
    %c0_i32_204 = arith.constant 0 : i32
    %1096 = vector.broadcast %c0_i32_204 : i32 to vector<2x8x64xi32>
    %1097 = arith.cmpi eq, %1094, %1096 : vector<2x8x64xi32>
    %1098 = vector.shape_cast %862 : vector<2x1x64xf32> to vector<2x1x64xf32>
    %1099 = vector.broadcast %1098 : vector<2x1x64xf32> to vector<2x8x64xf32>
    %1100 = arith.select %1097, %1099, %1095 : vector<2x8x64xi1>, vector<2x8x64xf32>
    %c1_i32_205 = arith.constant 1 : i32
    %1101 = vector.broadcast %c1_i32_205 : i32 to vector<2x8x64xi32>
    %1102 = arith.cmpi eq, %1094, %1101 : vector<2x8x64xi32>
    %1103 = vector.shape_cast %877 : vector<2x1x64xf32> to vector<2x1x64xf32>
    %1104 = vector.broadcast %1103 : vector<2x1x64xf32> to vector<2x8x64xf32>
    %1105 = arith.select %1102, %1104, %1100 : vector<2x8x64xi1>, vector<2x8x64xf32>
    %c2_i32_206 = arith.constant 2 : i32
    %1106 = vector.broadcast %c2_i32_206 : i32 to vector<2x8x64xi32>
    %1107 = arith.cmpi eq, %1094, %1106 : vector<2x8x64xi32>
    %1108 = vector.shape_cast %898 : vector<2x1x64xf32> to vector<2x1x64xf32>
    %1109 = vector.broadcast %1108 : vector<2x1x64xf32> to vector<2x8x64xf32>
    %1110 = arith.select %1107, %1109, %1105 : vector<2x8x64xi1>, vector<2x8x64xf32>
    %c3_i32_207 = arith.constant 3 : i32
    %1111 = vector.broadcast %c3_i32_207 : i32 to vector<2x8x64xi32>
    %1112 = arith.cmpi eq, %1094, %1111 : vector<2x8x64xi32>
    %1113 = vector.shape_cast %925 : vector<2x1x64xf32> to vector<2x1x64xf32>
    %1114 = vector.broadcast %1113 : vector<2x1x64xf32> to vector<2x8x64xf32>
    %1115 = arith.select %1112, %1114, %1110 : vector<2x8x64xi1>, vector<2x8x64xf32>
    %c4_i32_208 = arith.constant 4 : i32
    %1116 = vector.broadcast %c4_i32_208 : i32 to vector<2x8x64xi32>
    %1117 = arith.cmpi eq, %1094, %1116 : vector<2x8x64xi32>
    %1118 = vector.shape_cast %958 : vector<2x1x64xf32> to vector<2x1x64xf32>
    %1119 = vector.broadcast %1118 : vector<2x1x64xf32> to vector<2x8x64xf32>
    %1120 = arith.select %1117, %1119, %1115 : vector<2x8x64xi1>, vector<2x8x64xf32>
    %c5_i32_209 = arith.constant 5 : i32
    %1121 = vector.broadcast %c5_i32_209 : i32 to vector<2x8x64xi32>
    %1122 = arith.cmpi eq, %1094, %1121 : vector<2x8x64xi32>
    %1123 = vector.shape_cast %997 : vector<2x1x64xf32> to vector<2x1x64xf32>
    %1124 = vector.broadcast %1123 : vector<2x1x64xf32> to vector<2x8x64xf32>
    %1125 = arith.select %1122, %1124, %1120 : vector<2x8x64xi1>, vector<2x8x64xf32>
    %c6_i32_210 = arith.constant 6 : i32
    %1126 = vector.broadcast %c6_i32_210 : i32 to vector<2x8x64xi32>
    %1127 = arith.cmpi eq, %1094, %1126 : vector<2x8x64xi32>
    %1128 = vector.shape_cast %1042 : vector<2x1x64xf32> to vector<2x1x64xf32>
    %1129 = vector.broadcast %1128 : vector<2x1x64xf32> to vector<2x8x64xf32>
    %1130 = arith.select %1127, %1129, %1125 : vector<2x8x64xi1>, vector<2x8x64xf32>
    %c7_i32_211 = arith.constant 7 : i32
    %1131 = vector.broadcast %c7_i32_211 : i32 to vector<2x8x64xi32>
    %1132 = arith.cmpi eq, %1094, %1131 : vector<2x8x64xi32>
    %1133 = vector.shape_cast %1093 : vector<2x1x64xf32> to vector<2x1x64xf32>
    %1134 = vector.broadcast %1133 : vector<2x1x64xf32> to vector<2x8x64xf32>
    %1135 = arith.select %1132, %1134, %1130 : vector<2x8x64xi1>, vector<2x8x64xf32>
    "tpu.trace_start"() <{level = 10 : i32, message = "brm,bmn->brn"}> : () -> ()
    %cst_212 = arith.constant dense<0.000000e+00> : vector<2x8x32xf32>
    %1136 = tpu.matmul %1135, %0, %cst_212 {dimension_numbers = #tpu.dot_dimension_numbers<[2], [1], [1], [2], [0, 0, 0, 1, 1, 2], [0], [0]>} : vector<2x8x64xf32>, vector<2x64x32xf32>, vector<2x8x32xf32> -> vector<2x8x32xf32>
    "tpu.trace_stop"() : () -> ()
    %1137 = vector.extract_strided_slice %1136 {offsets = [0, 0, 0], sizes = [2, 1, 32], strides = [1, 1, 1]} : vector<2x8x32xf32> to vector<2x1x32xf32>
    %1138 = arith.mulf %1137, %1137 : vector<2x1x32xf32>
    %cst_213 = arith.constant dense<0.000000e+00> : vector<2x1xf32>
    %1139 = vector.multi_reduction <add>, %1138, %cst_213 [2] : vector<2x1x32xf32> to vector<2x1xf32>
    %1140 = vector.shape_cast %1139 : vector<2x1xf32> to vector<2x1x1xf32>
    %cst_214 = arith.constant 1.000000e-30 : f32
    %1141 = vector.broadcast %cst_214 : f32 to vector<2x1x1xf32>
    %1142 = arith.addf %1140, %1141 : vector<2x1x1xf32>
    %1143 = math.rsqrt %1142 : vector<2x1x1xf32>
    %1144 = vector.broadcast %1143 : vector<2x1x1xf32> to vector<2x1x32xf32>
    %1145 = arith.mulf %1137, %1144 : vector<2x1x32xf32>
    %1146 = vector.extract_strided_slice %1136 {offsets = [0, 1, 0], sizes = [2, 1, 32], strides = [1, 1, 1]} : vector<2x8x32xf32> to vector<2x1x32xf32>
    %1147 = arith.mulf %1145, %1146 : vector<2x1x32xf32>
    %cst_215 = arith.constant dense<0.000000e+00> : vector<2x1xf32>
    %1148 = vector.multi_reduction <add>, %1147, %cst_215 [2] : vector<2x1x32xf32> to vector<2x1xf32>
    %1149 = vector.shape_cast %1148 : vector<2x1xf32> to vector<2x1x1xf32>
    %1150 = vector.broadcast %1149 : vector<2x1x1xf32> to vector<2x1x32xf32>
    %1151 = arith.mulf %1150, %1145 : vector<2x1x32xf32>
    %1152 = arith.subf %1146, %1151 : vector<2x1x32xf32>
    %1153 = arith.mulf %1152, %1152 : vector<2x1x32xf32>
    %cst_216 = arith.constant dense<0.000000e+00> : vector<2x1xf32>
    %1154 = vector.multi_reduction <add>, %1153, %cst_216 [2] : vector<2x1x32xf32> to vector<2x1xf32>
    %1155 = vector.shape_cast %1154 : vector<2x1xf32> to vector<2x1x1xf32>
    %cst_217 = arith.constant 1.000000e-30 : f32
    %1156 = vector.broadcast %cst_217 : f32 to vector<2x1x1xf32>
    %1157 = arith.addf %1155, %1156 : vector<2x1x1xf32>
    %1158 = math.rsqrt %1157 : vector<2x1x1xf32>
    %1159 = vector.broadcast %1158 : vector<2x1x1xf32> to vector<2x1x32xf32>
    %1160 = arith.mulf %1152, %1159 : vector<2x1x32xf32>
    %1161 = vector.extract_strided_slice %1136 {offsets = [0, 2, 0], sizes = [2, 1, 32], strides = [1, 1, 1]} : vector<2x8x32xf32> to vector<2x1x32xf32>
    %1162 = arith.mulf %1145, %1161 : vector<2x1x32xf32>
    %cst_218 = arith.constant dense<0.000000e+00> : vector<2x1xf32>
    %1163 = vector.multi_reduction <add>, %1162, %cst_218 [2] : vector<2x1x32xf32> to vector<2x1xf32>
    %1164 = vector.shape_cast %1163 : vector<2x1xf32> to vector<2x1x1xf32>
    %1165 = vector.broadcast %1164 : vector<2x1x1xf32> to vector<2x1x32xf32>
    %1166 = arith.mulf %1165, %1145 : vector<2x1x32xf32>
    %1167 = arith.subf %1161, %1166 : vector<2x1x32xf32>
    %1168 = arith.mulf %1160, %1167 : vector<2x1x32xf32>
    %cst_219 = arith.constant dense<0.000000e+00> : vector<2x1xf32>
    %1169 = vector.multi_reduction <add>, %1168, %cst_219 [2] : vector<2x1x32xf32> to vector<2x1xf32>
    %1170 = vector.shape_cast %1169 : vector<2x1xf32> to vector<2x1x1xf32>
    %1171 = vector.broadcast %1170 : vector<2x1x1xf32> to vector<2x1x32xf32>
    %1172 = arith.mulf %1171, %1160 : vector<2x1x32xf32>
    %1173 = arith.subf %1167, %1172 : vector<2x1x32xf32>
    %1174 = arith.mulf %1173, %1173 : vector<2x1x32xf32>
    %cst_220 = arith.constant dense<0.000000e+00> : vector<2x1xf32>
    %1175 = vector.multi_reduction <add>, %1174, %cst_220 [2] : vector<2x1x32xf32> to vector<2x1xf32>
    %1176 = vector.shape_cast %1175 : vector<2x1xf32> to vector<2x1x1xf32>
    %cst_221 = arith.constant 1.000000e-30 : f32
    %1177 = vector.broadcast %cst_221 : f32 to vector<2x1x1xf32>
    %1178 = arith.addf %1176, %1177 : vector<2x1x1xf32>
    %1179 = math.rsqrt %1178 : vector<2x1x1xf32>
    %1180 = vector.broadcast %1179 : vector<2x1x1xf32> to vector<2x1x32xf32>
    %1181 = arith.mulf %1173, %1180 : vector<2x1x32xf32>
    %1182 = vector.extract_strided_slice %1136 {offsets = [0, 3, 0], sizes = [2, 1, 32], strides = [1, 1, 1]} : vector<2x8x32xf32> to vector<2x1x32xf32>
    %1183 = arith.mulf %1145, %1182 : vector<2x1x32xf32>
    %cst_222 = arith.constant dense<0.000000e+00> : vector<2x1xf32>
    %1184 = vector.multi_reduction <add>, %1183, %cst_222 [2] : vector<2x1x32xf32> to vector<2x1xf32>
    %1185 = vector.shape_cast %1184 : vector<2x1xf32> to vector<2x1x1xf32>
    %1186 = vector.broadcast %1185 : vector<2x1x1xf32> to vector<2x1x32xf32>
    %1187 = arith.mulf %1186, %1145 : vector<2x1x32xf32>
    %1188 = arith.subf %1182, %1187 : vector<2x1x32xf32>
    %1189 = arith.mulf %1160, %1188 : vector<2x1x32xf32>
    %cst_223 = arith.constant dense<0.000000e+00> : vector<2x1xf32>
    %1190 = vector.multi_reduction <add>, %1189, %cst_223 [2] : vector<2x1x32xf32> to vector<2x1xf32>
    %1191 = vector.shape_cast %1190 : vector<2x1xf32> to vector<2x1x1xf32>
    %1192 = vector.broadcast %1191 : vector<2x1x1xf32> to vector<2x1x32xf32>
    %1193 = arith.mulf %1192, %1160 : vector<2x1x32xf32>
    %1194 = arith.subf %1188, %1193 : vector<2x1x32xf32>
    %1195 = arith.mulf %1181, %1194 : vector<2x1x32xf32>
    %cst_224 = arith.constant dense<0.000000e+00> : vector<2x1xf32>
    %1196 = vector.multi_reduction <add>, %1195, %cst_224 [2] : vector<2x1x32xf32> to vector<2x1xf32>
    %1197 = vector.shape_cast %1196 : vector<2x1xf32> to vector<2x1x1xf32>
    %1198 = vector.broadcast %1197 : vector<2x1x1xf32> to vector<2x1x32xf32>
    %1199 = arith.mulf %1198, %1181 : vector<2x1x32xf32>
    %1200 = arith.subf %1194, %1199 : vector<2x1x32xf32>
    %1201 = arith.mulf %1200, %1200 : vector<2x1x32xf32>
    %cst_225 = arith.constant dense<0.000000e+00> : vector<2x1xf32>
    %1202 = vector.multi_reduction <add>, %1201, %cst_225 [2] : vector<2x1x32xf32> to vector<2x1xf32>
    %1203 = vector.shape_cast %1202 : vector<2x1xf32> to vector<2x1x1xf32>
    %cst_226 = arith.constant 1.000000e-30 : f32
    %1204 = vector.broadcast %cst_226 : f32 to vector<2x1x1xf32>
    %1205 = arith.addf %1203, %1204 : vector<2x1x1xf32>
    %1206 = math.rsqrt %1205 : vector<2x1x1xf32>
    %1207 = vector.broadcast %1206 : vector<2x1x1xf32> to vector<2x1x32xf32>
    %1208 = arith.mulf %1200, %1207 : vector<2x1x32xf32>
    %1209 = vector.extract_strided_slice %1136 {offsets = [0, 4, 0], sizes = [2, 1, 32], strides = [1, 1, 1]} : vector<2x8x32xf32> to vector<2x1x32xf32>
    %1210 = arith.mulf %1145, %1209 : vector<2x1x32xf32>
    %cst_227 = arith.constant dense<0.000000e+00> : vector<2x1xf32>
    %1211 = vector.multi_reduction <add>, %1210, %cst_227 [2] : vector<2x1x32xf32> to vector<2x1xf32>
    %1212 = vector.shape_cast %1211 : vector<2x1xf32> to vector<2x1x1xf32>
    %1213 = vector.broadcast %1212 : vector<2x1x1xf32> to vector<2x1x32xf32>
    %1214 = arith.mulf %1213, %1145 : vector<2x1x32xf32>
    %1215 = arith.subf %1209, %1214 : vector<2x1x32xf32>
    %1216 = arith.mulf %1160, %1215 : vector<2x1x32xf32>
    %cst_228 = arith.constant dense<0.000000e+00> : vector<2x1xf32>
    %1217 = vector.multi_reduction <add>, %1216, %cst_228 [2] : vector<2x1x32xf32> to vector<2x1xf32>
    %1218 = vector.shape_cast %1217 : vector<2x1xf32> to vector<2x1x1xf32>
    %1219 = vector.broadcast %1218 : vector<2x1x1xf32> to vector<2x1x32xf32>
    %1220 = arith.mulf %1219, %1160 : vector<2x1x32xf32>
    %1221 = arith.subf %1215, %1220 : vector<2x1x32xf32>
    %1222 = arith.mulf %1181, %1221 : vector<2x1x32xf32>
    %cst_229 = arith.constant dense<0.000000e+00> : vector<2x1xf32>
    %1223 = vector.multi_reduction <add>, %1222, %cst_229 [2] : vector<2x1x32xf32> to vector<2x1xf32>
    %1224 = vector.shape_cast %1223 : vector<2x1xf32> to vector<2x1x1xf32>
    %1225 = vector.broadcast %1224 : vector<2x1x1xf32> to vector<2x1x32xf32>
    %1226 = arith.mulf %1225, %1181 : vector<2x1x32xf32>
    %1227 = arith.subf %1221, %1226 : vector<2x1x32xf32>
    %1228 = arith.mulf %1208, %1227 : vector<2x1x32xf32>
    %cst_230 = arith.constant dense<0.000000e+00> : vector<2x1xf32>
    %1229 = vector.multi_reduction <add>, %1228, %cst_230 [2] : vector<2x1x32xf32> to vector<2x1xf32>
    %1230 = vector.shape_cast %1229 : vector<2x1xf32> to vector<2x1x1xf32>
    %1231 = vector.broadcast %1230 : vector<2x1x1xf32> to vector<2x1x32xf32>
    %1232 = arith.mulf %1231, %1208 : vector<2x1x32xf32>
    %1233 = arith.subf %1227, %1232 : vector<2x1x32xf32>
    %1234 = arith.mulf %1233, %1233 : vector<2x1x32xf32>
    %cst_231 = arith.constant dense<0.000000e+00> : vector<2x1xf32>
    %1235 = vector.multi_reduction <add>, %1234, %cst_231 [2] : vector<2x1x32xf32> to vector<2x1xf32>
    %1236 = vector.shape_cast %1235 : vector<2x1xf32> to vector<2x1x1xf32>
    %cst_232 = arith.constant 1.000000e-30 : f32
    %1237 = vector.broadcast %cst_232 : f32 to vector<2x1x1xf32>
    %1238 = arith.addf %1236, %1237 : vector<2x1x1xf32>
    %1239 = math.rsqrt %1238 : vector<2x1x1xf32>
    %1240 = vector.broadcast %1239 : vector<2x1x1xf32> to vector<2x1x32xf32>
    %1241 = arith.mulf %1233, %1240 : vector<2x1x32xf32>
    %1242 = vector.extract_strided_slice %1136 {offsets = [0, 5, 0], sizes = [2, 1, 32], strides = [1, 1, 1]} : vector<2x8x32xf32> to vector<2x1x32xf32>
    %1243 = arith.mulf %1145, %1242 : vector<2x1x32xf32>
    %cst_233 = arith.constant dense<0.000000e+00> : vector<2x1xf32>
    %1244 = vector.multi_reduction <add>, %1243, %cst_233 [2] : vector<2x1x32xf32> to vector<2x1xf32>
    %1245 = vector.shape_cast %1244 : vector<2x1xf32> to vector<2x1x1xf32>
    %1246 = vector.broadcast %1245 : vector<2x1x1xf32> to vector<2x1x32xf32>
    %1247 = arith.mulf %1246, %1145 : vector<2x1x32xf32>
    %1248 = arith.subf %1242, %1247 : vector<2x1x32xf32>
    %1249 = arith.mulf %1160, %1248 : vector<2x1x32xf32>
    %cst_234 = arith.constant dense<0.000000e+00> : vector<2x1xf32>
    %1250 = vector.multi_reduction <add>, %1249, %cst_234 [2] : vector<2x1x32xf32> to vector<2x1xf32>
    %1251 = vector.shape_cast %1250 : vector<2x1xf32> to vector<2x1x1xf32>
    %1252 = vector.broadcast %1251 : vector<2x1x1xf32> to vector<2x1x32xf32>
    %1253 = arith.mulf %1252, %1160 : vector<2x1x32xf32>
    %1254 = arith.subf %1248, %1253 : vector<2x1x32xf32>
    %1255 = arith.mulf %1181, %1254 : vector<2x1x32xf32>
    %cst_235 = arith.constant dense<0.000000e+00> : vector<2x1xf32>
    %1256 = vector.multi_reduction <add>, %1255, %cst_235 [2] : vector<2x1x32xf32> to vector<2x1xf32>
    %1257 = vector.shape_cast %1256 : vector<2x1xf32> to vector<2x1x1xf32>
    %1258 = vector.broadcast %1257 : vector<2x1x1xf32> to vector<2x1x32xf32>
    %1259 = arith.mulf %1258, %1181 : vector<2x1x32xf32>
    %1260 = arith.subf %1254, %1259 : vector<2x1x32xf32>
    %1261 = arith.mulf %1208, %1260 : vector<2x1x32xf32>
    %cst_236 = arith.constant dense<0.000000e+00> : vector<2x1xf32>
    %1262 = vector.multi_reduction <add>, %1261, %cst_236 [2] : vector<2x1x32xf32> to vector<2x1xf32>
    %1263 = vector.shape_cast %1262 : vector<2x1xf32> to vector<2x1x1xf32>
    %1264 = vector.broadcast %1263 : vector<2x1x1xf32> to vector<2x1x32xf32>
    %1265 = arith.mulf %1264, %1208 : vector<2x1x32xf32>
    %1266 = arith.subf %1260, %1265 : vector<2x1x32xf32>
    %1267 = arith.mulf %1241, %1266 : vector<2x1x32xf32>
    %cst_237 = arith.constant dense<0.000000e+00> : vector<2x1xf32>
    %1268 = vector.multi_reduction <add>, %1267, %cst_237 [2] : vector<2x1x32xf32> to vector<2x1xf32>
    %1269 = vector.shape_cast %1268 : vector<2x1xf32> to vector<2x1x1xf32>
    %1270 = vector.broadcast %1269 : vector<2x1x1xf32> to vector<2x1x32xf32>
    %1271 = arith.mulf %1270, %1241 : vector<2x1x32xf32>
    %1272 = arith.subf %1266, %1271 : vector<2x1x32xf32>
    %1273 = arith.mulf %1272, %1272 : vector<2x1x32xf32>
    %cst_238 = arith.constant dense<0.000000e+00> : vector<2x1xf32>
    %1274 = vector.multi_reduction <add>, %1273, %cst_238 [2] : vector<2x1x32xf32> to vector<2x1xf32>
    %1275 = vector.shape_cast %1274 : vector<2x1xf32> to vector<2x1x1xf32>
    %cst_239 = arith.constant 1.000000e-30 : f32
    %1276 = vector.broadcast %cst_239 : f32 to vector<2x1x1xf32>
    %1277 = arith.addf %1275, %1276 : vector<2x1x1xf32>
    %1278 = math.rsqrt %1277 : vector<2x1x1xf32>
    %1279 = vector.broadcast %1278 : vector<2x1x1xf32> to vector<2x1x32xf32>
    %1280 = arith.mulf %1272, %1279 : vector<2x1x32xf32>
    %1281 = vector.extract_strided_slice %1136 {offsets = [0, 6, 0], sizes = [2, 1, 32], strides = [1, 1, 1]} : vector<2x8x32xf32> to vector<2x1x32xf32>
    %1282 = arith.mulf %1145, %1281 : vector<2x1x32xf32>
    %cst_240 = arith.constant dense<0.000000e+00> : vector<2x1xf32>
    %1283 = vector.multi_reduction <add>, %1282, %cst_240 [2] : vector<2x1x32xf32> to vector<2x1xf32>
    %1284 = vector.shape_cast %1283 : vector<2x1xf32> to vector<2x1x1xf32>
    %1285 = vector.broadcast %1284 : vector<2x1x1xf32> to vector<2x1x32xf32>
    %1286 = arith.mulf %1285, %1145 : vector<2x1x32xf32>
    %1287 = arith.subf %1281, %1286 : vector<2x1x32xf32>
    %1288 = arith.mulf %1160, %1287 : vector<2x1x32xf32>
    %cst_241 = arith.constant dense<0.000000e+00> : vector<2x1xf32>
    %1289 = vector.multi_reduction <add>, %1288, %cst_241 [2] : vector<2x1x32xf32> to vector<2x1xf32>
    %1290 = vector.shape_cast %1289 : vector<2x1xf32> to vector<2x1x1xf32>
    %1291 = vector.broadcast %1290 : vector<2x1x1xf32> to vector<2x1x32xf32>
    %1292 = arith.mulf %1291, %1160 : vector<2x1x32xf32>
    %1293 = arith.subf %1287, %1292 : vector<2x1x32xf32>
    %1294 = arith.mulf %1181, %1293 : vector<2x1x32xf32>
    %cst_242 = arith.constant dense<0.000000e+00> : vector<2x1xf32>
    %1295 = vector.multi_reduction <add>, %1294, %cst_242 [2] : vector<2x1x32xf32> to vector<2x1xf32>
    %1296 = vector.shape_cast %1295 : vector<2x1xf32> to vector<2x1x1xf32>
    %1297 = vector.broadcast %1296 : vector<2x1x1xf32> to vector<2x1x32xf32>
    %1298 = arith.mulf %1297, %1181 : vector<2x1x32xf32>
    %1299 = arith.subf %1293, %1298 : vector<2x1x32xf32>
    %1300 = arith.mulf %1208, %1299 : vector<2x1x32xf32>
    %cst_243 = arith.constant dense<0.000000e+00> : vector<2x1xf32>
    %1301 = vector.multi_reduction <add>, %1300, %cst_243 [2] : vector<2x1x32xf32> to vector<2x1xf32>
    %1302 = vector.shape_cast %1301 : vector<2x1xf32> to vector<2x1x1xf32>
    %1303 = vector.broadcast %1302 : vector<2x1x1xf32> to vector<2x1x32xf32>
    %1304 = arith.mulf %1303, %1208 : vector<2x1x32xf32>
    %1305 = arith.subf %1299, %1304 : vector<2x1x32xf32>
    %1306 = arith.mulf %1241, %1305 : vector<2x1x32xf32>
    %cst_244 = arith.constant dense<0.000000e+00> : vector<2x1xf32>
    %1307 = vector.multi_reduction <add>, %1306, %cst_244 [2] : vector<2x1x32xf32> to vector<2x1xf32>
    %1308 = vector.shape_cast %1307 : vector<2x1xf32> to vector<2x1x1xf32>
    %1309 = vector.broadcast %1308 : vector<2x1x1xf32> to vector<2x1x32xf32>
    %1310 = arith.mulf %1309, %1241 : vector<2x1x32xf32>
    %1311 = arith.subf %1305, %1310 : vector<2x1x32xf32>
    %1312 = arith.mulf %1280, %1311 : vector<2x1x32xf32>
    %cst_245 = arith.constant dense<0.000000e+00> : vector<2x1xf32>
    %1313 = vector.multi_reduction <add>, %1312, %cst_245 [2] : vector<2x1x32xf32> to vector<2x1xf32>
    %1314 = vector.shape_cast %1313 : vector<2x1xf32> to vector<2x1x1xf32>
    %1315 = vector.broadcast %1314 : vector<2x1x1xf32> to vector<2x1x32xf32>
    %1316 = arith.mulf %1315, %1280 : vector<2x1x32xf32>
    %1317 = arith.subf %1311, %1316 : vector<2x1x32xf32>
    %1318 = arith.mulf %1317, %1317 : vector<2x1x32xf32>
    %cst_246 = arith.constant dense<0.000000e+00> : vector<2x1xf32>
    %1319 = vector.multi_reduction <add>, %1318, %cst_246 [2] : vector<2x1x32xf32> to vector<2x1xf32>
    %1320 = vector.shape_cast %1319 : vector<2x1xf32> to vector<2x1x1xf32>
    %cst_247 = arith.constant 1.000000e-30 : f32
    %1321 = vector.broadcast %cst_247 : f32 to vector<2x1x1xf32>
    %1322 = arith.addf %1320, %1321 : vector<2x1x1xf32>
    %1323 = math.rsqrt %1322 : vector<2x1x1xf32>
    %1324 = vector.broadcast %1323 : vector<2x1x1xf32> to vector<2x1x32xf32>
    %1325 = arith.mulf %1317, %1324 : vector<2x1x32xf32>
    %1326 = vector.extract_strided_slice %1136 {offsets = [0, 7, 0], sizes = [2, 1, 32], strides = [1, 1, 1]} : vector<2x8x32xf32> to vector<2x1x32xf32>
    %1327 = arith.mulf %1145, %1326 : vector<2x1x32xf32>
    %cst_248 = arith.constant dense<0.000000e+00> : vector<2x1xf32>
    %1328 = vector.multi_reduction <add>, %1327, %cst_248 [2] : vector<2x1x32xf32> to vector<2x1xf32>
    %1329 = vector.shape_cast %1328 : vector<2x1xf32> to vector<2x1x1xf32>
    %1330 = vector.broadcast %1329 : vector<2x1x1xf32> to vector<2x1x32xf32>
    %1331 = arith.mulf %1330, %1145 : vector<2x1x32xf32>
    %1332 = arith.subf %1326, %1331 : vector<2x1x32xf32>
    %1333 = arith.mulf %1160, %1332 : vector<2x1x32xf32>
    %cst_249 = arith.constant dense<0.000000e+00> : vector<2x1xf32>
    %1334 = vector.multi_reduction <add>, %1333, %cst_249 [2] : vector<2x1x32xf32> to vector<2x1xf32>
    %1335 = vector.shape_cast %1334 : vector<2x1xf32> to vector<2x1x1xf32>
    %1336 = vector.broadcast %1335 : vector<2x1x1xf32> to vector<2x1x32xf32>
    %1337 = arith.mulf %1336, %1160 : vector<2x1x32xf32>
    %1338 = arith.subf %1332, %1337 : vector<2x1x32xf32>
    %1339 = arith.mulf %1181, %1338 : vector<2x1x32xf32>
    %cst_250 = arith.constant dense<0.000000e+00> : vector<2x1xf32>
    %1340 = vector.multi_reduction <add>, %1339, %cst_250 [2] : vector<2x1x32xf32> to vector<2x1xf32>
    %1341 = vector.shape_cast %1340 : vector<2x1xf32> to vector<2x1x1xf32>
    %1342 = vector.broadcast %1341 : vector<2x1x1xf32> to vector<2x1x32xf32>
    %1343 = arith.mulf %1342, %1181 : vector<2x1x32xf32>
    %1344 = arith.subf %1338, %1343 : vector<2x1x32xf32>
    %1345 = arith.mulf %1208, %1344 : vector<2x1x32xf32>
    %cst_251 = arith.constant dense<0.000000e+00> : vector<2x1xf32>
    %1346 = vector.multi_reduction <add>, %1345, %cst_251 [2] : vector<2x1x32xf32> to vector<2x1xf32>
    %1347 = vector.shape_cast %1346 : vector<2x1xf32> to vector<2x1x1xf32>
    %1348 = vector.broadcast %1347 : vector<2x1x1xf32> to vector<2x1x32xf32>
    %1349 = arith.mulf %1348, %1208 : vector<2x1x32xf32>
    %1350 = arith.subf %1344, %1349 : vector<2x1x32xf32>
    %1351 = arith.mulf %1241, %1350 : vector<2x1x32xf32>
    %cst_252 = arith.constant dense<0.000000e+00> : vector<2x1xf32>
    %1352 = vector.multi_reduction <add>, %1351, %cst_252 [2] : vector<2x1x32xf32> to vector<2x1xf32>
    %1353 = vector.shape_cast %1352 : vector<2x1xf32> to vector<2x1x1xf32>
    %1354 = vector.broadcast %1353 : vector<2x1x1xf32> to vector<2x1x32xf32>
    %1355 = arith.mulf %1354, %1241 : vector<2x1x32xf32>
    %1356 = arith.subf %1350, %1355 : vector<2x1x32xf32>
    %1357 = arith.mulf %1280, %1356 : vector<2x1x32xf32>
    %cst_253 = arith.constant dense<0.000000e+00> : vector<2x1xf32>
    %1358 = vector.multi_reduction <add>, %1357, %cst_253 [2] : vector<2x1x32xf32> to vector<2x1xf32>
    %1359 = vector.shape_cast %1358 : vector<2x1xf32> to vector<2x1x1xf32>
    %1360 = vector.broadcast %1359 : vector<2x1x1xf32> to vector<2x1x32xf32>
    %1361 = arith.mulf %1360, %1280 : vector<2x1x32xf32>
    %1362 = arith.subf %1356, %1361 : vector<2x1x32xf32>
    %1363 = arith.mulf %1325, %1362 : vector<2x1x32xf32>
    %cst_254 = arith.constant dense<0.000000e+00> : vector<2x1xf32>
    %1364 = vector.multi_reduction <add>, %1363, %cst_254 [2] : vector<2x1x32xf32> to vector<2x1xf32>
    %1365 = vector.shape_cast %1364 : vector<2x1xf32> to vector<2x1x1xf32>
    %1366 = vector.broadcast %1365 : vector<2x1x1xf32> to vector<2x1x32xf32>
    %1367 = arith.mulf %1366, %1325 : vector<2x1x32xf32>
    %1368 = arith.subf %1362, %1367 : vector<2x1x32xf32>
    %1369 = arith.mulf %1368, %1368 : vector<2x1x32xf32>
    %cst_255 = arith.constant dense<0.000000e+00> : vector<2x1xf32>
    %1370 = vector.multi_reduction <add>, %1369, %cst_255 [2] : vector<2x1x32xf32> to vector<2x1xf32>
    %1371 = vector.shape_cast %1370 : vector<2x1xf32> to vector<2x1x1xf32>
    %cst_256 = arith.constant 1.000000e-30 : f32
    %1372 = vector.broadcast %cst_256 : f32 to vector<2x1x1xf32>
    %1373 = arith.addf %1371, %1372 : vector<2x1x1xf32>
    %1374 = math.rsqrt %1373 : vector<2x1x1xf32>
    %1375 = vector.broadcast %1374 : vector<2x1x1xf32> to vector<2x1x32xf32>
    %1376 = arith.mulf %1368, %1375 : vector<2x1x32xf32>
    %1377 = tpu.iota {dimensions = array<i32: 1>} : vector<2x8x32xi32>
    %cst_257 = arith.constant 0.000000e+00 : f32
    %1378 = vector.broadcast %cst_257 : f32 to vector<2x8x32xf32>
    %c0_i32_258 = arith.constant 0 : i32
    %1379 = vector.broadcast %c0_i32_258 : i32 to vector<2x8x32xi32>
    %1380 = arith.cmpi eq, %1377, %1379 : vector<2x8x32xi32>
    %1381 = vector.shape_cast %1145 : vector<2x1x32xf32> to vector<2x1x32xf32>
    %1382 = vector.broadcast %1381 : vector<2x1x32xf32> to vector<2x8x32xf32>
    %1383 = arith.select %1380, %1382, %1378 : vector<2x8x32xi1>, vector<2x8x32xf32>
    %c1_i32_259 = arith.constant 1 : i32
    %1384 = vector.broadcast %c1_i32_259 : i32 to vector<2x8x32xi32>
    %1385 = arith.cmpi eq, %1377, %1384 : vector<2x8x32xi32>
    %1386 = vector.shape_cast %1160 : vector<2x1x32xf32> to vector<2x1x32xf32>
    %1387 = vector.broadcast %1386 : vector<2x1x32xf32> to vector<2x8x32xf32>
    %1388 = arith.select %1385, %1387, %1383 : vector<2x8x32xi1>, vector<2x8x32xf32>
    %c2_i32_260 = arith.constant 2 : i32
    %1389 = vector.broadcast %c2_i32_260 : i32 to vector<2x8x32xi32>
    %1390 = arith.cmpi eq, %1377, %1389 : vector<2x8x32xi32>
    %1391 = vector.shape_cast %1181 : vector<2x1x32xf32> to vector<2x1x32xf32>
    %1392 = vector.broadcast %1391 : vector<2x1x32xf32> to vector<2x8x32xf32>
    %1393 = arith.select %1390, %1392, %1388 : vector<2x8x32xi1>, vector<2x8x32xf32>
    %c3_i32_261 = arith.constant 3 : i32
    %1394 = vector.broadcast %c3_i32_261 : i32 to vector<2x8x32xi32>
    %1395 = arith.cmpi eq, %1377, %1394 : vector<2x8x32xi32>
    %1396 = vector.shape_cast %1208 : vector<2x1x32xf32> to vector<2x1x32xf32>
    %1397 = vector.broadcast %1396 : vector<2x1x32xf32> to vector<2x8x32xf32>
    %1398 = arith.select %1395, %1397, %1393 : vector<2x8x32xi1>, vector<2x8x32xf32>
    %c4_i32_262 = arith.constant 4 : i32
    %1399 = vector.broadcast %c4_i32_262 : i32 to vector<2x8x32xi32>
    %1400 = arith.cmpi eq, %1377, %1399 : vector<2x8x32xi32>
    %1401 = vector.shape_cast %1241 : vector<2x1x32xf32> to vector<2x1x32xf32>
    %1402 = vector.broadcast %1401 : vector<2x1x32xf32> to vector<2x8x32xf32>
    %1403 = arith.select %1400, %1402, %1398 : vector<2x8x32xi1>, vector<2x8x32xf32>
    %c5_i32_263 = arith.constant 5 : i32
    %1404 = vector.broadcast %c5_i32_263 : i32 to vector<2x8x32xi32>
    %1405 = arith.cmpi eq, %1377, %1404 : vector<2x8x32xi32>
    %1406 = vector.shape_cast %1280 : vector<2x1x32xf32> to vector<2x1x32xf32>
    %1407 = vector.broadcast %1406 : vector<2x1x32xf32> to vector<2x8x32xf32>
    %1408 = arith.select %1405, %1407, %1403 : vector<2x8x32xi1>, vector<2x8x32xf32>
    %c6_i32_264 = arith.constant 6 : i32
    %1409 = vector.broadcast %c6_i32_264 : i32 to vector<2x8x32xi32>
    %1410 = arith.cmpi eq, %1377, %1409 : vector<2x8x32xi32>
    %1411 = vector.shape_cast %1325 : vector<2x1x32xf32> to vector<2x1x32xf32>
    %1412 = vector.broadcast %1411 : vector<2x1x32xf32> to vector<2x8x32xf32>
    %1413 = arith.select %1410, %1412, %1408 : vector<2x8x32xi1>, vector<2x8x32xf32>
    %c7_i32_265 = arith.constant 7 : i32
    %1414 = vector.broadcast %c7_i32_265 : i32 to vector<2x8x32xi32>
    %1415 = arith.cmpi eq, %1377, %1414 : vector<2x8x32xi32>
    %1416 = vector.shape_cast %1376 : vector<2x1x32xf32> to vector<2x1x32xf32>
    %1417 = vector.broadcast %1416 : vector<2x1x32xf32> to vector<2x8x32xf32>
    %1418 = arith.select %1415, %1417, %1413 : vector<2x8x32xi1>, vector<2x8x32xf32>
    %c0_266 = arith.constant 0 : index
    %c0_267 = arith.constant 0 : index
    %c0_268 = arith.constant 0 : index
    %1419 = vector.load %arg3[%c0_266, %c0_267, %c0_268] : memref<2x8x32xf32, #tpu.memory_space<vmem>>, vector<2x8x32xf32>
    tpu.vector_store %arg3[%c0_266, %c0_267, %c0_268], %1418 {strides = array<i32>} : memref<2x8x32xf32, #tpu.memory_space<vmem>>, vector<2x8x32xf32>,
    "tpu.trace_start"() <{level = 10 : i32, message = "brn,bmn->brm"}> : () -> ()
    %cst_269 = arith.constant dense<0.000000e+00> : vector<2x8x64xf32>
    %1420 = tpu.matmul %1418, %0, %cst_269 {dimension_numbers = #tpu.dot_dimension_numbers<[2], [2], [1], [1], [0, 0, 0, 1, 1, 1], [0], [0]>} : vector<2x8x32xf32>, vector<2x64x32xf32>, vector<2x8x64xf32> -> vector<2x8x64xf32>
    "tpu.trace_stop"() : () -> ()
    %c0_270 = arith.constant 0 : index
    %c0_271 = arith.constant 0 : index
    %c0_272 = arith.constant 0 : index
    %1421 = vector.load %arg4[%c0_270, %c0_271, %c0_272] : memref<2x8x64xf32, #tpu.memory_space<vmem>>, vector<2x8x64xf32>
    tpu.vector_store %arg4[%c0_270, %c0_271, %c0_272], %1420 {strides = array<i32>} : memref<2x8x64xf32, #tpu.memory_space<vmem>>, vector<2x8x64xf32>,
    return
  }
  func.func @transform_0(%arg0: i32) -> (i32, i32, i32) {
    %c0_i32 = arith.constant 0 : i32
    %c0_i32_0 = arith.constant 0 : i32
    %c0_i32_1 = arith.constant 0 : i32
    return %arg0, %c0_i32, %c0_i32_0 : i32, i32, i32
  }
  func.func @transform_1(%arg0: i32) -> (i32, i32, i32) {
    %c0_i32 = arith.constant 0 : i32
    %c0_i32_0 = arith.constant 0 : i32
    %c0_i32_1 = arith.constant 0 : i32
    %c0_i32_2 = arith.constant 0 : i32
    return %c0_i32, %c0_i32_0, %c0_i32_1 : i32, i32, i32
  }
  func.func @transform_2(%arg0: i32) -> (i32, i32, i32) {
    %c0_i32 = arith.constant 0 : i32
    %c0_i32_0 = arith.constant 0 : i32
    %c0_i32_1 = arith.constant 0 : i32
    return %arg0, %c0_i32, %c0_i32_0 : i32, i32, i32
  }
  func.func @transform_3(%arg0: i32) -> (i32, i32, i32) {
    %c0_i32 = arith.constant 0 : i32
    %c0_i32_0 = arith.constant 0 : i32
    %c0_i32_1 = arith.constant 0 : i32
    return %arg0, %c0_i32, %c0_i32_0 : i32, i32, i32
  }
}

module attributes {stable_mosaic.version = 11 : i64} {
  func.func @_finalize_kernel(%arg0: i32, %arg1: memref<2x64x8xf32, #tpu.memory_space<vmem>>, %arg2: memref<2x1x8xf32, #tpu.memory_space<vmem>>, %arg3: memref<2x8x8xf32, #tpu.memory_space<vmem>>, %arg4: memref<2x8x32xf32, #tpu.memory_space<vmem>>, %arg5: memref<2x64x8xf32, #tpu.memory_space<vmem>>, %arg6: memref<2x32x8xf32, #tpu.memory_space<vmem>>) attributes {dimension_semantics = [#tpu.dimension_semantics<parallel>], iteration_bounds = array<i64: 1>, scalar_prefetch = 0 : i64, scratch_operands = 0 : i64, tpu.core_type = #tpu.core_type<tc>, window_params = [{transform_indices = @transform_0, window_bounds = array<i64: 2, 64, 8>}, {transform_indices = @transform_1, window_bounds = array<i64: 2, 1, 8>}, {transform_indices = @transform_2, window_bounds = array<i64: 2, 8, 8>}, {transform_indices = @transform_3, window_bounds = array<i64: 2, 8, 32>}, {transform_indices = @transform_4, window_bounds = array<i64: 2, 64, 8>}, {transform_indices = @transform_5, window_bounds = array<i64: 2, 32, 8>}]} {
    %c0 = arith.constant 0 : index
    %c0_0 = arith.constant 0 : index
    %c0_1 = arith.constant 0 : index
    %0 = vector.load %arg2[%c0, %c0_0, %c0_1] : memref<2x1x8xf32, #tpu.memory_space<vmem>>, vector<2x1x8xf32>
    %1 = math.sqrt %0 : vector<2x1x8xf32>
    %c0_2 = arith.constant 0 : index
    %c0_3 = arith.constant 0 : index
    %c0_4 = arith.constant 0 : index
    %2 = vector.load %arg1[%c0_2, %c0_3, %c0_4] : memref<2x64x8xf32, #tpu.memory_space<vmem>>, vector<2x64x8xf32>
    %3 = vector.broadcast %1 : vector<2x1x8xf32> to vector<2x64x8xf32>
    %4 = arith.mulf %2, %3 : vector<2x64x8xf32>
    %c0_5 = arith.constant 0 : index
    %c0_6 = arith.constant 0 : index
    %c0_7 = arith.constant 0 : index
    %5 = vector.load %arg5[%c0_5, %c0_6, %c0_7] : memref<2x64x8xf32, #tpu.memory_space<vmem>>, vector<2x64x8xf32>
    tpu.vector_store %arg5[%c0_5, %c0_6, %c0_7], %4 {strides = array<i32>} : memref<2x64x8xf32, #tpu.memory_space<vmem>>, vector<2x64x8xf32>,
    %c0_8 = arith.constant 0 : index
    %c0_9 = arith.constant 0 : index
    %c0_10 = arith.constant 0 : index
    %6 = vector.load %arg3[%c0_8, %c0_9, %c0_10] : memref<2x8x8xf32, #tpu.memory_space<vmem>>, vector<2x8x8xf32>
    %c0_11 = arith.constant 0 : index
    %c0_12 = arith.constant 0 : index
    %c0_13 = arith.constant 0 : index
    %7 = vector.load %arg4[%c0_11, %c0_12, %c0_13] : memref<2x8x32xf32, #tpu.memory_space<vmem>>, vector<2x8x32xf32>
    "tpu.trace_start"() <{level = 10 : i32, message = "brk,bkn->brn"}> : () -> ()
    %cst = arith.constant dense<0.000000e+00> : vector<2x8x32xf32>
    %8 = tpu.matmul %6, %7, %cst {dimension_numbers = #tpu.dot_dimension_numbers<[2], [1], [1], [2], [0, 0, 0, 1, 1, 2], [0], [0]>} : vector<2x8x8xf32>, vector<2x8x32xf32>, vector<2x8x32xf32> -> vector<2x8x32xf32>
    "tpu.trace_stop"() : () -> ()
    %9 = tpu.transpose %8, [0, 2, 1] : vector<2x8x32xf32> -> vector<2x32x8xf32>
    %10 = vector.broadcast %1 : vector<2x1x8xf32> to vector<2x32x8xf32>
    %11 = arith.mulf %9, %10 : vector<2x32x8xf32>
    %c0_14 = arith.constant 0 : index
    %c0_15 = arith.constant 0 : index
    %c0_16 = arith.constant 0 : index
    %12 = vector.load %arg6[%c0_14, %c0_15, %c0_16] : memref<2x32x8xf32, #tpu.memory_space<vmem>>, vector<2x32x8xf32>
    tpu.vector_store %arg6[%c0_14, %c0_15, %c0_16], %11 {strides = array<i32>} : memref<2x32x8xf32, #tpu.memory_space<vmem>>, vector<2x32x8xf32>,
    return
  }
  func.func @transform_0(%arg0: i32) -> (i32, i32, i32) {
    %c0_i32 = arith.constant 0 : i32
    %c0_i32_0 = arith.constant 0 : i32
    %c0_i32_1 = arith.constant 0 : i32
    return %arg0, %c0_i32, %c0_i32_0 : i32, i32, i32
  }
  func.func @transform_1(%arg0: i32) -> (i32, i32, i32) {
    %c0_i32 = arith.constant 0 : i32
    %c0_i32_0 = arith.constant 0 : i32
    %c0_i32_1 = arith.constant 0 : i32
    return %arg0, %c0_i32, %c0_i32_0 : i32, i32, i32
  }
  func.func @transform_2(%arg0: i32) -> (i32, i32, i32) {
    %c0_i32 = arith.constant 0 : i32
    %c0_i32_0 = arith.constant 0 : i32
    %c0_i32_1 = arith.constant 0 : i32
    return %arg0, %c0_i32, %c0_i32_0 : i32, i32, i32
  }
  func.func @transform_3(%arg0: i32) -> (i32, i32, i32) {
    %c0_i32 = arith.constant 0 : i32
    %c0_i32_0 = arith.constant 0 : i32
    %c0_i32_1 = arith.constant 0 : i32
    return %arg0, %c0_i32, %c0_i32_0 : i32, i32, i32
  }
  func.func @transform_4(%arg0: i32) -> (i32, i32, i32) {
    %c0_i32 = arith.constant 0 : i32
    %c0_i32_0 = arith.constant 0 : i32
    %c0_i32_1 = arith.constant 0 : i32
    return %arg0, %c0_i32, %c0_i32_0 : i32, i32, i32
  }
  func.func @transform_5(%arg0: i32) -> (i32, i32, i32) {
    %c0_i32 = arith.constant 0 : i32
    %c0_i32_0 = arith.constant 0 : i32
    %c0_i32_1 = arith.constant 0 : i32
    return %arg0, %c0_i32, %c0_i32_0 : i32, i32, i32
  }
}

</mosaic_0001>

<bundles_post_ra>
// kernel: custom-call.31
= control target key start
LH: loop header
LB: loop body
LE: loop exit
PB: predicated region body
PF: predicated region fallthrough
CT: control target
= control target key end

     0   :  { %s1198_s9 = smov 0   ;;  %s1200_s10 = smov 0   ;;  %s1619_s0 = inlined_call_operand.vmem [shape: f32[2,64,8], index: 0, kind: input, shape index: {}]   ;;  %s1620_s1 = inlined_call_operand.vmem [shape: f32[2,64,8], index: 1, kind: output, shape index: {0}]   ;;  %s1621_s2 = inlined_call_operand.vmem [shape: f32[2,8], index: 2, kind: output, shape index: {1}]  }
   0x1   :  { %s1202_s11 = smov 0   ;;  %s1204_s12 = smov 0  }
   0x2   :  { %s1206_s13 = smov 0  }
   0x3 LB: > { %s28_s14 = sadd.s32 1, %s1171_s12  ;;  %s986_s15 = sadd.s32 4294967295, %s1175_s13   ;;  %s1175_s13 = sphi %s1206_s13, %s9_s13   ;;  %s1171_s12 = sphi %s1204_s12, %s1648_s12   ;;  %s1167_s11 = sphi %s1202_s11, %s1647_s11   ;;  %s1163_s10 = sphi %s1200_s10, %s1646_s10   ;;  %s1159_s9 = sphi %s1198_s9, %s1645_s9  }
   0x4   : > { %p30_p0 = scmp.ge.s32.totalorder %s28_s14, 2  ;;  %s33_s16 = ssub.s32 0, %s1171_s12 }
   0x5   : > { %s988_s17 = smin.u32 %s1171_s12, %s33_s16  ;;  %p57_p1 = scmp.ne.s32.totalorder %s1163_s10, %s1159_s9 }
   0x6   : > { %s1650_s14 = smov (%p30_p0, %s28_s14), 0  ;;  %s35_s18 = sshrl.u32 %s988_s17, 3 }
   0x7   : > { %s39_s19 = ssub.s32 0, %s1650_s14  ;;  %p58_p2 = scmp.eq.s32.totalorder %s986_s15, 1 }
   0x8   : > { %s989_s20 = smin.u32 %s39_s19, %s1650_s14  ;;  %s47_s24 = sadd.s32 1, %s1163_s10 }
   0x9   : > { %s41_s21 = sshrl.u32 %s989_s20, 3  ;;  %p1235_p3 = por %p58_p2, %p57_p1 }
   0xa   : > { %s44_s23 = ssub.s32 %s35_s18, %s41_s21  ;;  %p991_p5 = scmp.ge.s32.totalorder %s1175_s13, 2 }
   0xb   : > { %p45_p4 = scmp.eq.s32.totalorder %s44_s23, 0  ;;  %s82_s26 = sand.u32 (!%p991_p5), 1, %s1175_s13  }
   0xc   : > { %80 = sbr.rel (%p991_p5) target bundleno = 20 (0x14), region = 16  ;;  %s1071_s27 = sshll.u32 (!%p991_p5), %s1171_s12, 6 }
   0xd   : > { %s1241_s25 = scalar_select %p45_p4, %s1163_s10, %s47_s24  }
   0xe   : > { %s992_s28 = sshll.u32 (!%p991_p5), %s82_s26, 6  ;;  %s90_s3 = scalar_lea.vmem (!%p991_p5), %s1619_s0, %s1071_s27 }
   0xf   : > { %v132_v0 = vld [vmem:[%s90_s3] sm:$0xff] (!%p991_p5)  ;;  %v134_v1 = vld [vmem:[%s90_s3 + $0x8] sm:$0xff] (!%p991_p5)  ;;  %v136_v2 = vld [vmem:[%s90_s3 + $0x10] sm:$0xff] (!%p991_p5)  ;;  %s84_s4 = scalar_lea.vmem (!%p991_p5), [#allocation0], %s992_s28 }
  0x10   : > { %133 = vst [vmem:[%s84_s4] sm:$0xff] (!%p991_p5), %v132_v0  ;;  %135 = vst [vmem:[%s84_s4 + $0x8] sm:$0xff] (!%p991_p5), %v134_v1  ;;  %v138_v3 = vld [vmem:[%s90_s3 + $0x18] sm:$0xff] (!%p991_p5)  ;;  %v140_v4 = vld [vmem:[%s90_s3 + $0x20] sm:$0xff] (!%p991_p5) }
  0x11   : > { %137 = vst [vmem:[%s84_s4 + $0x10] sm:$0xff] (!%p991_p5), %v136_v2  ;;  %v142_v5 = vld [vmem:[%s90_s3 + $0x28] sm:$0xff] (!%p991_p5)  ;;  %139 = vst [vmem:[%s84_s4 + $0x18] sm:$0xff] (!%p991_p5), %v138_v3  ;;  %v144_v6 = vld [vmem:[%s90_s3 + $0x30] sm:$0xff] (!%p991_p5) }
  0x12   : > { %141 = vst [vmem:[%s84_s4 + $0x20] sm:$0xff] (!%p991_p5), %v140_v4  ;;  %143 = vst [vmem:[%s84_s4 + $0x28] sm:$0xff] (!%p991_p5), %v142_v5  ;;  %v146_v7 = vld [vmem:[%s90_s3 + $0x38] sm:$0xff] (!%p991_p5) }
  0x13   : > { %145 = vst [vmem:[%s84_s4 + $0x30] sm:$0xff] %v144_v6  ;;  %147 = vst [vmem:[%s84_s4 + $0x38] sm:$0xff] %v146_v7 }
  0x14 PF: > { %p995_p6 = scmp.ge.s32.totalorder %s1175_s13, 1  ;;  %p152_p7 = scmp.lt.s32.totalorder %s1175_s13, 3 }
  0x16   : > { %p153_p8 = pnand %p995_p6, %p152_p7 }
  0x18   : > { %156 = sbr.rel (%p153_p8) target bundleno = 380 (0x17c), region = 54 }
  0x1f   : > { %s159_s5 = sand.u32 1, %s986_s15   ;;  %s173_s6 = sand.u32 1, %s1159_s9   ;;  %v1181_v16 = vmov 0.0  }
  0x20   : > { %s996_s7 = sshll.u32 %s159_s5, 6  ;;  %s1254_s8 = sshll.u32 %s173_s6, 1 }
  0x21   : > { %s184_s16 = sand.u32 7, %s1167_s11   ;;  %s161_s17 = scalar_lea.vmem [#allocation0], %s996_s7 }
  0x22   : > { %v186_v8 = vld [vmem:[%s161_s17] sm:$0xff]  ;;  %v999_v9 = vld [vmem:[%s161_s17 + $0x8] sm:$0xff]  ;;  %v1001_v10 = vld [vmem:[%s161_s17 + $0x10] sm:$0xff]  ;;  %s1257_s18 = scalar_lea.vmem [#allocation1], %s996_s7  ;;  %s1265_s9 = scalar_lea.vmem [#allocation2], %s184_s16 }
  0x23   : > { %187 = vst [vmem:[%s1257_s18] sm:$0xff] %v186_v8  ;;  %1000 = vst [vmem:[%s1257_s18 + $0x8] sm:$0xff] %v999_v9  ;;  %v1003_v11 = vld [vmem:[%s161_s17 + $0x18] sm:$0xff]  ;;  %v1005_v12 = vld [vmem:[%s161_s17 + $0x20] sm:$0xff]  ;;  %s175_s15 = scalar_lea.vmem [#allocation3], %s1254_s8  ;;  %s1271_s19 = smov 0  }
  0x24   : > { %1002 = vst [vmem:[%s1257_s18 + $0x10] sm:$0xff] %v1001_v10  ;;  %v1007_v13 = vld [vmem:[%s161_s17 + $0x28] sm:$0xff]  ;;  %1004 = vst [vmem:[%s1257_s18 + $0x18] sm:$0xff] %v1003_v11  ;;  %v1009_v14 = vld [vmem:[%s161_s17 + $0x30] sm:$0xff] }
  0x25   : > { %1006 = vst [vmem:[%s1257_s18 + $0x20] sm:$0xff] %v1005_v12  ;;  %1008 = vst [vmem:[%s1257_s18 + $0x28] sm:$0xff] %v1007_v13  ;;  %v1011_v15 = vld [vmem:[%s161_s17 + $0x38] sm:$0xff] }
  0x26   : > { %216 = vst [vmem:[%s1265_s9] sm:$0x1] %v1181_v16  ;;  %1010 = vst [vmem:[%s1257_s18 + $0x30] sm:$0xff] %v1009_v14 }
  0x27   : > { %1012 = vst [vmem:[%s1257_s18 + $0x38] sm:$0xff] %v1011_v15 }
  0x28 LB: >> { %v224_v17 = vlaneseq  ;;  %v1281_v20 = vstv %s1179_s19  ;;  %s321_s20 = scalar_lea.vmem %s1257_s18, %s1179_s19 [#allocation1]  ;;  %s505_s21 = scalar_lea.vmem [#allocation4], %s1179_s19  ;;  %s1179_s19 = sphi %s1271_s19, %s222_s19  }
  0x29   : >> { %s1419_s23 = smov [#allocation4] }
  0x2a   : >> { %v223_v18 = vld [vmem:[%s1257_s18] sm:$0xff]  ;;  %v1278_v19 = vshrl.u32 %v224_v17, 7  ;;  %v1013_v21 = vld [vmem:[%s1257_s18 + $0x8] sm:$0xff] }
  0x2b   : >> { %v1014_v23 = vld [vmem:[%s1257_s18 + $0x10] sm:$0xff]  ;;  %v1015_v25 = vld [vmem:[%s1257_s18 + $0x18] sm:$0xff] }
  0x2c   : >> { %vm228_vm0 = vcmp.gt.s32.totalorder %v1278_v19, %v1281_v20  ;;  %v235_v22 = vadd.s32 8, %v1278_v19  ;;  %v245_v24 = vadd.s32 16, %v1278_v19  ;;  %v255_v26 = vadd.s32 24, %v1278_v19  ;;  %v1016_v32 = vld [vmem:[%s1257_s18 + $0x20] sm:$0xff]  ;;  %v1017_v38 = vld [vmem:[%s1257_s18 + $0x28] sm:$0xff] }
  0x2d   : >> { %v229_v27 = vsel %vm228_vm0, %v223_v18, 0.0  ;;  %v265_v28 = vadd.s32 32, %v1278_v19  ;;  %v275_v29 = vadd.s32 40, %v1278_v19  ;;  %v285_v30 = vadd.s32 48, %v1278_v19  ;;  %v1018_v43 = vld [vmem:[%s1257_s18 + $0x30] sm:$0xff] }
  0x2e   : >> { %v230_v31 = vmul.f32 %v229_v27, %v229_v27  ;;  %vm237_vm1 = vcmp.gt.s32.totalorder %v235_v22, %v1281_v20  ;;  %vm247_vm2 = vcmp.gt.s32.totalorder %v245_v24, %v1281_v20  ;;  %vm257_vm3 = vcmp.gt.s32.totalorder %v255_v26, %v1281_v20  ;;  %v1019_v47 = vld [vmem:[%s1257_s18 + $0x38] sm:$0xff]  ;;  %v1311_v0 = vld [vmem:[%s321_s20] ss:$0 sm:$0xff]  ;;  %s1334_s18 = smov %s1257_s18 }
  0x2f   : >> { %v238_v33 = vsel %vm237_vm1, %v1013_v21, 0.0  ;;  %v248_v34 = vsel %vm247_vm2, %v1014_v23, 0.0  ;;  %v258_v35 = vsel %vm257_vm3, %v1015_v25, 0.0  ;;  %vm267_vm4 = vcmp.gt.s32.totalorder %v265_v28, %v1281_v20 }
  0x30   : >> { %v239_v36 = vmul.f32 %v238_v33, %v238_v33  ;;  %v249_v37 = vmul.f32 %v248_v34, %v248_v34  ;;  %v268_v39 = vsel %vm267_vm4, %v1016_v32, 0.0  ;;  %vm277_vm5 = vcmp.gt.s32.totalorder %v275_v29, %v1281_v20 }
  0x31   : >> { %v295_v40 = vadd.s32 56, %v1278_v19  ;;  %v259_v42 = vmul.f32 %v258_v35, %v258_v35  ;;  %vm287_vm6 = vcmp.gt.s32.totalorder %v285_v30, %v1281_v20  ;;  %v278_v44 = vsel %vm277_vm5, %v1017_v38, 0.0  ;;  %v1022_v38 = vld [vmem:[%s1334_s18 + $0x10] sm:$0xff] }
  0x32   : >> { %v240_v41 = vadd.f32 %v239_v36, %v230_v31  ;;  %v269_v46 = vmul.f32 %v268_v39, %v268_v39  ;;  %v288_v48 = vsel %vm287_vm6, %v1018_v43, 0.0  ;;  %v279_v50 = vmul.f32 %v278_v44, %v278_v44  ;;  %v361_v39 = vld [vmem:[%s1334_s18] sm:$0xff]  ;;  %v1025_v44 = vld [vmem:[%s1334_s18 + $0x28] sm:$0xff] }
  0x33   : >> { %vm297_vm7 = vcmp.gt.s32.totalorder %v295_v40, %v1281_v20  ;;  %v289_v53 = vmul.f32 %v288_v48, %v288_v48  ;;  %v323_v1 = vand.u32 2147483647, %v1311_v0  ;;  %vm348_vm13 = vcmp.lt.f32.partialorder %v1311_v0, 0.0  ;;  %v1023_v40 = vld [vmem:[%s1334_s18 + $0x18] sm:$0xff] }
  0x34   : >> { %v250_v45 = vadd.f32 %v249_v37, %v240_v41  ;;  %v300_v51 = vsel %vm297_vm7, %v1019_v47, 0.0  ;;  %v360_v19 = vmov %v1278_v19  ;;  %v1345_v43 = vand.u32 127, %v224_v17 }
  0x35   : >> { %v301_v55 = vmul.f32 %v300_v51, %v300_v51  ;;  %v324_v6 = vmax.f32 %v323_v1, 0.0  ;;  %v397_v33 = vadd.s32 16, %v360_v19  ;;  %v415_v34 = vadd.s32 24, %v360_v19 }
  0x36   : >> { %v260_v49 = vadd.f32 %v259_v42, %v250_v45  ;;  %v379_v35 = vadd.s32 8, %v360_v19  ;;  %v451_v36 = vadd.s32 40, %v360_v19  ;;  %v433_v37 = vadd.s32 32, %v360_v19  ;;  %v1021_v42 = vld [vmem:[%s1334_s18 + $0x8] sm:$0xff]  ;;  %v1024_v45 = vld [vmem:[%s1334_s18 + $0x20] sm:$0xff] }
  0x37   : >> { %vm399_vm14 = vcmp.gt.s32.totalorder %v397_v33, %v1281_v20  ;;  %vm364_vm15 = vcmp.gt.s32.totalorder %v360_v19, %v1281_v20  ;;  %vm417_vm0 = vcmp.gt.s32.totalorder %v415_v34, %v1281_v20  ;;  %v487_v41 = vadd.s32 56, %v360_v19 }
  0x38   : >> { %v270_v52 = vadd.f32 %v269_v46, %v260_v49  ;;  %vm381_vm1 = vcmp.gt.s32.totalorder %v379_v35, %v1281_v20  ;;  %vm453_vm2 = vcmp.gt.s32.totalorder %v451_v36, %v1281_v20  ;;  %vm435_vm3 = vcmp.gt.s32.totalorder %v433_v37, %v1281_v20  ;;  %v518_v37 = vld [vmem:[%s1265_s9] ss:$0 sm:$0xff] }
  0x39   : >> { %v469_v46 = vadd.s32 48, %v360_v19  ;;  %v400_v47 = vsel %vm399_vm14, %v1022_v38, 0.0  ;;  %v365_v48 = vsel %vm364_vm15, %v361_v39, 0.0  ;;  %v418_v49 = vsel %vm417_vm0, %v1023_v40, 0.0 }
  0x3a   : >> { %v280_v54 = vadd.f32 %v279_v50, %v270_v52  ;;  %v382_v50 = vsel %vm381_vm1, %v1021_v42, 0.0  ;;  %vm489_vm4 = vcmp.gt.s32.totalorder %v487_v41, %v1281_v20  ;;  %vm490_vm5 = vcmp.lt.s32.totalorder %v487_v41, 64 }
  0x3b   : >> { %v454_v17 = vsel %vm453_vm2, %v1025_v44, 0.0  ;;  %v436_v51 = vsel %vm435_vm3, %v1024_v45, 0.0  ;;  %vm1355_vm6 = vcmp.eq.s32.totalorder %v1345_v43, %v1281_v20  ;;  %vm471_vm7 = vcmp.gt.s32.totalorder %v469_v46, %v1281_v20 }
  0x3c   : >> { %v290_v56 = vadd.f32 %v289_v53, %v280_v54  ;;  %v1182_v36 = vmov 1.0   ;;  %v525_v19 = vmov %v1278_v19  ;;  %vm1490_vm3 = vcmp.gt.s32.totalorder %v1345_v43, %v1281_v20 }
  0x3e   : >> { %v302_v57 = vadd.f32 %v301_v55, %v290_v56 }
  0x40   : >> { %v303_v58 = vrot.slane %v302_v57, 4 }
  0x42   : >> { %v304_v59 = vadd.f32 %v303_v58, %v302_v57  ;;  %v1027_v58 = vld [vmem:[%s1334_s18 + $0x38] sm:$0xff] }
  0x44   : >> { %v305_v60 = vrot.slane %v304_v59, 2 }
  0x46   : >> { %v306_v61 = vadd.f32 %v305_v60, %v304_v59  ;;  %v1026_v60 = vld [vmem:[%s1334_s18 + $0x30] sm:$0xff]  ;;  %s1416_s18 = smov %s1257_s18 }
  0x47   : >> { %v528_v40 = vld [vmem:[%s1416_s18] sm:$0xff]  ;;  %v1029_v41 = vld [vmem:[%s1416_s18 + $0x8] sm:$0xff] }
  0x48   : >> { %v307_v62 = vrot.slane %v306_v61, 1 }
  0x4a   : >> { %v1306_v63 = vadd.f32 %v307_v62, %v306_v61 }
  0x4c   : >> { %1123 = vrsqrt.f32 %v1306_v63  ;;  %vm311_vm8 = vcmp.eq.f32.partialorder %v1306_v63, inf  ;;  %v314_v3 = vand.u32 2147483648, %v1306_v63  ;;  %vm313_vm9 = vcmp.eq.f32.partialorder %v1306_v63, 0.0 }
  0x56   : >> { %v1124_v2 = vpop.eup %1123 }
  0x57   : >> { %v310_v4 = vmul.f32 %v1124_v2, %v1306_v63 }
  0x59   : >> { %v312_v5 = vsel %vm311_vm8, %v1306_v63, %v310_v4  ;;  %vm1361_vm8 = vmand %vm489_vm4, %vm490_vm5 }
  0x5a   : >> { %v315_v7 = vsel %vm313_vm9, %v314_v3, %v312_v5 }
  0x5b   : >> { %v325_v8 = vand.u32 2147483647, %v315_v7  ;;  %v492_v7 = vsel %vm1361_vm8, %v1027_v58, 0.0  ;;  %v1037_v58 = vld [vmem:[%s1416_s18 + $0x28] sm:$0xff] }
  0x5d   : >> { %v326_v9 = vmax.f32 %v324_v6, %v325_v8 }
  0x5f   : >> { %1125 = vrcp.f32 %v326_v9  ;;  %vm338_vm12 = vcmp.eq.f32.partialorder %v326_v9, 0.0 }
  0x69   : >> { %v1126_v10 = vpop.eup %1125 }
  0x6a   : >> { %v328_v11 = vmul.f32 %v1126_v10, %v323_v1  ;;  %v331_v12 = vmul.f32 0.0, %v1126_v10  ;;  %v335_v13 = vmul.f32 %v1126_v10, %v325_v8  ;;  %v472_v8 = vsel %vm471_vm7, %v1026_v60, 0.0 }
  0x6c   : >> { %v329_v14 = vmul.f32 %v328_v11, %v328_v11  ;;  %v332_v15 = vmul.f32 %v331_v12, %v331_v12  ;;  %v336_v16 = vmul.f32 %v335_v13, %v335_v13 }
  0x6e   : >> { %v333_v18 = vadd.f32 %v332_v15, %v329_v14 }
  0x70   : >> { %v337_v21 = vadd.f32 %v336_v16, %v333_v18 }
  0x72   : >> { %1127 = vrsqrt.f32 %v337_v21  ;;  %vm341_vm10 = vcmp.eq.f32.partialorder %v337_v21, inf  ;;  %v344_v23 = vand.u32 2147483648, %v337_v21  ;;  %vm343_vm11 = vcmp.eq.f32.partialorder %v337_v21, 0.0 }
  0x7c   : >> { %v1128_v22 = vpop.eup %1127 }
  0x7d   : >> { %v340_v24 = vmul.f32 %v1128_v22, %v337_v21 }
  0x7f   : >> { %v342_v25 = vsel %vm341_vm10, %v337_v21, %v340_v24 }
  0x80   : >> { %v345_v26 = vsel %vm343_vm11, %v344_v23, %v342_v25 }
  0x81   : >> { %v346_v27 = vmul.f32 %v345_v26, %v326_v9 }
  0x83   : >> { %v347_v28 = vsel %vm338_vm12, 0.0, %v346_v27 }
  0x84   : >> { %v349_v29 = vxor.u32 2147483648, %v347_v28 }
  0x86   : >> { %v1322_v30 = vsel %vm348_vm13, %v347_v28, %v349_v29 }
  0x87   : >> { %v1328_v31 = vsel %vm313_vm9, %v1311_v0, %v1322_v30  ;;  %v351_v11 = vsub.f32 %v1322_v30, %v1311_v0 }
  0x88   : >> { %v356_v32 = vsub.f32 %v1311_v0, %v1328_v31 }
  0x8a   : >> { %1129 = vrcp.f32 %v356_v32 }
  0x8b   : >> { %1131 = vrcp.f32 %v1322_v30 }
  0x94   : >> { %v1130_v52 = vpop.eup %1129 }
  0x95   : >> { %v402_v54 = vmul.f32 %v1130_v52, %v400_v47  ;;  %v367_v55 = vmul.f32 %v1130_v52, %v365_v48  ;;  %v420_v56 = vmul.f32 %v1130_v52, %v418_v49  ;;  %v384_v57 = vmul.f32 %v1130_v52, %v382_v50  ;;  %v1132_v16 = vpop.eup %1131  ;;  %v1031_v47 = vld [vmem:[%s1416_s18 + $0x10] sm:$0xff]  ;;  %v1033_v50 = vld [vmem:[%s1416_s18 + $0x18] sm:$0xff] }
  0x96   : >> { %v456_v61 = vmul.f32 %v1130_v52, %v454_v17  ;;  %v438_v62 = vmul.f32 %v1130_v52, %v436_v51  ;;  %v494_v14 = vmul.f32 %v1130_v52, %v492_v7  ;;  %v474_v15 = vmul.f32 %v1130_v52, %v472_v8 }
  0x97   : >> { %v403_v1 = vsel %vm313_vm9, 0.0, %v402_v54  ;;  %v368_v2 = vsel %vm313_vm9, 0.0, %v367_v55  ;;  %v421_v3 = vsel %vm313_vm9, 0.0, %v420_v56  ;;  %v385_v4 = vsel %vm313_vm9, 0.0, %v384_v57  ;;  %v1035_v54 = vld [vmem:[%s1416_s18 + $0x20] sm:$0xff] }
  0x98   : >> { %v408_v5 = vsel %vm1355_vm6, %v403_v1, 0.0  ;;  %v373_v6 = vsel %vm1355_vm6, %v368_v2, 0.0  ;;  %v426_v9 = vsel %vm1355_vm6, %v421_v3, 0.0  ;;  %v390_v10 = vsel %vm1355_vm6, %v385_v4, 0.0  ;;  %v1041_v1 = vld [vmem:[%s1416_s18 + $0x38] sm:$0xff]  ;;  %v1039_v3 = vld [vmem:[%s1416_s18 + $0x30] sm:$0xff]  ;;  %s1442_s18 = smov %s1416_s18 }
  0x99   : >> { %409 = vadd.xlane.f32.xlu1 %v408_v5  ;;  %374 = vadd.xlane.f32.xlu0 %v373_v6  ;;  %v457_v12 = vsel %vm313_vm9, 0.0, %v456_v61  ;;  %v439_v13 = vsel %vm313_vm9, 0.0, %v438_v62  ;;  %v495_v0 = vsel %vm313_vm9, 0.0, %v494_v14  ;;  %v475_v22 = vsel %vm313_vm9, 0.0, %v474_v15  ;;  %s759_s24 = scalar_lea.vmem %s1442_s18, %s1179_s19  ;;  %s222_s19 = sadd.s32 1, %s1179_s19  }
  0x9a   : >> { %v462_v18 = vsel %vm1355_vm6, %v457_v12, 0.0  ;;  %v444_v21 = vsel %vm1355_vm6, %v439_v13, 0.0  ;;  %v353_v23 = vmul.f32 %v1132_v16, %v351_v11  ;;  %v500_v24 = vsel %vm1355_vm6, %v495_v0, 0.0  ;;  %p219_p9 = scmp.ge.s32.totalorder %s222_s19, 8  }
  0x9b   : >> { %v480_v25 = vsel %vm1355_vm6, %v475_v22, 0.0  ;;  %v572_v61 = vadd.s32 56, %v525_v19  ;;  %v591_v19 = vmov %v1278_v19  ;;  %s1072_s26 = sshll.u32 (%p219_p9), %s1167_s11, 6 }
  0x9c   : >> { %v355_v26 = vsel %vm313_vm9, 0.0, %v353_v23  ;;  %v612_v14 = vadd.s32 8, %v591_v19  ;;  %v633_v16 = vadd.s32 16, %v591_v19  ;;  %vm608_vm10 = vcmp.ge.s32.totalorder %v591_v19, %v1281_v20  ;;  %s786_s29 = scalar_lea.vmem (%p219_p9), %s1620_s1, %s1072_s26 }
  0x9d   : >> { %427 = vadd.xlane.f32.xlu1 %v426_v9  ;;  %391 = vadd.xlane.f32.xlu0 %v390_v10  ;;  %v511_v27 = vsel %vm1355_vm6, %v355_v26, 0.0  ;;  %vm578_vm9 = vcmp.lt.s32.totalorder %v572_v61, 64  ;;  %v675_v22 = vadd.s32 32, %v591_v19  ;;  %vm1450_vm13 = vmand %vm1355_vm6, %vm608_vm10  ;;  %v738_v26 = vadd.s32 56, %v591_v19 }
  0x9e   : >> { %vm629_vm11 = vcmp.ge.s32.totalorder %v612_v14, %v1281_v20  ;;  %vm650_vm12 = vcmp.ge.s32.totalorder %v633_v16, %v1281_v20 }
  0x9f   : >> { %vm1457_vm15 = vmand %vm1355_vm6, %vm629_vm11  ;;  %vm692_vm2 = vcmp.ge.s32.totalorder %v675_v22, %v1281_v20  ;;  %vm755_vm7 = vcmp.ge.s32.totalorder %v738_v26, %v1281_v20 }
  0xa0   : >> { %vm1466_vm0 = vmand %vm1355_vm6, %vm650_vm12 }
  0xa1   : >> { %463 = vadd.xlane.f32.xlu1 %v462_v18  ;;  %445 = vadd.xlane.f32.xlu0 %v444_v21  ;;  %v654_v18 = vadd.s32 24, %v591_v19  ;;  %vm1504_vm8 = vmand %vm1355_vm6, %vm692_vm2 }
  0xa2   : >> { %vm1528_vm11 = vmand %vm1355_vm6, %vm755_vm7 }
  0xa3   : >> { %vm671_vm14 = vcmp.ge.s32.totalorder %v654_v18, %v1281_v20 }
  0xa4   : >> { %vm1475_vm1 = vmand %vm1355_vm6, %vm671_vm14 }
  0xa5   : >> { %501 = vadd.xlane.f32.xlu1 %v500_v24  ;;  %481 = vadd.xlane.f32.xlu0 %v480_v25  ;;  %v696_v24 = vadd.s32 40, %v591_v19  ;;  %v717_v25 = vadd.s32 48, %v591_v19  ;;  %v1049_v19 = vld [vmem:[%s1442_s18 + $0x18] sm:$0xff] }
  0xa7   : >> { %vm713_vm4 = vcmp.ge.s32.totalorder %v696_v24, %v1281_v20  ;;  %vm734_vm5 = vcmp.ge.s32.totalorder %v717_v25, %v1281_v20 }
  0xa8   : >> { %vm1520_vm10 = vmand %vm1355_vm6, %vm734_vm5 }
  0xa9   : >> { %512 = vadd.xlane.f32.xlu0 %v511_v27 }
 0x126   : >> { %v410_v28 = vpop.xlane.xlu1 %409  ;;  %v375_v29 = vpop.xlane.xlu0 %374 }
 0x127   : >> { %412 = vst [vmem:[#allocation4 + $0x10] sm:$0xff] %v410_v28  ;;  %376 = vst [vmem:[#allocation4] sm:$0xff] %v375_v29  ;;  %v598_v29 = vld [vmem:[%s1442_s18] sm:$0xff] }
 0x12a   : >> { %v428_v30 = vpop.xlane.xlu1 %427  ;;  %v392_v32 = vpop.xlane.xlu0 %391 }
 0x12b   : >> { %430 = vst [vmem:[#allocation4 + $0x18] sm:$0xff] %v428_v30  ;;  %394 = vst [vmem:[#allocation4 + $0x8] sm:$0xff] %v392_v32  ;;  %v1043_v30 = vld [vmem:[%s1442_s18 + $0x8] sm:$0xff]  ;;  %v1046_v32 = vld [vmem:[%s1442_s18 + $0x10] sm:$0xff] }
 0x12e   : >> { %v464_v63 = vpop.xlane.xlu1 %463  ;;  %v446_v33 = vpop.xlane.xlu0 %445 }
 0x12f   : >> { %466 = vst [vmem:[#allocation4 + $0x28] sm:$0xff] %v464_v63  ;;  %448 = vst [vmem:[#allocation4 + $0x20] sm:$0xff] %v446_v33 }
 0x132   : >> { %v502_v34 = vpop.xlane.xlu1 %501  ;;  %v482_v35 = vpop.xlane.xlu0 %481 }
 0x133   : >> { %504 = vst [vmem:[#allocation4 + $0x38] sm:$0xff] %v502_v34  ;;  %484 = vst [vmem:[#allocation4 + $0x30] sm:$0xff] %v482_v35 }
 0x134   : >> { %506 = vst [vmem:[%s505_s21] sm:$0x1] %v1182_v36  ;;  %v1052_v36 = vld [vmem:[%s1442_s18 + $0x20] sm:$0xff] }
 0x136   : >> { %v1410_v38 = vpop.xlane.xlu0 %512 }
 0x137   : >> { %v519_v39 = vsel %vm1355_vm6, %v1410_v38, %v518_v37  ;;  %v1055_v37 = vld [vmem:[%s1442_s18 + $0x28] sm:$0xff] }
 0x138   : >> { %520 = vst [vmem:[%s1265_s9] sm:$0x1] %v519_v39  ;;  %v1058_v39 = vld [vmem:[%s1442_s18 + $0x30] sm:$0xff] }
 0x13b   : >> { %v527_v42 = vld [vmem:[%s1419_s23] sm:$0xff]  ;;  %v1028_v45 = vld [vmem:[%s1419_s23 + $0x8] sm:$0xff]  ;;  %v1030_v46 = vld [vmem:[%s1419_s23 + $0x10] sm:$0xff] }
 0x13c   : >> { %v529_v44 = vmul.f32 %v528_v40, %v527_v42  ;;  %v535_v48 = vmul.f32 %v1029_v41, %v1028_v45  ;;  %v1032_v49 = vld [vmem:[%s1419_s23 + $0x18] sm:$0xff]  ;;  %v542_v51 = vmul.f32 %v1031_v47, %v1030_v46  ;;  %v1034_v52 = vld [vmem:[%s1419_s23 + $0x20] sm:$0xff]  ;;  %v1036_v57 = vld [vmem:[%s1419_s23 + $0x28] sm:$0xff] }
 0x13d   : >> { %v549_v56 = vmul.f32 %v1033_v50, %v1032_v49  ;;  %v556_v60 = vmul.f32 %v1035_v54, %v1034_v52  ;;  %v1040_v62 = vld [vmem:[%s1419_s23 + $0x38] sm:$0xff]  ;;  %v1038_v2 = vld [vmem:[%s1419_s23 + $0x30] sm:$0xff]  ;;  %v563_v5 = vmul.f32 %v1037_v58, %v1036_v57  ;;  %s1446_s23 = smov %s1419_s23 }
 0x13e   : >> { %v536_v17 = vadd.f32 %v535_v48, %v529_v44  ;;  %v577_v6 = vmul.f32 %v1041_v1, %v1040_v62  ;;  %v570_v8 = vmul.f32 %v1039_v3, %v1038_v2  ;;  %v596_v33 = vld [vmem:[%s1446_s23] sm:$0xff]  ;;  %v1042_v34 = vld [vmem:[%s1446_s23 + $0x8] sm:$0xff]  ;;  %v1061_v40 = vld [vmem:[%s1442_s18 + $0x38] sm:$0xff] }
 0x13f   : >> { %v1045_v42 = vld [vmem:[%s1446_s23 + $0x10] sm:$0xff]  ;;  %v1048_v44 = vld [vmem:[%s1446_s23 + $0x18] sm:$0xff]  ;;  %v1051_v45 = vld [vmem:[%s1446_s23 + $0x20] sm:$0xff] }
 0x140   : >> { %v543_v55 = vadd.f32 %v542_v51, %v536_v17  ;;  %v579_v10 = vsel %vm578_vm9, %v577_v6, 0.0  ;;  %v1054_v47 = vld [vmem:[%s1446_s23 + $0x28] sm:$0xff]  ;;  %v1057_v48 = vld [vmem:[%s1446_s23 + $0x30] sm:$0xff]  ;;  %v1060_v49 = vld [vmem:[%s1446_s23 + $0x38] sm:$0xff] }
 0x141   : >> { %vm1512_vm9 = vmand %vm1355_vm6, %vm713_vm4  ;;  %v770_v25 = vld [vmem:[#allocation2] sm:$0x3] (%p219_p9) }
 0x142   : >> { %v550_v59 = vadd.f32 %v549_v56, %v543_v55  ;;  %772 = vst [vmem:[%s175_s15] sm:$0x3] (%p219_p9), %v770_v25 }
 0x144   : >> { %v557_v4 = vadd.f32 %v556_v60, %v550_v59 }
 0x146   : >> { %v564_v7 = vadd.f32 %v563_v5, %v557_v4 }
 0x148   : >> { %v571_v9 = vadd.f32 %v570_v8, %v564_v7 }
 0x14a   : >> { %v580_v11 = vadd.f32 %v579_v10, %v571_v9 }
 0x14c   : >> { %v581_v12 = vrot.slane %v580_v11, 4 }
 0x14e   : >> { %v582_v13 = vadd.f32 %v581_v12, %v580_v11 }
 0x150   : >> { %v583_v15 = vrot.slane %v582_v13, 2 }
 0x152   : >> { %v584_v21 = vadd.f32 %v583_v15, %v582_v13 }
 0x154   : >> { %v585_v0 = vrot.slane %v584_v21, 1 }
 0x156   : >> { %v586_v27 = vadd.f32 %v585_v0, %v584_v21 }
 0x158   : >> { %v592_v41 = vmul.f32 %v586_v27, %v1410_v38 }
 0x15a   : >> { %v597_v50 = vmul.f32 %v596_v33, %v592_v41  ;;  %v617_v38 = vmul.f32 %v1042_v34, %v592_v41  ;;  %v638_v17 = vmul.f32 %v1045_v42, %v592_v41  ;;  %v659_v51 = vmul.f32 %v1048_v44, %v592_v41 }
 0x15b   : >> { %v680_v52 = vmul.f32 %v1051_v45, %v592_v41  ;;  %v701_v54 = vmul.f32 %v1054_v47, %v592_v41  ;;  %v722_v55 = vmul.f32 %v1057_v48, %v592_v41  ;;  %v743_v56 = vmul.f32 %v1060_v49, %v592_v41 }
 0x15c   : >> { %v601_v58 = vsub.f32 %v598_v29, %v597_v50  ;;  %v622_v59 = vsub.f32 %v1043_v30, %v617_v38  ;;  %v643_v60 = vsub.f32 %v1046_v32, %v638_v17  ;;  %v664_v61 = vsub.f32 %v1049_v19, %v659_v51 }
 0x15d   : >> { %v685_v1 = vsub.f32 %v1052_v36, %v680_v52  ;;  %v706_v2 = vsub.f32 %v1055_v37, %v701_v54  ;;  %v727_v3 = vsub.f32 %v1058_v39, %v722_v55  ;;  %v748_v4 = vsub.f32 %v1061_v40, %v743_v56 }
 0x15e   : >> { %v602_v6 = vsel %vm1490_vm3, %v601_v58, %v598_v29  ;;  %v623_v7 = vsel %vm1490_vm3, %v622_v59, %v1043_v30  ;;  %v644_v8 = vsel %vm1490_vm3, %v643_v60, %v1046_v32  ;;  %v665_v9 = vsel %vm1490_vm3, %v664_v61, %v1049_v19 }
 0x15f   : >> { %v610_v20 = vsel %vm1450_vm13, %v596_v33, %v602_v6  ;;  %v631_v10 = vsel %vm1457_vm15, %v1042_v34, %v623_v7  ;;  %v652_v11 = vsel %vm1466_vm0, %v1045_v42, %v644_v8  ;;  %v673_v12 = vsel %vm1475_vm1, %v1048_v44, %v665_v9 }
 0x160   : >> { %611 = vst [vmem:[%s1442_s18] sm:$0xff] %v610_v20  ;;  %1044 = vst [vmem:[%s1442_s18 + $0x8] sm:$0xff] %v631_v10  ;;  %v686_v13 = vsel %vm1490_vm3, %v685_v1, %v1052_v36  ;;  %v707_v14 = vsel %vm1490_vm3, %v706_v2, %v1055_v37  ;;  %v728_v15 = vsel %vm1490_vm3, %v727_v3, %v1058_v39 }
 0x161   : >> { %1047 = vst [vmem:[%s1442_s18 + $0x10] sm:$0xff] %v652_v11  ;;  %1050 = vst [vmem:[%s1442_s18 + $0x18] sm:$0xff] %v673_v12  ;;  %v749_v16 = vsel %vm1490_vm3, %v748_v4, %v1061_v40  ;;  %v694_v18 = vsel %vm1504_vm8, %v1051_v45, %v686_v13  ;;  %v715_v21 = vsel %vm1512_vm9, %v1054_v47, %v707_v14 }
 0x162   : >> { %v736_v0 = vsel %vm1520_vm10, %v1057_v48, %v728_v15  ;;  %v757_v22 = vsel %vm1528_vm11, %v1060_v49, %v749_v16  ;;  %1053 = vst [vmem:[%s1442_s18 + $0x20] sm:$0xff] %v694_v18  ;;  %1056 = vst [vmem:[%s1442_s18 + $0x28] sm:$0xff] %v715_v21 }
 0x163   : >> { %1059 = vst [vmem:[%s1442_s18 + $0x30] sm:$0xff] %v736_v0  ;;  %1062 = vst [vmem:[%s1442_s18 + $0x38] sm:$0xff] %v757_v22 }
 0x166   : > { %221 = sbr.rel (!%p219_p9) target bundleno = 40 (0x28), region = 238 }
 0x16a   : >> { %v760_v23 = vld [vmem:[%s759_s24] ss:$0 sm:$0xff] }
 0x16b   : >> { %v765_v24 = vsel %vm1355_vm6, %v1328_v31, %v760_v23 }
 0x16c   : >> { %766 = vst [vmem:[%s759_s24] sm:$0x1] %v765_v24 }
 0x16d   : > { %p850_p10 = scmp.lt.s32.totalorder (%p1235_p3), %s1167_s11, 0  ;;  %s851_s30 = ssub.s32 (%p1235_p3), 0, %s1167_s11  ;;  %v873_v63 = vld [vmem:[%s175_s15] sm:$0x3] (%p1235_p3) }
 0x16e   : > { %s1067_s3 = smin.u32 (%p1235_p3), %s1167_s11, %s851_s30 }
 0x16f   : > { %s853_s4 = sshrl.u32 (%p1235_p3), %s1067_s3, 3 }
 0x170   : > { %s854_s5 = ssub.s32 (%p1235_p3), 0, %s853_s4 }
 0x171   : > { %849 = sbr.rel (!%p1235_p3) target bundleno = 380 (0x17c), region = 99 }
 0x173   : > { %v828_v31 = vld [vmem:[%s1257_s18] sm:$0xff]  ;;  %v830_v53 = vld [vmem:[%s1257_s18 + $0x8] sm:$0xff]  ;;  %v832_v26 = vld [vmem:[%s1257_s18 + $0x10] sm:$0xff] }
 0x174   : > { %v834_v27 = vld [vmem:[%s1257_s18 + $0x18] sm:$0xff]  ;;  %v836_v28 = vld [vmem:[%s1257_s18 + $0x20] sm:$0xff]  ;;  %829 = vst [vmem:[%s786_s29] sm:$0xff] %v828_v31  ;;  %831 = vst [vmem:[%s786_s29 + $0x8] sm:$0xff] %v830_v53 }
 0x175   : > { %833 = vst [vmem:[%s786_s29 + $0x10] sm:$0xff] %v832_v26  ;;  %835 = vst [vmem:[%s786_s29 + $0x18] sm:$0xff] %v834_v27  ;;  %v838_v29 = vld [vmem:[%s1257_s18 + $0x28] sm:$0xff]  ;;  %v840_v30 = vld [vmem:[%s1257_s18 + $0x30] sm:$0xff] }
 0x176   : > { %837 = vst [vmem:[%s786_s29 + $0x20] sm:$0xff] %v836_v28  ;;  %v842_v32 = vld [vmem:[%s1257_s18 + $0x38] sm:$0xff]  ;;  %839 = vst [vmem:[%s786_s29 + $0x28] sm:$0xff] %v838_v29 }
 0x177   : > { %841 = vst [vmem:[%s786_s29 + $0x30] sm:$0xff] %v840_v30  ;;  %843 = vst [vmem:[%s786_s29 + $0x38] sm:$0xff] %v842_v32 }
 0x178   : > { %s1652_s5 = smov (!%p850_p10, %s854_s5), %s853_s4 }
 0x179   : > { %s1068_s6 = sshll.u32 %s1652_s5, 1 }
 0x17a   : > { %s857_s17 = scalar_lea.vmem %s1621_s2, %s1068_s6 }
 0x17b   : > { %874 = vst [vmem:[%s857_s17] sm:$0x3] %v873_v63 }
 0x17c PF: > { %s9_s13 = sadd.s32 1, %s1175_s13   ;;  %s1645_s9 = smov %s1163_s10 }
 0x17d   : > { %p6_p11 = scmp.ge.s32.totalorder %s9_s13, 4   ;;  %s1646_s10 = smov %s1241_s25 }
 0x17e   : > { %s1647_s11 = smov %s1171_s12  ;;  %s1648_s12 = smov %s1650_s14 }
 0x17f   :  { %8 = sbr.rel (!%p6_p11) target bundleno = 3 (0x3), region = 249 }

// kernel: custom-call.33
= control target key start
LH: loop header
LB: loop body
LE: loop exit
PB: predicated region body
PF: predicated region fallthrough
CT: control target
= control target key end

     0   :  { %s290_s6 = smov 0   ;;  %s331_s0 = inlined_call_operand.vmem [shape: f32[2,8,8], index: 0, kind: input, shape index: {}]   ;;  %s332_s1 = inlined_call_operand.vmem [shape: f32[2,8,8], index: 1, kind: output, shape index: {}]  }
   0x1 LB: > { %s245_s7 = sadd.s32 4294967295, %s278_s6   ;;  %p247_p0 = scmp.ge.s32.totalorder %s278_s6, 2  ;;  %s278_s6 = sphi %s290_s6, %s7_s6  }
   0x2   : > { %s23_s8 = sand.u32 (!%p247_p0), 1, %s278_s6   ;;  %s249_s9 = sshll.u32 (!%p247_p0), %s278_s6, 3 }
   0x3   : > { %21 = sbr.rel (%p247_p0) target bundleno = 10 (0xa), region = 16  ;;  %s248_s10 = sshll.u32 (!%p247_p0), %s23_s8, 3 }
   0x4   : > { %s27_s13 = scalar_lea.vmem (!%p247_p0), %s331_s0, %s249_s9  ;;  %s25_s14 = scalar_lea.vmem (!%p247_p0), [#allocation0], %s248_s10 }
   0x5   : > { %v55_v0 = vld [vmem:[%s27_s13] sm:$0xff] (!%p247_p0) }
   0x6   : > { %56 = vst [vmem:[%s25_s14] sm:$0xff] (!%p247_p0), %v55_v0 }
   0xa PF: > { %p250_p1 = scmp.ge.s32.totalorder %s278_s6, 1  ;;  %p61_p2 = scmp.lt.s32.totalorder %s278_s6, 3 }
   0xc   : > { %p62_p3 = pnand %p250_p1, %p61_p2 }
   0xd   : > { %s68_s15 = sand.u32 (!%p62_p3), 1, %s245_s7   ;;  %v79_v1 = vlaneseq (!%p62_p3)  ;;  %vm93_vm0 = vcmask (!%p62_p3), 64512   ;;  %s261_s18 = sshll.u32 (!%p62_p3), %s245_s7, 3 }
   0xe   : > { %65 = sbr.rel (%p62_p3) target bundleno = 1036 (0x40c), region = 54  ;;  %s251_s16 = sshll.u32 (!%p62_p3), %s68_s15, 3 }
   0xf   : > { %v80_v2 = vand.u32 (!%p62_p3), 127, %v79_v1  ;;  %v82_v3 = vshrl.u32 (!%p62_p3), %v79_v1, 7  ;;  %s306_s17 = scalar_lea.vmem (!%p62_p3), [#allocation0], %s251_s16  ;;  %s174_s21 = scalar_lea.vmem (!%p62_p3), %s332_s1, %s261_s18 }
  0x10   : > { %v85_v4 = vld [vmem:[%s306_s17] sm:$0xff] (!%p62_p3) }
  0x11   : > { %v253_v5 = vld [vmem:[%s306_s17 + $0x1] ss:$0 sm:$0xff] (!%p62_p3)  ;;  %vm84_vm1 = vcmp.eq.s32.totalorder (!%p62_p3), %v80_v2, %v82_v3  ;;  %vm88_vm2 = vcmp.eq.s32.totalorder (!%p62_p3), %v80_v2, 0  ;;  %v254_v10 = vld [vmem:[%s306_s17 + $0x2] ss:$0 sm:$0xff] (!%p62_p3)  ;;  %vm97_vm3 = vcmp.eq.s32.totalorder (!%p62_p3), %v80_v2, 1 }
  0x12   : > { %v94_v6 = vsel (!%p62_p3), %vm93_vm0, %v253_v5, 0.0  ;;  %v89_v7 = vsel (!%p62_p3), %vm88_vm2, %v85_v4, 1.0  ;;  %v105_v11 = vsel (!%p62_p3), %vm93_vm0, %v254_v10, 0.0  ;;  %v255_v15 = vld [vmem:[%s306_s17 + $0x3] ss:$0 sm:$0xff] (!%p62_p3)  ;;  %vm108_vm4 = vcmp.eq.s32.totalorder (!%p62_p3), %v80_v2, 2 }
  0x13   : > { %v90_v8 = vsel (!%p62_p3), %vm84_vm1, %v89_v7, 0.0  ;;  %v116_v16 = vsel (!%p62_p3), %vm93_vm0, %v255_v15, 0.0  ;;  %v256_v20 = vld [vmem:[%s306_s17 + $0x4] ss:$0 sm:$0xff] (!%p62_p3)  ;;  %vm119_vm5 = vcmp.eq.s32.totalorder (!%p62_p3), %v80_v2, 3  ;;  %vm130_vm6 = vcmp.eq.s32.totalorder (!%p62_p3), %v80_v2, 4 }
  0x14   : > { %v98_v9 = vmul.f32 (!%p62_p3), %v94_v6, %v90_v8  ;;  %v127_v21 = vsel (!%p62_p3), %vm93_vm0, %v256_v20, 0.0  ;;  %v257_v25 = vld [vmem:[%s306_s17 + $0x5] ss:$0 sm:$0xff] (!%p62_p3)  ;;  %v258_v30 = vld [vmem:[%s306_s17 + $0x6] ss:$0 sm:$0xff] (!%p62_p3)  ;;  %vm141_vm7 = vcmp.eq.s32.totalorder (!%p62_p3), %v80_v2, 5 }
  0x15   : > { %v138_v26 = vsel %vm93_vm0, %v257_v25, 0.0  ;;  %v149_v31 = vsel %vm93_vm0, %v258_v30, 0.0  ;;  %v259_v35 = vld [vmem:[%s306_s17 + $0x7] ss:$0 sm:$0xff]  ;;  %vm152_vm8 = vcmp.eq.s32.totalorder %v80_v2, 6  ;;  %vm163_vm9 = vcmp.eq.s32.totalorder %v80_v2, 7 }
  0x16   : > { %99 = vadd.xlane.f32.xlu0 %v98_v9  ;;  %v160_v36 = vsel %vm93_vm0, %v259_v35, 0.0 }
  0xa3   : > { %v100_v12 = vpop.xlane.xlu0 %99 }
  0xa4   : > { %v101_v13 = vsel %vm97_vm3, %v100_v12, %v90_v8 }
  0xa5   : > { %v109_v14 = vmul.f32 %v105_v11, %v101_v13 }
  0xa7   : > { %110 = vadd.xlane.f32.xlu0 %v109_v14 }
 0x134   : > { %v111_v17 = vpop.xlane.xlu0 %110 }
 0x135   : > { %v112_v18 = vsel %vm108_vm4, %v111_v17, %v101_v13 }
 0x136   : > { %v120_v19 = vmul.f32 %v116_v16, %v112_v18 }
 0x138   : > { %121 = vadd.xlane.f32.xlu1 %v120_v19 }
 0x1c5   : > { %v122_v22 = vpop.xlane.xlu1 %121 }
 0x1c6   : > { %v123_v23 = vsel %vm119_vm5, %v122_v22, %v112_v18 }
 0x1c7   : > { %v131_v24 = vmul.f32 %v127_v21, %v123_v23 }
 0x1c9   : > { %132 = vadd.xlane.f32.xlu1 %v131_v24 }
 0x256   : > { %v133_v27 = vpop.xlane.xlu1 %132 }
 0x257   : > { %v134_v28 = vsel %vm130_vm6, %v133_v27, %v123_v23 }
 0x258   : > { %v142_v29 = vmul.f32 %v138_v26, %v134_v28 }
 0x25a   : > { %143 = vadd.xlane.f32.xlu0 %v142_v29 }
 0x2e7   : > { %v144_v32 = vpop.xlane.xlu0 %143 }
 0x2e8   : > { %v145_v33 = vsel %vm141_vm7, %v144_v32, %v134_v28 }
 0x2e9   : > { %v153_v34 = vmul.f32 %v149_v31, %v145_v33 }
 0x2eb   : > { %154 = vadd.xlane.f32.xlu1 %v153_v34 }
 0x378   : > { %v155_v37 = vpop.xlane.xlu1 %154 }
 0x379   : > { %v156_v38 = vsel %vm152_vm8, %v155_v37, %v145_v33 }
 0x37a   : > { %v164_v39 = vmul.f32 %v160_v36, %v156_v38 }
 0x37c   : > { %165 = vadd.xlane.f32.xlu0 %v164_v39 }
 0x409   : > { %v166_v40 = vpop.xlane.xlu0 %165 }
 0x40a   : > { %v167_v41 = vsel %vm163_vm9, %v166_v40, %v156_v38 }
 0x40b   : > { %203 = vst [vmem:[%s174_s21] sm:$0xff] %v167_v41 }
 0x40c PF: > { %s7_s6 = sadd.s32 1, %s278_s6  }
 0x40d   : > { %p4_p4 = scmp.ge.s32.totalorder %s7_s6, 4  }
 0x40f   :  { %6 = sbr.rel (!%p4_p4) target bundleno = 1 (0x1), region = 125 }

// kernel: custom-call.47
= control target key start
LH: loop header
LB: loop body
LE: loop exit
PB: predicated region body
PF: predicated region fallthrough
CT: control target
= control target key end

     0   :  { %s736_s9 = smov 0   ;;  %s738_s10 = smov 0   ;;  %s918_s0 = inlined_call_operand.vmem [shape: f32[2,16,8], index: 0, kind: input, shape index: {}]   ;;  %s919_s1 = inlined_call_operand.vmem [shape: f32[2,16,8], index: 1, kind: output, shape index: {0}]   ;;  %s920_s2 = inlined_call_operand.vmem [shape: f32[2,8], index: 2, kind: output, shape index: {1}]  }
   0x1   :  { %s740_s11 = smov 0   ;;  %s742_s12 = smov 0  }
   0x2   :  { %s744_s13 = smov 0  }
   0x3 LB: > { %s28_s14 = sadd.s32 1, %s709_s12  ;;  %s578_s15 = sadd.s32 4294967295, %s713_s13   ;;  %s713_s13 = sphi %s744_s13, %s9_s13   ;;  %s709_s12 = sphi %s742_s12, %s927_s12   ;;  %s705_s11 = sphi %s740_s11, %s926_s11   ;;  %s701_s10 = sphi %s738_s10, %s925_s10   ;;  %s697_s9 = sphi %s736_s9, %s924_s9  }
   0x4   : > { %p30_p0 = scmp.ge.s32.totalorder %s28_s14, 2  ;;  %s33_s16 = ssub.s32 0, %s709_s12 }
   0x5   : > { %s580_s17 = smin.u32 %s709_s12, %s33_s16  ;;  %p57_p1 = scmp.ne.s32.totalorder %s701_s10, %s697_s9 }
   0x6   : > { %s929_s14 = smov (%p30_p0, %s28_s14), 0  ;;  %s35_s18 = sshrl.u32 %s580_s17, 3 }
   0x7   : > { %s39_s19 = ssub.s32 0, %s929_s14  ;;  %p58_p2 = scmp.eq.s32.totalorder %s578_s15, 1 }
   0x8   : > { %s581_s20 = smin.u32 %s39_s19, %s929_s14  ;;  %s47_s24 = sadd.s32 1, %s701_s10 }
   0x9   : > { %s41_s21 = sshrl.u32 %s581_s20, 3  ;;  %p773_p3 = por %p58_p2, %p57_p1 }
   0xa   : > { %s44_s23 = ssub.s32 %s35_s18, %s41_s21  ;;  %p583_p5 = scmp.ge.s32.totalorder %s713_s13, 2 }
   0xb   : > { %p45_p4 = scmp.eq.s32.totalorder %s44_s23, 0  ;;  %s82_s26 = sand.u32 (!%p583_p5), 1, %s713_s13  }
   0xc   : > { %80 = sbr.rel (%p583_p5) target bundleno = 19 (0x13), region = 16  ;;  %s609_s27 = sshll.u32 (!%p583_p5), %s709_s12, 4 }
   0xd   : > { %s779_s25 = scalar_select %p45_p4, %s701_s10, %s47_s24  }
   0xe   : > { %s584_s28 = sshll.u32 (!%p583_p5), %s82_s26, 4  ;;  %s90_s3 = scalar_lea.vmem (!%p583_p5), %s918_s0, %s609_s27 }
   0xf   : > { %v120_v0 = vld [vmem:[%s90_s3] sm:$0xff] (!%p583_p5)  ;;  %v122_v1 = vld [vmem:[%s90_s3 + $0x8] sm:$0xff] (!%p583_p5)  ;;  %s84_s4 = scalar_lea.vmem (!%p583_p5), [#allocation0], %s584_s28 }
  0x10   : > { %121 = vst [vmem:[%s84_s4] sm:$0xff] (!%p583_p5), %v120_v0  ;;  %123 = vst [vmem:[%s84_s4 + $0x8] sm:$0xff] (!%p583_p5), %v122_v1 }
  0x13 PF: > { %p587_p6 = scmp.ge.s32.totalorder %s713_s13, 1  ;;  %p128_p7 = scmp.lt.s32.totalorder %s713_s13, 3 }
  0x15   : > { %p129_p8 = pnand %p587_p6, %p128_p7 }
  0x17   : > { %132 = sbr.rel (%p129_p8) target bundleno = 339 (0x153), region = 54 }
  0x1e   : > { %s135_s5 = sand.u32 1, %s578_s15   ;;  %s149_s6 = sand.u32 1, %s697_s9   ;;  %v719_v4 = vmov 0.0  }
  0x1f   : > { %s588_s7 = sshll.u32 %s135_s5, 4  ;;  %s792_s8 = sshll.u32 %s149_s6, 1 }
  0x20   : > { %s160_s16 = sand.u32 7, %s705_s11   ;;  %s137_s17 = scalar_lea.vmem [#allocation0], %s588_s7 }
  0x21   : > { %v162_v2 = vld [vmem:[%s137_s17] sm:$0xff]  ;;  %v591_v3 = vld [vmem:[%s137_s17 + $0x8] sm:$0xff]  ;;  %s795_s18 = scalar_lea.vmem [#allocation1], %s588_s7  ;;  %s799_s19 = scalar_lea.vmem [#allocation2], %s160_s16 }
  0x22   : > { %163 = vst [vmem:[%s795_s18] sm:$0xff] %v162_v2  ;;  %592 = vst [vmem:[%s795_s18 + $0x8] sm:$0xff] %v591_v3  ;;  %s151_s9 = scalar_lea.vmem [#allocation3], %s792_s8  ;;  %s803_s15 = smov 0  }
  0x23   : > { %168 = vst [vmem:[%s799_s19] sm:$0x1] %v719_v4 }
  0x24 LB: >> { %v176_v5 = vlaneseq  ;;  %v813_v8 = vstv %s717_s15  ;;  %s213_s20 = scalar_lea.vmem %s795_s18, %s717_s15 [#allocation1]  ;;  %s289_s21 = scalar_lea.vmem [#allocation4], %s717_s15  ;;  %s717_s15 = sphi %s803_s15, %s174_s15  }
  0x25   : >> { %s306_s23 = smov [#allocation4] }
  0x26   : >> { %v810_v7 = vshrl.u32 %v176_v5, 7  ;;  %v842_v56 = vand.u32 127, %v176_v5 }
  0x28   : >> { %vm180_vm0 = vcmp.gt.s32.totalorder %v810_v7, %v813_v8  ;;  %v187_v10 = vadd.s32 8, %v810_v7  ;;  %v252_v7 = vmov %v810_v7  ;;  %vm846_vm12 = vcmp.eq.s32.totalorder %v842_v56, %v813_v8 }
  0x29   : >> { %v175_v6 = vld [vmem:[%s795_s18] sm:$0xff]  ;;  %v593_v9 = vld [vmem:[%s795_s18 + $0x8] sm:$0xff]  ;;  %v271_v52 = vadd.s32 8, %v252_v7  ;;  %s249_s18 = smov %s795_s18  ;;  %vm256_vm10 = vcmp.gt.s32.totalorder %v252_v7, %v813_v8  ;;  %v309_v7 = vmov %v810_v7 }
  0x2a   : >> { %v181_v11 = vsel %vm180_vm0, %v175_v6, 0.0  ;;  %vm189_vm1 = vcmp.gt.s32.totalorder %v187_v10, %v813_v8  ;;  %v214_v22 = vld [vmem:[%s213_s20] ss:$0 sm:$0xff]  ;;  %v595_v55 = vld [vmem:[%s249_s18 + $0x8] sm:$0xff]  ;;  %vm342_vm0 = vcmp.gt.s32.totalorder %v842_v56, %v813_v8 }
  0x2b   : >> { %v182_v12 = vmul.f32 %v181_v11, %v181_v11  ;;  %v192_v13 = vsel %vm189_vm1, %v593_v9, 0.0  ;;  %v215_v23 = vand.u32 2147483647, %v214_v22  ;;  %vm240_vm7 = vcmp.lt.f32.partialorder %v214_v22, 0.0  ;;  %v253_v54 = vld [vmem:[%s249_s18] sm:$0xff]  ;;  %s305_s18 = smov %s795_s18 }
  0x2c   : >> { %v193_v14 = vmul.f32 %v192_v13, %v192_v13  ;;  %vm273_vm8 = vcmp.gt.s32.totalorder %v271_v52, %v813_v8  ;;  %vm274_vm9 = vcmp.lt.s32.totalorder %v271_v52, 16  ;;  %v257_v58 = vsel %vm256_vm10, %v253_v54, 0.0  ;;  %v302_v9 = vld [vmem:[%s799_s19] ss:$0 sm:$0xff] }
  0x2d   : >> { %v216_v28 = vmax.f32 %v215_v23, 0.0  ;;  %vm275_vm11 = vmand %vm273_vm8, %vm274_vm9 }
  0x2e   : >> { %v194_v15 = vadd.f32 %v193_v14, %v182_v12  ;;  %v276_v59 = vsel %vm275_vm11, %v595_v55, 0.0  ;;  %v720_v14 = vmov 1.0  }
  0x30   : >> { %v195_v16 = vrot.slane %v194_v15, 4 }
  0x32   : >> { %v196_v17 = vadd.f32 %v195_v16, %v194_v15  ;;  %v314_v15 = vadd.s32 8, %v309_v7  ;;  %v312_v16 = vld [vmem:[%s305_s18] sm:$0xff]  ;;  %v333_v7 = vmov %v810_v7 }
  0x33   : >> { %vm350_vm14 = vcmp.ge.s32.totalorder %v333_v7, %v813_v8 }
  0x34   : >> { %v197_v18 = vrot.slane %v196_v17, 2  ;;  %vm320_vm13 = vcmp.lt.s32.totalorder %v314_v15, 16  ;;  %vm351_vm1 = vmand %vm846_vm12, %vm350_vm14 }
  0x36   : >> { %v198_v19 = vadd.f32 %v197_v18, %v196_v17  ;;  %v597_v17 = vld [vmem:[%s305_s18 + $0x8] sm:$0xff]  ;;  %s329_s18 = smov %s305_s18 }
  0x37   : >> { %s375_s24 = scalar_lea.vmem %s329_s18, %s717_s15  ;;  %s174_s15 = sadd.s32 1, %s717_s15  }
  0x38   : >> { %v199_v20 = vrot.slane %v198_v19, 1  ;;  %p171_p9 = scmp.ge.s32.totalorder %s174_s15, 8  }
  0x39   : > { %s610_s26 = sshll.u32 (%p171_p9), %s705_s11, 4 }
  0x3a   : >> { %v820_v21 = vadd.f32 %v199_v20, %v198_v19  ;;  %s402_s29 = scalar_lea.vmem (%p171_p9), %s919_s1, %s610_s26 }
  0x3c   : >> { %661 = vrsqrt.f32 %v820_v21  ;;  %vm203_vm2 = vcmp.eq.f32.partialorder %v820_v21, inf  ;;  %v206_v25 = vand.u32 2147483648, %v820_v21  ;;  %vm205_vm3 = vcmp.eq.f32.partialorder %v820_v21, 0.0 }
  0x46   : >> { %v662_v24 = vpop.eup %661 }
  0x47   : >> { %v202_v26 = vmul.f32 %v662_v24, %v820_v21 }
  0x49   : >> { %v204_v27 = vsel %vm203_vm2, %v820_v21, %v202_v26 }
  0x4a   : >> { %v207_v29 = vsel %vm205_vm3, %v206_v25, %v204_v27 }
  0x4b   : >> { %v217_v30 = vand.u32 2147483647, %v207_v29  ;;  %v354_v29 = vadd.s32 8, %v333_v7 }
  0x4d   : >> { %v218_v31 = vmax.f32 %v216_v28, %v217_v30  ;;  %vm371_vm15 = vcmp.ge.s32.totalorder %v354_v29, %v813_v8 }
  0x4e   : >> { %vm372_vm2 = vmand %vm846_vm12, %vm371_vm15 }
  0x4f   : >> { %663 = vrcp.f32 %v218_v31  ;;  %vm230_vm6 = vcmp.eq.f32.partialorder %v218_v31, 0.0 }
  0x59   : >> { %v664_v32 = vpop.eup %663 }
  0x5a   : >> { %v220_v33 = vmul.f32 %v664_v32, %v215_v23  ;;  %v223_v34 = vmul.f32 0.0, %v664_v32  ;;  %v227_v35 = vmul.f32 %v664_v32, %v217_v30 }
  0x5c   : >> { %v221_v36 = vmul.f32 %v220_v33, %v220_v33  ;;  %v224_v37 = vmul.f32 %v223_v34, %v223_v34  ;;  %v228_v38 = vmul.f32 %v227_v35, %v227_v35  ;;  %v599_v35 = vld [vmem:[%s329_s18 + $0x8] sm:$0xff] }
  0x5e   : >> { %v225_v39 = vadd.f32 %v224_v37, %v221_v36 }
  0x60   : >> { %v229_v40 = vadd.f32 %v228_v38, %v225_v39 }
  0x62   : >> { %665 = vrsqrt.f32 %v229_v40  ;;  %vm233_vm4 = vcmp.eq.f32.partialorder %v229_v40, inf  ;;  %v236_v42 = vand.u32 2147483648, %v229_v40  ;;  %vm235_vm5 = vcmp.eq.f32.partialorder %v229_v40, 0.0 }
  0x6c   : >> { %v666_v41 = vpop.eup %665 }
  0x6d   : >> { %v232_v43 = vmul.f32 %v666_v41, %v229_v40 }
  0x6f   : >> { %v234_v44 = vsel %vm233_vm4, %v229_v40, %v232_v43 }
  0x70   : >> { %v237_v45 = vsel %vm235_vm5, %v236_v42, %v234_v44 }
  0x71   : >> { %v238_v46 = vmul.f32 %v237_v45, %v218_v31  ;;  %v340_v31 = vld [vmem:[%s329_s18] sm:$0xff] }
  0x73   : >> { %v239_v47 = vsel %vm230_vm6, 0.0, %v238_v46 }
  0x74   : >> { %v241_v48 = vxor.u32 2147483648, %v239_v47 }
  0x76   : >> { %v242_v49 = vsel %vm240_vm7, %v239_v47, %v241_v48 }
  0x77   : >> { %v835_v50 = vsel %vm205_vm3, %v214_v22, %v242_v49  ;;  %667 = vrcp.f32 %v242_v49  ;;  %v243_v53 = vsub.f32 %v242_v49, %v214_v22 }
  0x78   : >> { %v248_v51 = vsub.f32 %v214_v22, %v835_v50 }
  0x7a   : >> { %669 = vrcp.f32 %v248_v51 }
  0x81   : >> { %v668_v57 = vpop.eup %667 }
  0x82   : >> { %v245_v60 = vmul.f32 %v668_v57, %v243_v53 }
  0x84   : >> { %v670_v61 = vpop.eup %669  ;;  %v247_v63 = vsel %vm205_vm3, 0.0, %v245_v60 }
  0x85   : >> { %v259_v0 = vmul.f32 %v670_v61, %v257_v58  ;;  %v278_v1 = vmul.f32 %v670_v61, %v276_v59  ;;  %v295_v2 = vsel %vm846_vm12, %v247_v63, 0.0 }
  0x86   : >> { %296 = vadd.xlane.f32.xlu1 %v295_v2 }
  0x87   : >> { %v260_v3 = vsel %vm205_vm3, 0.0, %v259_v0  ;;  %v279_v4 = vsel %vm205_vm3, 0.0, %v278_v1 }
  0x88   : >> { %v265_v5 = vsel %vm846_vm12, %v260_v3, 0.0  ;;  %v284_v6 = vsel %vm846_vm12, %v279_v4, 0.0 }
  0x89   : >> { %266 = vadd.xlane.f32.xlu0 %v265_v5 }
  0x8d   : >> { %285 = vadd.xlane.f32.xlu0 %v284_v6 }
 0x113   : >> { %v297_v10 = vpop.xlane.xlu1 %296 }
 0x114   : >> { %v303_v11 = vsel %vm846_vm12, %v297_v10, %v302_v9 }
 0x115   : >> { %304 = vst [vmem:[%s799_s19] sm:$0x1] %v303_v11 }
 0x116   : >> { %v267_v12 = vpop.xlane.xlu0 %266 }
 0x117   : >> { %268 = vst [vmem:[#allocation4] sm:$0xff] %v267_v12 }
 0x11a   : >> { %v286_v13 = vpop.xlane.xlu0 %285 }
 0x11b   : >> { %288 = vst [vmem:[#allocation4 + $0x8] sm:$0xff] %v286_v13 }
 0x11c   : >> { %290 = vst [vmem:[%s289_s21] sm:$0x1] %v720_v14  ;;  %v386_v44 = vld [vmem:[#allocation2] sm:$0x3] (%p171_p9) }
 0x11d   : > { %388 = vst [vmem:[%s151_s9] sm:$0x3] (%p171_p9), %v386_v44 }
 0x123   : >> { %v311_v18 = vld [vmem:[%s306_s23] sm:$0xff]  ;;  %v596_v19 = vld [vmem:[%s306_s23 + $0x8] sm:$0xff]  ;;  %s330_s23 = smov %s306_s23 }
 0x124   : >> { %v313_v20 = vmul.f32 %v312_v16, %v311_v18  ;;  %v319_v21 = vmul.f32 %v597_v17, %v596_v19  ;;  %v338_v33 = vld [vmem:[%s330_s23] sm:$0xff]  ;;  %v598_v34 = vld [vmem:[%s330_s23 + $0x8] sm:$0xff] }
 0x126   : >> { %v321_v22 = vsel %vm320_vm13, %v319_v21, 0.0 }
 0x127   : >> { %v322_v23 = vadd.f32 %v321_v22, %v313_v20 }
 0x129   : >> { %v323_v24 = vrot.slane %v322_v23, 4 }
 0x12b   : >> { %v324_v25 = vadd.f32 %v323_v24, %v322_v23 }
 0x12d   : >> { %v325_v26 = vrot.slane %v324_v25, 2 }
 0x12f   : >> { %v326_v27 = vadd.f32 %v325_v26, %v324_v25 }
 0x131   : >> { %v327_v28 = vrot.slane %v326_v27, 1 }
 0x133   : >> { %v328_v30 = vadd.f32 %v327_v28, %v326_v27 }
 0x135   : >> { %v334_v32 = vmul.f32 %v328_v30, %v297_v10 }
 0x137   : >> { %v339_v36 = vmul.f32 %v338_v33, %v334_v32  ;;  %v359_v37 = vmul.f32 %v598_v34, %v334_v32 }
 0x139   : >> { %v343_v38 = vsub.f32 %v340_v31, %v339_v36  ;;  %v364_v7 = vsub.f32 %v599_v35, %v359_v37 }
 0x13b   : >> { %v344_v39 = vsel %vm342_vm0, %v343_v38, %v340_v31  ;;  %v365_v40 = vsel %vm342_vm0, %v364_v7, %v599_v35 }
 0x13c   : >> { %v352_v41 = vsel %vm351_vm1, %v338_v33, %v344_v39  ;;  %v373_v42 = vsel %vm372_vm2, %v598_v34, %v365_v40 }
 0x13d   : >> { %353 = vst [vmem:[%s329_s18] sm:$0xff] %v352_v41  ;;  %600 = vst [vmem:[%s329_s18 + $0x8] sm:$0xff] %v373_v42 }
 0x140   : > { %173 = sbr.rel (!%p171_p9) target bundleno = 36 (0x24), region = 184 }
 0x144   : >> { %v376_v43 = vld [vmem:[%s375_s24] ss:$0 sm:$0xff] }
 0x145   : >> { %v381_v8 = vsel %vm846_vm12, %v835_v50, %v376_v43 }
 0x146   : >> { %382 = vst [vmem:[%s375_s24] sm:$0x1] %v381_v8 }
 0x147   : > { %p442_p10 = scmp.lt.s32.totalorder (%p773_p3), %s705_s11, 0  ;;  %s443_s30 = ssub.s32 (%p773_p3), 0, %s705_s11  ;;  %v465_v47 = vld [vmem:[%s151_s9] sm:$0x3] (%p773_p3) }
 0x148   : > { %441 = sbr.rel (!%p773_p3) target bundleno = 339 (0x153), region = 99  ;;  %s605_s3 = smin.u32 (%p773_p3), %s705_s11, %s443_s30 }
 0x149   : > { %s445_s4 = sshrl.u32 (%p773_p3), %s605_s3, 3 }
 0x14a   : > { %s446_s5 = ssub.s32 (%p773_p3), 0, %s445_s4 }
 0x14d   : > { %v432_v45 = vld [vmem:[%s795_s18] sm:$0xff]  ;;  %v434_v46 = vld [vmem:[%s795_s18 + $0x8] sm:$0xff] }
 0x14e   : > { %433 = vst [vmem:[%s402_s29] sm:$0xff] %v432_v45  ;;  %435 = vst [vmem:[%s402_s29 + $0x8] sm:$0xff] %v434_v46 }
 0x14f   : > { %s931_s5 = smov (!%p442_p10, %s446_s5), %s445_s4 }
 0x150   : > { %s606_s6 = sshll.u32 %s931_s5, 1 }
 0x151   : > { %s449_s17 = scalar_lea.vmem %s920_s2, %s606_s6 }
 0x152   : > { %466 = vst [vmem:[%s449_s17] sm:$0x3] %v465_v47 }
 0x153 PF: > { %s9_s13 = sadd.s32 1, %s713_s13   ;;  %s924_s9 = smov %s701_s10 }
 0x154   : > { %p6_p11 = scmp.ge.s32.totalorder %s9_s13, 4   ;;  %s925_s10 = smov %s779_s25 }
 0x155   : > { %s926_s11 = smov %s709_s12  ;;  %s927_s12 = smov %s929_s14 }
 0x156   :  { %8 = sbr.rel (!%p6_p11) target bundleno = 3 (0x3), region = 195 }

// kernel: custom-call.40
= control target key start
LH: loop header
LB: loop body
LE: loop exit
PB: predicated region body
PF: predicated region fallthrough
CT: control target
= control target key end

     0   :  { %s6_s0 = inlined_call_operand.hbm [shape: pred[2], index: 0, kind: output, shape index: {}]  }

// kernel: custom-call.45
= control target key start
LH: loop header
LB: loop body
LE: loop exit
PB: predicated region body
PF: predicated region fallthrough
CT: control target
= control target key end

     0   :  { %s469_s6 = smov 0   ;;  %s471_s7 = smov 0   ;;  %s549_s0 = inlined_call_operand.vmem [shape: f32[2,8,8], index: 0, kind: input, shape index: {}]   ;;  %s550_s1 = inlined_call_operand.vmem [shape: f32[2,8,8], index: 1, kind: output, shape index: {}]  }
   0x1   :  { %s473_s8 = smov 0  }
   0x2 LB: > { %s367_s9 = sadd.s32 4294967295, %s456_s8   ;;  %s26_s10 = sadd.s32 1, %s452_s7  ;;  %s456_s8 = sphi %s473_s8, %s7_s8   ;;  %s452_s7 = sphi %s471_s7, %s552_s7   ;;  %s448_s6 = sphi %s469_s6, %s551_s6  }
   0x3   : > { %p28_p0 = scmp.ge.s32.totalorder %s26_s10, 2  ;;  %p369_p1 = scmp.ge.s32.totalorder %s456_s8, 2 }
   0x4   : > { %s42_s11 = sand.u32 (!%p369_p1), 1, %s456_s8   ;;  %s371_s12 = sshll.u32 (!%p369_p1), %s452_s7, 3 }
   0x5   : > { %s554_s10 = smov (%p28_p0, %s26_s10), 0  ;;  %40 = sbr.rel (%p369_p1) target bundleno = 12 (0xc), region = 16 }
   0x6   : > { %s370_s13 = sshll.u32 (!%p369_p1), %s42_s11, 3  ;;  %s48_s16 = scalar_lea.vmem (!%p369_p1), %s549_s0, %s371_s12 }
   0x7   : > { %v76_v0 = vld [vmem:[%s48_s16] sm:$0xff] (!%p369_p1)  ;;  %s44_s17 = scalar_lea.vmem (!%p369_p1), [#allocation0], %s370_s13 }
   0x8   : > { %77 = vst [vmem:[%s44_s17] sm:$0xff] (!%p369_p1), %v76_v0 }
   0xc PF: > { %p372_p2 = scmp.ge.s32.totalorder %s456_s8, 1  ;;  %p82_p3 = scmp.lt.s32.totalorder %s456_s8, 3 }
   0xe   : > { %p83_p4 = pnand %p372_p2, %p82_p3 }
   0xf   : > { %s89_s18 = sand.u32 (!%p83_p4), 1, %s367_s9   ;;  %v458_v1 = vmov (!%p83_p4), 0.0   ;;  %vm101_vm0 = vcmask (!%p83_p4), 7168   ;;  %vm119_vm1 = vcmask (!%p83_p4), 15368   ;;  %vm136_vm2 = vcmask (!%p83_p4), 1047553   ;;  %s390_s22 = sshll.u32 (!%p83_p4), %s448_s6, 3 }
  0x10   : > { %86 = sbr.rel (%p83_p4) target bundleno = 1377 (0x561), region = 54  ;;  %s373_s19 = sshll.u32 (!%p83_p4), %s89_s18, 3  ;;  %vm137_vm3 = vmand (!%p83_p4), %vm119_vm1, %vm136_vm2  ;;  %vm141_vm4 = vcmask (!%p83_p4), 23568   ;;  %vm158_vm5 = vcmask (!%p83_p4), 1047554   ;;  %vm163_vm7 = vcmask (!%p83_p4), 31768   ;;  %vm180_vm8 = vcmask (!%p83_p4), 1047555  }
  0x11   : > { %s496_s20 = scalar_lea.vmem (!%p83_p4), [#allocation1], %s373_s19  ;;  %s500_s21 = scalar_lea.vmem (!%p83_p4), [#allocation0], %s373_s19  ;;  %vm159_vm6 = vmand (!%p83_p4), %vm141_vm4, %vm158_vm5  ;;  %vm185_vm10 = vcmask (!%p83_p4), 39968   ;;  %vm202_vm11 = vcmask (!%p83_p4), 1047556   ;;  %vm207_vm13 = vcmask (!%p83_p4), 48168   ;;  %vm224_vm14 = vcmask (!%p83_p4), 1047557  }
  0x12   : > { %100 = vst [vmem:[%s496_s20] sm:$0xff] (!%p83_p4), %v458_v1  ;;  %v103_v5 = vld [vmem:[%s500_s21] ss:$0 sm:$0xff] (!%p83_p4)  ;;  %v376_v17 = vld [vmem:[%s500_s21 + $0x1] ss:$0 sm:$0xff] (!%p83_p4)  ;;  %v378_v29 = vld [vmem:[%s500_s21 + $0x2] ss:$0 sm:$0xff] (!%p83_p4)  ;;  %s280_s25 = scalar_lea.vmem (!%p83_p4), %s550_s1, %s390_s22 }
  0x13   : > { %v504_v9 = vld [vmem:[%s500_s21] sm:$0xff] (!%p83_p4)  ;;  %vm181_vm9 = vmand (!%p83_p4), %vm163_vm7, %vm180_vm8  ;;  %vm246_vm1 = vcmask (!%p83_p4), 1047558   ;;  %vm268_vm4 = vcmask (!%p83_p4), 1047559  }
  0x14   : > { %v380_v41 = vld [vmem:[%s500_s21 + $0x3] ss:$0 sm:$0xff] (!%p83_p4)  ;;  %v382_v53 = vld [vmem:[%s500_s21 + $0x4] ss:$0 sm:$0xff] (!%p83_p4)  ;;  %vm203_vm12 = vmand (!%p83_p4), %vm185_vm10, %vm202_vm11 }
  0x15   : > { %v384_v1 = vld [vmem:[%s500_s21 + $0x5] ss:$0 sm:$0xff] (!%p83_p4)  ;;  %vm225_vm15 = vmand (!%p83_p4), %vm207_vm13, %vm224_vm14 }
  0x19   : > { %v102_v2 = vld [vmem:[%s496_s20] ss:$0 sm:$0xff] }
  0x1a   : > { %v104_v3 = vmul.f32 %v102_v2, %v102_v2  ;;  %v111_v4 = vmul.f32 0.0, %v102_v2 }
  0x1c   : > { %105 = vadd.xlane.f32.xlu0 %v104_v3 }
  0x20   : > { %112 = vadd.xlane.f32.xlu0 %v111_v4 }
  0xa9   : > { %v106_v6 = vpop.xlane.xlu0 %105 }
  0xaa   : > { %v107_v7 = vsub.f32 %v103_v5, %v106_v6 }
  0xac   : > { %418 = vrsqrt.f32 %v107_v7 }
  0xad   : > { %v113_v8 = vpop.xlane.xlu0 %112 }
  0xae   : > { %v114_v10 = vsub.f32 %v504_v9, %v113_v8 }
  0xb6   : > { %v419_v11 = vpop.eup %418 }
  0xb7   : > { %v115_v12 = vmul.f32 %v419_v11, %v114_v10 }
  0xb9   : > { %v116_v13 = vsel %vm101_vm0, %v115_v12, 0.0  ;;  %vm229_vm0 = vcmask 56368  }
  0xba   : > { %118 = vst [vmem:[%s496_s20] sm:$0xff] %v116_v13  ;;  %vm247_vm2 = vmand %vm229_vm0, %vm246_vm1 }
  0xc1   : > { %v375_v14 = vld [vmem:[%s496_s20 + $0x1] ss:$0 sm:$0xff] }
  0xc2   : > { %v124_v15 = vmul.f32 %v375_v14, %v375_v14  ;;  %v131_v16 = vmul.f32 %v375_v14, %v116_v13  ;;  %v386_v14 = vld [vmem:[%s500_s21 + $0x6] ss:$0 sm:$0xff] }
  0xc4   : > { %125 = vadd.xlane.f32.xlu1 %v124_v15 }
  0xc8   : > { %132 = vadd.xlane.f32.xlu1 %v131_v16 }
 0x151   : > { %v126_v18 = vpop.xlane.xlu1 %125 }
 0x152   : > { %v127_v19 = vsub.f32 %v376_v17, %v126_v18 }
 0x154   : > { %420 = vrsqrt.f32 %v127_v19 }
 0x155   : > { %v133_v20 = vpop.xlane.xlu1 %132 }
 0x156   : > { %v134_v21 = vsub.f32 %v504_v9, %v133_v20 }
 0x15e   : > { %v421_v22 = vpop.eup %420 }
 0x15f   : > { %v135_v23 = vmul.f32 %v421_v22, %v134_v21 }
 0x161   : > { %v138_v24 = vsel %vm137_vm3, %v135_v23, 0.0  ;;  %vm251_vm3 = vcmask 64568  }
 0x162   : > { %v139_v25 = vadd.f32 %v138_v24, %v116_v13  ;;  %vm269_vm5 = vmand %vm251_vm3, %vm268_vm4 }
 0x164   : > { %140 = vst [vmem:[%s496_s20] sm:$0xff] %v139_v25 }
 0x16b   : > { %v377_v26 = vld [vmem:[%s496_s20 + $0x2] ss:$0 sm:$0xff] }
 0x16c   : > { %v153_v27 = vmul.f32 %v377_v26, %v139_v25  ;;  %v146_v28 = vmul.f32 %v377_v26, %v377_v26  ;;  %v388_v26 = vld [vmem:[%s500_s21 + $0x7] ss:$0 sm:$0xff] }
 0x16e   : > { %154 = vadd.xlane.f32.xlu1 %v153_v27  ;;  %147 = vadd.xlane.f32.xlu0 %v146_v28 }
 0x1fb   : > { %v148_v30 = vpop.xlane.xlu0 %147  ;;  %v155_v32 = vpop.xlane.xlu1 %154 }
 0x1fc   : > { %v149_v31 = vsub.f32 %v378_v29, %v148_v30  ;;  %v156_v33 = vsub.f32 %v504_v9, %v155_v32 }
 0x1fe   : > { %422 = vrsqrt.f32 %v149_v31 }
 0x208   : > { %v423_v34 = vpop.eup %422 }
 0x209   : > { %v157_v35 = vmul.f32 %v423_v34, %v156_v33 }
 0x20b   : > { %v160_v36 = vsel %vm159_vm6, %v157_v35, 0.0 }
 0x20c   : > { %v161_v37 = vadd.f32 %v160_v36, %v139_v25 }
 0x20e   : > { %162 = vst [vmem:[%s496_s20] sm:$0xff] %v161_v37 }
 0x215   : > { %v379_v38 = vld [vmem:[%s496_s20 + $0x3] ss:$0 sm:$0xff] }
 0x216   : > { %v175_v39 = vmul.f32 %v379_v38, %v161_v37  ;;  %v168_v40 = vmul.f32 %v379_v38, %v379_v38 }
 0x218   : > { %176 = vadd.xlane.f32.xlu1 %v175_v39  ;;  %169 = vadd.xlane.f32.xlu0 %v168_v40 }
 0x2a5   : > { %v170_v42 = vpop.xlane.xlu0 %169  ;;  %v177_v44 = vpop.xlane.xlu1 %176 }
 0x2a6   : > { %v171_v43 = vsub.f32 %v380_v41, %v170_v42  ;;  %v178_v45 = vsub.f32 %v504_v9, %v177_v44 }
 0x2a8   : > { %424 = vrsqrt.f32 %v171_v43 }
 0x2b2   : > { %v425_v46 = vpop.eup %424 }
 0x2b3   : > { %v179_v47 = vmul.f32 %v425_v46, %v178_v45 }
 0x2b5   : > { %v182_v48 = vsel %vm181_vm9, %v179_v47, 0.0 }
 0x2b6   : > { %v183_v49 = vadd.f32 %v182_v48, %v161_v37 }
 0x2b8   : > { %184 = vst [vmem:[%s496_s20] sm:$0xff] %v183_v49 }
 0x2bf   : > { %v381_v50 = vld [vmem:[%s496_s20 + $0x4] ss:$0 sm:$0xff] }
 0x2c0   : > { %v197_v51 = vmul.f32 %v381_v50, %v183_v49  ;;  %v190_v52 = vmul.f32 %v381_v50, %v381_v50 }
 0x2c2   : > { %198 = vadd.xlane.f32.xlu1 %v197_v51  ;;  %191 = vadd.xlane.f32.xlu0 %v190_v52 }
 0x34f   : > { %v192_v54 = vpop.xlane.xlu0 %191  ;;  %v199_v56 = vpop.xlane.xlu1 %198 }
 0x350   : > { %v193_v55 = vsub.f32 %v382_v53, %v192_v54  ;;  %v200_v57 = vsub.f32 %v504_v9, %v199_v56 }
 0x352   : > { %426 = vrsqrt.f32 %v193_v55 }
 0x35c   : > { %v427_v58 = vpop.eup %426 }
 0x35d   : > { %v201_v59 = vmul.f32 %v427_v58, %v200_v57 }
 0x35f   : > { %v204_v60 = vsel %vm203_vm12, %v201_v59, 0.0 }
 0x360   : > { %v205_v61 = vadd.f32 %v204_v60, %v183_v49 }
 0x362   : > { %206 = vst [vmem:[%s496_s20] sm:$0xff] %v205_v61 }
 0x369   : > { %v383_v62 = vld [vmem:[%s496_s20 + $0x5] ss:$0 sm:$0xff] }
 0x36a   : > { %v219_v63 = vmul.f32 %v383_v62, %v205_v61  ;;  %v212_v0 = vmul.f32 %v383_v62, %v383_v62 }
 0x36c   : > { %220 = vadd.xlane.f32.xlu1 %v219_v63  ;;  %213 = vadd.xlane.f32.xlu0 %v212_v0 }
 0x3f9   : > { %v214_v2 = vpop.xlane.xlu0 %213  ;;  %v221_v4 = vpop.xlane.xlu1 %220 }
 0x3fa   : > { %v215_v3 = vsub.f32 %v384_v1, %v214_v2  ;;  %v222_v5 = vsub.f32 %v504_v9, %v221_v4 }
 0x3fc   : > { %428 = vrsqrt.f32 %v215_v3 }
 0x406   : > { %v429_v6 = vpop.eup %428 }
 0x407   : > { %v223_v7 = vmul.f32 %v429_v6, %v222_v5 }
 0x409   : > { %v226_v8 = vsel %vm225_vm15, %v223_v7, 0.0 }
 0x40a   : > { %v227_v10 = vadd.f32 %v226_v8, %v205_v61 }
 0x40c   : > { %228 = vst [vmem:[%s496_s20] sm:$0xff] %v227_v10 }
 0x413   : > { %v385_v11 = vld [vmem:[%s496_s20 + $0x6] ss:$0 sm:$0xff] }
 0x414   : > { %v241_v12 = vmul.f32 %v385_v11, %v227_v10  ;;  %v234_v13 = vmul.f32 %v385_v11, %v385_v11 }
 0x416   : > { %242 = vadd.xlane.f32.xlu1 %v241_v12  ;;  %235 = vadd.xlane.f32.xlu0 %v234_v13 }
 0x4a3   : > { %v236_v15 = vpop.xlane.xlu0 %235  ;;  %v243_v17 = vpop.xlane.xlu1 %242 }
 0x4a4   : > { %v237_v16 = vsub.f32 %v386_v14, %v236_v15  ;;  %v244_v18 = vsub.f32 %v504_v9, %v243_v17 }
 0x4a6   : > { %430 = vrsqrt.f32 %v237_v16 }
 0x4b0   : > { %v431_v19 = vpop.eup %430 }
 0x4b1   : > { %v245_v20 = vmul.f32 %v431_v19, %v244_v18 }
 0x4b3   : > { %v248_v21 = vsel %vm247_vm2, %v245_v20, 0.0 }
 0x4b4   : > { %v249_v22 = vadd.f32 %v248_v21, %v227_v10 }
 0x4b6   : > { %250 = vst [vmem:[%s496_s20] sm:$0xff] %v249_v22 }
 0x4bd   : > { %v387_v23 = vld [vmem:[%s496_s20 + $0x7] ss:$0 sm:$0xff] }
 0x4be   : > { %v263_v24 = vmul.f32 %v387_v23, %v249_v22  ;;  %v256_v25 = vmul.f32 %v387_v23, %v387_v23 }
 0x4c0   : > { %264 = vadd.xlane.f32.xlu1 %v263_v24  ;;  %257 = vadd.xlane.f32.xlu0 %v256_v25 }
 0x54d   : > { %v258_v27 = vpop.xlane.xlu0 %257  ;;  %v265_v29 = vpop.xlane.xlu1 %264 }
 0x54e   : > { %v259_v28 = vsub.f32 %v388_v26, %v258_v27  ;;  %v266_v30 = vsub.f32 %v504_v9, %v265_v29 }
 0x550   : > { %432 = vrsqrt.f32 %v259_v28 }
 0x55a   : > { %v433_v31 = vpop.eup %432 }
 0x55b   : > { %v267_v32 = vmul.f32 %v433_v31, %v266_v30 }
 0x55d   : > { %v270_v33 = vsel %vm269_vm5, %v267_v32, 0.0 }
 0x55e   : > { %v271_v34 = vadd.f32 %v270_v33, %v249_v22 }
 0x560   : > { %272 = vst [vmem:[%s496_s20] sm:$0xff] %v271_v34  ;;  %309 = vst [vmem:[%s280_s25] sm:$0xff] %v271_v34 }
 0x561 PF: > { %s7_s8 = sadd.s32 1, %s456_s8   ;;  %s551_s6 = smov %s452_s7 }
 0x562   : > { %p4_p5 = scmp.ge.s32.totalorder %s7_s8, 4   ;;  %s552_s7 = smov %s554_s10 }
 0x564   :  { %6 = sbr.rel (!%p4_p5) target bundleno = 2 (0x2), region = 132 }

// kernel: custom-call.46
= control target key start
LH: loop header
LB: loop body
LE: loop exit
PB: predicated region body
PF: predicated region fallthrough
CT: control target
= control target key end

     0   :  { %s385_s6 = smov 0   ;;  %s387_s7 = smov 0   ;;  %s443_s0 = inlined_call_operand.vmem [shape: f32[2,1,8,8], index: 0, kind: input, shape index: {}]   ;;  %s444_s1 = inlined_call_operand.vmem [shape: f32[2,1,8,8], index: 1, kind: output, shape index: {}]  }
   0x1   :  { %s389_s8 = smov 0  }
   0x2 LB: > { %s311_s9 = sadd.s32 4294967295, %s372_s8   ;;  %s33_s10 = sadd.s32 1, %s368_s7  ;;  %s372_s8 = sphi %s389_s8, %s7_s8   ;;  %s368_s7 = sphi %s387_s7, %s446_s7   ;;  %s364_s6 = sphi %s385_s6, %s445_s6  }
   0x3   : > { %p35_p0 = scmp.ge.s32.totalorder %s33_s10, 2  ;;  %p313_p1 = scmp.ge.s32.totalorder %s372_s8, 2 }
   0x4   : > { %s49_s11 = sand.u32 (!%p313_p1), 1, %s372_s8   ;;  %s315_s12 = sshll.u32 (!%p313_p1), %s368_s7, 3 }
   0x5   : > { %s448_s10 = smov (%p35_p0, %s33_s10), 0  ;;  %47 = sbr.rel (%p313_p1) target bundleno = 12 (0xc), region = 16 }
   0x6   : > { %s314_s13 = sshll.u32 (!%p313_p1), %s49_s11, 3  ;;  %s56_s16 = scalar_lea.vmem (!%p313_p1), %s443_s0, %s315_s12 }
   0x7   : > { %v84_v0 = vld [vmem:[%s56_s16] sm:$0xff] (!%p313_p1)  ;;  %s51_s17 = scalar_lea.vmem (!%p313_p1), [#allocation0], %s314_s13 }
   0x8   : > { %85 = vst [vmem:[%s51_s17] sm:$0xff] (!%p313_p1), %v84_v0 }
   0xc PF: > { %p316_p2 = scmp.ge.s32.totalorder %s372_s8, 1  ;;  %p90_p3 = scmp.lt.s32.totalorder %s372_s8, 3 }
   0xe   : > { %p91_p4 = pnand %p316_p2, %p90_p3 }
  0x10   : > { %94 = sbr.rel (%p91_p4) target bundleno = 1213 (0x4bd), region = 54 }
  0x17   : > { %s97_s18 = sand.u32 1, %s311_s9   ;;  %v108_v1 = vlaneseq  ;;  %v374_v10 = vmov -1.0   ;;  %s320_s21 = sshll.u32 %s364_s6, 3 }
  0x18   : > { %s317_s19 = sshll.u32 %s97_s18, 3  ;;  %s219_s24 = scalar_lea.vmem %s444_s1, %s320_s21 }
  0x19   : > { %v412_v2 = vand.u32 127, %v108_v1  ;;  %v112_v3 = vshrl.u32 %v108_v1, 7  ;;  %s99_s20 = scalar_lea.vmem [#allocation0], %s317_s19 }
  0x1a   : > { %v115_v4 = vld [vmem:[%s99_s20] sm:$0xff] }
  0x1b   : > { %vm110_vm0 = vcmp.lt.s32.totalorder %v412_v2, 8  ;;  %vm114_vm1 = vcmp.eq.s32.totalorder %v112_v3, %v412_v2  ;;  %vm119_vm2 = vcmp.ge.s32.totalorder %v112_v3, %v412_v2  ;;  %vm133_vm4 = vcmp.eq.s32.totalorder %v412_v2, 0 }
  0x1c   : > { %v116_v5 = vsel %vm114_vm1, %v115_v4, 0.0  ;;  %vm120_vm3 = vmand %vm119_vm2, %vm110_vm0  ;;  %vm130_vm5 = vcmp.eq.s32.totalorder %v412_v2, %v112_v3  ;;  %v134_v11 = vsel %vm133_vm4, 1.0, %v374_v10  ;;  %vm141_vm6 = vcmp.eq.s32.totalorder %v412_v2, 1 }
  0x1d   : > { %v121_v6 = vsel %vm120_vm3, %v115_v4, 0.0  ;;  %117 = vadd.xlane.f32.xlu0 %v116_v5  ;;  %v135_v12 = vsel %vm130_vm5, %v134_v11, 0.0  ;;  %vm151_vm7 = vcmp.eq.s32.totalorder %v412_v2, 2  ;;  %vm161_vm8 = vcmp.eq.s32.totalorder %v412_v2, 3 }
  0x1e   : > { %vm171_vm9 = vcmp.eq.s32.totalorder %v412_v2, 4  ;;  %vm181_vm10 = vcmp.eq.s32.totalorder %v412_v2, 5  ;;  %vm191_vm11 = vcmp.eq.s32.totalorder %v412_v2, 6  ;;  %vm201_vm12 = vcmp.eq.s32.totalorder %v412_v2, 7 }
  0xaa   : > { %v417_v7 = vpop.xlane.xlu0 %117 }
  0xab   : > { %348 = vrcp.f32 %v417_v7  ;;  %vm208_vm13 = vweird.f32 %v417_v7 }
  0xb5   : > { %v349_v8 = vpop.eup %348 }
  0xb6   : > { %v123_v9 = vmul.f32 %v349_v8, %v121_v6 }
  0xb8   : > { %124 = vst [vmem:[#allocation2] sm:$0xff] %v123_v9 }
  0xbf   : > { %v137_v13 = vld [vmem:[#allocation2 + $0x1] ss:$0 sm:$0xff]  ;;  %v147_v16 = vld [vmem:[#allocation2 + $0x2] ss:$0 sm:$0xff]  ;;  %v157_v21 = vld [vmem:[#allocation2 + $0x3] ss:$0 sm:$0xff] }
  0xc0   : > { %v138_v14 = vxor.u32 2147483648, %v137_v13  ;;  %v148_v18 = vxor.u32 2147483648, %v147_v16  ;;  %v158_v23 = vxor.u32 2147483648, %v157_v21  ;;  %v167_v26 = vld [vmem:[#allocation2 + $0x4] ss:$0 sm:$0xff] }
  0xc1   : > { %v168_v28 = vxor.u32 2147483648, %v167_v26  ;;  %v177_v31 = vld [vmem:[#allocation2 + $0x5] ss:$0 sm:$0xff]  ;;  %v187_v36 = vld [vmem:[#allocation2 + $0x6] ss:$0 sm:$0xff] }
  0xc2   : > { %v142_v15 = vmul.f32 %v138_v14, %v135_v12  ;;  %v178_v33 = vxor.u32 2147483648, %v177_v31  ;;  %v188_v38 = vxor.u32 2147483648, %v187_v36  ;;  %v197_v41 = vld [vmem:[#allocation2 + $0x7] ss:$0 sm:$0xff] }
  0xc3   : > { %v198_v43 = vxor.u32 2147483648, %v197_v41 }
  0xc4   : > { %143 = vadd.xlane.f32.xlu0 %v142_v15 }
 0x151   : > { %v144_v17 = vpop.xlane.xlu0 %143 }
 0x152   : > { %v145_v19 = vsel %vm141_vm6, %v144_v17, %v135_v12 }
 0x153   : > { %v152_v20 = vmul.f32 %v148_v18, %v145_v19 }
 0x155   : > { %153 = vadd.xlane.f32.xlu1 %v152_v20 }
 0x1e2   : > { %v154_v22 = vpop.xlane.xlu1 %153 }
 0x1e3   : > { %v155_v24 = vsel %vm151_vm7, %v154_v22, %v145_v19 }
 0x1e4   : > { %v162_v25 = vmul.f32 %v158_v23, %v155_v24 }
 0x1e6   : > { %163 = vadd.xlane.f32.xlu1 %v162_v25 }
 0x273   : > { %v164_v27 = vpop.xlane.xlu1 %163 }
 0x274   : > { %v165_v29 = vsel %vm161_vm8, %v164_v27, %v155_v24 }
 0x275   : > { %v172_v30 = vmul.f32 %v168_v28, %v165_v29 }
 0x277   : > { %173 = vadd.xlane.f32.xlu0 %v172_v30 }
 0x304   : > { %v174_v32 = vpop.xlane.xlu0 %173 }
 0x305   : > { %v175_v34 = vsel %vm171_vm9, %v174_v32, %v165_v29 }
 0x306   : > { %v182_v35 = vmul.f32 %v178_v33, %v175_v34 }
 0x308   : > { %183 = vadd.xlane.f32.xlu1 %v182_v35 }
 0x395   : > { %v184_v37 = vpop.xlane.xlu1 %183 }
 0x396   : > { %v185_v39 = vsel %vm181_vm10, %v184_v37, %v175_v34 }
 0x397   : > { %v192_v40 = vmul.f32 %v188_v38, %v185_v39 }
 0x399   : > { %193 = vadd.xlane.f32.xlu0 %v192_v40 }
 0x426   : > { %v194_v42 = vpop.xlane.xlu0 %193 }
 0x427   : > { %v195_v44 = vsel %vm191_vm11, %v194_v42, %v185_v39 }
 0x428   : > { %v202_v45 = vmul.f32 %v198_v43, %v195_v44 }
 0x42a   : > { %203 = vadd.xlane.f32.xlu1 %v202_v45 }
 0x4b7   : > { %v204_v46 = vpop.xlane.xlu1 %203 }
 0x4b8   : > { %v205_v47 = vsel %vm201_vm12, %v204_v46, %v195_v44 }
 0x4b9   : > { %v207_v48 = vmul.f32 %v349_v8, %v205_v47 }
 0x4bb   : > { %v209_v49 = vsel %vm208_vm13, %v205_v47, %v207_v48 }
 0x4bc   : > { %248 = vst [vmem:[%s219_s24] sm:$0xff] %v209_v49 }
 0x4bd PF: > { %s7_s8 = sadd.s32 1, %s372_s8   ;;  %s445_s6 = smov %s368_s7 }
 0x4be   : > { %p4_p5 = scmp.ge.s32.totalorder %s7_s8, 4   ;;  %s446_s7 = smov %s448_s10 }
 0x4c0   :  { %6 = sbr.rel (!%p4_p5) target bundleno = 2 (0x2), region = 125 }

// kernel: custom-call.34
= control target key start
LH: loop header
LB: loop body
LE: loop exit
PB: predicated region body
PF: predicated region fallthrough
CT: control target
= control target key end

     0   :  { %s1704_s30 = smov 0   ;;  %s1706_s10 = smov 0   ;;  %s2031_s0 = inlined_call_operand.vmem [shape: f32[2,4,4], index: 0, kind: input, shape index: {}]   ;;  %s2032_s1 = inlined_call_operand.vmem [shape: f32[2,4,4], index: 1, kind: input, shape index: {}]   ;;  %s2033_s2 = inlined_call_operand.vmem [shape: f32[2,4,4], index: 2, kind: input, shape index: {}]   ;;  %s2034_s3 = inlined_call_operand.vmem [shape: f32[2,4,4], index: 3, kind: input, shape index: {}]   ;;  %s2035_s4 = inlined_call_operand.vmem [shape: f32[2,4], index: 4, kind: output, shape index: {0}]   ;;  %s2036_s5 = inlined_call_operand.vmem [shape: f32[2,4], index: 5, kind: output, shape index: {1}]   ;;  %s2037_s6 = inlined_call_operand.vmem [shape: f32[2,4,4], index: 6, kind: output, shape index: {2}]   ;;  %s2038_s7 = inlined_call_operand.vmem [shape: f32[2,4,4], index: 7, kind: output, shape index: {3}]   ;;  %s2039_s8 = inlined_call_operand.vmem [shape: f32[2,4,4], index: 8, kind: output, shape index: {4}]   ;;  %s2040_s9 = inlined_call_operand.vmem [shape: f32[2,4,4], index: 9, kind: output, shape index: {5}]  }
   0x1   :  { %s1708_s11 = smov 0  }
   0x2 LB: > { %s1720_s12 = sadd.s32 4294967295, %s1641_s11   ;;  %s1723_s13 = sadd.s32 1, %s1641_s11   ;;  %s1641_s11 = sphi %s1708_s11, %s2059_s11   ;;  %s1637_s10 = sphi %s1706_s10, %s2058_s10   ;;  %s1633_s30 = sphi %s1704_s30, %s2057_s30  }
   0x3   : > { %s20_s14 = sshrl.u32 %s1641_s11, 3  ;;  %s21_s15 = sshrl.u32 %s1723_s13, 3 }
   0x4   : > { %s22_s16 = ssub.s32 %s20_s14, %s21_s15  ;;  %s25_s17 = sadd.s32 1, %s1637_s10 }
   0x5   : > { %p23_p0 = scmp.eq.s32.totalorder %s22_s16, 0  ;;  %p35_p1 = scmp.ne.s32.totalorder %s1637_s10, %s1633_s30 }
   0x6   : > { %p36_p2 = scmp.eq.s32.totalorder %s1720_s12, 1  ;;  %p1502_p4 = scmp.ge.s32.totalorder %s1641_s11, 2 }
   0x7   : > { %s1732_s18 = scalar_select %p23_p0, %s1637_s10, %s25_s17  }
   0x8   : > { %p1734_p3 = por %p36_p2, %p35_p1  ;;  %86 = sbr.rel (%p1502_p4) target bundleno = 17 (0x11), region = 16 }
   0x9   : > { %2041 = sst [smem:[#allocation33_spill]] %s1732_s18  ;;  %s88_s20 = sand.u32 (!%p1502_p4), 1, %s1641_s11  }
   0xa   : > { %s1504_s21 = sshll.u32 (!%p1502_p4), %s1641_s11, 2  ;;  %s1503_s22 = sshll.u32 (!%p1502_p4), %s88_s20, 2 }
   0xb   : > { %s92_s25 = scalar_lea.vmem (!%p1502_p4), %s2031_s0, %s1504_s21  ;;  %s90_s26 = scalar_lea.vmem (!%p1502_p4), [#allocation1], %s1503_s22 }
   0xc   : > { %v108_v0 = vld [vmem:[%s92_s25] sm:$0xf] (!%p1502_p4)  ;;  %s129_s29 = scalar_lea.vmem (!%p1502_p4), %s2032_s1, %s1504_s21  ;;  %s166_s16 = scalar_lea.vmem (!%p1502_p4), %s2033_s2, %s1504_s21 }
   0xd   : > { %109 = vst [vmem:[%s90_s26] sm:$0xf] (!%p1502_p4), %v108_v0  ;;  %v145_v1 = vld [vmem:[%s129_s29] sm:$0xf] (!%p1502_p4)  ;;  %s127_s17 = scalar_lea.vmem (!%p1502_p4), [#allocation3], %s1503_s22  ;;  %s203_s23 = scalar_lea.vmem (!%p1502_p4), %s2034_s3, %s1504_s21 }
   0xe   : > { %146 = vst [vmem:[%s127_s17] sm:$0xf] (!%p1502_p4), %v145_v1  ;;  %v182_v2 = vld [vmem:[%s166_s16] sm:$0xf] (!%p1502_p4)  ;;  %s164_s24 = scalar_lea.vmem (!%p1502_p4), [#allocation5], %s1503_s22  ;;  %s201_s25 = scalar_lea.vmem (!%p1502_p4), [#allocation7], %s1503_s22 }
   0xf   : > { %183 = vst [vmem:[%s164_s24] sm:$0xf] %v182_v2  ;;  %v219_v3 = vld [vmem:[%s203_s23] sm:$0xf] }
  0x10   : > { %220 = vst [vmem:[%s201_s25] sm:$0xf] %v219_v3 }
  0x11 PF: > { %p1511_p5 = scmp.ge.s32.totalorder %s1641_s11, 1  ;;  %p236_p6 = scmp.lt.s32.totalorder %s1641_s11, 3 }
  0x13   : > { %p237_p7 = pnand %p1511_p5, %p236_p6 }
  0x15   : > { %240 = sbr.rel (%p237_p7) target bundleno = 999 (0x3e7), region = 140 }
  0x1c   : > { %s259_s26 = sand.u32 1, %s1720_s12   ;;  %s277_s27 = sand.u32 1, %s1633_s30   ;;  %v337_v4 = vlaneseq  ;;  %v1651_v5 = vmov 0.0  }
  0x1d   : > { %s1757_s28 = sshll.u32 %s259_s26, 2  ;;  %s1759_s18 = sshll.u32 %s277_s27, 1  ;;  %332 = vst [vmem:[#allocation12] sm:$0xff] %v1651_v5  ;;  %333 = vst [vmem:[#allocation14] sm:$0xff] %v1651_v5 }
  0x1e   : > { %334 = vst [vmem:[#allocation16] sm:$0xff] %v1651_v5  ;;  %335 = vst [vmem:[#allocation18] sm:$0xff] %v1651_v5  ;;  %v1761_v6 = vand.u32 127, %v337_v4  ;;  %v1763_v7 = vshrl.u32 %v337_v4, 7  ;;  %s261_s11 = scalar_lea.vmem [#allocation1], %s1757_s28  ;;  %s265_s30 = scalar_lea.vmem [#allocation3], %s1757_s28 }
  0x1f   : > { %v304_v8 = vld [vmem:[%s261_s11] sm:$0xf]  ;;  %v308_v9 = vld [vmem:[%s265_s30] sm:$0xf]  ;;  %s269_s21 = scalar_lea.vmem [#allocation5], %s1757_s28  ;;  %s273_s22 = scalar_lea.vmem [#allocation7], %s1757_s28 }
  0x20   : > { %305 = vst [vmem:[#allocation0] sm:$0xf] %v304_v8  ;;  %309 = vst [vmem:[#allocation2] sm:$0xf] %v308_v9  ;;  %v312_v10 = vld [vmem:[%s269_s21] sm:$0xf]  ;;  %v339_v6 = vmov %v1761_v6  ;;  %v342_v7 = vmov %v1763_v7 }
  0x21   : > { %v316_v11 = vld [vmem:[%s273_s22] sm:$0xf]  ;;  %313 = vst [vmem:[#allocation4] sm:$0xf] %v312_v10  ;;  %v352_v6 = vmov %v1761_v6  ;;  %v355_v7 = vmov %v1763_v7  ;;  %s320_s29 = smov [#allocation20]  ;;  %s323_s14 = smov [#allocation21]  ;;  %vm346_vm0 = vcmp.eq.s32.totalorder %v342_v7, %v339_v6 }
  0x22   : > { %317 = vst [vmem:[#allocation6] sm:$0xf] %v316_v11  ;;  %vm359_vm1 = vcmp.eq.s32.totalorder %v355_v7, %v352_v6  ;;  %s336_s15 = smov [#allocation12]  ;;  %s349_s16 = smov [#allocation18]  ;;  %vm1391_vm2 = vcmp.lt.s32.totalorder %v1761_v6, 4  ;;  %v1383_v6 = vmov %v1761_v6  ;;  %v1386_v7 = vmov %v1763_v7 }
  0x23   : > { %s326_s17 = smov [#allocation22]  ;;  %s329_s20 = smov [#allocation23]  ;;  %vm1396_vm3 = vcmp.eq.s32.totalorder %v1386_v7, %v1383_v6  ;;  %v1434_v6 = vmov %v1761_v6  ;;  %v1403_v7 = vmov %v1763_v7 }
  0x24   : > { %v343_v12 = vld [vmem:[%s336_s15] sm:$0xf]  ;;  %s1387_s30 = smov [#allocation20]  ;;  %s1404_s21 = smov [#allocation21]  ;;  %v1400_v6 = vmov %v1761_v6  ;;  %v1437_v7 = vmov %v1763_v7 }
  0x25   : > { %v356_v13 = vld [vmem:[%s349_s16] sm:$0xf]  ;;  %v347_v16 = vsel %vm346_vm0, 1.0, %v343_v12  ;;  %s1421_s22 = smov [#allocation22]  ;;  %v1417_v6 = vmov %v1761_v6  ;;  %v1420_v7 = vmov %v1763_v7  ;;  %vm1447_vm4 = vcmp.eq.s32.totalorder %v1437_v7, %v1434_v6 }
  0x26   : > { %v360_v17 = vsel %vm359_vm1, 1.0, %v356_v13  ;;  %348 = vst [vmem:[%s336_s15] sm:$0xf] %v347_v16 }
  0x27   : > { %v321_v14 = vld [vmem:[#allocation0] sm:$0xff]  ;;  %v324_v15 = vld [vmem:[#allocation2] sm:$0xff]  ;;  %361 = vst [vmem:[%s349_s16] sm:$0xf] %v360_v17 }
  0x28   : > { %322 = vst [vmem:[%s320_s29] sm:$0xff] %v321_v14  ;;  %325 = vst [vmem:[%s323_s14] sm:$0xff] %v324_v15  ;;  %v327_v18 = vld [vmem:[#allocation4] sm:$0xff]  ;;  %s1438_s29 = smov [#allocation23] }
  0x29   : > { %v330_v19 = vld [vmem:[#allocation6] sm:$0xff]  ;;  %328 = vst [vmem:[%s326_s17] sm:$0xff] %v327_v18 }
  0x2a   : > { %331 = vst [vmem:[%s329_s20] sm:$0xff] %v330_v19 }
  0x2f   : > { %v1393_v20 = vld [vmem:[%s1387_s30] sm:$0xf] }
  0x30   : > { %v1410_v21 = vld [vmem:[%s1404_s21] sm:$0xf]  ;;  %v1394_v22 = vsel %vm1391_vm2, %v1393_v20, 0.0 }
  0x31   : > { %v1411_v23 = vsel %vm1391_vm2, %v1410_v21, 0.0  ;;  %v1427_v24 = vld [vmem:[%s1421_s22] sm:$0xf]  ;;  %v1395_v26 = vmul.f32 %v1394_v22, %v1394_v22 }
  0x32   : > { %v1444_v25 = vld [vmem:[%s1438_s29] sm:$0xf]  ;;  %v1412_v27 = vmul.f32 %v1411_v23, %v1411_v23  ;;  %v1428_v28 = vsel %vm1391_vm2, %v1427_v24, 0.0 }
  0x33   : > { %v1445_v29 = vsel %vm1391_vm2, %v1444_v25, 0.0  ;;  %v1429_v30 = vmul.f32 %v1428_v28, %v1428_v28  ;;  %v1397_v33 = vsel %vm1396_vm3, 0.0, %v1395_v26 }
  0x34   : > { %v1414_v31 = vadd.f32 %v1412_v27, %v1395_v26  ;;  %v1446_v32 = vmul.f32 %v1445_v29, %v1445_v29  ;;  %v1413_v34 = vadd.f32 %v1412_v27, %v1397_v33 }
  0x36   : > { %v1431_v35 = vadd.f32 %v1429_v30, %v1414_v31  ;;  %v1430_v36 = vadd.f32 %v1429_v30, %v1413_v34  ;;  %v1448_v37 = vsel %vm1447_vm4, 0.0, %v1446_v32 }
  0x38   : > { %v1450_v38 = vadd.f32 %v1446_v32, %v1431_v35  ;;  %v1449_v39 = vadd.f32 %v1448_v37, %v1430_v36 }
  0x3a   : > { %1451 = vadd.xlane.f32.xlu0 %v1450_v38 }
  0x3e   : > { %1459 = vadd.xlane.f32.xlu0 %v1449_v39 }
  0xc7   : > { %v1452_v40 = vpop.xlane.xlu0 %1451 }
  0xc8   : > { %v1453_v41 = vrot.slane %v1452_v40, 4 }
  0xca   : > { %v1454_v42 = vadd.f32 %v1453_v41, %v1452_v40 }
  0xcb   : > { %v1460_v43 = vpop.xlane.xlu0 %1459 }
  0xcc   : > { %v1455_v44 = vrot.slane %v1454_v42, 2  ;;  %v1461_v45 = vrot.slane %v1460_v43, 4 }
  0xce   : > { %v1462_v46 = vadd.f32 %v1461_v45, %v1460_v43  ;;  %v1456_v47 = vadd.f32 %v1455_v44, %v1454_v42 }
  0xd0   : > { %v1463_v48 = vrot.slane %v1462_v46, 2  ;;  %v1457_v50 = vrot.slane %v1456_v47, 1 }
  0xd2   : > { %v1464_v49 = vadd.f32 %v1463_v48, %v1462_v46  ;;  %v1458_v53 = vadd.f32 %v1457_v50, %v1456_v47 }
  0xd4   : > { %v1465_v51 = vrot.slane %v1464_v49, 1 }
  0xd6   : > { %v1466_v52 = vadd.f32 %v1465_v51, %v1464_v49 }
  0xd8   : > { %1552 = vpush %v1466_v52 }
  0xd9   : > { %1554 = vpush %v1458_v53 }
 0x109   : > { %s1553_s14 = spop %1552 }
 0x10a   : > { %s1555_s15 = spop %1554 }
 0x10b   : > { %s1469_s16 = smul.f32 1e-10, %s1555_s15 }
 0x10d   : > { %p1470_p8 = scmp.le.f32.partialorder %s1553_s14, %s1469_s16 }
 0x10e   : > { %s1797_s17 = smov (!%p1470_p8), 0  }
 0x10f   : > { %1473 = sbr.rel (%p1470_p8) target bundleno = 953 (0x3b9), region = 467 }
 0x116 LB: >> { %s1802_s20 = smov 0   ;;  %s1645_s17 = sphi %s1797_s17, %s2043_s17  }
 0x117 LB: >>> { %s466_s30 = smov [#allocation20]  ;;  %v470_v6 = vmov %v1761_v6  ;;  %v473_v7 = vmov %v1763_v7  ;;  %s486_s21 = smov [#allocation21]  ;;  %vm789_vm14 = vcmp.eq.s32.totalorder %v1763_v7, 0  ;;  %vm801_vm15 = vcmp.eq.s32.totalorder %v1763_v7, 3  ;;  %s1649_s20 = sphi %s1802_s20, %s465_s20  }
 0x118   : >>> { %v490_v6 = vmov %v1761_v6  ;;  %v493_v7 = vmov %v1763_v7  ;;  %v474_v54 = vld [vmem:[%s466_s30] sm:$0xf]  ;;  %vm477_vm5 = vcmp.eq.s32.totalorder %v473_v7, %v470_v6  ;;  %s506_s22 = smov [#allocation23]  ;;  %s467_s29 = smov [#allocation24] }
 0x119   : >>> { %vm497_vm6 = vcmp.eq.s32.totalorder %v493_v7, %v490_v6  ;;  %v510_v6 = vmov %v1761_v6  ;;  %v513_v7 = vmov %v1763_v7  ;;  %v478_v55 = vsel %vm477_vm5, %v474_v54, 0.0  ;;  %v494_v56 = vld [vmem:[%s486_s21] sm:$0xf]  ;;  %s487_s14 = smov [#allocation25]  ;;  %s507_s15 = smov [#allocation26] }
 0x11a   : >>> { %vm517_vm7 = vcmp.eq.s32.totalorder %v513_v7, %v510_v6  ;;  %v479_v57 = vrot.slane %v478_v55, 4  ;;  %v498_v58 = vsel %vm497_vm6, %v494_v56, 0.0  ;;  %v514_v59 = vld [vmem:[%s506_s22] sm:$0xf]  ;;  %s530_s16 = smov [#allocation25]  ;;  %s528_s30 = smov [#allocation24]  ;;  %v579_v6 = vmov %v1761_v6 }
 0x11b   : >>> { %v499_v60 = vrot.slane %v498_v58, 4  ;;  %v518_v61 = vsel %vm517_vm7, %v514_v59, 0.0  ;;  %s532_s21 = smov [#allocation26]  ;;  %s567_s22 = smov [#allocation27]  ;;  %v582_v7 = vmov %v1763_v7  ;;  %v594_v6 = vmov %v1761_v6 }
 0x11c   : >>> { %v480_v62 = vadd.f32 %v479_v57, %v478_v55  ;;  %v519_v63 = vrot.slane %v518_v61, 4  ;;  %v597_v7 = vmov %v1763_v7  ;;  %vm584_vm12 = vcmp.eq.s32.totalorder %v582_v7, %v579_v6  ;;  %s1821_s24 = smov [#allocation22]  ;;  %s1827_s23 = smov [#allocation14] }
 0x11d   : >>> { %v500_v0 = vadd.f32 %v499_v60, %v498_v58  ;;  %vm599_vm13 = vcmp.eq.s32.totalorder %v597_v7, %v594_v6  ;;  %s829_s11 = smov [#allocation31]  ;;  %s1833_s27 = smov [#allocation18]  ;;  %v615_v55 = vld [vmem:[%s1821_s24] sm:$0xf]  ;;  %v692_v6 = vmov %v1761_v6  ;;  %v695_v7 = vmov %v1763_v7 }
 0x11e   : >>> { %v481_v1 = vrot.slane %v480_v62, 2  ;;  %v520_v2 = vadd.f32 %v519_v63, %v518_v61  ;;  %v838_v58 = vld [vmem:[%s1827_s23] sm:$0xf]  ;;  %s607_s26 = smov [#allocation32]  ;;  %s831_s25 = smov [#allocation32]  ;;  %v706_v6 = vmov %v1761_v6  ;;  %v709_v7 = vmov %v1763_v7 }
 0x11f   : >>> { %v501_v3 = vrot.slane %v500_v0, 2  ;;  %v840_v61 = vld [vmem:[%s1833_s27] sm:$0xf]  ;;  %vm699_vm0 = vcmp.eq.s32.totalorder %v695_v7, %v692_v6  ;;  %v665_v6 = vmov %v1761_v6  ;;  %v668_v7 = vmov %v1763_v7  ;;  %s465_s20 = sadd.s32 1, %s1649_s20  }
 0x120   : >>> { %v482_v4 = vadd.f32 %v481_v1, %v480_v62  ;;  %v521_v5 = vrot.slane %v520_v2, 2  ;;  %v679_v6 = vmov %v1761_v6  ;;  %v682_v7 = vmov %v1763_v7  ;;  %p462_p9 = scmp.ge.s32.totalorder %s465_s20, 7  }
 0x121   : >>> { %v502_v8 = vadd.f32 %v501_v3, %v500_v0  ;;  %vm714_vm1 = vcmp.eq.s32.totalorder %v709_v7, %v706_v6  ;;  %vm673_vm3 = vcmp.eq.s32.totalorder %v668_v7, %v665_v6  ;;  %vm686_vm4 = vcmp.eq.s32.totalorder %v682_v7, %v679_v6 }
 0x122   : >>> { %v483_v9 = vrot.slane %v482_v4, 1  ;;  %v522_v10 = vadd.f32 %v521_v5, %v520_v2  ;;  %vm728_vm5 = vcmp.eq.s32.totalorder %v1761_v6, 0  ;;  %vm732_vm6 = vcmp.eq.s32.totalorder %v1761_v6, 1 }
 0x123   : >>> { %v503_v11 = vrot.slane %v502_v8, 1  ;;  %vm745_vm7 = vcmp.eq.s32.totalorder %v1761_v6, 3  ;;  %v366_v6 = vmov (%p462_p9), %v1761_v6  ;;  %v369_v7 = vmov (%p462_p9), %v1763_v7 }
 0x124   : >>> { %v484_v12 = vadd.f32 %v483_v9, %v482_v4  ;;  %v523_v13 = vrot.slane %v522_v10, 1  ;;  %v419_v6 = vmov (%p462_p9), %v1761_v6 }
 0x125   : >>> { %v504_v14 = vadd.f32 %v503_v11, %v502_v8 }
 0x126   : >>> { %485 = vst [vmem:[%s467_s29] sm:$0x1] %v484_v12  ;;  %v524_v15 = vadd.f32 %v523_v13, %v522_v10  ;;  %s569_s29 = smov [#allocation28] }
 0x127   : >>> { %505 = vst [vmem:[%s487_s14] sm:$0x1] %v504_v14  ;;  %s526_s14 = smov [#allocation29] }
 0x128   : >>> { %525 = vst [vmem:[%s507_s15] sm:$0x1] %v524_v15  ;;  %s527_s15 = smov [#allocation30]  ;;  %s571_s14 = smov %s526_s14 }
 0x129   : >>> { %s573_s15 = smov %s527_s15 }
 0x12d   : >>> { %v529_v18 = vld [vmem:[%s528_s30] sm:$0xff]  ;;  %s590_s30 = smov [#allocation30] }
 0x12e   : >>> { %v531_v16 = vld [vmem:[%s530_s16] sm:$0xff]  ;;  %v552_v31 = vand.u32 2147483647, %v529_v18  ;;  %s575_s16 = smov [#allocation29] }
 0x12f   : >>> { %v535_v17 = vmul.f32 2.0, %v531_v16  ;;  %v533_v19 = vld [vmem:[%s532_s21] sm:$0xff]  ;;  %v553_v36 = vand.u32 2147483647, %v531_v16  ;;  %s588_s21 = smov [#allocation31] }
 0x130   : >>> { %v534_v20 = vsub.f32 %v533_v19, %v529_v18  ;;  %v554_v32 = vand.u32 2147483647, %v533_v19 }
 0x131   : >>> { %1603 = vrcp.f32 %v535_v17 }
 0x132   : >>> { %v555_v35 = vmin.f32 %v552_v31, %v554_v32 }
 0x134   : >>> { %v556_v37 = vmul.f32 1.1920929e-08, %v555_v35 }
 0x136   : >>> { %vm557_vm11 = vcmp.le.f32.partialorder %v553_v36, %v556_v37 }
 0x13b   : >>> { %v1604_v21 = vpop.eup %1603 }
 0x13c   : >>> { %v537_v22 = vmul.f32 %v1604_v21, %v534_v20 }
 0x13e   : >>> { %v539_v23 = vmul.f32 %v537_v22, %v537_v22  ;;  %vm538_vm10 = vcmp.ge.f32.partialorder %v537_v22, 0.0 }
 0x140   : >>> { %v540_v24 = vadd.f32 1.0, %v539_v23 }
 0x142   : >>> { %1605 = vrsqrt.f32 %v540_v24  ;;  %vm543_vm8 = vcmp.eq.f32.partialorder %v540_v24, inf  ;;  %v546_v26 = vand.u32 2147483648, %v540_v24  ;;  %vm545_vm9 = vcmp.eq.f32.partialorder %v540_v24, 0.0 }
 0x14c   : >>> { %v1606_v25 = vpop.eup %1605 }
 0x14d   : >>> { %v542_v27 = vmul.f32 %v1606_v25, %v540_v24 }
 0x14f   : >>> { %v544_v28 = vsel %vm543_vm8, %v540_v24, %v542_v27  ;;  %vm381_vm8 = vcmp.eq.s32.totalorder (%p462_p9), %v369_v7, %v366_v6  ;;  %v422_v7 = vmov (%p462_p9), %v1763_v7  ;;  %v385_v6 = vmov (%p462_p9), %v1761_v6 }
 0x150   : >>> { %v547_v29 = vsel %vm545_vm9, %v546_v26, %v544_v28  ;;  %v388_v7 = vmov (%p462_p9), %v1763_v7  ;;  %v402_v6 = vmov (%p462_p9), %v1761_v6  ;;  %vm434_vm9 = vcmp.eq.s32.totalorder (%p462_p9), %v422_v7, %v419_v6 }
 0x151   : >>> { %v548_v30 = vxor.u32 2147483648, %v547_v29  ;;  %v405_v7 = vmov (%p462_p9), %v1763_v7 }
 0x153   : >>> { %v549_v33 = vsel %vm538_vm10, %v547_v29, %v548_v30 }
 0x154   : >>> { %v550_v34 = vadd.f32 %v549_v33, %v537_v22 }
 0x156   : >>> { %1607 = vrcp.f32 %v550_v34 }
 0x160   : >>> { %v1608_v38 = vpop.eup %1607 }
 0x161   : >>> { %v558_v39 = vsel %vm557_vm11, 0.0, %v1608_v38 }
 0x162   : >>> { %v559_v40 = vmul.f32 %v558_v39, %v558_v39  ;;  %v563_v41 = vmul.f32 %v558_v39, %v531_v16 }
 0x164   : >>> { %v560_v42 = vadd.f32 1.0, %v559_v40  ;;  %v564_v43 = vsub.f32 %v529_v18, %v563_v41  ;;  %v566_v44 = vadd.f32 %v563_v41, %v533_v19 }
 0x166   : >>> { %1609 = vrsqrt.f32 %v560_v42  ;;  %568 = vst [vmem:[%s567_s22] sm:$0xff] %v564_v43  ;;  %570 = vst [vmem:[%s569_s29] sm:$0xff] %v566_v44  ;;  %s605_s22 = smov [#allocation31]  ;;  %s1817_s29 = smov [#allocation20] }
 0x167   : >>> { %v613_v53 = vld [vmem:[%s1817_s29] sm:$0xf] }
 0x170   : >>> { %v1610_v45 = vpop.eup %1609 }
 0x171   : >>> { %572 = vst [vmem:[%s571_s14] sm:$0xff] %v1610_v45  ;;  %v562_v46 = vmul.f32 %v1610_v45, %v558_v39  ;;  %s603_s14 = smov [#allocation32] }
 0x173   : >>> { %574 = vst [vmem:[%s573_s15] sm:$0xff] %v562_v46  ;;  %s1819_s15 = smov [#allocation21] }
 0x174   : >>> { %v614_v54 = vld [vmem:[%s1819_s15] sm:$0xf] }
 0x178   : >>> { %v576_v47 = vld [vmem:[%s575_s16] ss:$0 sm:$0xff]  ;;  %s1823_s16 = smov [#allocation23] }
 0x179   : >>> { %v585_v48 = vsel %vm584_vm12, %v576_v47, 0.0  ;;  %v616_v56 = vld [vmem:[%s1823_s16] sm:$0xf] }
 0x17a   : >>> { %586 = vadd.xlane.f32.xlu0 %v585_v48  ;;  %v591_v49 = vld [vmem:[%s590_s30] ss:$0 sm:$0xff]  ;;  %s1825_s30 = smov [#allocation12] }
 0x17b   : >>> { %v600_v50 = vsel %vm599_vm13, %v591_v49, 0.0  ;;  %v837_v57 = vld [vmem:[%s1825_s30] sm:$0xf] }
 0x17e   : >>> { %601 = vadd.xlane.f32.xlu0 %v600_v50 }
 0x207   : >>> { %v587_v51 = vpop.xlane.xlu0 %586 }
 0x208   : >>> { %589 = vst [vmem:[%s588_s21] sm:$0xff] %v587_v51  ;;  %s1829_s21 = smov [#allocation16] }
 0x209   : >>> { %v839_v59 = vld [vmem:[%s1829_s21] sm:$0xf] }
 0x20b   : >>> { %v602_v52 = vpop.xlane.xlu0 %601 }
 0x20c   : >>> { %604 = vst [vmem:[%s603_s14] sm:$0xff] %v602_v52  ;;  %s1853_s14 = smov [#allocation23] }
 0x20f   : >>> { %v606_v60 = vld [vmem:[%s605_s22] sm:$0xff]  ;;  %s1851_s22 = smov [#allocation22] }
 0x210   : >>> { %v830_v62 = vld [vmem:[%s829_s11] sm:$0xff]  ;;  %v617_v63 = vmul.f32 %v613_v53, %v606_v60  ;;  %v620_v0 = vmul.f32 %v614_v54, %v606_v60  ;;  %v624_v1 = vmul.f32 %v615_v55, %v606_v60  ;;  %v627_v2 = vmul.f32 %v616_v56, %v606_v60  ;;  %s1849_s11 = smov [#allocation12] }
 0x211   : >>> { %v841_v3 = vmul.f32 %v837_v57, %v830_v62  ;;  %v844_v4 = vmul.f32 %v838_v58, %v830_v62  ;;  %v848_v5 = vmul.f32 %v839_v59, %v830_v62  ;;  %v851_v8 = vmul.f32 %v840_v61, %v830_v62 }
 0x213   : >>> { %v608_v9 = vld [vmem:[%s607_s26] sm:$0xff]  ;;  %s635_s26 = smov [#allocation30] }
 0x214   : >>> { %v832_v10 = vld [vmem:[%s831_s25] sm:$0xff]  ;;  %v618_v11 = vmul.f32 %v615_v55, %v608_v9  ;;  %v621_v12 = vmul.f32 %v616_v56, %v608_v9  ;;  %v623_v13 = vmul.f32 %v613_v53, %v608_v9  ;;  %v626_v14 = vmul.f32 %v614_v54, %v608_v9  ;;  %s633_s25 = smov [#allocation29] }
 0x215   : >>> { %v842_v15 = vmul.f32 %v839_v59, %v832_v10  ;;  %v845_v16 = vmul.f32 %v840_v61, %v832_v10  ;;  %v847_v17 = vmul.f32 %v837_v57, %v832_v10  ;;  %v850_v18 = vmul.f32 %v838_v58, %v832_v10  ;;  %v634_v27 = vld [vmem:[%s633_s25] ss:$0 sm:$0xff]  ;;  %s662_s25 = smov [#allocation27] }
 0x216   : >>> { %v619_v19 = vsub.f32 %v617_v63, %v618_v11  ;;  %v622_v20 = vsub.f32 %v620_v0, %v621_v12  ;;  %v625_v21 = vadd.f32 %v624_v1, %v623_v13  ;;  %v628_v22 = vadd.f32 %v627_v2, %v626_v14  ;;  %v636_v28 = vld [vmem:[%s635_s26] ss:$0 sm:$0xff]  ;;  %s661_s26 = smov [#allocation20] }
 0x217   : >>> { %v843_v23 = vsub.f32 %v841_v3, %v842_v15  ;;  %v846_v24 = vsub.f32 %v844_v4, %v845_v16  ;;  %v849_v25 = vadd.f32 %v848_v5, %v847_v17  ;;  %v852_v26 = vadd.f32 %v851_v8, %v850_v18  ;;  %v669_v63 = vld [vmem:[%s662_s25] ss:$0 sm:$0xff]  ;;  %s905_s25 = sadd.s32 (%p462_p9), 1, %s1645_s17  }
 0x218   : >>> { %630 = vst [vmem:[%s1819_s15] sm:$0xf] %v622_v20  ;;  %632 = vst [vmem:[%s1823_s16] sm:$0xf] %v628_v22  ;;  %s1855_s15 = smov [#allocation20]  ;;  %s703_s16 = smov [#allocation28] }
 0x219   : >>> { %629 = vst [vmem:[%s1817_s29] sm:$0xf] %v619_v19  ;;  %631 = vst [vmem:[%s1821_s24] sm:$0xf] %v625_v21  ;;  %s1857_s24 = smov [#allocation16]  ;;  %s1865_s29 = smov [#allocation21]  ;;  %v710_v59 = vld [vmem:[%s703_s16] ss:$0 sm:$0xff] }
 0x21a   : >>> { %853 = vst [vmem:[%s1825_s30] sm:$0xf] %v843_v23  ;;  %854 = vst [vmem:[%s1827_s23] sm:$0xf] %v846_v24  ;;  %s1859_s23 = smov [#allocation14]  ;;  %s689_s30 = smov [#allocation22] }
 0x21b   : >>> { %855 = vst [vmem:[%s1829_s21] sm:$0xf] %v849_v25  ;;  %856 = vst [vmem:[%s1833_s27] sm:$0xf] %v852_v26  ;;  %s1863_s27 = smov [#allocation18]  ;;  %s702_s21 = smov [#allocation23] }
 0x21c   : >>> { %s805_s16 = smov [#allocation21]  ;;  %p458_p10 = scmp.ge.s32.totalorder (%p462_p9), %s905_s25, 15 }
 0x21d   : >> { %s2043_s17 = smov (%p462_p9), %s905_s25 }
 0x21f   : >>> { %v644_v30 = vld [vmem:[%s1853_s14] sm:$0xf] }
 0x220   : >>> { %v643_v29 = vld [vmem:[%s1851_s22] sm:$0xf]  ;;  %v652_v36 = vmul.f32 %v644_v30, %v636_v28  ;;  %v655_v42 = vmul.f32 %v644_v30, %v634_v27 }
 0x221   : >>> { %v641_v31 = vld [vmem:[%s1855_s15] sm:$0xf]  ;;  %v651_v35 = vmul.f32 %v643_v29, %v634_v27  ;;  %v654_v37 = vmul.f32 %v643_v29, %v636_v28 }
 0x222   : >>> { %v859_v32 = vld [vmem:[%s1849_s11] ss:$0 sm:$0xff]  ;;  %v1531_v34 = vld [vmem:[%s1849_s11 + $0x3] ss:$0 sm:$0xff]  ;;  %v645_v48 = vmul.f32 %v641_v31, %v634_v27  ;;  %v648_v49 = vmul.f32 %v641_v31, %v636_v28 }
 0x223   : >>> { %v1530_v33 = vld [vmem:[%s1849_s11 - $0x1] sm:$0xe]  ;;  %v1535_v45 = vld [vmem:[%s1859_s23 + $0x3] ss:$0 sm:$0xff]  ;;  %v653_v47 = vsub.f32 %v651_v35, %v652_v36  ;;  %v656_v53 = vadd.f32 %v655_v42, %v654_v37 }
 0x224   : >>> { %v866_v38 = vsel %vm789_vm14, %v859_v32, %v1530_v33  ;;  %v870_v39 = vld [vmem:[%s1857_s24] ss:$0 sm:$0xff]  ;;  %v1533_v40 = vld [vmem:[%s1857_s24 + $0x1] sm:$0x7] }
 0x225   : >>> { %v883_v41 = vld [vmem:[%s1859_s23] ss:$0 sm:$0xff]  ;;  %869 = vst [vmem:[%s1849_s11] sm:$0xf] %v866_v38  ;;  %v878_v43 = vsel %vm801_vm15, %v1531_v34, %v1533_v40  ;;  %v1537_v51 = vld [vmem:[%s1863_s27 + $0x1] sm:$0x7]  ;;  %659 = vst [vmem:[%s1851_s22] sm:$0xf] %v653_v47 }
 0x226   : >>> { %v1534_v44 = vld [vmem:[%s1859_s23 - $0x1] sm:$0xe]  ;;  %1532 = vst [vmem:[%s1849_s11 + $0x1] sm:$0x1] %v870_v39  ;;  %880 = vst [vmem:[%s1857_s24] sm:$0xf] %v878_v43  ;;  %v902_v54 = vsel %vm801_vm15, %v1535_v45, %v1537_v51  ;;  %s676_s11 = smov [#allocation21] }
 0x227   : >>> { %v894_v46 = vld [vmem:[%s1863_s27] ss:$0 sm:$0xff]  ;;  %v890_v50 = vsel %vm789_vm14, %v883_v41, %v1534_v44  ;;  %660 = vst [vmem:[%s1853_s14] sm:$0xf] %v656_v53  ;;  %s1907_s22 = smov [#allocation22]  ;;  %s1652_s14 = smov 1  }
 0x228   : >>> { %v642_v52 = vld [vmem:[%s1865_s29] sm:$0xf]  ;;  %893 = vst [vmem:[%s1859_s23] sm:$0xf] %v890_v50  ;;  %904 = vst [vmem:[%s1863_s27] sm:$0xf] %v902_v54  ;;  %s718_s24 = smov [#allocation21]  ;;  %s1910_s27 = smov [#allocation23] }
 0x229   : >>> { %v646_v55 = vmul.f32 %v642_v52, %v636_v28  ;;  %v649_v56 = vmul.f32 %v642_v52, %v634_v27  ;;  %1536 = vst [vmem:[%s1859_s23 + $0x1] sm:$0x1] %v894_v46  ;;  %s1653_s23 = smov 127  }
 0x22b   : >>> { %v647_v57 = vsub.f32 %v645_v48, %v646_v55  ;;  %v650_v58 = vadd.f32 %v649_v56, %v648_v49 }
 0x22c   : >>> { %v696_v60 = vld [vmem:[%s689_s30] sm:$0xf] }
 0x22d   : >>> { %657 = vst [vmem:[%s1855_s15] sm:$0xf] %v647_v57  ;;  %658 = vst [vmem:[%s1865_s29] sm:$0xf] %v650_v58  ;;  %v700_v61 = vsel %vm699_vm0, 0.0, %v696_v60  ;;  %s717_s15 = smov [#allocation20]  ;;  %s781_s29 = smov [#allocation20] }
 0x22e   : >>> { %v711_v62 = vld [vmem:[%s702_s21] sm:$0xf]  ;;  %701 = vst [vmem:[%s689_s30] sm:$0xf] %v700_v61  ;;  %s782_s30 = smov [#allocation22] }
 0x22f   : >>> { %v715_v0 = vsel %vm714_vm1, %v710_v59, %v711_v62 }
 0x230   : >>> { %716 = vst [vmem:[%s702_s21] sm:$0xf] %v715_v0  ;;  %s806_s21 = smov [#allocation23] }
 0x234   : >>> { %v670_v1 = vld [vmem:[%s661_s26] sm:$0xf] }
 0x235   : >>> { %v683_v2 = vld [vmem:[%s676_s11] sm:$0xf]  ;;  %v674_v3 = vsel %vm673_vm3, %v669_v63, %v670_v1 }
 0x236   : >>> { %v687_v4 = vsel %vm686_vm4, 0.0, %v683_v2  ;;  %675 = vst [vmem:[%s661_s26] sm:$0xf] %v674_v3  ;;  %v755_v5 = vld [vmem:[%s1907_s22] sm:$0xf]  ;;  %s370_s26 = smov (%p462_p9), [#allocation20] }
 0x237   : >>> { %688 = vst [vmem:[%s676_s11] sm:$0xf] %v687_v4  ;;  %756 = vrot.lane.b32.xlu0 %v755_v5, %s1652_s14  ;;  %v751_v11 = vld [vmem:[%s1910_s27] sm:$0xf]  ;;  %s389_s11 = smov (%p462_p9), [#allocation21] }
 0x238   : >>> { %v772_v12 = vld [vmem:[%s1910_s27] sm:$0xf] }
 0x239   : >>> { %v754_v30 = vld [vmem:[%s1907_s22] sm:$0xf] }
 0x23d   : >>> { %v723_v8 = vld [vmem:[%s717_s15] sm:$0xf] }
 0x23e   : >>> { %724 = vrot.lane.b32.xlu1 %v723_v8, %s1652_s14  ;;  %v719_v9 = vld [vmem:[%s718_s24] sm:$0xf] }
 0x23f   : >>> { %v740_v10 = vld [vmem:[%s718_s24] sm:$0xf] }
 0x240   : >>> { %v722_v18 = vld [vmem:[%s717_s15] sm:$0xf] }
 0x242   : >>> { %720 = vrot.lane.b32.xlu1 %v719_v9, %s1652_s14 }
 0x246   : >>> { %741 = vrot.lane.b32.xlu1 %v740_v10, %s1653_s23 }
 0x24a   : >>> { %752 = vrot.lane.b32.xlu1 %v751_v11, %s1652_s14  ;;  %s423_s14 = smov (%p462_p9), [#allocation23] }
 0x24e   : >>> { %773 = vrot.lane.b32.xlu1 %v772_v12, %s1653_s23 }
 0x2a9   : >>> { %v757_v20 = vpop.permute.xlu0 %756 }
 0x2aa   : >>> { %v761_v22 = vsel %vm728_vm5, %v755_v5, %v757_v20 }
 0x2b0   : >>> { %v725_v13 = vpop.permute.xlu1 %724 }
 0x2b1   : >>> { %v729_v14 = vsel %vm728_vm5, %v723_v8, %v725_v13 }
 0x2b4   : >>> { %v721_v15 = vpop.permute.xlu1 %720 }
 0x2b5   : >>> { %v733_v16 = vsel %vm732_vm6, %v721_v15, %v729_v14 }
 0x2b6   : >>> { %v739_v17 = vsel %vm1391_vm2, %v733_v16, 0.0 }
 0x2b7   : >>> { %747 = vst [vmem:[%s717_s15] sm:$0xf] %v739_v17 }
 0x2b8   : >>> { %v742_v19 = vpop.permute.xlu1 %741 }
 0x2b9   : >>> { %v746_v21 = vsel %vm745_vm7, %v722_v18, %v742_v19 }
 0x2ba   : >>> { %748 = vst [vmem:[%s718_s24] sm:$0xf] %v746_v21 }
 0x2bc   : >>> { %v753_v23 = vpop.permute.xlu1 %752 }
 0x2bd   : >>> { %v765_v24 = vsel %vm732_vm6, %v753_v23, %v761_v22 }
 0x2be   : >>> { %v783_v25 = vld [vmem:[%s781_s29] ss:$0 sm:$0xff]  ;;  %v1523_v27 = vld [vmem:[%s781_s29 + $0x3] ss:$0 sm:$0xff]  ;;  %v771_v29 = vsel %vm1391_vm2, %v765_v24, 0.0 }
 0x2bf   : >>> { %v1522_v26 = vld [vmem:[%s781_s29 - $0x1] sm:$0xe]  ;;  %779 = vst [vmem:[%s1907_s22] sm:$0xf] %v771_v29  ;;  %s406_s22 = smov (%p462_p9), [#allocation22] }
 0x2c0   : >>> { %v790_v28 = vsel %vm789_vm14, %v783_v25, %v1522_v26  ;;  %v774_v31 = vpop.permute.xlu1 %773 }
 0x2c1   : >>> { %793 = vst [vmem:[%s781_s29] sm:$0xf] %v790_v28  ;;  %v807_v32 = vld [vmem:[%s805_s16] ss:$0 sm:$0xff]  ;;  %v1527_v34 = vld [vmem:[%s805_s16 + $0x3] ss:$0 sm:$0xff]  ;;  %v778_v35 = vsel %vm745_vm7, %v754_v30, %v774_v31 }
 0x2c2   : >>> { %v1526_v33 = vld [vmem:[%s805_s16 - $0x1] sm:$0xe]  ;;  %780 = vst [vmem:[%s1910_s27] sm:$0xf] %v778_v35 }
 0x2c3   : >>> { %v814_v36 = vsel %vm789_vm14, %v807_v32, %v1526_v33 }
 0x2c4   : >>> { %817 = vst [vmem:[%s805_s16] sm:$0xf] %v814_v36 }
 0x2c6   : >>> { %v794_v37 = vld [vmem:[%s782_s30] ss:$0 sm:$0xff]  ;;  %v1525_v38 = vld [vmem:[%s782_s30 + $0x1] sm:$0x7] }
 0x2c7   : >>> { %1524 = vst [vmem:[%s781_s29 + $0x1] sm:$0x1] %v794_v37  ;;  %v802_v39 = vsel %vm801_vm15, %v1523_v27, %v1525_v38  ;;  %464 = sbr.rel (!%p462_p9) target bundleno = 279 (0x117), region = 462 }
 0x2c8   : >>> { %804 = vst [vmem:[%s782_s30] sm:$0xf] %v802_v39 }
 0x2c9   : >>> { %v818_v40 = vld [vmem:[%s806_s21] ss:$0 sm:$0xff]  ;;  %v1529_v41 = vld [vmem:[%s806_s21 + $0x1] sm:$0x7] }
 0x2ca   : >>> { %1528 = vst [vmem:[%s805_s16 + $0x1] sm:$0x1] %v818_v40  ;;  %v826_v42 = vsel %vm801_vm15, %v1527_v34, %v1529_v41 }
 0x2cb   : >>> { %828 = vst [vmem:[%s806_s21] sm:$0xf] %v826_v42 }
 0x2ce   : >> { %v376_v43 = vld [vmem:[%s370_s26] sm:$0xf] }
 0x2cf   : >> { %v377_v45 = vsel %vm1391_vm2, %v376_v43, 0.0  ;;  %v412_v47 = vld [vmem:[%s406_s22] sm:$0xf] }
 0x2d0   : >> { %v378_v49 = vmul.f32 %v377_v45, %v377_v45  ;;  %v413_v51 = vsel %vm1391_vm2, %v412_v47, 0.0 }
 0x2d1   : >> { %v395_v44 = vld [vmem:[%s389_s11] sm:$0xf]  ;;  %v414_v53 = vmul.f32 %v413_v51, %v413_v51 }
 0x2d2   : >> { %v396_v46 = vsel %vm1391_vm2, %v395_v44, 0.0  ;;  %v429_v48 = vld [vmem:[%s423_s14] sm:$0xf]  ;;  %v382_v56 = vsel %vm381_vm8, 0.0, %v378_v49 }
 0x2d3   : >> { %v397_v50 = vmul.f32 %v396_v46, %v396_v46  ;;  %v430_v52 = vsel %vm1391_vm2, %v429_v48, 0.0 }
 0x2d4   : >> { %v431_v55 = vmul.f32 %v430_v52, %v430_v52 }
 0x2d5   : >> { %v399_v54 = vadd.f32 %v397_v50, %v378_v49  ;;  %v398_v57 = vadd.f32 %v397_v50, %v382_v56 }
 0x2d6   : >> { %v435_v60 = vsel %vm434_vm9, 0.0, %v431_v55 }
 0x2d7   : >> { %v416_v58 = vadd.f32 %v414_v53, %v399_v54  ;;  %v415_v59 = vadd.f32 %v414_v53, %v398_v57 }
 0x2d9   : >> { %v437_v61 = vadd.f32 %v431_v55, %v416_v58  ;;  %v436_v62 = vadd.f32 %v435_v60, %v415_v59 }
 0x2db   : >> { %438 = vadd.xlane.f32.xlu0 %v437_v61 }
 0x2df   : >> { %446 = vadd.xlane.f32.xlu0 %v436_v62 }
 0x368   : >> { %v439_v63 = vpop.xlane.xlu0 %438 }
 0x369   : >> { %v440_v0 = vrot.slane %v439_v63, 4 }
 0x36b   : >> { %v441_v1 = vadd.f32 %v440_v0, %v439_v63 }
 0x36c   : >> { %v447_v2 = vpop.xlane.xlu0 %446 }
 0x36d   : >> { %v442_v3 = vrot.slane %v441_v1, 2  ;;  %v448_v4 = vrot.slane %v447_v2, 4 }
 0x36f   : >> { %v449_v5 = vadd.f32 %v448_v4, %v447_v2  ;;  %v443_v8 = vadd.f32 %v442_v3, %v441_v1 }
 0x371   : >> { %v450_v9 = vrot.slane %v449_v5, 2  ;;  %v444_v11 = vrot.slane %v443_v8, 1 }
 0x373   : >> { %v451_v10 = vadd.f32 %v450_v9, %v449_v5  ;;  %v445_v14 = vadd.f32 %v444_v11, %v443_v8 }
 0x375   : >> { %v452_v12 = vrot.slane %v451_v10, 1 }
 0x377   : >> { %v453_v13 = vadd.f32 %v452_v12, %v451_v10 }
 0x379   : >> { %1556 = vpush %v453_v13 }
 0x37a   : >> { %1558 = vpush %v445_v14 }
 0x3aa   : >> { %s1557_s20 = spop %1556 }
 0x3ab   : >> { %s1559_s15 = spop %1558 }
 0x3ac   : >> { %s456_s24 = smul.f32 1e-10, %s1559_s15 }
 0x3ae   : >> { %p457_p11 = scmp.le.f32.partialorder %s1557_s20, %s456_s24 }
 0x3b0   : >> { %p459_p12 = por %p458_p10, %p457_p11 }
 0x3b2   : > { %907 = sbr.rel (!%p459_p12) target bundleno = 278 (0x116), region = 473 }
 0x3b9 PF: > { %s912_s23 = smov [#allocation20]  ;;  %v916_v6 = vmov %v1761_v6  ;;  %v919_v7 = vmov %v1763_v7  ;;  %v967_v15 = vld [vmem:[#allocation12] sm:$0xf]  ;;  %v973_v16 = vld [vmem:[#allocation14] sm:$0xf]  ;;  %s2044_s17 = scalar_lea.vmem [#allocation13], %s1757_s28 }
 0x3ba   : > { %v936_v6 = vmov %v1761_v6  ;;  %v939_v7 = vmov %v1763_v7  ;;  %v920_v17 = vld [vmem:[%s912_s23] sm:$0xf]  ;;  %vm923_vm10 = vcmp.eq.s32.totalorder %v919_v7, %v916_v6  ;;  %969 = vst [vmem:[%s2044_s17] sm:$0xf] %v967_v15  ;;  %s2045_s27 = scalar_lea.vmem [#allocation15], %s1757_s28  ;;  %v979_v18 = vld [vmem:[#allocation16] sm:$0xf] }
 0x3bb   : > { %vm943_vm11 = vcmp.eq.s32.totalorder %v939_v7, %v936_v6  ;;  %975 = vst [vmem:[%s2045_s27] sm:$0xf] %v973_v16  ;;  %v924_v19 = vsel %vm923_vm10, %v920_v17, 0.0  ;;  %s932_s29 = smov [#allocation23]  ;;  %s2046_s16 = scalar_lea.vmem [#allocation17], %s1757_s28  ;;  %v985_v20 = vld [vmem:[#allocation18] sm:$0xf] }
 0x3bc   : > { %981 = vst [vmem:[%s2046_s16] sm:$0xf] %v979_v18  ;;  %v925_v21 = vrot.slane %v924_v19, 4  ;;  %v940_v22 = vld [vmem:[%s932_s29] sm:$0xf]  ;;  %s2047_s30 = scalar_lea.vmem [#allocation19], %s1757_s28  ;;  %s908_s21 = sand.u32 7, %s1720_s12  }
 0x3bd   : > { %987 = vst [vmem:[%s2047_s30] sm:$0xf] %v985_v20  ;;  %v944_v23 = vsel %vm943_vm11, %v940_v22, 0.0  ;;  %s909_s25 = scalar_lea.vmem [#allocation8], %s908_s21  ;;  %s911_s26 = scalar_lea.vmem [#allocation10], %s908_s21 }
 0x3be   : > { %v926_v24 = vadd.f32 %v925_v21, %v924_v19  ;;  %v945_v25 = vrot.slane %v944_v23, 4  ;;  %s913_s25 = smov %s909_s25  ;;  %s933_s26 = smov %s911_s26 }
 0x3bf   : > { %s2048_s11 = scalar_lea.vmem [#allocation9], %s1759_s18  ;;  %s2049_s22 = scalar_lea.vmem [#allocation11], %s1759_s18 }
 0x3c0   : > { %v927_v26 = vrot.slane %v926_v24, 2  ;;  %v946_v6 = vadd.f32 %v945_v25, %v944_v23  ;;  %s1015_s14 = sshrl.u32 (%p1734_p3), %s1720_s12, 3  ;;  %s2050_s20 = scalar_lea.vmem (%p1734_p3), [#allocation9], %s1759_s18 }
 0x3c1   : > { %s1544_s15 = sshll.u32 (%p1734_p3), %s1015_s14, 1 }
 0x3c2   : > { %v928_v7 = vadd.f32 %v927_v26, %v926_v24  ;;  %v947_v27 = vrot.slane %v946_v6, 2  ;;  %s1017_s17 = scalar_lea.vmem (%p1734_p3), %s2035_s4, %s1544_s15 }
 0x3c4   : > { %v929_v28 = vrot.slane %v928_v7, 1  ;;  %v948_v29 = vadd.f32 %v947_v27, %v946_v6 }
 0x3c6   : > { %v930_v30 = vadd.f32 %v929_v28, %v928_v7  ;;  %v949_v31 = vrot.slane %v948_v29, 1 }
 0x3c8   : > { %931 = vst [vmem:[%s913_s25] sm:$0x1] %v930_v30  ;;  %v950_v32 = vadd.f32 %v949_v31, %v948_v29 }
 0x3ca   : > { %951 = vst [vmem:[%s933_s26] sm:$0x1] %v950_v32 }
 0x3cc   : > { %1014 = sbr.rel (!%p1734_p3) target bundleno = 985 (0x3d9), region = 158 }
 0x3cf   : > { %v955_v33 = vld [vmem:[#allocation8] sm:$0x3] }
 0x3d0   : > { %957 = vst [vmem:[%s2048_s11] sm:$0x3] %v955_v33 }
 0x3d1   : > { %v961_v34 = vld [vmem:[#allocation10] sm:$0x3] }
 0x3d2   : > { %963 = vst [vmem:[%s2049_s22] sm:$0x3] %v961_v34 }
 0x3d7   : > { %v1033_v35 = vld [vmem:[%s2050_s20] sm:$0x3] }
 0x3d8   : > { %1034 = vst [vmem:[%s1017_s17] sm:$0x3] %v1033_v35 }
 0x3d9 PF: > { %1051 = sbr.rel (!%p1734_p3) target bundleno = 993 (0x3e1), region = 192  ;;  %s1052_s27 = sshrl.u32 (%p1734_p3), %s1720_s12, 3 }
 0x3da   : > { %s2051_s29 = scalar_lea.vmem (%p1734_p3), [#allocation11], %s1759_s18  ;;  %s1545_s16 = sshll.u32 (%p1734_p3), %s1052_s27, 1 }
 0x3db   : > { %s1054_s25 = scalar_lea.vmem (%p1734_p3), %s2036_s5, %s1545_s16 }
 0x3df   : > { %v1070_v36 = vld [vmem:[%s2051_s29] sm:$0x3] (%p1734_p3) }
 0x3e0   : > { %1071 = vst [vmem:[%s1054_s25] sm:$0x3] %v1070_v36 }
 0x3e1 PF: > { %s1546_s26 = sshll.u32 %s1720_s12, 2  ;;  %s2052_s19 = scalar_lea.vmem [#allocation13], %s1757_s28 }
 0x3e2   : > { %v1103_v37 = vld [vmem:[%s2052_s19] sm:$0xf]  ;;  %s2053_s11 = scalar_lea.vmem [#allocation15], %s1757_s28  ;;  %s1087_s14 = scalar_lea.vmem %s2037_s6, %s1546_s26 }
 0x3e3   : > { %v1136_v38 = vld [vmem:[%s2053_s11] sm:$0xf]  ;;  %s1120_s24 = scalar_lea.vmem %s2038_s7, %s1546_s26  ;;  %s2054_s23 = scalar_lea.vmem [#allocation17], %s1757_s28  ;;  %1104 = vst [vmem:[%s1087_s14] sm:$0xf] %v1103_v37 }
 0x3e4   : > { %v1169_v39 = vld [vmem:[%s2054_s23] sm:$0xf]  ;;  %s2055_s17 = scalar_lea.vmem [#allocation19], %s1757_s28  ;;  %1137 = vst [vmem:[%s1120_s24] sm:$0xf] %v1136_v38  ;;  %s1153_s29 = scalar_lea.vmem %s2039_s8, %s1546_s26 }
 0x3e5   : > { %v1202_v40 = vld [vmem:[%s2055_s17] sm:$0xf]  ;;  %s1186_s21 = scalar_lea.vmem %s2040_s9, %s1546_s26  ;;  %1170 = vst [vmem:[%s1153_s29] sm:$0xf] %v1169_v39 }
 0x3e6   : > { %1203 = vst [vmem:[%s1186_s21] sm:$0xf] %v1202_v40 }
 0x3e7 PF: > { %s2056_s25 = sld [smem:[#allocation33_spill]]  ;;  %p13_p13 = scmp.ge.s32.totalorder %s1723_s13, 4  }
 0x3e8   : > { %s2057_s30 = smov %s1637_s10  ;;  %s2059_s11 = smov %s1723_s13 }
 0x3e9   :  { %15 = sbr.rel (!%p13_p13) target bundleno = 2 (0x2), region = 484 }
 0x3ed   : > { %s2058_s10 = smov %s2056_s25 }

// kernel: reverse
= control target key start
LH: loop header
LB: loop body
LE: loop exit
PB: predicated region body
PF: predicated region fallthrough
CT: control target
= control target key end

     0   :  { %v2_v0 = vlaneseq  ;;  %s105_s0 = inlined_call_operand.vmem [shape: f32[2,8], index: 0, kind: input, shape index: {}]   ;;  %s106_s1 = inlined_call_operand.vmem [shape: f32[2,8], index: 1, kind: output, shape index: {}]  }
   0x2   :  { %v3_v1 = vsub.s32 7, %v2_v0 }
   0x4   :  { %4 = vset.pattern.permute.xlu0 %v3_v1 }
   0x5   :  { %v20_v2 = vld [vmem:[%s105_s0] sm:$0x3] }
   0x6   :  { %21 = vst [vmem:[#allocation1] sm:$0x3] %v20_v2 }
   0xd   :  { %v38_v3 = vld [vmem:[#allocation1] sm:$0x3] }
   0xe   :  { %39 = vst [vmem:[#allocation0] sm:$0x3] %v38_v3 }
  0x15   :  { %v40_v4 = vld [vmem:[#allocation0] sm:$0xff] }
  0x16   :  { %41 = vperm.xlu0 %4, %v40_v4  }
  0x95   :  { %v42_v5 = vpop.permute.xlu0 %41 }
  0x96   :  { %43 = vst [vmem:[#allocation2] sm:$0xff] %v42_v5 }
  0x9d   :  { %v47_v6 = vld [vmem:[#allocation2] sm:$0x3] }
  0x9e   :  { %49 = vst [vmem:[#allocation3] sm:$0x3] %v47_v6 }
  0xa5   :  { %v65_v7 = vld [vmem:[#allocation3] sm:$0x3] }
  0xa6   :  { %66 = vst [vmem:[%s106_s1] sm:$0x3] %v65_v7 }

// kernel: custom-call.19
= control target key start
LH: loop header
LB: loop body
LE: loop exit
PB: predicated region body
PF: predicated region fallthrough
CT: control target
= control target key end

     0   :  { %s645_s9 = smov 0   ;;  %s647_s10 = smov 0   ;;  %s792_s0 = inlined_call_operand.vmem [shape: f32[2,8,8], index: 0, kind: input, shape index: {}]   ;;  %s793_s1 = inlined_call_operand.vmem [shape: f32[2,8,8], index: 1, kind: output, shape index: {0}]   ;;  %s794_s2 = inlined_call_operand.vmem [shape: f32[2,8], index: 2, kind: output, shape index: {1}]  }
   0x1   :  { %s649_s11 = smov 0   ;;  %s651_s12 = smov 0  }
   0x2   :  { %s653_s13 = smov 0  }
   0x3 LB: > { %s28_s14 = sadd.s32 1, %s618_s12  ;;  %s500_s15 = sadd.s32 4294967295, %s622_s13   ;;  %s622_s13 = sphi %s653_s13, %s9_s13   ;;  %s618_s12 = sphi %s651_s12, %s801_s12   ;;  %s614_s11 = sphi %s649_s11, %s800_s11   ;;  %s610_s10 = sphi %s647_s10, %s799_s10   ;;  %s606_s9 = sphi %s645_s9, %s798_s9  }
   0x4   : > { %p30_p0 = scmp.ge.s32.totalorder %s28_s14, 2  ;;  %s33_s16 = ssub.s32 0, %s618_s12 }
   0x5   : > { %s502_s17 = smin.u32 %s618_s12, %s33_s16  ;;  %p57_p1 = scmp.ne.s32.totalorder %s610_s10, %s606_s9 }
   0x6   : > { %s803_s14 = smov (%p30_p0, %s28_s14), 0  ;;  %s35_s18 = sshrl.u32 %s502_s17, 3 }
   0x7   : > { %s39_s19 = ssub.s32 0, %s803_s14  ;;  %p58_p2 = scmp.eq.s32.totalorder %s500_s15, 1 }
   0x8   : > { %s503_s20 = smin.u32 %s39_s19, %s803_s14  ;;  %s47_s24 = sadd.s32 1, %s610_s10 }
   0x9   : > { %s41_s21 = sshrl.u32 %s503_s20, 3  ;;  %p680_p3 = por %p58_p2, %p57_p1 }
   0xa   : > { %s44_s23 = ssub.s32 %s35_s18, %s41_s21  ;;  %p505_p5 = scmp.ge.s32.totalorder %s622_s13, 2 }
   0xb   : > { %p45_p4 = scmp.eq.s32.totalorder %s44_s23, 0  ;;  %s82_s26 = sand.u32 (!%p505_p5), 1, %s622_s13  }
   0xc   : > { %80 = sbr.rel (%p505_p5) target bundleno = 19 (0x13), region = 16  ;;  %s507_s27 = sshll.u32 (!%p505_p5), %s618_s12, 3 }
   0xd   : > { %s686_s25 = scalar_select %p45_p4, %s610_s10, %s47_s24  }
   0xe   : > { %s506_s28 = sshll.u32 (!%p505_p5), %s82_s26, 3  ;;  %s88_s3 = scalar_lea.vmem (!%p505_p5), %s792_s0, %s507_s27 }
   0xf   : > { %v116_v0 = vld [vmem:[%s88_s3] sm:$0xff] (!%p505_p5)  ;;  %s84_s4 = scalar_lea.vmem (!%p505_p5), [#allocation0], %s506_s28 }
  0x10   : > { %117 = vst [vmem:[%s84_s4] sm:$0xff] (!%p505_p5), %v116_v0 }
  0x13 PF: > { %p508_p6 = scmp.ge.s32.totalorder %s622_s13, 1  ;;  %p122_p7 = scmp.lt.s32.totalorder %s622_s13, 3 }
  0x15   : > { %p123_p8 = pnand %p508_p6, %p122_p7 }
  0x17   : > { %126 = sbr.rel (%p123_p8) target bundleno = 330 (0x14a), region = 54 }
  0x1e   : > { %s129_s5 = sand.u32 1, %s500_s15   ;;  %s143_s6 = sand.u32 1, %s606_s9   ;;  %v628_v2 = vmov 0.0  }
  0x1f   : > { %s509_s7 = sshll.u32 %s129_s5, 3  ;;  %s697_s8 = sshll.u32 %s143_s6, 1 }
  0x20   : > { %s152_s16 = sand.u32 7, %s614_s11   ;;  %s131_s17 = scalar_lea.vmem [#allocation0], %s509_s7 }
  0x21   : > { %v154_v1 = vld [vmem:[%s131_s17] sm:$0xff]  ;;  %s700_s18 = scalar_lea.vmem [#allocation1], %s509_s7  ;;  %s703_s19 = scalar_lea.vmem [#allocation2], %s152_s16 }
  0x22   : > { %155 = vst [vmem:[%s700_s18] sm:$0xff] %v154_v1  ;;  %156 = vst [vmem:[%s703_s19] sm:$0x1] %v628_v2  ;;  %s145_s15 = scalar_lea.vmem [#allocation3], %s697_s8  ;;  %s707_s20 = smov 0  }
  0x23 LB: >> { %v164_v3 = vlaneseq  ;;  %v716_v6 = vstv %s626_s20  ;;  %s191_s9 = scalar_lea.vmem %s700_s18, %s626_s20 [#allocation1]  ;;  %s249_s21 = scalar_lea.vmem [#allocation4], %s626_s20  ;;  %v629_v59 = vmov 1.0   ;;  %s626_s20 = sphi %s707_s20, %s162_s20  }
  0x24   : >> { %s266_s23 = smov [#allocation4] }
  0x25   : >> { %v713_v5 = vshrl.u32 %v164_v3, 7  ;;  %v243_v48 = vand.u32 127, %v164_v3 }
  0x27   : >> { %vm168_vm0 = vcmp.gt.s32.totalorder %v713_v5, %v716_v6  ;;  %v230_v5 = vmov %v713_v5  ;;  %vm731_vm10 = vcmp.eq.s32.totalorder %v243_v48, %v716_v6  ;;  %vm295_vm13 = vcmp.gt.s32.totalorder %v243_v48, %v716_v6 }
  0x28   : >> { %vm234_vm7 = vcmp.gt.s32.totalorder %v230_v5, %v716_v6  ;;  %vm235_vm8 = vcmp.lt.s32.totalorder %v230_v5, 8  ;;  %v269_v5 = vmov %v713_v5 }
  0x29   : >> { %v163_v4 = vld [vmem:[%s700_s18] sm:$0xff]  ;;  %v192_v15 = vld [vmem:[%s191_s9] ss:$0 sm:$0xff]  ;;  %s227_s18 = smov %s700_s18  ;;  %vm236_vm9 = vmand %vm234_vm7, %vm235_vm8  ;;  %vm274_vm11 = vcmp.lt.s32.totalorder %v269_v5, 8  ;;  %v286_v5 = vmov %v713_v5 }
  0x2a   : >> { %v171_v7 = vsel %vm168_vm0, %v163_v4, 0.0  ;;  %v193_v16 = vand.u32 2147483647, %v192_v15  ;;  %vm218_vm6 = vcmp.lt.f32.partialorder %v192_v15, 0.0  ;;  %v231_v45 = vld [vmem:[%s227_s18] sm:$0xff]  ;;  %s265_s18 = smov %s700_s18  ;;  %vm303_vm12 = vcmp.ge.s32.totalorder %v286_v5, %v716_v6 }
  0x2b   : >> { %v172_v8 = vmul.f32 %v171_v7, %v171_v7  ;;  %v237_v49 = vsel %vm236_vm9, %v231_v45, 0.0  ;;  %v262_v60 = vld [vmem:[%s703_s19] ss:$0 sm:$0xff]  ;;  %vm304_vm14 = vmand %vm731_vm10, %vm303_vm12 }
  0x2c   : >> { %v194_v21 = vmax.f32 %v193_v16, 0.0  ;;  %v272_v63 = vld [vmem:[%s265_s18] sm:$0xff]  ;;  %s282_s18 = smov %s265_s18 }
  0x2d   : >> { %v173_v9 = vrot.slane %v172_v8, 4  ;;  %s307_s24 = scalar_lea.vmem %s282_s18, %s626_s20  ;;  %s162_s20 = sadd.s32 1, %s626_s20  }
  0x2e   : >> { %p159_p9 = scmp.ge.s32.totalorder %s162_s20, 8  }
  0x2f   : >> { %v174_v10 = vadd.f32 %v173_v9, %v172_v8  ;;  %s515_s26 = sshll.u32 (%p159_p9), %s614_s11, 3 }
  0x30   : > { %s332_s29 = scalar_lea.vmem (%p159_p9), %s793_s1, %s515_s26 }
  0x31   : >> { %v175_v11 = vrot.slane %v174_v10, 2 }
  0x33   : >> { %v176_v12 = vadd.f32 %v175_v11, %v174_v10 }
  0x35   : >> { %v177_v13 = vrot.slane %v176_v12, 1 }
  0x37   : >> { %v178_v14 = vadd.f32 %v177_v13, %v176_v12  ;;  %v293_v13 = vld [vmem:[%s282_s18] sm:$0xff] }
  0x39   : >> { %570 = vrsqrt.f32 %v178_v14  ;;  %vm181_vm1 = vcmp.eq.f32.partialorder %v178_v14, inf  ;;  %v184_v18 = vand.u32 2147483648, %v178_v14  ;;  %vm183_vm2 = vcmp.eq.f32.partialorder %v178_v14, 0.0 }
  0x43   : >> { %v571_v17 = vpop.eup %570 }
  0x44   : >> { %v180_v19 = vmul.f32 %v571_v17, %v178_v14 }
  0x46   : >> { %v182_v20 = vsel %vm181_vm1, %v178_v14, %v180_v19 }
  0x47   : >> { %v185_v22 = vsel %vm183_vm2, %v184_v18, %v182_v20 }
  0x48   : >> { %v195_v23 = vand.u32 2147483647, %v185_v22 }
  0x4a   : >> { %v196_v24 = vmax.f32 %v194_v21, %v195_v23 }
  0x4c   : >> { %572 = vrcp.f32 %v196_v24  ;;  %vm208_vm5 = vcmp.eq.f32.partialorder %v196_v24, 0.0 }
  0x56   : >> { %v573_v25 = vpop.eup %572 }
  0x57   : >> { %v198_v26 = vmul.f32 %v573_v25, %v193_v16  ;;  %v201_v27 = vmul.f32 0.0, %v573_v25  ;;  %v205_v28 = vmul.f32 %v573_v25, %v195_v23 }
  0x59   : >> { %v199_v29 = vmul.f32 %v198_v26, %v198_v26  ;;  %v202_v30 = vmul.f32 %v201_v27, %v201_v27  ;;  %v206_v31 = vmul.f32 %v205_v28, %v205_v28 }
  0x5b   : >> { %v203_v32 = vadd.f32 %v202_v30, %v199_v29 }
  0x5d   : >> { %v207_v33 = vadd.f32 %v206_v31, %v203_v32 }
  0x5f   : >> { %574 = vrsqrt.f32 %v207_v33  ;;  %vm211_vm3 = vcmp.eq.f32.partialorder %v207_v33, inf  ;;  %v214_v35 = vand.u32 2147483648, %v207_v33  ;;  %vm213_vm4 = vcmp.eq.f32.partialorder %v207_v33, 0.0 }
  0x69   : >> { %v575_v34 = vpop.eup %574 }
  0x6a   : >> { %v210_v36 = vmul.f32 %v575_v34, %v207_v33 }
  0x6c   : >> { %v212_v37 = vsel %vm211_vm3, %v207_v33, %v210_v36 }
  0x6d   : >> { %v215_v38 = vsel %vm213_vm4, %v214_v35, %v212_v37 }
  0x6e   : >> { %v216_v39 = vmul.f32 %v215_v38, %v196_v24 }
  0x70   : >> { %v217_v40 = vsel %vm208_vm5, 0.0, %v216_v39 }
  0x71   : >> { %v219_v41 = vxor.u32 2147483648, %v217_v40 }
  0x73   : >> { %v220_v42 = vsel %vm218_vm6, %v217_v40, %v219_v41 }
  0x74   : >> { %v724_v43 = vsel %vm183_vm2, %v192_v15, %v220_v42  ;;  %576 = vrcp.f32 %v220_v42  ;;  %v221_v46 = vsub.f32 %v220_v42, %v192_v15 }
  0x75   : >> { %v226_v44 = vsub.f32 %v192_v15, %v724_v43 }
  0x77   : >> { %578 = vrcp.f32 %v226_v44 }
  0x7e   : >> { %v577_v47 = vpop.eup %576 }
  0x7f   : >> { %v223_v50 = vmul.f32 %v577_v47, %v221_v46 }
  0x81   : >> { %v579_v51 = vpop.eup %578  ;;  %v225_v55 = vsel %vm183_vm2, 0.0, %v223_v50 }
  0x82   : >> { %v239_v52 = vmul.f32 %v579_v51, %v237_v49  ;;  %v255_v57 = vsel %vm731_vm10, %v225_v55, 0.0 }
  0x84   : >> { %v240_v54 = vsel %vm183_vm2, 0.0, %v239_v52 }
  0x85   : >> { %v245_v56 = vsel %vm731_vm10, %v240_v54, 0.0 }
  0x86   : >> { %246 = vadd.xlane.f32.xlu0 %v245_v56 }
  0x8a   : >> { %256 = vadd.xlane.f32.xlu0 %v255_v57 }
 0x113   : >> { %v247_v58 = vpop.xlane.xlu0 %246 }
 0x114   : >> { %248 = vst [vmem:[#allocation4] sm:$0xff] %v247_v58 }
 0x115   : >> { %250 = vst [vmem:[%s249_s21] sm:$0x1] %v629_v59 }
 0x117   : >> { %v257_v61 = vpop.xlane.xlu0 %256 }
 0x118   : >> { %v263_v62 = vsel %vm731_vm10, %v257_v61, %v262_v60 }
 0x119   : >> { %264 = vst [vmem:[%s703_s19] sm:$0x1] %v263_v62 }
 0x11c   : >> { %v271_v0 = vld [vmem:[%s266_s23] sm:$0xff]  ;;  %s283_s23 = smov %s266_s23 }
 0x11d   : >> { %v273_v1 = vmul.f32 %v272_v63, %v271_v0  ;;  %v291_v12 = vld [vmem:[%s283_s23] sm:$0xff] }
 0x11f   : >> { %v275_v2 = vsel %vm274_vm11, %v273_v1, 0.0 }
 0x120   : >> { %v276_v3 = vrot.slane %v275_v2, 4  ;;  %v318_v5 = vld [vmem:[#allocation2] sm:$0x3] (%p159_p9) }
 0x121   : > { %320 = vst [vmem:[%s145_s15] sm:$0x3] (%p159_p9), %v318_v5 }
 0x122   : >> { %v277_v4 = vadd.f32 %v276_v3, %v275_v2 }
 0x124   : >> { %v278_v7 = vrot.slane %v277_v4, 2 }
 0x126   : >> { %v279_v8 = vadd.f32 %v278_v7, %v277_v4 }
 0x128   : >> { %v280_v9 = vrot.slane %v279_v8, 1 }
 0x12a   : >> { %v281_v10 = vadd.f32 %v280_v9, %v279_v8 }
 0x12c   : >> { %v287_v11 = vmul.f32 %v281_v10, %v257_v61 }
 0x12e   : >> { %v292_v14 = vmul.f32 %v291_v12, %v287_v11 }
 0x130   : >> { %v296_v15 = vsub.f32 %v293_v13, %v292_v14 }
 0x132   : >> { %v297_v16 = vsel %vm295_vm13, %v296_v15, %v293_v13 }
 0x133   : >> { %v305_v17 = vsel %vm304_vm14, %v291_v12, %v297_v16 }
 0x134   : >> { %306 = vst [vmem:[%s282_s18] sm:$0xff] %v305_v17 }
 0x137   : > { %161 = sbr.rel (!%p159_p9) target bundleno = 35 (0x23), region = 175 }
 0x13b   : >> { %v308_v18 = vld [vmem:[%s307_s24] ss:$0 sm:$0xff] }
 0x13c   : >> { %v313_v19 = vsel %vm731_vm10, %v724_v43, %v308_v18 }
 0x13d   : >> { %314 = vst [vmem:[%s307_s24] sm:$0x1] %v313_v19 }
 0x13e   : > { %p368_p10 = scmp.lt.s32.totalorder (%p680_p3), %s614_s11, 0  ;;  %s369_s30 = ssub.s32 (%p680_p3), 0, %s614_s11  ;;  %v391_v20 = vld [vmem:[%s145_s15] sm:$0x3] (%p680_p3) }
 0x13f   : > { %367 = sbr.rel (!%p680_p3) target bundleno = 330 (0x14a), region = 99  ;;  %s516_s3 = smin.u32 (%p680_p3), %s614_s11, %s369_s30 }
 0x140   : > { %s371_s4 = sshrl.u32 (%p680_p3), %s516_s3, 3 }
 0x141   : > { %s372_s5 = ssub.s32 (%p680_p3), 0, %s371_s4 }
 0x144   : > { %v360_v6 = vld [vmem:[%s700_s18] sm:$0xff] }
 0x145   : > { %361 = vst [vmem:[%s332_s29] sm:$0xff] %v360_v6 }
 0x146   : > { %s805_s5 = smov (!%p368_p10, %s372_s5), %s371_s4 }
 0x147   : > { %s517_s6 = sshll.u32 %s805_s5, 1 }
 0x148   : > { %s375_s17 = scalar_lea.vmem %s794_s2, %s517_s6 }
 0x149   : > { %392 = vst [vmem:[%s375_s17] sm:$0x3] %v391_v20 }
 0x14a PF: > { %s9_s13 = sadd.s32 1, %s622_s13   ;;  %s798_s9 = smov %s610_s10 }
 0x14b   : > { %p6_p11 = scmp.ge.s32.totalorder %s9_s13, 4   ;;  %s799_s10 = smov %s686_s25 }
 0x14c   : > { %s800_s11 = smov %s618_s12  ;;  %s801_s12 = smov %s803_s14 }
 0x14d   :  { %8 = sbr.rel (!%p6_p11) target bundleno = 3 (0x3), region = 186 }

// kernel: svd_init_forward.2
= control target key start
LH: loop header
LB: loop body
LE: loop exit
PB: predicated region body
PF: predicated region fallthrough
CT: control target
= control target key end

     0   :  { %v5978_v0 = vmov 0.0|0.0   ;;  %vm5979_vm0 = vmmov 0   ;;  %v5980_v8 = vmov 0.0   ;;  %vm7960_vm1 = vcmask 523264   ;;  %s7944_s0 = inlined_call_operand.vmem [shape: f32[2,64,32], index: 0, kind: input, shape index: {}]   ;;  %s7945_s1 = inlined_call_operand.vmem [shape: f32[1,8,64], index: 1, kind: input, shape index: {}]   ;;  %s7946_s2 = inlined_call_operand.vmem [shape: f32[2,8,32], index: 2, kind: output, shape index: {0}]   ;;  %s7947_s3 = inlined_call_operand.vmem [shape: f32[2,8,64], index: 3, kind: output, shape index: {1}]  }
   0x1   :  { %5647 = vmatprep.subr.bf16.mxu0 %v5978_v0  ;;  %v13_v1 = vld [vmem:[%s7944_s0] sm:$0xff]  ;;  %v14_v2 = vld [vmem:[%s7944_s0 + $0x8] sm:$0xff]  ;;  %5659 = vmatprep.subr.bf16.mxu1 %v5978_v0  ;;  %v15_v6 = vld [vmem:[%s7944_s0 + $0x10] sm:$0xff]  ;;  %vm7956_vm2 = vcmask 253952   ;;  %vm7955_vm3 = vcmask 254977   ;;  %vm7954_vm4 = vcmask 256002  }
   0x2   :  { %v21_v3 = vld [vmem:[%s7944_s0 + $0x40] sm:$0xff]  ;;  %v6012_v4 = vpack.c.bf16 %v14_v2, %v13_v1  ;;  %v22_v5 = vld [vmem:[%s7944_s0 + $0x48] sm:$0xff]  ;;  %v16_v7 = vld [vmem:[%s7944_s0 + $0x18] sm:$0xff]  ;;  %5435 = vmatprep.mubr.msk.f32.mxu0 %vm5979_vm0, %v5980_v8  ;;  %5454 = vmatprep.mubr.msk.f32.mxu1 %vm5979_vm0, %v5980_v8  ;;  %vm7953_vm5 = vcmask 257027   ;;  %vm7951_vm6 = vcmask 258052   ;;  %vm7950_vm7 = vcmask 259077  }
   0x3   :  { %v6027_v9 = vpack.c.bf16 %v22_v5, %v21_v3  ;;  %v23_v10 = vld [vmem:[%s7944_s0 + $0x50] sm:$0xff]  ;;  %v24_v11 = vld [vmem:[%s7944_s0 + $0x58] sm:$0xff]  ;;  %v6036_v12 = vpack.c.bf16 %v16_v7, %v15_v6  ;;  %v17_v14 = vld [vmem:[%s7944_s0 + $0x20] sm:$0xff]  ;;  %vm7949_vm8 = vcmask 260102   ;;  %vm7952_vm9 = vcmask 261120  }
   0x4   :  { %5649 = vmatpush3.bf16.msra.mxu0 %v6012_v4  ;;  %v6040_v13 = vpack.c.bf16 %v24_v11, %v23_v10  ;;  %v18_v15 = vld [vmem:[%s7944_s0 + $0x28] sm:$0xff]  ;;  %v25_v16 = vld [vmem:[%s7944_s0 + $0x60] sm:$0xff]  ;;  %v19_v20 = vld [vmem:[%s7944_s0 + $0x30] sm:$0xff]  ;;  %vm7948_vm11 = vcmask 261127  }
   0x5   :  { %5650 = vmatprep.subr.bf16.mxu0 %v5978_v0  ;;  %5661 = vmatpush3.bf16.msra.mxu1 %v6027_v9  ;;  %v26_v17 = vld [vmem:[%s7944_s0 + $0x68] sm:$0xff]  ;;  %v6056_v18 = vpack.c.bf16 %v18_v15, %v17_v14  ;;  %v20_v21 = vld [vmem:[%s7944_s0 + $0x38] sm:$0xff]  ;;  %v27_v22 = vld [vmem:[%s7944_s0 + $0x70] sm:$0xff] }
   0x6   :  { %5662 = vmatprep.subr.bf16.mxu1 %v5978_v0  ;;  %v6060_v19 = vpack.c.bf16 %v26_v17, %v25_v16  ;;  %v28_v23 = vld [vmem:[%s7944_s0 + $0x78] sm:$0xff]  ;;  %v6076_v24 = vpack.c.bf16 %v20_v21, %v19_v20  ;;  %v29_v26 = vld [vmem:[%s7945_s1] sm:$0xff]  ;;  %vm6364_vm10 = vmpackc.low %vm7952_vm9, %vm7952_vm9 }
   0x7   :  { %v6080_v25 = vpack.c.bf16 %v28_v23, %v27_v22 }
   0x8   :  { %5652 = vmatpush3.bf16.msra.mxu0 %v6036_v12 }
   0x9   :  { %5653 = vmatprep.subr.bf16.mxu0 %v5978_v0  ;;  %5664 = vmatpush3.bf16.msra.mxu1 %v6040_v13 }
   0xa   :  { %5665 = vmatprep.subr.bf16.mxu1 %v5978_v0 }
   0xc   :  { %5655 = vmatpush3.bf16.msra.mxu0 %v6056_v18 }
   0xd   :  { %5656 = vmatprep.subr.bf16.mxu0 %v5978_v0  ;;  %5667 = vmatpush3.bf16.msra.mxu1 %v6060_v19 }
   0xe   :  { %5668 = vmatprep.subr.bf16.mxu1 %v5978_v0 }
  0x10   :  { %5658 = vmatpush3.bf16.msra.mxu0 %v6076_v24 }
  0x11   :  { %5670 = vmatpush3.bf16.msra.mxu1 %v6080_v25  ;;  %5671 = vmatprep.subr.bf16.mxu0 %v5978_v0 }
  0x12   :  { %5687 = vmatprep.subr.bf16.mxu1 %v5978_v0 }
  0x13   :  { %5436 = vmatmul.mubr.msk.f32.vlgmr.msra.gmra.mrb[0].mxu0 %vm7960_vm1, %v29_v26 }
  0x14   :  { %5455 = vmatmul.mubr.msk.f32.vlgmr.msra.gmra.mrb[0].mxu1 %vm7960_vm1, %v29_v26  ;;  %5473 = vmatprep.mubr.msk.f32.mxu0 %vm5979_vm0, %v5980_v8 }
  0x15   :  { %5492 = vmatprep.mubr.msk.f32.mxu1 %vm5979_vm0, %v5980_v8 }
  0x19   :  { %5674 = vmatpush3.bf16.xpose.msk.msra.mxu0 %vm6364_vm10, %v6012_v4 }
  0x1a   :  { %5690 = vmatpush3.bf16.xpose.msk.msra.mxu1 %vm6364_vm10, %v6027_v9  ;;  %5675 = vmatprep.subr.bf16.mxu0 %v5978_v0 }
  0x1b   :  { %5691 = vmatprep.subr.bf16.mxu1 %v5978_v0 }
  0x21   :  { %5678 = vmatpush3.bf16.xpose.msk.msra.mxu0 %vm6364_vm10, %v6036_v12 }
  0x22   :  { %5694 = vmatpush3.bf16.xpose.msk.msra.mxu1 %vm6364_vm10, %v6040_v13  ;;  %5679 = vmatprep.subr.bf16.mxu0 %v5978_v0 }
  0x23   :  { %5695 = vmatprep.subr.bf16.mxu1 %v5978_v0 }
  0x29   :  { %5682 = vmatpush3.bf16.xpose.msk.msra.mxu0 %vm6364_vm10, %v6056_v18 }
  0x2a   :  { %5698 = vmatpush3.bf16.xpose.msk.msra.mxu1 %vm6364_vm10, %v6060_v19  ;;  %5683 = vmatprep.subr.bf16.mxu0 %v5978_v0 }
  0x2b   :  { %5699 = vmatprep.subr.bf16.mxu1 %v5978_v0 }
  0x31   :  { %5686 = vmatpush3.bf16.xpose.msk.msra.mxu0 %vm6364_vm10, %v6076_v24 }
  0x32   :  { %5702 = vmatpush3.bf16.xpose.msk.msra.mxu1 %vm6364_vm10, %v6080_v25  ;;  %5703 = vmatprep.subr.bf16.mxu0 %v5978_v0 }
  0x33   :  { %5715 = vmatprep.subr.bf16.mxu1 %v5978_v0 }
  0xe6   :  { %v6096_v27 = vpop.f32.mrb[0].mxu0 }
  0xe7   :  { %v5437_v28 = vpop.f32.mrb[1].mxu0  ;;  %v6098_v29 = vpop.f32.mrb[0].mxu1  ;;  %v174_v30 = vmul.f32 %v6096_v27, %v6096_v27  ;;  %v191_v41 = vrot.slane %v6096_v27, 1  ;;  %v228_v57 = vrot.slane %v6096_v27, 2 }
  0xe8   :  { %v5456_v31 = vpop.f32.mrb[1].mxu1  ;;  %v175_v32 = vmul.f32 %v6098_v29, %v6098_v29  ;;  %v192_v46 = vrot.slane %v6098_v29, 1  ;;  %v229_v62 = vrot.slane %v6098_v29, 2 }
  0xe9   :  { %v177_v33 = vsel %vm7956_vm2, %v174_v30, 0.0  ;;  %v289_v31 = vrot.slane %v6096_v27, 3 }
  0xea   :  { %178 = vadd.xlane.f32.xlu0 %v177_v33  ;;  %v180_v34 = vsel %vm7956_vm2, %v175_v32, 0.0 }
  0xee   :  { %181 = vadd.xlane.f32.xlu0 %v180_v34 }
 0x177   :  { %v179_v35 = vpop.xlane.xlu0 %178 }
 0x178   :  { %v183_v36 = vadd.f32 1e-30, %v179_v35 }
 0x17a   :  { %5818 = vrsqrt.f32 %v183_v36 }
 0x17b   :  { %v182_v37 = vpop.xlane.xlu0 %181 }
 0x17c   :  { %v184_v38 = vadd.f32 1e-30, %v182_v37 }
 0x17e   :  { %5820 = vrsqrt.f32 %v184_v38  ;;  %v290_v38 = vrot.slane %v6098_v29, 3 }
 0x184   :  { %v5819_v39 = vpop.eup %5818 }
 0x185   :  { %v6107_v40 = vmul.f32 %v5819_v39, %v6096_v27 }
 0x187   :  { %v195_v42 = vmul.f32 %v191_v41, %v6107_v40  ;;  %v232_v60 = vmul.f32 %v228_v57, %v6107_v40  ;;  %v293_v36 = vmul.f32 %v289_v31, %v6107_v40 }
 0x188   :  { %v5821_v43 = vpop.eup %5820 }
 0x189   :  { %v6112_v44 = vmul.f32 %v5821_v43, %v6098_v29  ;;  %v197_v45 = vsel %vm7956_vm2, %v195_v42, 0.0  ;;  %v234_v63 = vsel %vm7956_vm2, %v232_v60, 0.0  ;;  %v295_v41 = vsel %vm7956_vm2, %v293_v36, 0.0 }
 0x18a   :  { %198 = vadd.xlane.f32.xlu1 %v197_v45 }
 0x18b   :  { %v196_v47 = vmul.f32 %v192_v46, %v6112_v44  ;;  %v233_v2 = vmul.f32 %v229_v62, %v6112_v44  ;;  %v294_v42 = vmul.f32 %v290_v38, %v6112_v44 }
 0x18d   :  { %v200_v48 = vsel %vm7956_vm2, %v196_v47, 0.0  ;;  %v237_v3 = vsel %vm7956_vm2, %v233_v2, 0.0  ;;  %v298_v43 = vsel %vm7956_vm2, %v294_v42, 0.0 }
 0x18e   :  { %201 = vadd.xlane.f32.xlu1 %v200_v48 }
 0x217   :  { %v199_v49 = vpop.xlane.xlu1 %198 }
 0x218   :  { %v203_v50 = vmul.f32 %v199_v49, %v6107_v40 }
 0x21a   :  { %v207_v51 = vrot.slane %v203_v50, 7 }
 0x21b   :  { %v202_v52 = vpop.xlane.xlu1 %201 }
 0x21c   :  { %v211_v53 = vsub.f32 %v6096_v27, %v207_v51  ;;  %v204_v54 = vmul.f32 %v202_v52, %v6112_v44 }
 0x21e   :  { %v208_v55 = vrot.slane %v204_v54, 7  ;;  %v213_v56 = vmul.f32 %v211_v53, %v211_v53 }
 0x220   :  { %v212_v58 = vsub.f32 %v6098_v29, %v208_v55  ;;  %v216_v59 = vsel %vm7955_vm3, %v213_v56, 0.0 }
 0x221   :  { %217 = vadd.xlane.f32.xlu0 %v216_v59 }
 0x222   :  { %v214_v61 = vmul.f32 %v212_v58, %v212_v58 }
 0x224   :  { %v219_v1 = vsel %vm7955_vm3, %v214_v61, 0.0 }
 0x225   :  { %235 = vadd.xlane.f32.xlu0 %v234_v63  ;;  %220 = vadd.xlane.f32.xlu1 %v219_v1 }
 0x229   :  { %238 = vadd.xlane.f32.xlu1 %v237_v3 }
 0x2ae   :  { %v218_v5 = vpop.xlane.xlu0 %217 }
 0x2af   :  { %v222_v6 = vadd.f32 1e-30, %v218_v5  ;;  %v374_v5 = vrot.slane %v6096_v27, 4 }
 0x2b1   :  { %5822 = vrsqrt.f32 %v222_v6 }
 0x2b2   :  { %v221_v7 = vpop.xlane.xlu1 %220  ;;  %v236_v10 = vpop.xlane.xlu0 %235 }
 0x2b3   :  { %v223_v11 = vadd.f32 1e-30, %v221_v7  ;;  %v240_v14 = vmul.f32 %v236_v10, %v6107_v40  ;;  %v378_v10 = vmul.f32 %v374_v5, %v6107_v40 }
 0x2b5   :  { %5824 = vrsqrt.f32 %v223_v11  ;;  %v244_v15 = vrot.slane %v240_v14, 6  ;;  %v375_v14 = vrot.slane %v6098_v29, 4 }
 0x2b6   :  { %v239_v16 = vpop.xlane.xlu1 %238 }
 0x2b7   :  { %v241_v17 = vmul.f32 %v239_v16, %v6112_v44  ;;  %v248_v20 = vsub.f32 %v6096_v27, %v244_v15  ;;  %v380_v16 = vsel %vm7956_vm2, %v378_v10, 0.0 }
 0x2b9   :  { %v245_v21 = vrot.slane %v241_v17, 6  ;;  %v252_v28 = vrot.slane %v248_v20, 1  ;;  %v379_v17 = vmul.f32 %v375_v14, %v6112_v44 }
 0x2bb   :  { %v5823_v22 = vpop.eup %5822  ;;  %v249_v26 = vsub.f32 %v6098_v29, %v245_v21 }
 0x2bc   :  { %v6133_v23 = vmul.f32 %v5823_v22, %v211_v53 }
 0x2bd   :  { %v253_v35 = vrot.slane %v249_v26, 1 }
 0x2be   :  { %v256_v30 = vmul.f32 %v252_v28, %v6133_v23 }
 0x2bf   :  { %v5825_v32 = vpop.eup %5824 }
 0x2c0   :  { %v6138_v33 = vmul.f32 %v5825_v32, %v212_v58  ;;  %v258_v34 = vsel %vm7955_vm3, %v256_v30, 0.0 }
 0x2c1   :  { %259 = vadd.xlane.f32.xlu0 %v258_v34 }
 0x2c2   :  { %v257_v37 = vmul.f32 %v253_v35, %v6138_v33 }
 0x2c4   :  { %v261_v39 = vsel %vm7955_vm3, %v257_v37, 0.0 }
 0x2c5   :  { %262 = vadd.xlane.f32.xlu1 %v261_v39  ;;  %296 = vadd.xlane.f32.xlu0 %v295_v41 }
 0x2c9   :  { %299 = vadd.xlane.f32.xlu1 %v298_v43 }
 0x34e   :  { %v260_v45 = vpop.xlane.xlu0 %259 }
 0x34f   :  { %v264_v46 = vmul.f32 %v260_v45, %v6133_v23 }
 0x351   :  { %v268_v47 = vrot.slane %v264_v46, 7 }
 0x352   :  { %v263_v48 = vpop.xlane.xlu1 %262  ;;  %v297_v49 = vpop.xlane.xlu0 %296 }
 0x353   :  { %v272_v50 = vsub.f32 %v248_v20, %v268_v47  ;;  %v265_v51 = vmul.f32 %v263_v48, %v6138_v33  ;;  %v301_v52 = vmul.f32 %v297_v49, %v6107_v40  ;;  %v383_v20 = vsel %vm7956_vm2, %v379_v17, 0.0 }
 0x355   :  { %v269_v53 = vrot.slane %v265_v51, 7  ;;  %v305_v54 = vrot.slane %v301_v52, 5  ;;  %v274_v55 = vmul.f32 %v272_v50, %v272_v50 }
 0x356   :  { %v300_v56 = vpop.xlane.xlu1 %299 }
 0x357   :  { %v273_v57 = vsub.f32 %v249_v26, %v269_v53  ;;  %v309_v58 = vsub.f32 %v6096_v27, %v305_v54  ;;  %v302_v59 = vmul.f32 %v300_v56, %v6112_v44  ;;  %v277_v60 = vsel %vm7954_vm4, %v274_v55, 0.0 }
 0x358   :  { %278 = vadd.xlane.f32.xlu0 %v277_v60 }
 0x359   :  { %v306_v61 = vrot.slane %v302_v59, 5  ;;  %v275_v62 = vmul.f32 %v273_v57, %v273_v57  ;;  %v313_v63 = vrot.slane %v309_v58, 2 }
 0x35b   :  { %v310_v1 = vsub.f32 %v6098_v29, %v306_v61  ;;  %v280_v2 = vsel %vm7954_vm4, %v275_v62, 0.0  ;;  %v317_v3 = vmul.f32 %v313_v63, %v6133_v23  ;;  %v483_v61 = vrot.slane %v6096_v27, 5 }
 0x35c   :  { %281 = vadd.xlane.f32.xlu1 %v280_v2 }
 0x35d   :  { %v319_v6 = vsel %vm7955_vm3, %v317_v3, 0.0  ;;  %v314_v7 = vrot.slane %v310_v1, 2  ;;  %v487_v2 = vmul.f32 %v483_v61, %v6107_v40  ;;  %v484_v3 = vrot.slane %v6098_v29, 5 }
 0x35e   :  { %320 = vadd.xlane.f32.xlu0 %v319_v6  ;;  %v616_v61 = vrot.slane %v6096_v27, 6 }
 0x35f   :  { %v318_v11 = vmul.f32 %v314_v7, %v6138_v33  ;;  %v489_v6 = vsel %vm7956_vm2, %v487_v2, 0.0  ;;  %v488_v7 = vmul.f32 %v484_v3, %v6112_v44  ;;  %v617_v3 = vrot.slane %v6098_v29, 6 }
 0x360   :  { %v620_v2 = vmul.f32 %v616_v61, %v6107_v40 }
 0x361   :  { %v322_v15 = vsel %vm7955_vm3, %v318_v11, 0.0  ;;  %v492_v10 = vsel %vm7956_vm2, %v488_v7, 0.0 }
 0x362   :  { %323 = vadd.xlane.f32.xlu1 %v322_v15  ;;  %381 = vadd.xlane.f32.xlu0 %v380_v16  ;;  %v622_v7 = vsel %vm7956_vm2, %v620_v2, 0.0 }
 0x366   :  { %384 = vadd.xlane.f32.xlu1 %v383_v20 }
 0x3e5   :  { %v279_v21 = vpop.xlane.xlu0 %278 }
 0x3e6   :  { %v283_v22 = vadd.f32 1e-30, %v279_v21 }
 0x3e8   :  { %5826 = vrsqrt.f32 %v283_v22 }
 0x3e9   :  { %v282_v26 = vpop.xlane.xlu1 %281 }
 0x3ea   :  { %v284_v28 = vadd.f32 1e-30, %v282_v26 }
 0x3eb   :  { %v321_v30 = vpop.xlane.xlu0 %320 }
 0x3ec   :  { %5828 = vrsqrt.f32 %v284_v28  ;;  %v325_v31 = vmul.f32 %v321_v30, %v6133_v23 }
 0x3ee   :  { %v329_v32 = vrot.slane %v325_v31, 6 }
 0x3ef   :  { %v324_v34 = vpop.xlane.xlu1 %323  ;;  %v382_v35 = vpop.xlane.xlu0 %381 }
 0x3f0   :  { %v333_v36 = vsub.f32 %v309_v58, %v329_v32  ;;  %v326_v37 = vmul.f32 %v324_v34, %v6138_v33  ;;  %v386_v38 = vmul.f32 %v382_v35, %v6107_v40 }
 0x3f2   :  { %v5827_v39 = vpop.eup %5826  ;;  %v330_v41 = vrot.slane %v326_v37, 6  ;;  %v390_v42 = vrot.slane %v386_v38, 4  ;;  %v337_v43 = vrot.slane %v333_v36, 1 }
 0x3f3   :  { %v6169_v45 = vmul.f32 %v5827_v39, %v272_v50  ;;  %v385_v46 = vpop.xlane.xlu1 %384 }
 0x3f4   :  { %v334_v47 = vsub.f32 %v310_v1, %v330_v41  ;;  %v394_v48 = vsub.f32 %v6096_v27, %v390_v42  ;;  %v387_v49 = vmul.f32 %v385_v46, %v6112_v44 }
 0x3f5   :  { %v341_v51 = vmul.f32 %v337_v43, %v6169_v45 }
 0x3f6   :  { %v5829_v52 = vpop.eup %5828  ;;  %v391_v53 = vrot.slane %v387_v49, 4  ;;  %v338_v54 = vrot.slane %v334_v47, 1  ;;  %v398_v55 = vrot.slane %v394_v48, 3 }
 0x3f7   :  { %v6174_v56 = vmul.f32 %v5829_v52, %v273_v57  ;;  %v343_v58 = vsel %vm7954_vm4, %v341_v51, 0.0 }
 0x3f8   :  { %v395_v59 = vsub.f32 %v6098_v29, %v391_v53  ;;  %344 = vadd.xlane.f32.xlu0 %v343_v58  ;;  %v402_v50 = vmul.f32 %v398_v55, %v6133_v23 }
 0x3f9   :  { %v342_v60 = vmul.f32 %v338_v54, %v6174_v56 }
 0x3fa   :  { %v404_v62 = vsel %vm7955_vm3, %v402_v50, 0.0  ;;  %v399_v63 = vrot.slane %v395_v59, 3 }
 0x3fb   :  { %v346_v1 = vsel %vm7954_vm4, %v342_v60, 0.0 }
 0x3fc   :  { %347 = vadd.xlane.f32.xlu1 %v346_v1  ;;  %405 = vadd.xlane.f32.xlu0 %v404_v62  ;;  %v403_v57 = vmul.f32 %v399_v63, %v6138_v33 }
 0x3fe   :  { %v407_v5 = vsel %vm7955_vm3, %v403_v57, 0.0 }
 0x400   :  { %408 = vadd.xlane.f32.xlu1 %v407_v5  ;;  %490 = vadd.xlane.f32.xlu0 %v489_v6  ;;  %v621_v6 = vmul.f32 %v617_v3, %v6112_v44 }
 0x404   :  { %493 = vadd.xlane.f32.xlu1 %v492_v10  ;;  %v625_v10 = vsel %vm7956_vm2, %v621_v6, 0.0 }
 0x485   :  { %v345_v11 = vpop.xlane.xlu0 %344 }
 0x486   :  { %v349_v14 = vmul.f32 %v345_v11, %v6169_v45 }
 0x488   :  { %v353_v15 = vrot.slane %v349_v14, 7 }
 0x489   :  { %v348_v16 = vpop.xlane.xlu1 %347  ;;  %v406_v17 = vpop.xlane.xlu0 %405 }
 0x48a   :  { %v6191_v20 = vsub.f32 %v333_v36, %v353_v15  ;;  %v350_v21 = vmul.f32 %v348_v16, %v6174_v56  ;;  %v410_v22 = vmul.f32 %v406_v17, %v6133_v23 }
 0x48c   :  { %v354_v26 = vrot.slane %v350_v21, 7  ;;  %v414_v28 = vrot.slane %v410_v22, 5  ;;  %v359_v30 = vmul.f32 %v6191_v20, %v6191_v20 }
 0x48d   :  { %v409_v31 = vpop.xlane.xlu1 %408  ;;  %v491_v32 = vpop.xlane.xlu0 %490 }
 0x48e   :  { %v6197_v34 = vsub.f32 %v334_v47, %v354_v26  ;;  %v418_v35 = vsub.f32 %v394_v48, %v414_v28  ;;  %v411_v37 = vmul.f32 %v409_v31, %v6138_v33  ;;  %v495_v36 = vmul.f32 %v491_v32, %v6107_v40 }
 0x48f   :  { %v362_v38 = vsel %vm7953_vm5, %v359_v30, 0.0 }
 0x490   :  { %v415_v39 = vrot.slane %v411_v37, 5  ;;  %v499_v41 = vrot.slane %v495_v36, 3  ;;  %363 = vadd.xlane.f32.xlu0 %v362_v38  ;;  %v360_v42 = vmul.f32 %v6197_v34, %v6197_v34  ;;  %v422_v43 = vrot.slane %v418_v35, 2 }
 0x491   :  { %v494_v46 = vpop.xlane.xlu1 %493 }
 0x492   :  { %v419_v49 = vsub.f32 %v395_v59, %v415_v39  ;;  %v503_v51 = vsub.f32 %v6096_v27, %v499_v41  ;;  %v496_v47 = vmul.f32 %v494_v46, %v6112_v44  ;;  %v365_v48 = vsel %vm7953_vm5, %v360_v42, 0.0 }
 0x493   :  { %366 = vadd.xlane.f32.xlu1 %v365_v48  ;;  %v426_v52 = vmul.f32 %v422_v43, %v6169_v45 }
 0x494   :  { %v500_v53 = vrot.slane %v496_v47, 3  ;;  %v423_v54 = vrot.slane %v419_v49, 2  ;;  %v507_v55 = vrot.slane %v503_v51, 4 }
 0x495   :  { %v428_v58 = vsel %vm7954_vm4, %v426_v52, 0.0 }
 0x496   :  { %v504_v50 = vsub.f32 %v6098_v29, %v500_v53  ;;  %429 = vadd.xlane.f32.xlu0 %v428_v58  ;;  %v427_v60 = vmul.f32 %v423_v54, %v6174_v56  ;;  %v511_v59 = vmul.f32 %v507_v55, %v6133_v23 }
 0x498   :  { %v431_v62 = vsel %vm7954_vm4, %v427_v60, 0.0  ;;  %v513_v63 = vsel %vm7955_vm3, %v511_v59, 0.0  ;;  %v508_v1 = vrot.slane %v504_v50, 4 }
 0x499   :  { %432 = vadd.xlane.f32.xlu1 %v431_v62 }
 0x49a   :  { %514 = vadd.xlane.f32.xlu0 %v513_v63  ;;  %v512_v57 = vmul.f32 %v508_v1, %v6138_v33 }
 0x49c   :  { %v516_v5 = vsel %vm7955_vm3, %v512_v57, 0.0 }
 0x49d   :  { %517 = vadd.xlane.f32.xlu1 %v516_v5 }
 0x49e   :  { %623 = vadd.xlane.f32.xlu0 %v622_v7 }
 0x4a1   :  { %626 = vadd.xlane.f32.xlu1 %v625_v10 }
 0x51d   :  { %v364_v11 = vpop.xlane.xlu0 %363 }
 0x51e   :  { %v368_v14 = vadd.f32 1e-30, %v364_v11 }
 0x520   :  { %5830 = vrsqrt.f32 %v368_v14  ;;  %v367_v15 = vpop.xlane.xlu1 %366  ;;  %v773_v14 = vrot.slane %v6096_v27, 7 }
 0x521   :  { %v369_v16 = vadd.f32 1e-30, %v367_v15 }
 0x523   :  { %5832 = vrsqrt.f32 %v369_v16  ;;  %v430_v17 = vpop.xlane.xlu0 %429 }
 0x524   :  { %v434_v21 = vmul.f32 %v430_v17, %v6169_v45  ;;  %v777_v17 = vmul.f32 %v773_v14, %v6107_v40 }
 0x526   :  { %v438_v22 = vrot.slane %v434_v21, 6  ;;  %v433_v26 = vpop.xlane.xlu1 %432  ;;  %v774_v21 = vrot.slane %v6098_v29, 7 }
 0x527   :  { %v435_v28 = vmul.f32 %v433_v26, %v6174_v56  ;;  %v515_v30 = vpop.xlane.xlu0 %514 }
 0x528   :  { %v442_v31 = vsub.f32 %v418_v35, %v438_v22  ;;  %v519_v32 = vmul.f32 %v515_v30, %v6133_v23  ;;  %v778_v26 = vmul.f32 %v774_v21, %v6112_v44 }
 0x529   :  { %v439_v37 = vrot.slane %v435_v28, 6  ;;  %v779_v28 = vsel %vm7956_vm2, %v777_v17, 0.0 }
 0x52a   :  { %v5831_v36 = vpop.eup %5830  ;;  %v523_v38 = vrot.slane %v519_v32, 4  ;;  %v518_v39 = vpop.xlane.xlu1 %517  ;;  %v446_v41 = vrot.slane %v442_v31, 1  ;;  %v782_v30 = vsel %vm7956_vm2, %v778_v26, 0.0  ;;  %vm7963_vm2 = vcmask 520196  }
 0x52b   :  { %v6226_v42 = vmul.f32 %v5831_v36, %v6191_v20  ;;  %v443_v43 = vsub.f32 %v419_v49, %v439_v37  ;;  %v520_v46 = vmul.f32 %v518_v39, %v6138_v33  ;;  %v624_v47 = vpop.xlane.xlu0 %623 }
 0x52c   :  { %v527_v48 = vsub.f32 %v503_v51, %v523_v38  ;;  %v628_v52 = vmul.f32 %v624_v47, %v6107_v40 }
 0x52d   :  { %v5833_v53 = vpop.eup %5832  ;;  %v524_v54 = vrot.slane %v520_v46, 4  ;;  %v450_v35 = vmul.f32 %v446_v41, %v6226_v42  ;;  %v447_v55 = vrot.slane %v443_v43, 1 }
 0x52e   :  { %v6232_v58 = vmul.f32 %v5833_v53, %v6197_v34  ;;  %v632_v60 = vrot.slane %v628_v52, 2  ;;  %v627_v59 = vpop.xlane.xlu1 %626  ;;  %v531_v61 = vrot.slane %v527_v48, 3 }
 0x52f   :  { %v528_v20 = vsub.f32 %v504_v50, %v524_v54  ;;  %v629_v49 = vmul.f32 %v627_v59, %v6112_v44  ;;  %v452_v62 = vsel %vm7953_vm5, %v450_v35, 0.0 }
 0x530   :  { %v636_v51 = vsub.f32 %v6096_v27, %v632_v60  ;;  %453 = vadd.xlane.f32.xlu0 %v452_v62  ;;  %v451_v63 = vmul.f32 %v447_v55, %v6232_v58  ;;  %v535_v1 = vmul.f32 %v531_v61, %v6169_v45 }
 0x531   :  { %v633_v2 = vrot.slane %v629_v49, 2  ;;  %v532_v57 = vrot.slane %v528_v20, 3 }
 0x532   :  { %v455_v34 = vsel %vm7953_vm5, %v451_v63, 0.0  ;;  %v537_v3 = vsel %vm7954_vm4, %v535_v1, 0.0  ;;  %v640_v5 = vrot.slane %v636_v51, 5 }
 0x533   :  { %v637_v50 = vsub.f32 %v6098_v29, %v633_v2  ;;  %456 = vadd.xlane.f32.xlu1 %v455_v34  ;;  %v536_v6 = vmul.f32 %v532_v57, %v6174_v56 }
 0x534   :  { %538 = vadd.xlane.f32.xlu0 %v537_v3  ;;  %v644_v7 = vmul.f32 %v640_v5, %v6133_v23 }
 0x535   :  { %v540_v10 = vsel %vm7954_vm4, %v536_v6, 0.0  ;;  %v641_v11 = vrot.slane %v637_v50, 5 }
 0x536   :  { %v646_v15 = vsel %vm7955_vm3, %v644_v7, 0.0 }
 0x537   :  { %541 = vadd.xlane.f32.xlu1 %v540_v10  ;;  %v645_v16 = vmul.f32 %v641_v11, %v6138_v33 }
 0x538   :  { %647 = vadd.xlane.f32.xlu0 %v646_v15 }
 0x539   :  { %v649_v22 = vsel %vm7955_vm3, %v645_v16, 0.0 }
 0x53b   :  { %650 = vadd.xlane.f32.xlu1 %v649_v22 }
 0x53c   :  { %780 = vadd.xlane.f32.xlu0 %v779_v28 }
 0x53f   :  { %783 = vadd.xlane.f32.xlu1 %v782_v30 }
 0x5bd   :  { %v454_v32 = vpop.xlane.xlu0 %453 }
 0x5be   :  { %v458_v37 = vmul.f32 %v454_v32, %v6226_v42 }
 0x5c0   :  { %v462_v36 = vrot.slane %v458_v37, 7  ;;  %v457_v38 = vpop.xlane.xlu1 %456 }
 0x5c1   :  { %v459_v39 = vmul.f32 %v457_v38, %v6232_v58  ;;  %v539_v41 = vpop.xlane.xlu0 %538 }
 0x5c2   :  { %v6256_v46 = vsub.f32 %v442_v31, %v462_v36  ;;  %v543_v47 = vmul.f32 %v539_v41, %v6169_v45 }
 0x5c3   :  { %v463_v52 = vrot.slane %v459_v39, 7 }
 0x5c4   :  { %v547_v53 = vrot.slane %v543_v47, 5  ;;  %v542_v54 = vpop.xlane.xlu1 %541  ;;  %v468_v35 = vmul.f32 %v6256_v46, %v6256_v46 }
 0x5c5   :  { %v6261_v55 = vsub.f32 %v443_v43, %v463_v52  ;;  %v544_v60 = vmul.f32 %v542_v54, %v6174_v56  ;;  %v648_v59 = vpop.xlane.xlu0 %647 }
 0x5c6   :  { %v551_v61 = vsub.f32 %v527_v48, %v547_v53  ;;  %v652_v49 = vmul.f32 %v648_v59, %v6133_v23  ;;  %v471_v31 = vsel %vm7951_vm6, %v468_v35, 0.0 }
 0x5c7   :  { %v548_v62 = vrot.slane %v544_v60, 5  ;;  %472 = vadd.xlane.f32.xlu0 %v471_v31  ;;  %v469_v63 = vmul.f32 %v6261_v55, %v6261_v55 }
 0x5c8   :  { %v656_v1 = vrot.slane %v652_v49, 3  ;;  %v651_v2 = vpop.xlane.xlu1 %650  ;;  %v555_v57 = vrot.slane %v551_v61, 2 }
 0x5c9   :  { %v552_v34 = vsub.f32 %v528_v20, %v548_v62  ;;  %v653_v43 = vmul.f32 %v651_v2, %v6138_v33  ;;  %v781_v3 = vpop.xlane.xlu0 %780  ;;  %v474_v5 = vsel %vm7951_vm6, %v469_v63, 0.0 }
 0x5ca   :  { %v660_v6 = vsub.f32 %v636_v51, %v656_v1  ;;  %v785_v48 = vmul.f32 %v781_v3, %v6107_v40  ;;  %475 = vadd.xlane.f32.xlu1 %v474_v5  ;;  %v559_v7 = vmul.f32 %v555_v57, %v6226_v42 }
 0x5cb   :  { %v657_v10 = vrot.slane %v653_v43, 3  ;;  %v556_v11 = vrot.slane %v552_v34, 2 }
 0x5cc   :  { %v789_v14 = vrot.slane %v785_v48, 1  ;;  %v784_v15 = vpop.xlane.xlu1 %783  ;;  %v561_v16 = vsel %vm7953_vm5, %v559_v7, 0.0  ;;  %v664_v17 = vrot.slane %v660_v6, 4 }
 0x5cd   :  { %v661_v21 = vsub.f32 %v637_v50, %v657_v10  ;;  %v786_v20 = vmul.f32 %v784_v15, %v6112_v44  ;;  %562 = vadd.xlane.f32.xlu0 %v561_v16  ;;  %v560_v22 = vmul.f32 %v556_v11, %v6232_v58 }
 0x5ce   :  { %v793_v51 = vsub.f32 %v6096_v27, %v789_v14  ;;  %v668_v26 = vmul.f32 %v664_v17, %v6169_v45 }
 0x5cf   :  { %v790_v28 = vrot.slane %v786_v20, 1  ;;  %v564_v30 = vsel %vm7953_vm5, %v560_v22, 0.0  ;;  %v665_v32 = vrot.slane %v661_v21, 4 }
 0x5d0   :  { %565 = vadd.xlane.f32.xlu1 %v564_v30  ;;  %v670_v37 = vsel %vm7954_vm4, %v668_v26, 0.0  ;;  %v797_v36 = vrot.slane %v793_v51, 6 }
 0x5d1   :  { %v794_v38 = vsub.f32 %v6098_v29, %v790_v28  ;;  %671 = vadd.xlane.f32.xlu0 %v670_v37  ;;  %v669_v50 = vmul.f32 %v665_v32, %v6174_v56 }
 0x5d2   :  { %v801_v39 = vmul.f32 %v797_v36, %v6133_v23 }
 0x5d3   :  { %v673_v41 = vsel %vm7954_vm4, %v669_v50, 0.0  ;;  %v798_v27 = vrot.slane %v794_v38, 6 }
 0x5d4   :  { %674 = vadd.xlane.f32.xlu1 %v673_v41  ;;  %v803_v47 = vsel %vm7955_vm3, %v801_v39, 0.0 }
 0x5d5   :  { %804 = vadd.xlane.f32.xlu0 %v803_v47  ;;  %v802_v52 = vmul.f32 %v798_v27, %v6138_v33 }
 0x5d7   :  { %v806_v53 = vsel %vm7955_vm3, %v802_v52, 0.0  ;;  %vm7958_vm3 = vcmask 519171  }
 0x5d8   :  { %807 = vadd.xlane.f32.xlu1 %v806_v53 }
 0x654   :  { %v473_v54 = vpop.xlane.xlu0 %472 }
 0x655   :  { %v477_v35 = vadd.f32 1e-30, %v473_v54 }
 0x657   :  { %5834 = vrsqrt.f32 %v477_v35  ;;  %v476_v29 = vpop.xlane.xlu1 %475 }
 0x658   :  { %v478_v60 = vadd.f32 1e-30, %v476_v29 }
 0x65a   :  { %5836 = vrsqrt.f32 %v478_v60  ;;  %v563_v59 = vpop.xlane.xlu0 %562 }
 0x65b   :  { %v567_v49 = vmul.f32 %v563_v59, %v6226_v42 }
 0x65d   :  { %v571_v31 = vrot.slane %v567_v49, 6  ;;  %v566_v62 = vpop.xlane.xlu1 %565 }
 0x65e   :  { %v568_v63 = vmul.f32 %v566_v62, %v6232_v58  ;;  %v672_v1 = vpop.xlane.xlu0 %671 }
 0x65f   :  { %v575_v2 = vsub.f32 %v551_v61, %v571_v31  ;;  %v676_v57 = vmul.f32 %v672_v1, %v6169_v45 }
 0x660   :  { %v572_v43 = vrot.slane %v568_v63, 6 }
 0x661   :  { %v5835_v3 = vpop.eup %5834  ;;  %v680_v5 = vrot.slane %v676_v57, 4  ;;  %v675_v48 = vpop.xlane.xlu1 %674  ;;  %v579_v7 = vrot.slane %v575_v2, 1 }
 0x662   :  { %v6290_v10 = vmul.f32 %v5835_v3, %v6256_v46  ;;  %v576_v11 = vsub.f32 %v552_v34, %v572_v43  ;;  %v677_v14 = vmul.f32 %v675_v48, %v6174_v56  ;;  %v805_v15 = vpop.xlane.xlu0 %804 }
 0x663   :  { %v684_v16 = vsub.f32 %v660_v6, %v680_v5  ;;  %v809_v17 = vmul.f32 %v805_v15, %v6133_v23 }
 0x664   :  { %v5837_v20 = vpop.eup %5836  ;;  %v681_v22 = vrot.slane %v677_v14, 4  ;;  %v583_v61 = vmul.f32 %v579_v7, %v6290_v10  ;;  %v580_v26 = vrot.slane %v576_v11, 1 }
 0x665   :  { %v6296_v28 = vmul.f32 %v5837_v20, %v6261_v55  ;;  %v813_v30 = vrot.slane %v809_v17, 2  ;;  %v808_v32 = vpop.xlane.xlu1 %807  ;;  %v688_v37 = vrot.slane %v684_v16, 3 }
 0x666   :  { %v685_v46 = vsub.f32 %v661_v21, %v681_v22  ;;  %v810_v34 = vmul.f32 %v808_v32, %v6138_v33  ;;  %v585_v36 = vsel %vm7951_vm6, %v583_v61, 0.0 }
 0x667   :  { %v817_v50 = vsub.f32 %v793_v51, %v813_v30  ;;  %586 = vadd.xlane.f32.xlu0 %v585_v36  ;;  %v584_v6 = vmul.f32 %v580_v26, %v6296_v28  ;;  %v692_v39 = vmul.f32 %v688_v37, %v6226_v42 }
 0x668   :  { %v814_v41 = vrot.slane %v810_v34, 2  ;;  %v689_v27 = vrot.slane %v685_v46, 3 }
 0x669   :  { %v588_v47 = vsel %vm7951_vm6, %v584_v6, 0.0  ;;  %v694_v55 = vsel %vm7953_vm5, %v692_v39, 0.0  ;;  %v821_v52 = vrot.slane %v817_v50, 5 }
 0x66a   :  { %v818_v53 = vsub.f32 %v794_v38, %v814_v41  ;;  %589 = vadd.xlane.f32.xlu1 %v588_v47  ;;  %v693_v21 = vmul.f32 %v689_v27, %v6232_v58 }
 0x66b   :  { %695 = vadd.xlane.f32.xlu0 %v694_v55  ;;  %v825_v54 = vmul.f32 %v821_v52, %v6169_v45 }
 0x66c   :  { %v697_v51 = vsel %vm7953_vm5, %v693_v21, 0.0  ;;  %v822_v35 = vrot.slane %v818_v53, 5 }
 0x66d   :  { %v827_v29 = vsel %vm7954_vm4, %v825_v54, 0.0 }
 0x66e   :  { %698 = vadd.xlane.f32.xlu1 %v697_v51  ;;  %v826_v60 = vmul.f32 %v822_v35, %v6174_v56 }
 0x66f   :  { %828 = vadd.xlane.f32.xlu0 %v827_v29 }
 0x670   :  { %v830_v59 = vsel %vm7954_vm4, %v826_v60, 0.0  ;;  %vm7964_vm4 = vcmask 518146  }
 0x672   :  { %831 = vadd.xlane.f32.xlu1 %v830_v59 }
 0x6f4   :  { %v587_v49 = vpop.xlane.xlu0 %586 }
 0x6f5   :  { %v591_v38 = vmul.f32 %v587_v49, %v6290_v10 }
 0x6f7   :  { %v595_v31 = vrot.slane %v591_v38, 7  ;;  %v590_v62 = vpop.xlane.xlu1 %589 }
 0x6f8   :  { %v592_v63 = vmul.f32 %v590_v62, %v6296_v28  ;;  %v696_v1 = vpop.xlane.xlu0 %695 }
 0x6f9   :  { %v599_v57 = vsub.f32 %v575_v2, %v595_v31  ;;  %v700_v43 = vmul.f32 %v696_v1, %v6226_v42 }
 0x6fa   :  { %v596_v3 = vrot.slane %v592_v63, 7 }
 0x6fb   :  { %v704_v5 = vrot.slane %v700_v43, 5  ;;  %v699_v48 = vpop.xlane.xlu1 %698  ;;  %v601_v7 = vmul.f32 %v599_v57, %v599_v57 }
 0x6fc   :  { %v600_v14 = vsub.f32 %v576_v11, %v596_v3  ;;  %v701_v15 = vmul.f32 %v699_v48, %v6232_v58  ;;  %v829_v17 = vpop.xlane.xlu0 %828 }
 0x6fd   :  { %v708_v20 = vsub.f32 %v684_v16, %v704_v5  ;;  %v833_v22 = vmul.f32 %v829_v17, %v6169_v45  ;;  %v604_v61 = vsel %vm7950_vm7, %v601_v7, 0.0 }
 0x6fe   :  { %v705_v26 = vrot.slane %v701_v15, 5  ;;  %605 = vadd.xlane.f32.xlu0 %v604_v61  ;;  %v602_v30 = vmul.f32 %v600_v14, %v600_v14 }
 0x6ff   :  { %v837_v2 = vrot.slane %v833_v22, 3  ;;  %v832_v32 = vpop.xlane.xlu1 %831  ;;  %v712_v37 = vrot.slane %v708_v20, 2 }
 0x700   :  { %v709_v34 = vsub.f32 %v685_v46, %v705_v26  ;;  %v834_v36 = vmul.f32 %v832_v32, %v6174_v56  ;;  %v607_v6 = vsel %vm7950_vm7, %v602_v30, 0.0 }
 0x701   :  { %v841_v11 = vsub.f32 %v817_v50, %v837_v2  ;;  %608 = vadd.xlane.f32.xlu1 %v607_v6  ;;  %v716_v39 = vmul.f32 %v712_v37, %v6290_v10 }
 0x702   :  { %v838_v16 = vrot.slane %v834_v36, 3  ;;  %v713_v41 = vrot.slane %v709_v34, 2 }
 0x703   :  { %v718_v27 = vsel %vm7951_vm6, %v716_v39, 0.0  ;;  %v845_v47 = vrot.slane %v841_v11, 4 }
 0x704   :  { %v842_v55 = vsub.f32 %v818_v53, %v838_v16  ;;  %719 = vadd.xlane.f32.xlu0 %v718_v27  ;;  %v717_v52 = vmul.f32 %v713_v41, %v6296_v28 }
 0x705   :  { %v849_v21 = vmul.f32 %v845_v47, %v6226_v42 }
 0x706   :  { %v721_v46 = vsel %vm7951_vm6, %v717_v52, 0.0  ;;  %v846_v54 = vrot.slane %v842_v55, 4 }
 0x707   :  { %722 = vadd.xlane.f32.xlu1 %v721_v46  ;;  %v851_v50 = vsel %vm7953_vm5, %v849_v21, 0.0 }
 0x708   :  { %852 = vadd.xlane.f32.xlu0 %v851_v50  ;;  %v850_v51 = vmul.f32 %v846_v54, %v6232_v58 }
 0x70a   :  { %v854_v35 = vsel %vm7953_vm5, %v850_v51, 0.0  ;;  %vm7957_vm5 = vcmask 517121  }
 0x70b   :  { %855 = vadd.xlane.f32.xlu1 %v854_v35 }
 0x78b   :  { %v606_v29 = vpop.xlane.xlu0 %605 }
 0x78c   :  { %v610_v60 = vadd.f32 1e-30, %v606_v29 }
 0x78e   :  { %5838 = vrsqrt.f32 %v610_v60  ;;  %v609_v53 = vpop.xlane.xlu1 %608 }
 0x78f   :  { %v611_v59 = vadd.f32 1e-30, %v609_v53 }
 0x791   :  { %5840 = vrsqrt.f32 %v611_v59  ;;  %v720_v49 = vpop.xlane.xlu0 %719 }
 0x792   :  { %v724_v38 = vmul.f32 %v720_v49, %v6290_v10 }
 0x794   :  { %v728_v31 = vrot.slane %v724_v38, 6  ;;  %v723_v62 = vpop.xlane.xlu1 %722 }
 0x795   :  { %v725_v63 = vmul.f32 %v723_v62, %v6296_v28  ;;  %v853_v1 = vpop.xlane.xlu0 %852 }
 0x796   :  { %v732_v43 = vsub.f32 %v708_v20, %v728_v31  ;;  %v857_v3 = vmul.f32 %v853_v1, %v6226_v42 }
 0x797   :  { %v729_v5 = vrot.slane %v725_v63, 6 }
 0x798   :  { %v5839_v48 = vpop.eup %5838  ;;  %v861_v7 = vrot.slane %v857_v3, 4  ;;  %v856_v15 = vpop.xlane.xlu1 %855  ;;  %v736_v17 = vrot.slane %v732_v43, 1 }
 0x799   :  { %v6329_v22 = vmul.f32 %v5839_v48, %v599_v57  ;;  %v733_v61 = vsub.f32 %v709_v34, %v729_v5  ;;  %v858_v26 = vmul.f32 %v856_v15, %v6232_v58 }
 0x79a   :  { %v865_v30 = vsub.f32 %v841_v11, %v861_v7 }
 0x79b   :  { %v5841_v2 = vpop.eup %5840  ;;  %v862_v32 = vrot.slane %v858_v26, 4  ;;  %v740_v37 = vmul.f32 %v736_v17, %v6329_v22  ;;  %v737_v36 = vrot.slane %v733_v61, 1 }
 0x79c   :  { %v6333_v6 = vmul.f32 %v5841_v2, %v600_v14  ;;  %v869_v20 = vrot.slane %v865_v30, 3 }
 0x79d   :  { %v866_v39 = vsub.f32 %v842_v55, %v862_v32  ;;  %v742_v16 = vsel %vm7950_vm7, %v740_v37, 0.0 }
 0x79e   :  { %743 = vadd.xlane.f32.xlu0 %v742_v16  ;;  %v741_v41 = vmul.f32 %v737_v36, %v6333_v6  ;;  %v873_v57 = vmul.f32 %v869_v20, %v6290_v10 }
 0x79f   :  { %v870_v34 = vrot.slane %v866_v39, 3 }
 0x7a0   :  { %v745_v27 = vsel %vm7950_vm7, %v741_v41, 0.0  ;;  %v875_v11 = vsel %vm7951_vm6, %v873_v57, 0.0 }
 0x7a1   :  { %746 = vadd.xlane.f32.xlu1 %v745_v27  ;;  %v874_v47 = vmul.f32 %v870_v34, %v6296_v28 }
 0x7a2   :  { %876 = vadd.xlane.f32.xlu0 %v875_v11 }
 0x7a3   :  { %v878_v14 = vsel %vm7951_vm6, %v874_v47, 0.0 }
 0x7a5   :  { %879 = vadd.xlane.f32.xlu1 %v878_v14 }
 0x82b   :  { %v744_v55 = vpop.xlane.xlu0 %743 }
 0x82c   :  { %v748_v52 = vmul.f32 %v744_v55, %v6329_v22 }
 0x82e   :  { %v752_v21 = vrot.slane %v748_v52, 7  ;;  %v747_v46 = vpop.xlane.xlu1 %746 }
 0x82f   :  { %v749_v54 = vmul.f32 %v747_v46, %v6333_v6  ;;  %v877_v50 = vpop.xlane.xlu0 %876 }
 0x830   :  { %v756_v51 = vsub.f32 %v732_v43, %v752_v21  ;;  %v881_v35 = vmul.f32 %v877_v50, %v6290_v10 }
 0x831   :  { %v753_v29 = vrot.slane %v749_v54, 7 }
 0x832   :  { %v885_v60 = vrot.slane %v881_v35, 5  ;;  %v880_v53 = vpop.xlane.xlu1 %879  ;;  %v758_v59 = vmul.f32 %v756_v51, %v756_v51 }
 0x833   :  { %v757_v49 = vsub.f32 %v733_v61, %v753_v29  ;;  %v882_v38 = vmul.f32 %v880_v53, %v6296_v28 }
 0x834   :  { %v889_v31 = vsub.f32 %v865_v30, %v885_v60  ;;  %v761_v62 = vsel %vm7949_vm8, %v758_v59, 0.0 }
 0x835   :  { %v886_v63 = vrot.slane %v882_v38, 5  ;;  %762 = vadd.xlane.f32.xlu0 %v761_v62  ;;  %v759_v1 = vmul.f32 %v757_v49, %v757_v49 }
 0x836   :  { %v893_v3 = vrot.slane %v889_v31, 2 }
 0x837   :  { %v890_v5 = vsub.f32 %v866_v39, %v886_v63  ;;  %v764_v43 = vsel %vm7949_vm8, %v759_v1, 0.0 }
 0x838   :  { %765 = vadd.xlane.f32.xlu1 %v764_v43  ;;  %v897_v48 = vmul.f32 %v893_v3, %v6329_v22 }
 0x839   :  { %v894_v7 = vrot.slane %v890_v5, 2 }
 0x83a   :  { %v899_v15 = vsel %vm7950_vm7, %v897_v48, 0.0 }
 0x83b   :  { %900 = vadd.xlane.f32.xlu0 %v899_v15  ;;  %v898_v17 = vmul.f32 %v894_v7, %v6333_v6 }
 0x83d   :  { %v902_v61 = vsel %vm7950_vm7, %v898_v17, 0.0 }
 0x83e   :  { %903 = vadd.xlane.f32.xlu1 %v902_v61 }
 0x8c2   :  { %v763_v26 = vpop.xlane.xlu0 %762 }
 0x8c3   :  { %v767_v30 = vadd.f32 1e-30, %v763_v26 }
 0x8c5   :  { %5842 = vrsqrt.f32 %v767_v30  ;;  %v766_v2 = vpop.xlane.xlu1 %765 }
 0x8c6   :  { %v768_v32 = vadd.f32 1e-30, %v766_v2 }
 0x8c8   :  { %5844 = vrsqrt.f32 %v768_v32  ;;  %v901_v37 = vpop.xlane.xlu0 %900 }
 0x8c9   :  { %v905_v36 = vmul.f32 %v901_v37, %v6329_v22 }
 0x8cb   :  { %v909_v20 = vrot.slane %v905_v36, 6  ;;  %v904_v39 = vpop.xlane.xlu1 %903 }
 0x8cc   :  { %v906_v16 = vmul.f32 %v904_v39, %v6333_v6 }
 0x8cd   :  { %v913_v41 = vsub.f32 %v889_v31, %v909_v20 }
 0x8ce   :  { %v910_v57 = vrot.slane %v906_v16, 6 }
 0x8cf   :  { %v5843_v34 = vpop.eup %5842  ;;  %v917_v27 = vrot.slane %v913_v41, 1 }
 0x8d0   :  { %v914_v11 = vsub.f32 %v890_v5, %v910_v57  ;;  %v6354_v47 = vmul.f32 %v5843_v34, %v756_v51  ;;  %v954_v5 = vlaneseq }
 0x8d2   :  { %v5845_v14 = vpop.eup %5844  ;;  %v921_v55 = vmul.f32 %v917_v27, %v6354_v47  ;;  %v918_v52 = vrot.slane %v914_v11, 1  ;;  %v6404_v43 = vshrl.u32 %v954_v5, 7 }
 0x8d3   :  { %v6357_v21 = vmul.f32 %v5845_v14, %v757_v49 }
 0x8d4   :  { %v923_v46 = vsel %vm7949_vm8, %v921_v55, 0.0  ;;  %v6407_v15 = vsub.s32 0, %v6404_v43  ;;  %v6410_v61 = vsub.s32 1, %v6404_v43  ;;  %v6413_v30 = vsub.s32 2, %v6404_v43 }
 0x8d5   :  { %924 = vadd.xlane.f32.xlu0 %v923_v46  ;;  %v922_v54 = vmul.f32 %v918_v52, %v6357_v21  ;;  %v6418_v32 = vsub.s32 3, %v6404_v43  ;;  %vm956_vm12 = vcmp.eq.s32.totalorder %v6404_v43, 0  ;;  %v6426_v20 = vsub.s32 4, %v6404_v43 }
 0x8d6   :  { %v960_v2 = vrot.slane %v6107_v40, %v6407_v15  ;;  %v964_v37 = vrot.slane %v6112_v44, %v6407_v15  ;;  %v971_v36 = vrot.slane %v6133_v23, %v6410_v61  ;;  %vm967_vm13 = vcmp.eq.s32.totalorder %v6404_v43, 1 }
 0x8d7   :  { %v926_v50 = vsel %vm7949_vm8, %v922_v54, 0.0  ;;  %v6430_v39 = vsub.s32 5, %v6404_v43  ;;  %v6433_v40 = vsub.s32 6, %v6404_v43  ;;  %v982_v16 = vrot.slane %v6169_v45, %v6413_v30 }
 0x8d8   :  { %927 = vadd.xlane.f32.xlu1 %v926_v50  ;;  %v965_v44 = vsel %vm956_vm12, %v960_v2, 0.0  ;;  %vm978_vm14 = vcmp.eq.s32.totalorder %v6404_v43, 2  ;;  %v993_v23 = vrot.slane %v6226_v42, %v6418_v32  ;;  %vm989_vm15 = vcmp.eq.s32.totalorder %v6404_v43, 3 }
 0x8d9   :  { %v976_v57 = vsel %vm967_vm13, %v971_v36, %v965_v44  ;;  %v1004_v34 = vrot.slane %v6290_v10, %v6426_v20  ;;  %v975_v45 = vrot.slane %v6138_v33, %v6410_v61  ;;  %v1015_v27 = vrot.slane %v6329_v22, %v6430_v39 }
 0x8da   :  { %v6455_v42 = vsub.s32 7, %v6404_v43  ;;  %v1026_v55 = vrot.slane %v6354_v47, %v6433_v40  ;;  %v987_v10 = vsel %vm978_vm14, %v982_v16, %v976_v57  ;;  %vm1011_vm8 = vcmp.eq.s32.totalorder %v6404_v43, 5 }
 0x8db   :  { %v997_v33 = vrot.slane %v6232_v58, %v6418_v32  ;;  %v998_v22 = vsel %vm989_vm15, %v993_v23, %v987_v10  ;;  %vm1022_vm7 = vcmp.eq.s32.totalorder %v6404_v43, 6  ;;  %vm1033_vm6 = vcmp.eq.s32.totalorder %v6404_v43, 7 }
 0x8dc   :  { %v1019_v58 = vrot.slane %v6333_v6, %v6430_v39  ;;  %v1030_v50 = vrot.slane %v6357_v21, %v6433_v40 }
 0x962   :  { %v925_v35 = vpop.xlane.xlu0 %924 }
 0x963   :  { %v929_v29 = vmul.f32 %v925_v35, %v6354_v47 }
 0x965   :  { %v933_v60 = vrot.slane %v929_v29, 7  ;;  %v928_v53 = vpop.xlane.xlu1 %927 }
 0x966   :  { %v930_v59 = vmul.f32 %v928_v53, %v6357_v21 }
 0x967   :  { %v937_v49 = vsub.f32 %v913_v41, %v933_v60  ;;  %v966_v41 = vsel %vm956_vm12, %v964_v37, 0.0 }
 0x968   :  { %v934_v38 = vrot.slane %v930_v59, 7  ;;  %v977_v46 = vsel %vm967_vm13, %v975_v45, %v966_v41 }
 0x969   :  { %v939_v31 = vmul.f32 %v937_v49, %v937_v49 }
 0x96a   :  { %v938_v62 = vsub.f32 %v914_v11, %v934_v38  ;;  %v986_v11 = vrot.slane %v6174_v56, %v6413_v30  ;;  %v1008_v56 = vrot.slane %v6296_v28, %v6426_v20 }
 0x96b   :  { %v942_v63 = vsel %vm7948_vm11, %v939_v31, 0.0 }
 0x96c   :  { %943 = vadd.xlane.f32.xlu0 %v942_v63  ;;  %v940_v1 = vmul.f32 %v938_v62, %v938_v62  ;;  %v988_v29 = vsel %vm978_vm14, %v986_v11, %v977_v46 }
 0x96d   :  { %v999_v59 = vsel %vm989_vm15, %v997_v33, %v988_v29 }
 0x96e   :  { %v945_v3 = vsel %vm7948_vm11, %v940_v1, 0.0  ;;  %vm1000_vm11 = vcmp.eq.s32.totalorder %v6404_v43, 4 }
 0x96f   :  { %946 = vadd.xlane.f32.xlu1 %v945_v3  ;;  %v1009_v47 = vsel %vm1000_vm11, %v1004_v34, %v998_v22  ;;  %v1010_v21 = vsel %vm1000_vm11, %v1008_v56, %v999_v59 }
 0x970   :  { %v1020_v35 = vsel %vm1011_vm8, %v1015_v27, %v1009_v47 }
 0x971   :  { %v1031_v60 = vsel %vm1022_vm7, %v1026_v55, %v1020_v35 }
 0x9f9   :  { %v944_v48 = vpop.xlane.xlu0 %943 }
 0x9fa   :  { %v948_v7 = vadd.f32 1e-30, %v944_v48 }
 0x9fc   :  { %5846 = vrsqrt.f32 %v948_v7  ;;  %v947_v17 = vpop.xlane.xlu1 %946 }
 0x9fd   :  { %v949_v26 = vadd.f32 1e-30, %v947_v17 }
 0x9ff   :  { %5848 = vrsqrt.f32 %v949_v26 }
 0xa06   :  { %v5847_v14 = vpop.eup %5846 }
 0xa07   :  { %v952_v52 = vmul.f32 %v5847_v14, %v937_v49  ;;  %v1021_v49 = vsel %vm1011_vm8, %v1019_v58, %v1010_v21 }
 0xa08   :  { %v1032_v31 = vsel %vm1022_vm7, %v1030_v50, %v1021_v49 }
 0xa09   :  { %v5849_v54 = vpop.eup %5848  ;;  %v1037_v28 = vrot.slane %v952_v52, %v6455_v42 }
 0xa0a   :  { %v953_v53 = vmul.f32 %v5849_v54, %v938_v62 }
 0xa0b   :  { %v1042_v6 = vsel %vm1033_vm6, %v1037_v28, %v1031_v60 }
 0xa0c   :  { %5474 = vmatmul.mubr.msk.f32.vlgmr.msra.gmra.mrb[2].mxu0 %vm7952_vm9, %v1042_v6  ;;  %v1041_v38 = vrot.slane %v953_v53, %v6455_v42 }
 0xa0d   :  { %5705 = vmatpush3.bf16.msra.mxu0 %v6012_v4  ;;  %5511 = vmatprep.mubr.msk.f32.mxu0 %vm5979_vm0, %v5980_v8 }
 0xa0e   :  { %v1043_v62 = vsel %vm1033_vm6, %v1041_v38, %v1032_v31  ;;  %5706 = vmatprep.subr.bf16.mxu0 %v5978_v0 }
 0xa0f   :  { %5493 = vmatmul.mubr.msk.f32.vlgmr.msra.gmra.mrb[2].mxu1 %vm7952_vm9, %v1043_v62  ;;  %vm1241_vm9 = vcmask 516096  }
 0xa10   :  { %5717 = vmatpush3.bf16.msra.mxu1 %v6027_v9  ;;  %5530 = vmatprep.mubr.msk.f32.mxu1 %vm5979_vm0, %v5980_v8 }
 0xa11   :  { %5708 = vmatpush3.bf16.msra.mxu0 %v6036_v12  ;;  %5718 = vmatprep.subr.bf16.mxu1 %v5978_v0 }
 0xa12   :  { %5709 = vmatprep.subr.bf16.mxu0 %v5978_v0 }
 0xa14   :  { %5720 = vmatpush3.bf16.msra.mxu1 %v6040_v13 }
 0xa15   :  { %5711 = vmatpush3.bf16.msra.mxu0 %v6056_v18  ;;  %5721 = vmatprep.subr.bf16.mxu1 %v5978_v0 }
 0xa16   :  { %5712 = vmatprep.subr.bf16.mxu0 %v5978_v0 }
 0xa18   :  { %5723 = vmatpush3.bf16.msra.mxu1 %v6060_v19 }
 0xa19   :  { %5714 = vmatpush3.bf16.msra.mxu0 %v6076_v24  ;;  %5724 = vmatprep.subr.bf16.mxu1 %v5978_v0 }
 0xa1a   :  { %5727 = vmatprep.subr.bf16.mxu0 %v5978_v0 }
 0xa1c   :  { %5726 = vmatpush3.bf16.msra.mxu1 %v6080_v25 }
 0xa1d   :  { %5743 = vmatprep.subr.bf16.mxu1 %v5978_v0 }
 0xadf   :  { %v6522_v63 = vpop.f32.mrb[2].mxu0 }
 0xae0   :  { %v5475_v1 = vpop.f32.mrb[3].mxu0  ;;  %v1239_v3 = vmul.f32 %v6522_v63, %v6522_v63  ;;  %v1256_v41 = vrot.slane %v6522_v63, 1  ;;  %v1293_v54 = vrot.slane %v6522_v63, 2 }
 0xae2   :  { %v6526_v5 = vpop.f32.mrb[2].mxu1  ;;  %v1242_v48 = vsel %vm1241_vm9, %v1239_v3, 0.0 }
 0xae3   :  { %1243 = vadd.xlane.f32.xlu0 %v1242_v48  ;;  %v5494_v7 = vpop.f32.mrb[3].mxu1  ;;  %v1240_v17 = vmul.f32 %v6526_v5, %v6526_v5  ;;  %v1257_v27 = vrot.slane %v6526_v5, 1  ;;  %v1294_v60 = vrot.slane %v6526_v5, 2 }
 0xae5   :  { %v1245_v26 = vsel %vm1241_vm9, %v1240_v17, 0.0 }
 0xae6   :  { %1246 = vadd.xlane.f32.xlu1 %v1245_v26 }
 0xb70   :  { %v1244_v2 = vpop.xlane.xlu0 %1243 }
 0xb71   :  { %v1248_v37 = vadd.f32 1e-30, %v1244_v2 }
 0xb73   :  { %5850 = vrsqrt.f32 %v1248_v37  ;;  %v1247_v36 = vpop.xlane.xlu1 %1246 }
 0xb74   :  { %v1249_v16 = vadd.f32 1e-30, %v1247_v36 }
 0xb76   :  { %5852 = vrsqrt.f32 %v1249_v16 }
 0xb7d   :  { %v5851_v44 = vpop.eup %5850 }
 0xb7e   :  { %v6533_v23 = vmul.f32 %v5851_v44, %v6522_v63 }
 0xb80   :  { %v5853_v57 = vpop.eup %5852  ;;  %v1260_v34 = vmul.f32 %v1256_v41, %v6533_v23  ;;  %v1297_v28 = vmul.f32 %v1293_v54, %v6533_v23 }
 0xb81   :  { %v6538_v45 = vmul.f32 %v5853_v57, %v6526_v5 }
 0xb82   :  { %v1262_v11 = vsel %vm1241_vm9, %v1260_v34, 0.0  ;;  %v1299_v6 = vsel %vm1241_vm9, %v1297_v28, 0.0  ;;  %v1354_v34 = vrot.slane %v6522_v63, 3 }
 0xb83   :  { %1263 = vadd.xlane.f32.xlu0 %v1262_v11  ;;  %v1261_v14 = vmul.f32 %v1257_v27, %v6538_v45  ;;  %v1298_v59 = vmul.f32 %v1294_v60, %v6538_v45 }
 0xb85   :  { %v1265_v55 = vsel %vm1241_vm9, %v1261_v14, 0.0  ;;  %v1302_v21 = vsel %vm1241_vm9, %v1298_v59, 0.0 }
 0xb86   :  { %1266 = vadd.xlane.f32.xlu1 %v1265_v55  ;;  %v1358_v55 = vmul.f32 %v1354_v34, %v6533_v23 }
 0xc10   :  { %v1264_v10 = vpop.xlane.xlu0 %1263 }
 0xc11   :  { %v1268_v33 = vmul.f32 %v1264_v10, %v6533_v23 }
 0xc13   :  { %v1272_v52 = vrot.slane %v1268_v33, 7  ;;  %v1267_v22 = vpop.xlane.xlu1 %1266  ;;  %v1355_v33 = vrot.slane %v6526_v5, 3 }
 0xc14   :  { %v1269_v56 = vmul.f32 %v1267_v22, %v6538_v45 }
 0xc15   :  { %v1276_v47 = vsub.f32 %v6522_v63, %v1272_v52  ;;  %v1359_v22 = vmul.f32 %v1355_v33, %v6538_v45 }
 0xc16   :  { %v1273_v46 = vrot.slane %v1269_v56, 7  ;;  %v1360_v56 = vsel %vm1241_vm9, %v1358_v55, 0.0 }
 0xc17   :  { %v1278_v58 = vmul.f32 %v1276_v47, %v1276_v47 }
 0xc18   :  { %v1277_v50 = vsub.f32 %v6526_v5, %v1273_v46 }
 0xc19   :  { %v1281_v35 = vsel %vm7957_vm5, %v1278_v58, 0.0 }
 0xc1a   :  { %1282 = vadd.xlane.f32.xlu0 %v1281_v35  ;;  %v1279_v29 = vmul.f32 %v1277_v50, %v1277_v50 }
 0xc1c   :  { %v1284_v53 = vsel %vm7957_vm5, %v1279_v29, 0.0 }
 0xc1d   :  { %1285 = vadd.xlane.f32.xlu1 %v1284_v53 }
 0xc1e   :  { %1300 = vadd.xlane.f32.xlu0 %v1299_v6 }
 0xc21   :  { %1303 = vadd.xlane.f32.xlu1 %v1302_v21 }
 0xca7   :  { %v1283_v49 = vpop.xlane.xlu0 %1282 }
 0xca8   :  { %v1287_v38 = vadd.f32 1e-30, %v1283_v49 }
 0xcaa   :  { %5854 = vrsqrt.f32 %v1287_v38  ;;  %v1286_v31 = vpop.xlane.xlu1 %1285 }
 0xcab   :  { %v1288_v62 = vadd.f32 1e-30, %v1286_v31  ;;  %v1301_v1 = vpop.xlane.xlu0 %1300 }
 0xcac   :  { %v1305_v3 = vmul.f32 %v1301_v1, %v6533_v23 }
 0xcad   :  { %5856 = vrsqrt.f32 %v1288_v62 }
 0xcae   :  { %v1309_v48 = vrot.slane %v1305_v3, 6  ;;  %v1304_v7 = vpop.xlane.xlu1 %1303 }
 0xcaf   :  { %v1306_v17 = vmul.f32 %v1304_v7, %v6538_v45 }
 0xcb0   :  { %v1313_v26 = vsub.f32 %v6522_v63, %v1309_v48 }
 0xcb1   :  { %v1310_v2 = vrot.slane %v1306_v17, 6 }
 0xcb2   :  { %v1317_v44 = vrot.slane %v1313_v26, 1 }
 0xcb3   :  { %v1314_v36 = vsub.f32 %v6526_v5, %v1310_v2  ;;  %v1439_v2 = vrot.slane %v6522_v63, 4 }
 0xcb4   :  { %v5855_v37 = vpop.eup %5854 }
 0xcb5   :  { %v6560_v16 = vmul.f32 %v5855_v37, %v1276_v47  ;;  %v1318_v11 = vrot.slane %v1314_v36, 1  ;;  %v1363_v47 = vsel %vm1241_vm9, %v1359_v22, 0.0 }
 0xcb7   :  { %v5857_v41 = vpop.eup %5856  ;;  %v1321_v57 = vmul.f32 %v1317_v44, %v6560_v16  ;;  %v1443_v44 = vmul.f32 %v1439_v2, %v6533_v23 }
 0xcb8   :  { %v6564_v27 = vmul.f32 %v5857_v41, %v1277_v50 }
 0xcb9   :  { %v1323_v14 = vsel %vm7957_vm5, %v1321_v57, 0.0  ;;  %v1440_v57 = vrot.slane %v6526_v5, 4 }
 0xcba   :  { %1324 = vadd.xlane.f32.xlu0 %v1323_v14  ;;  %v1322_v10 = vmul.f32 %v1318_v11, %v6564_v27  ;;  %v1445_v14 = vsel %vm1241_vm9, %v1443_v44, 0.0 }
 0xcbb   :  { %v1444_v11 = vmul.f32 %v1440_v57, %v6538_v45  ;;  %v1548_v57 = vrot.slane %v6522_v63, 5 }
 0xcbc   :  { %v1326_v52 = vsel %vm7957_vm5, %v1322_v10, 0.0 }
 0xcbd   :  { %1327 = vadd.xlane.f32.xlu1 %v1326_v52  ;;  %v1448_v55 = vsel %vm1241_vm9, %v1444_v11, 0.0 }
 0xcbe   :  { %1361 = vadd.xlane.f32.xlu0 %v1360_v56 }
 0xcc1   :  { %1364 = vadd.xlane.f32.xlu1 %v1363_v47 }
 0xd47   :  { %v1325_v46 = vpop.xlane.xlu0 %1324 }
 0xd48   :  { %v1329_v58 = vmul.f32 %v1325_v46, %v6560_v16 }
 0xd4a   :  { %v1333_v54 = vrot.slane %v1329_v58, 7  ;;  %v1328_v50 = vpop.xlane.xlu1 %1327 }
 0xd4b   :  { %v1330_v35 = vmul.f32 %v1328_v50, %v6564_v27  ;;  %v1362_v28 = vpop.xlane.xlu0 %1361 }
 0xd4c   :  { %v1337_v29 = vsub.f32 %v1313_v26, %v1333_v54  ;;  %v1366_v60 = vmul.f32 %v1362_v28, %v6533_v23 }
 0xd4d   :  { %v1334_v53 = vrot.slane %v1330_v35, 7 }
 0xd4e   :  { %v1370_v59 = vrot.slane %v1366_v60, 5  ;;  %v1365_v6 = vpop.xlane.xlu1 %1364  ;;  %v1339_v21 = vmul.f32 %v1337_v29, %v1337_v29 }
 0xd4f   :  { %v1338_v49 = vsub.f32 %v1314_v36, %v1334_v53  ;;  %v1367_v38 = vmul.f32 %v1365_v6, %v6538_v45 }
 0xd50   :  { %v1374_v31 = vsub.f32 %v6522_v63, %v1370_v59  ;;  %v1342_v62 = vsel %vm7964_vm4, %v1339_v21, 0.0 }
 0xd51   :  { %v1371_v1 = vrot.slane %v1367_v38, 5  ;;  %1343 = vadd.xlane.f32.xlu0 %v1342_v62  ;;  %v1340_v3 = vmul.f32 %v1338_v49, %v1338_v49 }
 0xd52   :  { %v1378_v48 = vrot.slane %v1374_v31, 2 }
 0xd53   :  { %v1375_v7 = vsub.f32 %v6526_v5, %v1371_v1  ;;  %v1345_v17 = vsel %vm7964_vm4, %v1340_v3, 0.0 }
 0xd54   :  { %1346 = vadd.xlane.f32.xlu1 %v1345_v17  ;;  %v1382_v26 = vmul.f32 %v1378_v48, %v6560_v16 }
 0xd55   :  { %v1379_v37 = vrot.slane %v1375_v7, 2 }
 0xd56   :  { %v1384_v36 = vsel %vm7957_vm5, %v1382_v26, 0.0 }
 0xd57   :  { %1385 = vadd.xlane.f32.xlu0 %v1384_v36  ;;  %v1383_v41 = vmul.f32 %v1379_v37, %v6564_v27 }
 0xd59   :  { %v1387_v34 = vsel %vm7957_vm5, %v1383_v41, 0.0 }
 0xd5a   :  { %1388 = vadd.xlane.f32.xlu1 %v1387_v34 }
 0xd5b   :  { %1446 = vadd.xlane.f32.xlu0 %v1445_v14  ;;  %v1552_v14 = vmul.f32 %v1548_v57, %v6533_v23 }
 0xd5e   :  { %1449 = vadd.xlane.f32.xlu1 %v1448_v55  ;;  %v1549_v55 = vrot.slane %v6526_v5, 5 }
 0xdde   :  { %v1344_v10 = vpop.xlane.xlu0 %1343 }
 0xddf   :  { %v1348_v33 = vadd.f32 1e-30, %v1344_v10 }
 0xde1   :  { %5858 = vrsqrt.f32 %v1348_v33  ;;  %v1347_v52 = vpop.xlane.xlu1 %1346  ;;  %v1553_v33 = vmul.f32 %v1549_v55, %v6538_v45 }
 0xde2   :  { %v1349_v22 = vadd.f32 1e-30, %v1347_v52  ;;  %v1554_v52 = vsel %vm1241_vm9, %v1552_v14, 0.0 }
 0xde4   :  { %5860 = vrsqrt.f32 %v1349_v22  ;;  %v1386_v56 = vpop.xlane.xlu0 %1385  ;;  %v1557_v22 = vsel %vm1241_vm9, %v1553_v33, 0.0 }
 0xde5   :  { %v1390_v47 = vmul.f32 %v1386_v56, %v6560_v16 }
 0xde7   :  { %v1394_v46 = vrot.slane %v1390_v47, 6  ;;  %v1389_v58 = vpop.xlane.xlu1 %1388 }
 0xde8   :  { %v1391_v54 = vmul.f32 %v1389_v58, %v6564_v27  ;;  %v1447_v50 = vpop.xlane.xlu0 %1446 }
 0xde9   :  { %v1398_v35 = vsub.f32 %v1374_v31, %v1394_v46  ;;  %v1451_v28 = vmul.f32 %v1447_v50, %v6533_v23 }
 0xdea   :  { %v1395_v60 = vrot.slane %v1391_v54, 6 }
 0xdeb   :  { %v5859_v53 = vpop.eup %5858  ;;  %v1455_v59 = vrot.slane %v1451_v28, 4  ;;  %v1450_v6 = vpop.xlane.xlu1 %1449  ;;  %v1402_v21 = vrot.slane %v1398_v35, 1 }
 0xdec   :  { %v6595_v38 = vmul.f32 %v5859_v53, %v1337_v29  ;;  %v1399_v62 = vsub.f32 %v1375_v7, %v1395_v60  ;;  %v1452_v1 = vmul.f32 %v1450_v6, %v6538_v45 }
 0xded   :  { %v1459_v3 = vsub.f32 %v6522_v63, %v1455_v59 }
 0xdee   :  { %v5861_v48 = vpop.eup %5860  ;;  %v1456_v17 = vrot.slane %v1452_v1, 4  ;;  %v1406_v26 = vmul.f32 %v1402_v21, %v6595_v38  ;;  %v1403_v2 = vrot.slane %v1399_v62, 1 }
 0xdef   :  { %v6600_v31 = vmul.f32 %v5861_v48, %v1338_v49  ;;  %v1463_v37 = vrot.slane %v1459_v3, 3 }
 0xdf0   :  { %v1460_v36 = vsub.f32 %v6526_v5, %v1456_v17  ;;  %v1408_v44 = vsel %vm7964_vm4, %v1406_v26, 0.0 }
 0xdf1   :  { %1409 = vadd.xlane.f32.xlu0 %v1408_v44  ;;  %v1407_v29 = vmul.f32 %v1403_v2, %v6600_v31  ;;  %v1467_v7 = vmul.f32 %v1463_v37, %v6560_v16 }
 0xdf2   :  { %v1464_v41 = vrot.slane %v1460_v36, 3 }
 0xdf3   :  { %v1411_v34 = vsel %vm7964_vm4, %v1407_v29, 0.0  ;;  %v1469_v11 = vsel %vm7957_vm5, %v1467_v7, 0.0 }
 0xdf4   :  { %1412 = vadd.xlane.f32.xlu1 %v1411_v34  ;;  %v1468_v49 = vmul.f32 %v1464_v41, %v6564_v27 }
 0xdf5   :  { %1470 = vadd.xlane.f32.xlu0 %v1469_v11 }
 0xdf6   :  { %v1472_v10 = vsel %vm7957_vm5, %v1468_v49, 0.0 }
 0xdf8   :  { %1473 = vadd.xlane.f32.xlu1 %v1472_v10 }
 0xdf9   :  { %1555 = vadd.xlane.f32.xlu0 %v1554_v52 }
 0xdfc   :  { %1558 = vadd.xlane.f32.xlu1 %v1557_v22  ;;  %v1681_v22 = vrot.slane %v6522_v63, 6 }
 0xe7e   :  { %v1410_v56 = vpop.xlane.xlu0 %1409 }
 0xe7f   :  { %v1414_v47 = vmul.f32 %v1410_v56, %v6595_v38 }
 0xe81   :  { %v1418_v46 = vrot.slane %v1414_v47, 7  ;;  %v1413_v58 = vpop.xlane.xlu1 %1412 }
 0xe82   :  { %v1415_v54 = vmul.f32 %v1413_v58, %v6600_v31  ;;  %v1471_v50 = vpop.xlane.xlu0 %1470  ;;  %v1685_v58 = vmul.f32 %v1681_v22, %v6533_v23 }
 0xe83   :  { %v6618_v28 = vsub.f32 %v1398_v35, %v1418_v46  ;;  %v1475_v60 = vmul.f32 %v1471_v50, %v6560_v16  ;;  %v1682_v50 = vrot.slane %v6526_v5, 6 }
 0xe84   :  { %v1419_v53 = vrot.slane %v1415_v54, 7 }
 0xe85   :  { %v1479_v59 = vrot.slane %v1475_v60, 5  ;;  %v1474_v6 = vpop.xlane.xlu1 %1473  ;;  %v1424_v21 = vmul.f32 %v6618_v28, %v6618_v28 }
 0xe86   :  { %v6623_v1 = vsub.f32 %v1399_v62, %v1419_v53  ;;  %v1476_v48 = vmul.f32 %v1474_v6, %v6564_v27  ;;  %v1556_v17 = vpop.xlane.xlu0 %1555  ;;  %v1686_v53 = vmul.f32 %v1682_v50, %v6538_v45 }
 0xe87   :  { %v1483_v26 = vsub.f32 %v1459_v3, %v1479_v59  ;;  %v1560_v2 = vmul.f32 %v1556_v17, %v6533_v23  ;;  %v1427_v35 = vsel %vm7958_vm3, %v1424_v21, 0.0  ;;  %v1687_v59 = vsel %vm1241_vm9, %v1685_v58, 0.0 }
 0xe88   :  { %v1480_v37 = vrot.slane %v1476_v48, 5  ;;  %1428 = vadd.xlane.f32.xlu0 %v1427_v35  ;;  %v1425_v44 = vmul.f32 %v6623_v1, %v6623_v1  ;;  %v1690_v6 = vsel %vm1241_vm9, %v1686_v53, 0.0 }
 0xe89   :  { %v1564_v29 = vrot.slane %v1560_v2, 3  ;;  %v1559_v7 = vpop.xlane.xlu1 %1558  ;;  %v1487_v41 = vrot.slane %v1483_v26, 2 }
 0xe8a   :  { %v1484_v57 = vsub.f32 %v1460_v36, %v1480_v37  ;;  %v1561_v62 = vmul.f32 %v1559_v7, %v6538_v45  ;;  %v1430_v34 = vsel %vm7958_vm3, %v1425_v44, 0.0 }
 0xe8b   :  { %v1568_v11 = vsub.f32 %v6522_v63, %v1564_v29  ;;  %1431 = vadd.xlane.f32.xlu1 %v1430_v34  ;;  %v1491_v3 = vmul.f32 %v1487_v41, %v6595_v38 }
 0xe8c   :  { %v1565_v49 = vrot.slane %v1561_v62, 3  ;;  %v1488_v14 = vrot.slane %v1484_v57, 2 }
 0xe8d   :  { %v1493_v55 = vsel %vm7964_vm4, %v1491_v3, 0.0  ;;  %v1572_v10 = vrot.slane %v1568_v11, 4 }
 0xe8e   :  { %v1569_v33 = vsub.f32 %v6526_v5, %v1565_v49  ;;  %1494 = vadd.xlane.f32.xlu0 %v1493_v55  ;;  %v1492_v52 = vmul.f32 %v1488_v14, %v6600_v31 }
 0xe8f   :  { %v1576_v36 = vmul.f32 %v1572_v10, %v6560_v16 }
 0xe90   :  { %v1496_v56 = vsel %vm7964_vm4, %v1492_v52, 0.0  ;;  %v1573_v47 = vrot.slane %v1569_v33, 4 }
 0xe91   :  { %1497 = vadd.xlane.f32.xlu1 %v1496_v56  ;;  %v1578_v46 = vsel %vm7957_vm5, %v1576_v36, 0.0 }
 0xe92   :  { %1579 = vadd.xlane.f32.xlu0 %v1578_v46  ;;  %v1577_v54 = vmul.f32 %v1573_v47, %v6564_v27 }
 0xe94   :  { %v1581_v60 = vsel %vm7957_vm5, %v1577_v54, 0.0 }
 0xe95   :  { %1582 = vadd.xlane.f32.xlu1 %v1581_v60 }
 0xe96   :  { %1688 = vadd.xlane.f32.xlu0 %v1687_v59 }
 0xe99   :  { %1691 = vadd.xlane.f32.xlu1 %v1690_v6 }
 0xf15   :  { %v1429_v21 = vpop.xlane.xlu0 %1428 }
 0xf16   :  { %v1433_v48 = vadd.f32 1e-30, %v1429_v21 }
 0xf18   :  { %5862 = vrsqrt.f32 %v1433_v48  ;;  %v1432_v17 = vpop.xlane.xlu1 %1431 }
 0xf19   :  { %v1434_v2 = vadd.f32 1e-30, %v1432_v17 }
 0xf1b   :  { %5864 = vrsqrt.f32 %v1434_v2  ;;  %v1495_v35 = vpop.xlane.xlu0 %1494 }
 0xf1c   :  { %v1499_v37 = vmul.f32 %v1495_v35, %v6595_v38 }
 0xf1e   :  { %v1503_v44 = vrot.slane %v1499_v37, 6  ;;  %v1498_v29 = vpop.xlane.xlu1 %1497 }
 0xf1f   :  { %v1500_v7 = vmul.f32 %v1498_v29, %v6600_v31  ;;  %v1580_v41 = vpop.xlane.xlu0 %1579 }
 0xf20   :  { %v1507_v62 = vsub.f32 %v1483_v26, %v1503_v44  ;;  %v1584_v34 = vmul.f32 %v1580_v41, %v6560_v16 }
 0xf21   :  { %v1504_v3 = vrot.slane %v1500_v7, 6 }
 0xf22   :  { %v5863_v49 = vpop.eup %5862  ;;  %v1588_v14 = vrot.slane %v1584_v34, 4  ;;  %v1583_v55 = vpop.xlane.xlu1 %1582  ;;  %v1511_v10 = vrot.slane %v1507_v62, 1 }
 0xf23   :  { %v6652_v52 = vmul.f32 %v5863_v49, %v6618_v28  ;;  %v1508_v36 = vsub.f32 %v1484_v57, %v1504_v3  ;;  %v1585_v22 = vmul.f32 %v1583_v55, %v6564_v27  ;;  %v1689_v56 = vpop.xlane.xlu0 %1688  ;;  %v1838_v3 = vrot.slane %v6522_v63, 7 }
 0xf24   :  { %v1592_v47 = vsub.f32 %v1568_v11, %v1588_v14  ;;  %v1693_v46 = vmul.f32 %v1689_v56, %v6533_v23 }
 0xf25   :  { %v5865_v58 = vpop.eup %5864  ;;  %v1589_v54 = vrot.slane %v1585_v22, 4  ;;  %v1515_v26 = vmul.f32 %v1511_v10, %v6652_v52  ;;  %v1512_v50 = vrot.slane %v1508_v36, 1  ;;  %v1842_v55 = vmul.f32 %v1838_v3, %v6533_v23 }
 0xf26   :  { %v6658_v60 = vmul.f32 %v5865_v58, %v6623_v1  ;;  %v1697_v53 = vrot.slane %v1693_v46, 2  ;;  %v1692_v59 = vpop.xlane.xlu1 %1691  ;;  %v1596_v6 = vrot.slane %v1592_v47, 3  ;;  %v1839_v10 = vrot.slane %v6526_v5, 7 }
 0xf27   :  { %v1593_v28 = vsub.f32 %v1569_v33, %v1589_v54  ;;  %v1694_v57 = vmul.f32 %v1692_v59, %v6538_v45  ;;  %v1517_v21 = vsel %vm7958_vm3, %v1515_v26, 0.0  ;;  %v1844_v46 = vsel %vm1241_vm9, %v1842_v55, 0.0 }
 0xf28   :  { %v1701_v11 = vsub.f32 %v6522_v63, %v1697_v53  ;;  %1518 = vadd.xlane.f32.xlu0 %v1517_v21  ;;  %v1516_v48 = vmul.f32 %v1512_v50, %v6658_v60  ;;  %v1600_v17 = vmul.f32 %v1596_v6, %v6595_v38  ;;  %v1843_v56 = vmul.f32 %v1839_v10, %v6538_v45 }
 0xf29   :  { %v1698_v2 = vrot.slane %v1694_v57, 2  ;;  %v1597_v35 = vrot.slane %v1593_v28, 3 }
 0xf2a   :  { %v1520_v1 = vsel %vm7958_vm3, %v1516_v48, 0.0  ;;  %v1602_v37 = vsel %vm7964_vm4, %v1600_v17, 0.0  ;;  %v1705_v44 = vrot.slane %v1701_v11, 5  ;;  %v1847_v58 = vsel %vm1241_vm9, %v1843_v56, 0.0 }
 0xf2b   :  { %v1702_v33 = vsub.f32 %v6526_v5, %v1698_v2  ;;  %1521 = vadd.xlane.f32.xlu1 %v1520_v1  ;;  %v1601_v29 = vmul.f32 %v1597_v35, %v6600_v31 }
 0xf2c   :  { %1603 = vadd.xlane.f32.xlu0 %v1602_v37  ;;  %v1709_v7 = vmul.f32 %v1705_v44, %v6560_v16 }
 0xf2d   :  { %v1605_v41 = vsel %vm7964_vm4, %v1601_v29, 0.0  ;;  %v1706_v34 = vrot.slane %v1702_v33, 5 }
 0xf2e   :  { %v1711_v49 = vsel %vm7957_vm5, %v1709_v7, 0.0 }
 0xf2f   :  { %1606 = vadd.xlane.f32.xlu1 %v1605_v41  ;;  %v1710_v14 = vmul.f32 %v1706_v34, %v6564_v27 }
 0xf30   :  { %1712 = vadd.xlane.f32.xlu0 %v1711_v49 }
 0xf31   :  { %v1714_v22 = vsel %vm7957_vm5, %v1710_v14, 0.0 }
 0xf33   :  { %1715 = vadd.xlane.f32.xlu1 %v1714_v22 }
 0xf34   :  { %1845 = vadd.xlane.f32.xlu0 %v1844_v46 }
 0xf37   :  { %1848 = vadd.xlane.f32.xlu1 %v1847_v58 }
 0xfb5   :  { %v1519_v54 = vpop.xlane.xlu0 %1518 }
 0xfb6   :  { %v1523_v26 = vmul.f32 %v1519_v54, %v6652_v52 }
 0xfb8   :  { %v1527_v50 = vrot.slane %v1523_v26, 7  ;;  %v1522_v53 = vpop.xlane.xlu1 %1521 }
 0xfb9   :  { %v1524_v59 = vmul.f32 %v1522_v53, %v6658_v60  ;;  %v1604_v6 = vpop.xlane.xlu0 %1603 }
 0xfba   :  { %v6682_v57 = vsub.f32 %v1507_v62, %v1527_v50  ;;  %v1608_v21 = vmul.f32 %v1604_v6, %v6595_v38 }
 0xfbb   :  { %v1528_v48 = vrot.slane %v1524_v59, 7 }
 0xfbc   :  { %v1612_v17 = vrot.slane %v1608_v21, 5  ;;  %v1607_v2 = vpop.xlane.xlu1 %1606  ;;  %v1533_v35 = vmul.f32 %v6682_v57, %v6682_v57 }
 0xfbd   :  { %v6687_v1 = vsub.f32 %v1508_v36, %v1528_v48  ;;  %v1609_v37 = vmul.f32 %v1607_v2, %v6600_v31  ;;  %v1713_v44 = vpop.xlane.xlu0 %1712 }
 0xfbe   :  { %v1616_v29 = vsub.f32 %v1592_v47, %v1612_v17  ;;  %v1717_v7 = vmul.f32 %v1713_v44, %v6560_v16  ;;  %v1536_v62 = vsel %vm7963_vm2, %v1533_v35, 0.0 }
 0xfbf   :  { %v1613_v41 = vrot.slane %v1609_v37, 5  ;;  %1537 = vadd.xlane.f32.xlu0 %v1536_v62  ;;  %v1534_v34 = vmul.f32 %v6687_v1, %v6687_v1 }
 0xfc0   :  { %v1721_v3 = vrot.slane %v1717_v7, 3  ;;  %v1716_v49 = vpop.xlane.xlu1 %1715  ;;  %v1620_v14 = vrot.slane %v1616_v29, 2 }
 0xfc1   :  { %v1617_v55 = vsub.f32 %v1593_v28, %v1613_v41  ;;  %v1718_v36 = vmul.f32 %v1716_v49, %v6564_v27  ;;  %v1846_v10 = vpop.xlane.xlu0 %1845  ;;  %v1539_v22 = vsel %vm7963_vm2, %v1534_v34, 0.0 }
 0xfc2   :  { %v1725_v56 = vsub.f32 %v1701_v11, %v1721_v3  ;;  %v1850_v47 = vmul.f32 %v1846_v10, %v6533_v23  ;;  %1540 = vadd.xlane.f32.xlu1 %v1539_v22  ;;  %v1624_v46 = vmul.f32 %v1620_v14, %v6652_v52 }
 0xfc3   :  { %v1722_v58 = vrot.slane %v1718_v36, 3  ;;  %v1621_v54 = vrot.slane %v1617_v55, 2 }
 0xfc4   :  { %v1854_v26 = vrot.slane %v1850_v47, 1  ;;  %v1849_v50 = vpop.xlane.xlu1 %1848  ;;  %v1626_v53 = vsel %vm7958_vm3, %v1624_v46, 0.0  ;;  %v1729_v59 = vrot.slane %v1725_v56, 4 }
 0xfc5   :  { %v1726_v6 = vsub.f32 %v1702_v33, %v1722_v58  ;;  %v1851_v28 = vmul.f32 %v1849_v50, %v6538_v45  ;;  %1627 = vadd.xlane.f32.xlu0 %v1626_v53  ;;  %v1625_v21 = vmul.f32 %v1621_v54, %v6658_v60 }
 0xfc6   :  { %v1858_v11 = vsub.f32 %v6522_v63, %v1854_v26  ;;  %v1733_v48 = vmul.f32 %v1729_v59, %v6595_v38 }
 0xfc7   :  { %v1855_v17 = vrot.slane %v1851_v28, 1  ;;  %v1629_v2 = vsel %vm7958_vm3, %v1625_v21, 0.0  ;;  %v1730_v35 = vrot.slane %v1726_v6, 4 }
 0xfc8   :  { %1630 = vadd.xlane.f32.xlu1 %v1629_v2  ;;  %v1735_v37 = vsel %vm7964_vm4, %v1733_v48, 0.0  ;;  %v1862_v44 = vrot.slane %v1858_v11, 6 }
 0xfc9   :  { %v1859_v7 = vsub.f32 %v6526_v5, %v1855_v17  ;;  %1736 = vadd.xlane.f32.xlu0 %v1735_v37  ;;  %v1734_v33 = vmul.f32 %v1730_v35, %v6600_v31 }
 0xfca   :  { %v1866_v62 = vmul.f32 %v1862_v44, %v6560_v16 }
 0xfcb   :  { %v1738_v41 = vsel %vm7964_vm4, %v1734_v33, 0.0  ;;  %v1863_v63 = vrot.slane %v1859_v7, 6 }
 0xfcc   :  { %1739 = vadd.xlane.f32.xlu1 %v1738_v41  ;;  %v1868_v34 = vsel %vm7957_vm5, %v1866_v62, 0.0 }
 0xfcd   :  { %1869 = vadd.xlane.f32.xlu0 %v1868_v34  ;;  %v1867_v3 = vmul.f32 %v1863_v63, %v6564_v27 }
 0xfcf   :  { %v1871_v49 = vsel %vm7957_vm5, %v1867_v3, 0.0  ;;  %vm7959_vm5 = vcmask 521221  }
 0xfd0   :  { %1872 = vadd.xlane.f32.xlu1 %v1871_v49 }
0x104c   :  { %v1538_v14 = vpop.xlane.xlu0 %1537 }
0x104d   :  { %v1542_v36 = vadd.f32 1e-30, %v1538_v14 }
0x104f   :  { %5866 = vrsqrt.f32 %v1542_v36  ;;  %v1541_v5 = vpop.xlane.xlu1 %1540 }
0x1050   :  { %v1543_v10 = vadd.f32 1e-30, %v1541_v5 }
0x1052   :  { %5868 = vrsqrt.f32 %v1543_v10  ;;  %v1628_v22 = vpop.xlane.xlu0 %1627 }
0x1053   :  { %v1632_v47 = vmul.f32 %v1628_v22, %v6652_v52 }
0x1055   :  { %v1636_v46 = vrot.slane %v1632_v47, 6  ;;  %v1631_v58 = vpop.xlane.xlu1 %1630 }
0x1056   :  { %v1633_v54 = vmul.f32 %v1631_v58, %v6658_v60  ;;  %v1737_v26 = vpop.xlane.xlu0 %1736 }
0x1057   :  { %v1640_v50 = vsub.f32 %v1616_v29, %v1636_v46  ;;  %v1741_v53 = vmul.f32 %v1737_v26, %v6595_v38 }
0x1058   :  { %v1637_v59 = vrot.slane %v1633_v54, 6 }
0x1059   :  { %v5867_v28 = vpop.eup %5866  ;;  %v1745_v21 = vrot.slane %v1741_v53, 4  ;;  %v1740_v48 = vpop.xlane.xlu1 %1739  ;;  %v1644_v17 = vrot.slane %v1640_v50, 1 }
0x105a   :  { %v6716_v2 = vmul.f32 %v5867_v28, %v6682_v57  ;;  %v1641_v35 = vsub.f32 %v1617_v55, %v1637_v59  ;;  %v1742_v37 = vmul.f32 %v1740_v48, %v6600_v31  ;;  %v1870_v44 = vpop.xlane.xlu0 %1869 }
0x105b   :  { %v1749_v33 = vsub.f32 %v1725_v56, %v1745_v21  ;;  %v1874_v62 = vmul.f32 %v1870_v44, %v6560_v16 }
0x105c   :  { %v5869_v41 = vpop.eup %5868  ;;  %v1746_v63 = vrot.slane %v1742_v37, 4  ;;  %v1648_v29 = vmul.f32 %v1644_v17, %v6716_v2  ;;  %v1645_v34 = vrot.slane %v1641_v35, 1 }
0x105d   :  { %v6722_v3 = vmul.f32 %v5869_v41, %v6687_v1  ;;  %v1878_v49 = vrot.slane %v1874_v62, 2  ;;  %v1873_v14 = vpop.xlane.xlu1 %1872  ;;  %v1753_v36 = vrot.slane %v1749_v33, 3 }
0x105e   :  { %v1750_v57 = vsub.f32 %v1726_v6, %v1746_v63  ;;  %v1875_v55 = vmul.f32 %v1873_v14, %v6564_v27  ;;  %v1650_v5 = vsel %vm7963_vm2, %v1648_v29, 0.0 }
0x105f   :  { %v1882_v10 = vsub.f32 %v1858_v11, %v1878_v49  ;;  %1651 = vadd.xlane.f32.xlu0 %v1650_v5  ;;  %v1649_v56 = vmul.f32 %v1645_v34, %v6722_v3  ;;  %v1757_v22 = vmul.f32 %v1753_v36, %v6652_v52 }
0x1060   :  { %v1879_v47 = vrot.slane %v1875_v55, 2  ;;  %v1754_v46 = vrot.slane %v1750_v57, 3 }
0x1061   :  { %v1653_v58 = vsel %vm7963_vm2, %v1649_v56, 0.0  ;;  %v1759_v1 = vsel %vm7958_vm3, %v1757_v22, 0.0  ;;  %v1886_v54 = vrot.slane %v1882_v10, 5 }
0x1062   :  { %v1883_v26 = vsub.f32 %v1859_v7, %v1879_v47  ;;  %1654 = vadd.xlane.f32.xlu1 %v1653_v58  ;;  %v1758_v6 = vmul.f32 %v1754_v46, %v6658_v60 }
0x1063   :  { %1760 = vadd.xlane.f32.xlu0 %v1759_v1  ;;  %v1890_v53 = vmul.f32 %v1886_v54, %v6595_v38 }
0x1064   :  { %v1762_v11 = vsel %vm7958_vm3, %v1758_v6, 0.0  ;;  %v1887_v59 = vrot.slane %v1883_v26, 5 }
0x1065   :  { %v1892_v28 = vsel %vm7964_vm4, %v1890_v53, 0.0 }
0x1066   :  { %1763 = vadd.xlane.f32.xlu1 %v1762_v11  ;;  %v1891_v21 = vmul.f32 %v1887_v59, %v6600_v31 }
0x1067   :  { %1893 = vadd.xlane.f32.xlu0 %v1892_v28 }
0x1068   :  { %v1895_v48 = vsel %vm7964_vm4, %v1891_v21, 0.0 }
0x106a   :  { %1896 = vadd.xlane.f32.xlu1 %v1895_v48 }
0x10ec   :  { %v1652_v17 = vpop.xlane.xlu0 %1651 }
0x10ed   :  { %v1656_v7 = vmul.f32 %v1652_v17, %v6716_v2 }
0x10ef   :  { %v1660_v37 = vrot.slane %v1656_v7, 7  ;;  %v1655_v44 = vpop.xlane.xlu1 %1654 }
0x10f0   :  { %v1657_v62 = vmul.f32 %v1655_v44, %v6722_v3  ;;  %v1761_v41 = vpop.xlane.xlu0 %1760 }
0x10f1   :  { %v1664_v63 = vsub.f32 %v1640_v50, %v1660_v37  ;;  %v1765_v29 = vmul.f32 %v1761_v41, %v6652_v52 }
0x10f2   :  { %v1661_v34 = vrot.slane %v1657_v62, 7 }
0x10f3   :  { %v1769_v49 = vrot.slane %v1765_v29, 5  ;;  %v1764_v14 = vpop.xlane.xlu1 %1763  ;;  %v1666_v36 = vmul.f32 %v1664_v63, %v1664_v63 }
0x10f4   :  { %v1665_v55 = vsub.f32 %v1641_v35, %v1661_v34  ;;  %v1766_v5 = vmul.f32 %v1764_v14, %v6658_v60  ;;  %v1894_v56 = vpop.xlane.xlu0 %1893 }
0x10f5   :  { %v1773_v22 = vsub.f32 %v1749_v33, %v1769_v49  ;;  %v1898_v47 = vmul.f32 %v1894_v56, %v6595_v38  ;;  %v1669_v46 = vsel %vm7959_vm5, %v1666_v36, 0.0 }
0x10f6   :  { %v1770_v58 = vrot.slane %v1766_v5, 5  ;;  %1670 = vadd.xlane.f32.xlu0 %v1669_v46  ;;  %v1667_v1 = vmul.f32 %v1665_v55, %v1665_v55 }
0x10f7   :  { %v1902_v50 = vrot.slane %v1898_v47, 3  ;;  %v1897_v54 = vpop.xlane.xlu1 %1896  ;;  %v1777_v6 = vrot.slane %v1773_v22, 2 }
0x10f8   :  { %v1774_v53 = vsub.f32 %v1750_v57, %v1770_v58  ;;  %v1899_v11 = vmul.f32 %v1897_v54, %v6600_v31  ;;  %v1672_v59 = vsel %vm7959_vm5, %v1667_v1, 0.0 }
0x10f9   :  { %v1906_v35 = vsub.f32 %v1882_v10, %v1902_v50  ;;  %1673 = vadd.xlane.f32.xlu1 %v1672_v59  ;;  %v1781_v28 = vmul.f32 %v1777_v6, %v6716_v2 }
0x10fa   :  { %v1903_v33 = vrot.slane %v1899_v11, 3  ;;  %v1778_v21 = vrot.slane %v1774_v53, 2 }
0x10fb   :  { %v1783_v48 = vsel %vm7963_vm2, %v1781_v28, 0.0  ;;  %v1910_v17 = vrot.slane %v1906_v35, 4 }
0x10fc   :  { %v1907_v7 = vsub.f32 %v1883_v26, %v1903_v33  ;;  %1784 = vadd.xlane.f32.xlu0 %v1783_v48  ;;  %v1782_v37 = vmul.f32 %v1778_v21, %v6722_v3 }
0x10fd   :  { %v1914_v44 = vmul.f32 %v1910_v17, %v6652_v52 }
0x10fe   :  { %v1786_v57 = vsel %vm7963_vm2, %v1782_v37, 0.0  ;;  %v1911_v62 = vrot.slane %v1907_v7, 4 }
0x10ff   :  { %1787 = vadd.xlane.f32.xlu1 %v1786_v57  ;;  %v1916_v10 = vsel %vm7958_vm3, %v1914_v44, 0.0 }
0x1100   :  { %1917 = vadd.xlane.f32.xlu0 %v1916_v10  ;;  %v1915_v41 = vmul.f32 %v1911_v62, %v6658_v60 }
0x1102   :  { %v1919_v29 = vsel %vm7958_vm3, %v1915_v41, 0.0  ;;  %vm7962_vm3 = vcmask 522246  }
0x1103   :  { %1920 = vadd.xlane.f32.xlu1 %v1919_v29 }
0x1183   :  { %v1671_v34 = vpop.xlane.xlu0 %1670 }
0x1184   :  { %v1675_v49 = vadd.f32 1e-30, %v1671_v34 }
0x1186   :  { %5870 = vrsqrt.f32 %v1675_v49  ;;  %v1674_v26 = vpop.xlane.xlu1 %1673 }
0x1187   :  { %v1676_v14 = vadd.f32 1e-30, %v1674_v26 }
0x1189   :  { %5872 = vrsqrt.f32 %v1676_v14  ;;  %v1785_v36 = vpop.xlane.xlu0 %1784 }
0x118a   :  { %v1789_v5 = vmul.f32 %v1785_v36, %v6716_v2 }
0x118c   :  { %v1793_v56 = vrot.slane %v1789_v5, 6  ;;  %v1788_v47 = vpop.xlane.xlu1 %1787 }
0x118d   :  { %v1790_v46 = vmul.f32 %v1788_v47, %v6722_v3  ;;  %v1918_v58 = vpop.xlane.xlu0 %1917 }
0x118e   :  { %v1797_v1 = vsub.f32 %v1773_v22, %v1793_v56  ;;  %v1922_v50 = vmul.f32 %v1918_v58, %v6652_v52 }
0x118f   :  { %v1794_v54 = vrot.slane %v1790_v46, 6 }
0x1190   :  { %v5871_v6 = vpop.eup %5870  ;;  %v1926_v11 = vrot.slane %v1922_v50, 4  ;;  %v1921_v59 = vpop.xlane.xlu1 %1920  ;;  %v1801_v28 = vrot.slane %v1797_v1, 1 }
0x1191   :  { %v6755_v33 = vmul.f32 %v5871_v6, %v1664_v63  ;;  %v1798_v21 = vsub.f32 %v1774_v53, %v1794_v54  ;;  %v1923_v48 = vmul.f32 %v1921_v59, %v6658_v60 }
0x1192   :  { %v1930_v17 = vsub.f32 %v1906_v35, %v1926_v11 }
0x1193   :  { %v5873_v37 = vpop.eup %5872  ;;  %v1927_v44 = vrot.slane %v1923_v48, 4  ;;  %v1805_v57 = vmul.f32 %v1801_v28, %v6755_v33  ;;  %v1802_v62 = vrot.slane %v1798_v21, 1 }
0x1194   :  { %v6759_v10 = vmul.f32 %v5873_v37, %v1665_v55  ;;  %v1934_v22 = vrot.slane %v1930_v17, 3 }
0x1195   :  { %v1931_v41 = vsub.f32 %v1907_v7, %v1927_v44  ;;  %v1807_v29 = vsel %vm7959_vm5, %v1805_v57, 0.0 }
0x1196   :  { %1808 = vadd.xlane.f32.xlu0 %v1807_v29  ;;  %v1806_v34 = vmul.f32 %v1802_v62, %v6759_v10  ;;  %v1938_v63 = vmul.f32 %v1934_v22, %v6716_v2 }
0x1197   :  { %v1935_v53 = vrot.slane %v1931_v41, 3 }
0x1198   :  { %v1810_v49 = vsel %vm7959_vm5, %v1806_v34, 0.0  ;;  %v1940_v35 = vsel %vm7963_vm2, %v1938_v63, 0.0 }
0x1199   :  { %1811 = vadd.xlane.f32.xlu1 %v1810_v49  ;;  %v1939_v26 = vmul.f32 %v1935_v53, %v6722_v3 }
0x119a   :  { %1941 = vadd.xlane.f32.xlu0 %v1940_v35 }
0x119b   :  { %v1943_v55 = vsel %vm7963_vm2, %v1939_v26, 0.0 }
0x119d   :  { %1944 = vadd.xlane.f32.xlu1 %v1943_v55 }
0x1223   :  { %v1809_v7 = vpop.xlane.xlu0 %1808 }
0x1224   :  { %v1813_v14 = vmul.f32 %v1809_v7, %v6755_v33 }
0x1226   :  { %v1817_v36 = vrot.slane %v1813_v14, 7  ;;  %v1812_v5 = vpop.xlane.xlu1 %1811 }
0x1227   :  { %v1814_v56 = vmul.f32 %v1812_v5, %v6759_v10  ;;  %v1942_v47 = vpop.xlane.xlu0 %1941 }
0x1228   :  { %v1821_v46 = vsub.f32 %v1797_v1, %v1817_v36  ;;  %v1946_v58 = vmul.f32 %v1942_v47, %v6716_v2 }
0x1229   :  { %v1818_v50 = vrot.slane %v1814_v56, 7 }
0x122a   :  { %v1950_v54 = vrot.slane %v1946_v58, 5  ;;  %v1945_v6 = vpop.xlane.xlu1 %1944  ;;  %v1823_v11 = vmul.f32 %v1821_v46, %v1821_v46 }
0x122b   :  { %v1822_v59 = vsub.f32 %v1798_v21, %v1818_v50  ;;  %v1947_v28 = vmul.f32 %v1945_v6, %v6722_v3 }
0x122c   :  { %v1954_v48 = vsub.f32 %v1930_v17, %v1950_v54  ;;  %v1826_v37 = vsel %vm7962_vm3, %v1823_v11, 0.0 }
0x122d   :  { %v1951_v44 = vrot.slane %v1947_v28, 5  ;;  %1827 = vadd.xlane.f32.xlu0 %v1826_v37  ;;  %v1824_v57 = vmul.f32 %v1822_v59, %v1822_v59 }
0x122e   :  { %v1958_v62 = vrot.slane %v1954_v48, 2 }
0x122f   :  { %v1955_v22 = vsub.f32 %v1931_v41, %v1951_v44  ;;  %v1829_v1 = vsel %vm7962_vm3, %v1824_v57, 0.0 }
0x1230   :  { %1830 = vadd.xlane.f32.xlu1 %v1829_v1  ;;  %v1962_v29 = vmul.f32 %v1958_v62, %v6755_v33 }
0x1231   :  { %v1959_v34 = vrot.slane %v1955_v22, 2 }
0x1232   :  { %v1964_v63 = vsel %vm7959_vm5, %v1962_v29, 0.0 }
0x1233   :  { %1965 = vadd.xlane.f32.xlu0 %v1964_v63  ;;  %v1963_v21 = vmul.f32 %v1959_v34, %v6759_v10 }
0x1235   :  { %v1967_v17 = vsel %vm7959_vm5, %v1963_v21, 0.0  ;;  %vm7961_vm5 = vcmask 523271  }
0x1236   :  { %1968 = vadd.xlane.f32.xlu1 %v1967_v17 }
0x12ba   :  { %v1828_v53 = vpop.xlane.xlu0 %1827 }
0x12bb   :  { %v1832_v49 = vadd.f32 1e-30, %v1828_v53 }
0x12bd   :  { %5874 = vrsqrt.f32 %v1832_v49  ;;  %v1831_v35 = vpop.xlane.xlu1 %1830 }
0x12be   :  { %v1833_v26 = vadd.f32 1e-30, %v1831_v35 }
0x12c0   :  { %5876 = vrsqrt.f32 %v1833_v26  ;;  %v1966_v41 = vpop.xlane.xlu0 %1965 }
0x12c1   :  { %v1970_v55 = vmul.f32 %v1966_v41, %v6755_v33 }
0x12c3   :  { %v1974_v7 = vrot.slane %v1970_v55, 6  ;;  %v1969_v14 = vpop.xlane.xlu1 %1968 }
0x12c4   :  { %v1971_v36 = vmul.f32 %v1969_v14, %v6759_v10  ;;  %v2032_v14 = vrot.slane %v6560_v16, %v6410_v61 }
0x12c5   :  { %v1978_v5 = vsub.f32 %v1954_v48, %v1974_v7  ;;  %v2022_v7 = vrot.slane %v6533_v23, %v6407_v15  ;;  %v2036_v23 = vrot.slane %v6564_v27, %v6410_v61 }
0x12c6   :  { %v1975_v56 = vrot.slane %v1971_v36, 6  ;;  %v2042_v36 = vrot.slane %v6595_v38, %v6413_v30  ;;  %v2072_v38 = vrot.slane %v6755_v33, %v6430_v39  ;;  %v2066_v33 = vrot.slane %v6722_v3, %v6426_v20 }
0x12c7   :  { %v5875_v47 = vpop.eup %5874  ;;  %v1982_v58 = vrot.slane %v1978_v5, 1 }
0x12c8   :  { %v1979_v50 = vsub.f32 %v1955_v22, %v1975_v56  ;;  %v1836_v54 = vmul.f32 %v5875_v47, %v1821_v46  ;;  %v2026_v56 = vrot.slane %v6538_v45, %v6407_v15  ;;  %v2027_v47 = vsel %vm956_vm12, %v2022_v7, 0.0 }
0x12c9   :  { %v2037_v16 = vsel %vm967_vm13, %v2032_v14, %v2027_v47 }
0x12ca   :  { %v5877_v6 = vpop.eup %5876  ;;  %v1986_v11 = vmul.f32 %v1982_v58, %v1836_v54  ;;  %v1983_v28 = vrot.slane %v1979_v50, 1  ;;  %v2062_v58 = vrot.slane %v6716_v2, %v6426_v20  ;;  %v2047_v45 = vsel %vm978_vm14, %v2042_v36, %v2037_v16 }
0x12cb   :  { %v6780_v37 = vmul.f32 %v5877_v6, %v1822_v59  ;;  %v2082_v6 = vrot.slane %v1836_v54, %v6433_v40  ;;  %v2056_v2 = vrot.slane %v6658_v60, %v6418_v32 }
0x12cc   :  { %v1988_v44 = vsel %vm7962_vm3, %v1986_v11, 0.0 }
0x12cd   :  { %1989 = vadd.xlane.f32.xlu0 %v1988_v44  ;;  %v1987_v57 = vmul.f32 %v1983_v28, %v6780_v37  ;;  %v2028_v28 = vsel %vm956_vm12, %v2026_v56, 0.0  ;;  %v2086_v3 = vrot.slane %v6780_v37, %v6433_v40 }
0x12ce   :  { %v2038_v44 = vsel %vm967_vm13, %v2036_v23, %v2028_v28 }
0x12cf   :  { %v1991_v62 = vsel %vm7962_vm3, %v1987_v57, 0.0  ;;  %vm7972_vm3 = vcmask 253952  }
0x12d0   :  { %1992 = vadd.xlane.f32.xlu1 %v1991_v62  ;;  %vm7973_vm2 = vmmov %vm7972_vm3 }
0x135a   :  { %v1990_v1 = vpop.xlane.xlu0 %1989 }
0x135b   :  { %v1994_v48 = vmul.f32 %v1990_v1, %v1836_v54  ;;  %v2076_v54 = vrot.slane %v6759_v10, %v6430_v39 }
0x135d   :  { %v1998_v29 = vrot.slane %v1994_v48, 7  ;;  %v1993_v34 = vpop.xlane.xlu1 %1992 }
0x135e   :  { %v1995_v22 = vmul.f32 %v1993_v34, %v6780_v37 }
0x135f   :  { %v2002_v46 = vsub.f32 %v1978_v5, %v1998_v29  ;;  %v2052_v5 = vrot.slane %v6652_v52, %v6418_v32  ;;  %v2046_v52 = vrot.slane %v6600_v31, %v6413_v30 }
0x1360   :  { %v1999_v63 = vrot.slane %v1995_v22, 7 }
0x1361   :  { %v2004_v21 = vmul.f32 %v2002_v46, %v2002_v46  ;;  %v2057_v27 = vsel %vm989_vm15, %v2052_v5, %v2047_v45  ;;  %v2048_v1 = vsel %vm978_vm14, %v2046_v52, %v2038_v44 }
0x1362   :  { %v2003_v59 = vsub.f32 %v1979_v50, %v1999_v63  ;;  %v2067_v31 = vsel %vm1000_vm11, %v2062_v58, %v2057_v27  ;;  %v2058_v34 = vsel %vm989_vm15, %v2056_v2, %v2048_v1 }
0x1363   :  { %v2007_v17 = vsel %vm7961_vm5, %v2004_v21, 0.0  ;;  %v2077_v57 = vsel %vm1011_vm8, %v2072_v38, %v2067_v31  ;;  %v2068_v22 = vsel %vm1000_vm11, %v2066_v33, %v2058_v34 }
0x1364   :  { %2008 = vadd.xlane.f32.xlu0 %v2007_v17  ;;  %v2005_v53 = vmul.f32 %v2003_v59, %v2003_v59  ;;  %v2087_v48 = vsel %vm1022_vm7, %v2082_v6, %v2077_v57 }
0x1366   :  { %v2010_v49 = vsel %vm7961_vm5, %v2005_v53, 0.0 }
0x1367   :  { %2011 = vadd.xlane.f32.xlu1 %v2010_v49 }
0x13f1   :  { %v2009_v35 = vpop.xlane.xlu0 %2008 }
0x13f2   :  { %v2013_v26 = vadd.f32 1e-30, %v2009_v35 }
0x13f4   :  { %5878 = vrsqrt.f32 %v2013_v26  ;;  %v2012_v41 = vpop.xlane.xlu1 %2011 }
0x13f5   :  { %v2014_v55 = vadd.f32 1e-30, %v2012_v41 }
0x13f7   :  { %5880 = vrsqrt.f32 %v2014_v55 }
0x13fe   :  { %v5879_v50 = vpop.eup %5878 }
0x13ff   :  { %v2017_v11 = vmul.f32 %v5879_v50, %v2002_v46  ;;  %v2078_v46 = vsel %vm1011_vm8, %v2076_v54, %v2068_v22 }
0x1400   :  { %v2088_v63 = vsel %vm1022_vm7, %v2086_v3, %v2078_v46 }
0x1401   :  { %v5881_v60 = vpop.eup %5880  ;;  %v2092_v62 = vrot.slane %v2017_v11, %v6455_v42 }
0x1402   :  { %v2018_v29 = vmul.f32 %v5881_v60, %v2003_v59 }
0x1403   :  { %v2097_v10 = vsel %vm1033_vm6, %v2092_v62, %v2087_v48 }
0x1404   :  { %5512 = vmatmul.mubr.msk.f32.vlgmr.msra.gmra.mrb[4].mxu0 %vm7960_vm1, %v2097_v10  ;;  %v2096_v37 = vrot.slane %v2018_v29, %v6455_v42 }
0x1405   :  { %5730 = vmatpush3.bf16.xpose.msk.msra.mxu0 %vm6364_vm10, %v6012_v4  ;;  %5549 = vmatprep.mubr.msk.f32.mxu0 %vm5979_vm0, %v5980_v8 }
0x1406   :  { %v2098_v21 = vsel %vm1033_vm6, %v2096_v37, %v2088_v63  ;;  %5731 = vmatprep.subr.bf16.mxu0 %v5978_v0 }
0x1407   :  { %5531 = vmatmul.mubr.msk.f32.vlgmr.msra.gmra.mrb[4].mxu1 %vm7960_vm1, %v2098_v21  ;;  %vm7967_vm1 = vcmask 253952  }
0x1408   :  { %5746 = vmatpush3.bf16.xpose.msk.msra.mxu1 %vm6364_vm10, %v6027_v9  ;;  %5568 = vmatprep.mubr.msk.f32.mxu1 %vm5979_vm0, %v5980_v8  ;;  %vm7968_vm5 = vmmov %vm7967_vm1 }
0x1409   :  { %5747 = vmatprep.subr.bf16.mxu1 %v5978_v0 }
0x140d   :  { %5734 = vmatpush3.bf16.xpose.msk.msra.mxu0 %vm6364_vm10, %v6036_v12 }
0x140e   :  { %5735 = vmatprep.subr.bf16.mxu0 %v5978_v0 }
0x1410   :  { %5750 = vmatpush3.bf16.xpose.msk.msra.mxu1 %vm6364_vm10, %v6040_v13 }
0x1411   :  { %5751 = vmatprep.subr.bf16.mxu1 %v5978_v0 }
0x1415   :  { %5738 = vmatpush3.bf16.xpose.msk.msra.mxu0 %vm6364_vm10, %v6056_v18 }
0x1416   :  { %5739 = vmatprep.subr.bf16.mxu0 %v5978_v0 }
0x1418   :  { %5754 = vmatpush3.bf16.xpose.msk.msra.mxu1 %vm6364_vm10, %v6060_v19 }
0x1419   :  { %5755 = vmatprep.subr.bf16.mxu1 %v5978_v0 }
0x141d   :  { %5742 = vmatpush3.bf16.xpose.msk.msra.mxu0 %vm6364_vm10, %v6076_v24 }
0x141e   :  { %5759 = vmatprep.subr.bf16.mxu0 %v5978_v0 }
0x1420   :  { %5758 = vmatpush3.bf16.xpose.msk.msra.mxu1 %vm6364_vm10, %v6080_v25 }
0x1421   :  { %5771 = vmatprep.subr.bf16.mxu1 %v5978_v0 }
0x14d7   :  { %v6887_v59 = vpop.f32.mrb[4].mxu0 }
0x14d8   :  { %v5513_v17 = vpop.f32.mrb[5].mxu0  ;;  %v2245_v53 = vmul.f32 %v6887_v59, %v6887_v59  ;;  %v2261_v58 = vrot.slane %v6887_v59, 1  ;;  %v2297_v60 = vrot.slane %v6887_v59, 2 }
0x14da   :  { %v6891_v49 = vpop.f32.mrb[4].mxu1  ;;  %v2247_v35 = vsel %vm7967_vm1, %v2245_v53, 0.0 }
0x14db   :  { %2248 = vadd.xlane.f32.xlu0 %v2247_v35  ;;  %v5532_v26 = vpop.f32.mrb[5].mxu1  ;;  %v2246_v41 = vmul.f32 %v6891_v49, %v6891_v49  ;;  %v2262_v52 = vrot.slane %v6891_v49, 1  ;;  %v2298_v48 = vrot.slane %v6891_v49, 2 }
0x14dd   :  { %v2250_v55 = vsel %vm7968_vm5, %v2246_v41, 0.0  ;;  %vm7969_vm5 = vmmov %vm7967_vm1 }
0x14de   :  { %2251 = vadd.xlane.f32.xlu1 %v2250_v55 }
0x1568   :  { %v2249_v7 = vpop.xlane.xlu0 %2248 }
0x1569   :  { %v2253_v14 = vadd.f32 1e-30, %v2249_v7 }
0x156b   :  { %5882 = vrsqrt.f32 %v2253_v14  ;;  %v2252_v36 = vpop.xlane.xlu1 %2251 }
0x156c   :  { %v2254_v5 = vadd.f32 1e-30, %v2252_v36 }
0x156e   :  { %5884 = vrsqrt.f32 %v2254_v5 }
0x1575   :  { %v5883_v56 = vpop.eup %5882 }
0x1576   :  { %v6898_v47 = vmul.f32 %v5883_v56, %v6887_v59 }
0x1578   :  { %v5885_v23 = vpop.eup %5884  ;;  %v2265_v16 = vmul.f32 %v2261_v58, %v6898_v47  ;;  %v2301_v1 = vmul.f32 %v2297_v60, %v6898_v47 }
0x1579   :  { %v6903_v38 = vmul.f32 %v5885_v23, %v6891_v49 }
0x157a   :  { %v2267_v50 = vsel %vm7967_vm1, %v2265_v16, 0.0  ;;  %vm7970_vm1 = vcmask 254977   ;;  %v2303_v10 = vsel %vm7972_vm3, %v2301_v1, 0.0  ;;  %v2357_v16 = vrot.slane %v6887_v59, 3 }
0x157b   :  { %2268 = vadd.xlane.f32.xlu0 %v2267_v50  ;;  %v2266_v45 = vmul.f32 %v2262_v52, %v6903_v38  ;;  %v2302_v34 = vmul.f32 %v2298_v48, %v6903_v38  ;;  %vm7975_vm3 = vmmov %vm7970_vm1 }
0x157d   :  { %v2270_v6 = vsel %vm7969_vm5, %v2266_v45, 0.0  ;;  %vm7971_vm5 = vmmov %vm7970_vm1  ;;  %v2306_v22 = vsel %vm7973_vm2, %v2302_v34, 0.0 }
0x157e   :  { %2271 = vadd.xlane.f32.xlu1 %v2270_v6  ;;  %vm7974_vm2 = vmmov %vm7970_vm1  ;;  %v2361_v6 = vmul.f32 %v2357_v16, %v6898_v47 }
0x1608   :  { %v2269_v2 = vpop.xlane.xlu0 %2268 }
0x1609   :  { %v2273_v11 = vmul.f32 %v2269_v2, %v6898_v47 }
0x160b   :  { %v2277_v27 = vrot.slane %v2273_v11, 7  ;;  %v2272_v28 = vpop.xlane.xlu1 %2271  ;;  %v2358_v11 = vrot.slane %v6891_v49, 3 }
0x160c   :  { %v2274_v33 = vmul.f32 %v2272_v28, %v6903_v38 }
0x160d   :  { %v2281_v31 = vsub.f32 %v6887_v59, %v2277_v27  ;;  %v2362_v28 = vmul.f32 %v2358_v11, %v6903_v38 }
0x160e   :  { %v2278_v44 = vrot.slane %v2274_v33, 7 }
0x160f   :  { %v2283_v54 = vmul.f32 %v2281_v31, %v2281_v31 }
0x1610   :  { %v2282_v57 = vsub.f32 %v6891_v49, %v2278_v44 }
0x1611   :  { %v2285_v62 = vsel %vm7970_vm1, %v2283_v54, 0.0  ;;  %vm7976_vm1 = vcmask 253952  }
0x1612   :  { %2286 = vadd.xlane.f32.xlu0 %v2285_v62  ;;  %v2284_v3 = vmul.f32 %v2282_v57, %v2282_v57  ;;  %v2363_v33 = vsel %vm7976_vm1, %v2361_v6, 0.0 }
0x1614   :  { %v2288_v29 = vsel %vm7971_vm5, %v2284_v3, 0.0  ;;  %vm7977_vm5 = vmmov %vm7976_vm1  ;;  %vm7980_vm1 = vcmask 254977  }
0x1615   :  { %2289 = vadd.xlane.f32.xlu1 %v2288_v29 }
0x1616   :  { %2304 = vadd.xlane.f32.xlu0 %v2303_v10 }
0x1619   :  { %2307 = vadd.xlane.f32.xlu1 %v2306_v22 }
0x169f   :  { %v2287_v46 = vpop.xlane.xlu0 %2286 }
0x16a0   :  { %v2291_v37 = vadd.f32 1e-30, %v2287_v46 }
0x16a2   :  { %5886 = vrsqrt.f32 %v2291_v37  ;;  %v2290_v63 = vpop.xlane.xlu1 %2289 }
0x16a3   :  { %v2292_v21 = vadd.f32 1e-30, %v2290_v63  ;;  %v2305_v17 = vpop.xlane.xlu0 %2304 }
0x16a4   :  { %v2309_v53 = vmul.f32 %v2305_v17, %v6898_v47 }
0x16a5   :  { %5888 = vrsqrt.f32 %v2292_v21 }
0x16a6   :  { %v2313_v35 = vrot.slane %v2309_v53, 6  ;;  %v2308_v26 = vpop.xlane.xlu1 %2307 }
0x16a7   :  { %v2310_v41 = vmul.f32 %v2308_v26, %v6903_v38 }
0x16a8   :  { %v2317_v55 = vsub.f32 %v6887_v59, %v2313_v35 }
0x16a9   :  { %v2314_v7 = vrot.slane %v2310_v41, 6 }
0x16aa   :  { %v2321_v56 = vrot.slane %v2317_v55, 1 }
0x16ab   :  { %v2318_v36 = vsub.f32 %v6891_v49, %v2314_v7  ;;  %v2441_v7 = vrot.slane %v6887_v59, 4 }
0x16ac   :  { %v5887_v14 = vpop.eup %5886 }
0x16ad   :  { %v6925_v5 = vmul.f32 %v5887_v14, %v2281_v31  ;;  %v2322_v50 = vrot.slane %v2318_v36, 1  ;;  %v2366_v31 = vsel %vm7977_vm5, %v2362_v28, 0.0  ;;  %vm7981_vm5 = vmmov %vm7980_vm1 }
0x16af   :  { %v5889_v58 = vpop.eup %5888  ;;  %v2325_v23 = vmul.f32 %v2321_v56, %v6925_v5  ;;  %v2445_v56 = vmul.f32 %v2441_v7, %v6898_v47 }
0x16b0   :  { %v6929_v52 = vmul.f32 %v5889_v58, %v2282_v57 }
0x16b1   :  { %v2327_v45 = vsel %vm7974_vm2, %v2325_v23, 0.0  ;;  %vm7978_vm2 = vcmask 256002   ;;  %v2442_v23 = vrot.slane %v6891_v49, 4 }
0x16b2   :  { %2328 = vadd.xlane.f32.xlu0 %v2327_v45  ;;  %v2326_v2 = vmul.f32 %v2322_v50, %v6929_v52 }
0x16b3   :  { %v2446_v50 = vmul.f32 %v2442_v23, %v6903_v38  ;;  %v2549_v23 = vrot.slane %v6887_v59, 5 }
0x16b4   :  { %v2330_v27 = vsel %vm7975_vm3, %v2326_v2, 0.0  ;;  %vm7979_vm3 = vmmov %vm7978_vm2 }
0x16b5   :  { %2331 = vadd.xlane.f32.xlu1 %v2330_v27 }
0x16b6   :  { %2364 = vadd.xlane.f32.xlu0 %v2363_v33 }
0x16b9   :  { %2367 = vadd.xlane.f32.xlu1 %v2366_v31 }
0x173f   :  { %v2329_v44 = vpop.xlane.xlu0 %2328 }
0x1740   :  { %v2333_v54 = vmul.f32 %v2329_v44, %v6925_v5 }
0x1742   :  { %v2337_v60 = vrot.slane %v2333_v54, 7  ;;  %v2332_v57 = vpop.xlane.xlu1 %2331 }
0x1743   :  { %v2334_v62 = vmul.f32 %v2332_v57, %v6929_v52  ;;  %v2365_v1 = vpop.xlane.xlu0 %2364 }
0x1744   :  { %v2341_v3 = vsub.f32 %v2317_v55, %v2337_v60  ;;  %v2369_v48 = vmul.f32 %v2365_v1, %v6898_v47 }
0x1745   :  { %v2338_v29 = vrot.slane %v2334_v62, 7 }
0x1746   :  { %v2373_v34 = vrot.slane %v2369_v48, 5  ;;  %v2368_v10 = vpop.xlane.xlu1 %2367  ;;  %v2343_v22 = vmul.f32 %v2341_v3, %v2341_v3 }
0x1747   :  { %v2342_v46 = vsub.f32 %v2318_v36, %v2338_v29  ;;  %v2370_v37 = vmul.f32 %v2368_v10, %v6903_v38 }
0x1748   :  { %v2377_v63 = vsub.f32 %v6887_v59, %v2373_v34  ;;  %v2345_v21 = vsel %vm7978_vm2, %v2343_v22, 0.0  ;;  %vm7982_vm2 = vcmask 253952  }
0x1749   :  { %v2374_v17 = vrot.slane %v2370_v37, 5  ;;  %2346 = vadd.xlane.f32.xlu0 %v2345_v21  ;;  %v2344_v53 = vmul.f32 %v2342_v46, %v2342_v46  ;;  %v2447_v45 = vsel %vm7982_vm2, %v2445_v56, 0.0 }
0x174a   :  { %v2381_v35 = vrot.slane %v2377_v63, 2 }
0x174b   :  { %v2378_v26 = vsub.f32 %v6891_v49, %v2374_v17  ;;  %v2348_v41 = vsel %vm7979_vm3, %v2344_v53, 0.0  ;;  %vm7983_vm3 = vmmov %vm7982_vm2  ;;  %vm7986_vm2 = vcmask 254977  }
0x174c   :  { %2349 = vadd.xlane.f32.xlu1 %v2348_v41  ;;  %v2385_v55 = vmul.f32 %v2381_v35, %v6925_v5  ;;  %v2450_v6 = vsel %vm7983_vm3, %v2446_v50, 0.0  ;;  %vm7987_vm3 = vmmov %vm7986_vm2 }
0x174d   :  { %v2382_v14 = vrot.slane %v2378_v26, 2 }
0x174e   :  { %v2387_v36 = vsel %vm7980_vm1, %v2385_v55, 0.0  ;;  %vm7984_vm1 = vcmask 256002  }
0x174f   :  { %2388 = vadd.xlane.f32.xlu0 %v2387_v36  ;;  %v2386_v58 = vmul.f32 %v2382_v14, %v6929_v52 }
0x1751   :  { %v2390_v16 = vsel %vm7981_vm5, %v2386_v58, 0.0  ;;  %vm7985_vm5 = vmmov %vm7984_vm1 }
0x1752   :  { %2391 = vadd.xlane.f32.xlu1 %v2390_v16 }
0x1753   :  { %2448 = vadd.xlane.f32.xlu0 %v2447_v45  ;;  %v2553_v45 = vmul.f32 %v2549_v23, %v6898_v47 }
0x1756   :  { %2451 = vadd.xlane.f32.xlu1 %v2450_v6  ;;  %v2550_v6 = vrot.slane %v6891_v49, 5 }
0x17d6   :  { %v2347_v2 = vpop.xlane.xlu0 %2346 }
0x17d7   :  { %v2351_v11 = vadd.f32 1e-30, %v2347_v2 }
0x17d9   :  { %5890 = vrsqrt.f32 %v2351_v11  ;;  %v2350_v27 = vpop.xlane.xlu1 %2349  ;;  %v2554_v11 = vmul.f32 %v2550_v6, %v6903_v38 }
0x17da   :  { %v2352_v28 = vadd.f32 1e-30, %v2350_v27 }
0x17dc   :  { %5892 = vrsqrt.f32 %v2352_v28  ;;  %v2389_v33 = vpop.xlane.xlu0 %2388 }
0x17dd   :  { %v2393_v31 = vmul.f32 %v2389_v33, %v6925_v5 }
0x17df   :  { %v2397_v44 = vrot.slane %v2393_v31, 6  ;;  %v2392_v54 = vpop.xlane.xlu1 %2391 }
0x17e0   :  { %v2394_v60 = vmul.f32 %v2392_v54, %v6929_v52  ;;  %v2449_v57 = vpop.xlane.xlu0 %2448 }
0x17e1   :  { %v2401_v62 = vsub.f32 %v2377_v63, %v2397_v44  ;;  %v2453_v1 = vmul.f32 %v2449_v57, %v6898_v47 }
0x17e2   :  { %v2398_v48 = vrot.slane %v2394_v60, 6 }
0x17e3   :  { %v5891_v29 = vpop.eup %5890  ;;  %v2457_v34 = vrot.slane %v2453_v1, 4  ;;  %v2452_v10 = vpop.xlane.xlu1 %2451  ;;  %v2405_v22 = vrot.slane %v2401_v62, 1 }
0x17e4   :  { %v6960_v37 = vmul.f32 %v5891_v29, %v2341_v3  ;;  %v2402_v21 = vsub.f32 %v2378_v26, %v2398_v48  ;;  %v2454_v17 = vmul.f32 %v2452_v10, %v6903_v38 }
0x17e5   :  { %v2461_v53 = vsub.f32 %v6887_v59, %v2457_v34 }
0x17e6   :  { %v5893_v35 = vpop.eup %5892  ;;  %v2458_v41 = vrot.slane %v2454_v17, 4  ;;  %v2409_v55 = vmul.f32 %v2405_v22, %v6960_v37  ;;  %v2406_v7 = vrot.slane %v2402_v21, 1 }
0x17e7   :  { %v6965_v63 = vmul.f32 %v5893_v35, %v2342_v46  ;;  %v2465_v14 = vrot.slane %v2461_v53, 3 }
0x17e8   :  { %v2462_v36 = vsub.f32 %v6891_v49, %v2458_v41  ;;  %v2411_v56 = vsel %vm7984_vm1, %v2409_v55, 0.0  ;;  %vm7988_vm1 = vcmask 253952  }
0x17e9   :  { %2412 = vadd.xlane.f32.xlu0 %v2411_v56  ;;  %v2410_v3 = vmul.f32 %v2406_v7, %v6965_v63  ;;  %v2469_v26 = vmul.f32 %v2465_v14, %v6925_v5  ;;  %v2555_v27 = vsel %vm7988_vm1, %v2553_v45, 0.0  ;;  %vm7989_vm4 = vmmov %vm7988_vm1  ;;  %vm7994_vm1 = vcmask 254977  }
0x17ea   :  { %v2466_v58 = vrot.slane %v2462_v36, 3  ;;  %v2558_v28 = vsel %vm7989_vm4, %v2554_v11, 0.0  ;;  %vm7990_vm4 = vcmask 257027  }
0x17eb   :  { %v2414_v16 = vsel %vm7985_vm5, %v2410_v3, 0.0  ;;  %v2471_v50 = vsel %vm7986_vm2, %v2469_v26, 0.0  ;;  %vm7991_vm5 = vmmov %vm7990_vm4  ;;  %vm7992_vm2 = vcmask 256002  }
0x17ec   :  { %2415 = vadd.xlane.f32.xlu1 %v2414_v16  ;;  %v2470_v46 = vmul.f32 %v2466_v58, %v6929_v52 }
0x17ed   :  { %2472 = vadd.xlane.f32.xlu0 %v2471_v50 }
0x17ee   :  { %v2474_v2 = vsel %vm7987_vm3, %v2470_v46, 0.0  ;;  %vm7993_vm3 = vmmov %vm7992_vm2 }
0x17f0   :  { %2475 = vadd.xlane.f32.xlu1 %v2474_v2 }
0x17f1   :  { %2556 = vadd.xlane.f32.xlu0 %v2555_v27 }
0x17f4   :  { %2559 = vadd.xlane.f32.xlu1 %v2558_v28  ;;  %v2681_v28 = vrot.slane %v6887_v59, 6 }
0x1876   :  { %v2413_v33 = vpop.xlane.xlu0 %2412 }
0x1877   :  { %v2417_v31 = vmul.f32 %v2413_v33, %v6960_v37 }
0x1879   :  { %v2421_v44 = vrot.slane %v2417_v31, 7  ;;  %v2416_v54 = vpop.xlane.xlu1 %2415 }
0x187a   :  { %v2418_v60 = vmul.f32 %v2416_v54, %v6965_v63  ;;  %v2473_v57 = vpop.xlane.xlu0 %2472  ;;  %v2685_v54 = vmul.f32 %v2681_v28, %v6898_v47 }
0x187b   :  { %v6983_v1 = vsub.f32 %v2401_v62, %v2421_v44  ;;  %v2477_v48 = vmul.f32 %v2473_v57, %v6925_v5  ;;  %v2682_v57 = vrot.slane %v6891_v49, 6 }
0x187c   :  { %v2422_v29 = vrot.slane %v2418_v60, 7 }
0x187d   :  { %v2481_v34 = vrot.slane %v2477_v48, 5  ;;  %v2476_v10 = vpop.xlane.xlu1 %2475  ;;  %v2427_v22 = vmul.f32 %v6983_v1, %v6983_v1 }
0x187e   :  { %v6988_v17 = vsub.f32 %v2402_v21, %v2422_v29  ;;  %v2478_v35 = vmul.f32 %v2476_v10, %v6929_v52  ;;  %v2557_v41 = vpop.xlane.xlu0 %2556  ;;  %v2686_v29 = vmul.f32 %v2682_v57, %v6903_v38 }
0x187f   :  { %v2485_v55 = vsub.f32 %v2461_v53, %v2481_v34  ;;  %v2561_v7 = vmul.f32 %v2557_v41, %v6898_v47  ;;  %v2429_v14 = vsel %vm7990_vm4, %v2427_v22, 0.0  ;;  %vm7995_vm4 = vmmov %vm7994_vm1 }
0x1880   :  { %v2482_v62 = vrot.slane %v2478_v35, 5  ;;  %2430 = vadd.xlane.f32.xlu0 %v2429_v14  ;;  %v2428_v56 = vmul.f32 %v6988_v17, %v6988_v17 }
0x1881   :  { %v2565_v3 = vrot.slane %v2561_v7, 3  ;;  %v2560_v26 = vpop.xlane.xlu1 %2559  ;;  %v2489_v58 = vrot.slane %v2485_v55, 2 }
0x1882   :  { %v2486_v23 = vsub.f32 %v2462_v36, %v2482_v62  ;;  %v2562_v21 = vmul.f32 %v2560_v26, %v6903_v38  ;;  %v2432_v16 = vsel %vm7991_vm5, %v2428_v56, 0.0  ;;  %vm7996_vm5 = vcmask 253952  }
0x1883   :  { %v2569_v50 = vsub.f32 %v6887_v59, %v2565_v3  ;;  %2433 = vadd.xlane.f32.xlu1 %v2432_v16  ;;  %v2493_v53 = vmul.f32 %v2489_v58, %v6960_v37  ;;  %v2687_v34 = vsel %vm7996_vm5, %v2685_v54, 0.0 }
0x1884   :  { %v2566_v46 = vrot.slane %v2562_v21, 3  ;;  %v2490_v45 = vrot.slane %v2486_v23, 2 }
0x1885   :  { %v2495_v6 = vsel %vm7992_vm2, %v2493_v53, 0.0  ;;  %v2573_v2 = vrot.slane %v2569_v50, 4  ;;  %vm7997_vm2 = vmmov %vm7996_vm5 }
0x1886   :  { %v2570_v11 = vsub.f32 %v6891_v49, %v2566_v46  ;;  %2496 = vadd.xlane.f32.xlu0 %v2495_v6  ;;  %v2494_v27 = vmul.f32 %v2490_v45, %v6965_v63  ;;  %v2690_v10 = vsel %vm7997_vm2, %v2686_v29, 0.0  ;;  %vm8002_vm2 = vcmask 254977  }
0x1887   :  { %v2577_v36 = vmul.f32 %v2573_v2, %v6925_v5 }
0x1888   :  { %v2498_v33 = vsel %vm7993_vm3, %v2494_v27, 0.0  ;;  %v2574_v31 = vrot.slane %v2570_v11, 4  ;;  %vm7998_vm3 = vcmask 257027  }
0x1889   :  { %2499 = vadd.xlane.f32.xlu1 %v2498_v33  ;;  %v2579_v44 = vsel %vm7994_vm1, %v2577_v36, 0.0  ;;  %vm7999_vm1 = vmmov %vm7998_vm3 }
0x188a   :  { %2580 = vadd.xlane.f32.xlu0 %v2579_v44  ;;  %v2578_v60 = vmul.f32 %v2574_v31, %v6929_v52 }
0x188c   :  { %v2582_v48 = vsel %vm7995_vm4, %v2578_v60, 0.0  ;;  %vm8000_vm4 = vcmask 256002  }
0x188d   :  { %2583 = vadd.xlane.f32.xlu1 %v2582_v48  ;;  %vm8001_vm5 = vmmov %vm8000_vm4 }
0x188e   :  { %2688 = vadd.xlane.f32.xlu0 %v2687_v34 }
0x1891   :  { %2691 = vadd.xlane.f32.xlu1 %v2690_v10 }
0x190d   :  { %v2431_v22 = vpop.xlane.xlu0 %2430 }
0x190e   :  { %v2435_v35 = vadd.f32 1e-30, %v2431_v22 }
0x1910   :  { %5894 = vrsqrt.f32 %v2435_v35  ;;  %v2434_v41 = vpop.xlane.xlu1 %2433 }
0x1911   :  { %v2436_v7 = vadd.f32 1e-30, %v2434_v41 }
0x1913   :  { %5896 = vrsqrt.f32 %v2436_v7  ;;  %v2497_v14 = vpop.xlane.xlu0 %2496 }
0x1914   :  { %v2501_v62 = vmul.f32 %v2497_v14, %v6960_v37 }
0x1916   :  { %v2505_v56 = vrot.slane %v2501_v62, 6  ;;  %v2500_v3 = vpop.xlane.xlu1 %2499 }
0x1917   :  { %v2502_v26 = vmul.f32 %v2500_v3, %v6965_v63  ;;  %v2581_v58 = vpop.xlane.xlu0 %2580 }
0x1918   :  { %v2509_v21 = vsub.f32 %v2485_v55, %v2505_v56  ;;  %v2585_v16 = vmul.f32 %v2581_v58, %v6925_v5 }
0x1919   :  { %v2506_v53 = vrot.slane %v2502_v26, 6 }
0x191a   :  { %v5895_v46 = vpop.eup %5894  ;;  %v2589_v45 = vrot.slane %v2585_v16, 4  ;;  %v2584_v6 = vpop.xlane.xlu1 %2583  ;;  %v2513_v2 = vrot.slane %v2509_v21, 1 }
0x191b   :  { %v7017_v27 = vmul.f32 %v5895_v46, %v6983_v1  ;;  %v2510_v36 = vsub.f32 %v2486_v23, %v2506_v53  ;;  %v2586_v28 = vmul.f32 %v2584_v6, %v6929_v52  ;;  %v2689_v33 = vpop.xlane.xlu0 %2688  ;;  %v2837_v53 = vrot.slane %v6887_v59, 7 }
0x191c   :  { %v2593_v31 = vsub.f32 %v2569_v50, %v2589_v45  ;;  %v2693_v44 = vmul.f32 %v2689_v33, %v6898_v47 }
0x191d   :  { %v5897_v54 = vpop.eup %5896  ;;  %v2590_v60 = vrot.slane %v2586_v28, 4  ;;  %v2517_v55 = vmul.f32 %v2513_v2, %v7017_v27  ;;  %v2514_v57 = vrot.slane %v2510_v36, 1  ;;  %v2841_v6 = vmul.f32 %v2837_v53, %v6898_v47 }
0x191e   :  { %v7023_v48 = vmul.f32 %v5897_v54, %v6988_v17  ;;  %v2697_v29 = vrot.slane %v2693_v44, 2  ;;  %v2692_v34 = vpop.xlane.xlu1 %2691  ;;  %v2597_v10 = vrot.slane %v2593_v31, 3  ;;  %v2838_v2 = vrot.slane %v6891_v49, 7 }
0x191f   :  { %v2594_v1 = vsub.f32 %v2570_v11, %v2590_v60  ;;  %v2694_v23 = vmul.f32 %v2692_v34, %v6903_v38  ;;  %v2519_v22 = vsel %vm7998_vm3, %v2517_v55, 0.0  ;;  %vm8003_vm3 = vmmov %vm8002_vm2 }
0x1920   :  { %v2701_v50 = vsub.f32 %v6887_v59, %v2697_v29  ;;  %2520 = vadd.xlane.f32.xlu0 %v2519_v22  ;;  %v2518_v35 = vmul.f32 %v2514_v57, %v7023_v48  ;;  %v2601_v41 = vmul.f32 %v2597_v10, %v6960_v37  ;;  %v2842_v33 = vmul.f32 %v2838_v2, %v6903_v38 }
0x1921   :  { %v2698_v7 = vrot.slane %v2694_v23, 2  ;;  %v2598_v14 = vrot.slane %v2594_v1, 3 }
0x1922   :  { %v2522_v17 = vsel %vm7999_vm1, %v2518_v35, 0.0  ;;  %v2603_v62 = vsel %vm8000_vm4, %v2601_v41, 0.0  ;;  %v2705_v56 = vrot.slane %v2701_v50, 5  ;;  %vm8004_vm1 = vcmask 253952  }
0x1923   :  { %v2702_v11 = vsub.f32 %v6891_v49, %v2698_v7  ;;  %2523 = vadd.xlane.f32.xlu1 %v2522_v17  ;;  %v2602_v3 = vmul.f32 %v2598_v14, %v6965_v63  ;;  %v2843_v44 = vsel %vm8004_vm1, %v2841_v6, 0.0  ;;  %vm8005_vm4 = vmmov %vm8004_vm1 }
0x1924   :  { %2604 = vadd.xlane.f32.xlu0 %v2603_v62  ;;  %v2709_v26 = vmul.f32 %v2705_v56, %v6925_v5  ;;  %v2846_v54 = vsel %vm8005_vm4, %v2842_v33, 0.0  ;;  %vm8010_vm4 = vcmask 256002  }
0x1925   :  { %v2606_v58 = vsel %vm8001_vm5, %v2602_v3, 0.0  ;;  %v2706_v16 = vrot.slane %v2702_v11, 5  ;;  %vm8006_vm5 = vcmask 258052  }
0x1926   :  { %v2711_v46 = vsel %vm8002_vm2, %v2709_v26, 0.0  ;;  %vm8007_vm2 = vmmov %vm8006_vm5 }
0x1927   :  { %2607 = vadd.xlane.f32.xlu1 %v2606_v58  ;;  %v2710_v45 = vmul.f32 %v2706_v16, %v6929_v52 }
0x1928   :  { %2712 = vadd.xlane.f32.xlu0 %v2711_v46 }
0x1929   :  { %v2714_v28 = vsel %vm8003_vm3, %v2710_v45, 0.0  ;;  %vm8008_vm3 = vcmask 257027  }
0x192a   :  { %vm8009_vm1 = vmmov %vm8008_vm3 }
0x192b   :  { %2715 = vadd.xlane.f32.xlu1 %v2714_v28 }
0x192c   :  { %2844 = vadd.xlane.f32.xlu0 %v2843_v44 }
0x192f   :  { %2847 = vadd.xlane.f32.xlu1 %v2846_v54 }
0x19ad   :  { %v2521_v60 = vpop.xlane.xlu0 %2520 }
0x19ae   :  { %v2525_v55 = vmul.f32 %v2521_v60, %v7017_v27 }
0x19b0   :  { %v2529_v57 = vrot.slane %v2525_v55, 7  ;;  %v2524_v29 = vpop.xlane.xlu1 %2523 }
0x19b1   :  { %v2526_v34 = vmul.f32 %v2524_v29, %v7023_v48  ;;  %v2605_v10 = vpop.xlane.xlu0 %2604 }
0x19b2   :  { %v7047_v23 = vsub.f32 %v2509_v21, %v2529_v57  ;;  %v2609_v22 = vmul.f32 %v2605_v10, %v6960_v37 }
0x19b3   :  { %v2530_v35 = vrot.slane %v2526_v34, 7 }
0x19b4   :  { %v2613_v41 = vrot.slane %v2609_v22, 5  ;;  %v2608_v7 = vpop.xlane.xlu1 %2607  ;;  %v2535_v14 = vmul.f32 %v7047_v23, %v7047_v23 }
0x19b5   :  { %v7052_v17 = vsub.f32 %v2510_v36, %v2530_v35  ;;  %v2610_v62 = vmul.f32 %v2608_v7, %v6965_v63  ;;  %v2713_v56 = vpop.xlane.xlu0 %2712 }
0x19b6   :  { %v2617_v3 = vsub.f32 %v2593_v31, %v2613_v41  ;;  %v2717_v26 = vmul.f32 %v2713_v56, %v6925_v5  ;;  %v2537_v58 = vsel %vm8006_vm5, %v2535_v14, 0.0  ;;  %vm8011_vm5 = vmmov %vm8010_vm4 }
0x19b7   :  { %v2614_v21 = vrot.slane %v2610_v62, 5  ;;  %2538 = vadd.xlane.f32.xlu0 %v2537_v58  ;;  %v2536_v16 = vmul.f32 %v7052_v17, %v7052_v17 }
0x19b8   :  { %v2721_v53 = vrot.slane %v2717_v26, 3  ;;  %v2716_v46 = vpop.xlane.xlu1 %2715  ;;  %v2621_v45 = vrot.slane %v2617_v3, 2 }
0x19b9   :  { %v2618_v6 = vsub.f32 %v2594_v1, %v2614_v21  ;;  %v2718_v36 = vmul.f32 %v2716_v46, %v6929_v52  ;;  %v2845_v2 = vpop.xlane.xlu0 %2844  ;;  %v2540_v28 = vsel %vm8007_vm2, %v2536_v16, 0.0  ;;  %vm8012_vm2 = vcmask 254977  }
0x19ba   :  { %v2725_v33 = vsub.f32 %v2701_v50, %v2721_v53  ;;  %v2849_v31 = vmul.f32 %v2845_v2, %v6898_v47  ;;  %2541 = vadd.xlane.f32.xlu1 %v2540_v28  ;;  %v2625_v44 = vmul.f32 %v2621_v45, %v7017_v27 }
0x19bb   :  { %v2722_v54 = vrot.slane %v2718_v36, 3  ;;  %v2622_v60 = vrot.slane %v2618_v6, 2 }
0x19bc   :  { %v2853_v55 = vrot.slane %v2849_v31, 1  ;;  %v2848_v57 = vpop.xlane.xlu1 %2847  ;;  %v2627_v29 = vsel %vm8008_vm3, %v2625_v44, 0.0  ;;  %v2729_v34 = vrot.slane %v2725_v33, 4  ;;  %vm8013_vm3 = vmmov %vm8012_vm2 }
0x19bd   :  { %v2726_v10 = vsub.f32 %v2702_v11, %v2722_v54  ;;  %v2850_v1 = vmul.f32 %v2848_v57, %v6903_v38  ;;  %2628 = vadd.xlane.f32.xlu0 %v2627_v29  ;;  %v2626_v22 = vmul.f32 %v2622_v60, %v7023_v48 }
0x19be   :  { %v2857_v50 = vsub.f32 %v6887_v59, %v2853_v55  ;;  %v2733_v35 = vmul.f32 %v2729_v34, %v6960_v37 }
0x19bf   :  { %v2854_v41 = vrot.slane %v2850_v1, 1  ;;  %v2630_v7 = vsel %vm8009_vm1, %v2626_v22, 0.0  ;;  %v2730_v14 = vrot.slane %v2726_v10, 4  ;;  %vm8014_vm1 = vcmask 258052  }
0x19c0   :  { %2631 = vadd.xlane.f32.xlu1 %v2630_v7  ;;  %v2735_v62 = vsel %vm8010_vm4, %v2733_v35, 0.0  ;;  %v2861_v56 = vrot.slane %v2857_v50, 6  ;;  %vm8015_vm4 = vmmov %vm8014_vm1 }
0x19c1   :  { %v2858_v26 = vsub.f32 %v6891_v49, %v2854_v41  ;;  %2736 = vadd.xlane.f32.xlu0 %v2735_v62  ;;  %v2734_v11 = vmul.f32 %v2730_v14, %v6965_v63 }
0x19c2   :  { %v2865_v58 = vmul.f32 %v2861_v56, %v6925_v5 }
0x19c3   :  { %v2738_v21 = vsel %vm8011_vm5, %v2734_v11, 0.0  ;;  %v2862_v59 = vrot.slane %v2858_v26, 6  ;;  %vm8016_vm5 = vcmask 257027  }
0x19c4   :  { %2739 = vadd.xlane.f32.xlu1 %v2738_v21  ;;  %v2867_v16 = vsel %vm8012_vm2, %v2865_v58, 0.0  ;;  %vm8017_vm2 = vmmov %vm8016_vm5 }
0x19c5   :  { %2868 = vadd.xlane.f32.xlu0 %v2867_v16  ;;  %v2866_v53 = vmul.f32 %v2862_v59, %v6929_v52 }
0x19c7   :  { %v2870_v46 = vsel %vm8013_vm3, %v2866_v53, 0.0  ;;  %vm8018_vm3 = vcmask 256002  }
0x19c8   :  { %2871 = vadd.xlane.f32.xlu1 %v2870_v46 }
0x1a44   :  { %v2539_v45 = vpop.xlane.xlu0 %2538 }
0x1a45   :  { %v2543_v36 = vadd.f32 1e-30, %v2539_v45 }
0x1a47   :  { %5898 = vrsqrt.f32 %v2543_v36  ;;  %v2542_v49 = vpop.xlane.xlu1 %2541 }
0x1a48   :  { %v2544_v2 = vadd.f32 1e-30, %v2542_v49 }
0x1a4a   :  { %5900 = vrsqrt.f32 %v2544_v2  ;;  %v2629_v28 = vpop.xlane.xlu0 %2628 }
0x1a4b   :  { %v2633_v31 = vmul.f32 %v2629_v28, %v7017_v27 }
0x1a4d   :  { %v2637_v44 = vrot.slane %v2633_v31, 6  ;;  %v2632_v54 = vpop.xlane.xlu1 %2631 }
0x1a4e   :  { %v2634_v60 = vmul.f32 %v2632_v54, %v7023_v48  ;;  %v2737_v55 = vpop.xlane.xlu0 %2736 }
0x1a4f   :  { %v2641_v57 = vsub.f32 %v2617_v3, %v2637_v44  ;;  %v2741_v29 = vmul.f32 %v2737_v55, %v6960_v37 }
0x1a50   :  { %v2638_v34 = vrot.slane %v2634_v60, 6 }
0x1a51   :  { %v5899_v1 = vpop.eup %5898  ;;  %v2745_v22 = vrot.slane %v2741_v29, 4  ;;  %v2740_v35 = vpop.xlane.xlu1 %2739  ;;  %v2645_v41 = vrot.slane %v2641_v57, 1 }
0x1a52   :  { %v7081_v7 = vmul.f32 %v5899_v1, %v7047_v23  ;;  %v2642_v14 = vsub.f32 %v2618_v6, %v2638_v34  ;;  %v2742_v62 = vmul.f32 %v2740_v35, %v6965_v63  ;;  %v2869_v56 = vpop.xlane.xlu0 %2868 }
0x1a53   :  { %v2749_v11 = vsub.f32 %v2725_v33, %v2745_v22  ;;  %v2873_v58 = vmul.f32 %v2869_v56, %v6925_v5 }
0x1a54   :  { %v5901_v21 = vpop.eup %5900  ;;  %v2746_v59 = vrot.slane %v2742_v62, 4  ;;  %v2649_v3 = vmul.f32 %v2645_v41, %v7081_v7  ;;  %v2646_v16 = vrot.slane %v2642_v14, 1 }
0x1a55   :  { %v7087_v53 = vmul.f32 %v5901_v21, %v7052_v17  ;;  %v2877_v46 = vrot.slane %v2873_v58, 2  ;;  %v2872_v45 = vpop.xlane.xlu1 %2871  ;;  %v2753_v36 = vrot.slane %v2749_v11, 3 }
0x1a56   :  { %v2750_v23 = vsub.f32 %v2726_v10, %v2746_v59  ;;  %v2874_v6 = vmul.f32 %v2872_v45, %v6929_v52  ;;  %v2651_v49 = vsel %vm8014_vm1, %v2649_v3, 0.0  ;;  %vm8019_vm1 = vmmov %vm8018_vm3 }
0x1a57   :  { %v2881_v2 = vsub.f32 %v2857_v50, %v2877_v46  ;;  %2652 = vadd.xlane.f32.xlu0 %v2651_v49  ;;  %v2650_v33 = vmul.f32 %v2646_v16, %v7087_v53  ;;  %v2757_v28 = vmul.f32 %v2753_v36, %v7017_v27 }
0x1a58   :  { %v2878_v31 = vrot.slane %v2874_v6, 2  ;;  %v2754_v44 = vrot.slane %v2750_v23, 3 }
0x1a59   :  { %v2654_v54 = vsel %vm8015_vm4, %v2650_v33, 0.0  ;;  %v2759_v17 = vsel %vm8016_vm5, %v2757_v28, 0.0  ;;  %v2885_v60 = vrot.slane %v2881_v2, 5  ;;  %vm8020_vm4 = vcmask 259077  }
0x1a5a   :  { %v2882_v55 = vsub.f32 %v2858_v26, %v2878_v31  ;;  %2655 = vadd.xlane.f32.xlu1 %v2654_v54  ;;  %v2758_v10 = vmul.f32 %v2754_v44, %v7023_v48  ;;  %vm8021_vm5 = vmmov %vm8020_vm4 }
0x1a5b   :  { %2760 = vadd.xlane.f32.xlu0 %v2759_v17  ;;  %v2889_v29 = vmul.f32 %v2885_v60, %v6960_v37 }
0x1a5c   :  { %v2762_v50 = vsel %vm8017_vm2, %v2758_v10, 0.0  ;;  %v2886_v34 = vrot.slane %v2882_v55, 5  ;;  %vm8022_vm2 = vcmask 258052  }
0x1a5d   :  { %v2891_v1 = vsel %vm8018_vm3, %v2889_v29, 0.0  ;;  %vm8023_vm3 = vmmov %vm8022_vm2 }
0x1a5e   :  { %2763 = vadd.xlane.f32.xlu1 %v2762_v50  ;;  %v2890_v22 = vmul.f32 %v2886_v34, %v6965_v63 }
0x1a5f   :  { %2892 = vadd.xlane.f32.xlu0 %v2891_v1 }
0x1a60   :  { %v2894_v35 = vsel %vm8019_vm1, %v2890_v22, 0.0  ;;  %vm8024_vm1 = vcmask 257027  }
0x1a62   :  { %2895 = vadd.xlane.f32.xlu1 %v2894_v35 }
0x1ae4   :  { %v2653_v41 = vpop.xlane.xlu0 %2652 }
0x1ae5   :  { %v2657_v26 = vmul.f32 %v2653_v41, %v7081_v7 }
0x1ae7   :  { %v2661_v62 = vrot.slane %v2657_v26, 7  ;;  %v2656_v56 = vpop.xlane.xlu1 %2655 }
0x1ae8   :  { %v2658_v58 = vmul.f32 %v2656_v56, %v7087_v53  ;;  %v2761_v21 = vpop.xlane.xlu0 %2760 }
0x1ae9   :  { %v2665_v59 = vsub.f32 %v2641_v57, %v2661_v62  ;;  %v2765_v3 = vmul.f32 %v2761_v21, %v7017_v27 }
0x1aea   :  { %v2662_v16 = vrot.slane %v2658_v58, 7 }
0x1aeb   :  { %v2769_v46 = vrot.slane %v2765_v3, 5  ;;  %v2764_v45 = vpop.xlane.xlu1 %2763  ;;  %v2667_v36 = vmul.f32 %v2665_v59, %v2665_v59 }
0x1aec   :  { %v2666_v6 = vsub.f32 %v2642_v14, %v2662_v16  ;;  %v2766_v49 = vmul.f32 %v2764_v45, %v7023_v48  ;;  %v2893_v33 = vpop.xlane.xlu0 %2892 }
0x1aed   :  { %v2773_v28 = vsub.f32 %v2749_v11, %v2769_v46  ;;  %v2897_v31 = vmul.f32 %v2893_v33, %v6960_v37  ;;  %v2669_v44 = vsel %vm8020_vm4, %v2667_v36, 0.0  ;;  %vm8025_vm4 = vmmov %vm8024_vm1 }
0x1aee   :  { %v2770_v54 = vrot.slane %v2766_v49, 5  ;;  %2670 = vadd.xlane.f32.xlu0 %v2669_v44  ;;  %v2668_v17 = vmul.f32 %v2666_v6, %v2666_v6 }
0x1aef   :  { %v2901_v60 = vrot.slane %v2897_v31, 3  ;;  %v2896_v57 = vpop.xlane.xlu1 %2895  ;;  %v2777_v10 = vrot.slane %v2773_v28, 2 }
0x1af0   :  { %v2774_v29 = vsub.f32 %v2750_v23, %v2770_v54  ;;  %v2898_v50 = vmul.f32 %v2896_v57, %v6965_v63  ;;  %v2672_v34 = vsel %vm8021_vm5, %v2668_v17, 0.0 }
0x1af1   :  { %v2905_v14 = vsub.f32 %v2881_v2, %v2901_v60  ;;  %2673 = vadd.xlane.f32.xlu1 %v2672_v34  ;;  %v2781_v1 = vmul.f32 %v2777_v10, %v7081_v7 }
0x1af2   :  { %v2902_v11 = vrot.slane %v2898_v50, 3  ;;  %v2778_v22 = vrot.slane %v2774_v29, 2 }
0x1af3   :  { %v2783_v35 = vsel %vm8022_vm2, %v2781_v1, 0.0  ;;  %v2909_v41 = vrot.slane %v2905_v14, 4  ;;  %vm8026_vm2 = vmmov %vm8021_vm5 }
0x1af4   :  { %v2906_v26 = vsub.f32 %v2882_v55, %v2902_v11  ;;  %2784 = vadd.xlane.f32.xlu0 %v2783_v35  ;;  %v2782_v62 = vmul.f32 %v2778_v22, %v7087_v53 }
0x1af5   :  { %v2913_v56 = vmul.f32 %v2909_v41, %v7017_v27 }
0x1af6   :  { %v2786_v23 = vsel %vm8023_vm3, %v2782_v62, 0.0  ;;  %v2910_v58 = vrot.slane %v2906_v26, 4 }
0x1af7   :  { %2787 = vadd.xlane.f32.xlu1 %v2786_v23  ;;  %v2915_v2 = vsel %vm8024_vm1, %v2913_v56, 0.0  ;;  %vm8027_vm1 = vmmov %vm8023_vm3 }
0x1af8   :  { %2916 = vadd.xlane.f32.xlu0 %v2915_v2  ;;  %v2914_v21 = vmul.f32 %v2910_v58, %v7023_v48 }
0x1afa   :  { %v2918_v3 = vsel %vm8025_vm4, %v2914_v21, 0.0  ;;  %vm8028_vm4 = vcmask 260102  }
0x1afb   :  { %2919 = vadd.xlane.f32.xlu1 %v2918_v3 }
0x1b7b   :  { %v2671_v16 = vpop.xlane.xlu0 %2670 }
0x1b7c   :  { %v2675_v46 = vadd.f32 1e-30, %v2671_v16 }
0x1b7e   :  { %5902 = vrsqrt.f32 %v2675_v46  ;;  %v2674_v55 = vpop.xlane.xlu1 %2673 }
0x1b7f   :  { %v2676_v45 = vadd.f32 1e-30, %v2674_v55 }
0x1b81   :  { %5904 = vrsqrt.f32 %v2676_v45  ;;  %v2785_v36 = vpop.xlane.xlu0 %2784 }
0x1b82   :  { %v2789_v49 = vmul.f32 %v2785_v36, %v7081_v7 }
0x1b84   :  { %v2793_v33 = vrot.slane %v2789_v49, 6  ;;  %v2788_v31 = vpop.xlane.xlu1 %2787 }
0x1b85   :  { %v2790_v44 = vmul.f32 %v2788_v31, %v7087_v53  ;;  %v2917_v54 = vpop.xlane.xlu0 %2916 }
0x1b86   :  { %v2797_v17 = vsub.f32 %v2773_v28, %v2793_v33  ;;  %v2921_v60 = vmul.f32 %v2917_v54, %v7017_v27 }
0x1b87   :  { %v2794_v57 = vrot.slane %v2790_v44, 6 }
0x1b88   :  { %v5903_v10 = vpop.eup %5902  ;;  %v2925_v50 = vrot.slane %v2921_v60, 4  ;;  %v2920_v34 = vpop.xlane.xlu1 %2919  ;;  %v2801_v1 = vrot.slane %v2797_v17, 1 }
0x1b89   :  { %v7120_v11 = vmul.f32 %v5903_v10, %v2665_v59  ;;  %v2798_v22 = vsub.f32 %v2774_v29, %v2794_v57  ;;  %v2922_v35 = vmul.f32 %v2920_v34, %v7023_v48 }
0x1b8a   :  { %v2929_v41 = vsub.f32 %v2905_v14, %v2925_v50 }
0x1b8b   :  { %v5905_v62 = vpop.eup %5904  ;;  %v2926_v56 = vrot.slane %v2922_v35, 4  ;;  %v2805_v23 = vmul.f32 %v2801_v1, %v7120_v11  ;;  %v2802_v58 = vrot.slane %v2798_v22, 1 }
0x1b8c   :  { %v7124_v2 = vmul.f32 %v5905_v62, %v2666_v6  ;;  %v2933_v28 = vrot.slane %v2929_v41, 3 }
0x1b8d   :  { %v2930_v21 = vsub.f32 %v2906_v26, %v2926_v56  ;;  %v2807_v3 = vsel %vm8021_vm5, %v2805_v23, 0.0  ;;  %vm8029_vm5 = vmmov %vm8028_vm4 }
0x1b8e   :  { %2808 = vadd.xlane.f32.xlu0 %v2807_v3  ;;  %v2806_v16 = vmul.f32 %v2802_v58, %v7124_v2  ;;  %v2937_v59 = vmul.f32 %v2933_v28, %v7081_v7 }
0x1b8f   :  { %v2934_v29 = vrot.slane %v2930_v21, 3 }
0x1b90   :  { %v2810_v46 = vsel %vm8026_vm2, %v2806_v16, 0.0  ;;  %v2939_v14 = vsel %vm8023_vm3, %v2937_v59, 0.0  ;;  %vm8030_vm3 = vmmov %vm8026_vm2 }
0x1b91   :  { %2811 = vadd.xlane.f32.xlu1 %v2810_v46  ;;  %v2938_v55 = vmul.f32 %v2934_v29, %v7087_v53 }
0x1b92   :  { %2940 = vadd.xlane.f32.xlu0 %v2939_v14 }
0x1b93   :  { %v2942_v6 = vsel %vm8027_vm1, %v2938_v55, 0.0  ;;  %vm8031_vm1 = vmmov %vm8028_vm4 }
0x1b95   :  { %2943 = vadd.xlane.f32.xlu1 %v2942_v6 }
0x1c1b   :  { %v2809_v26 = vpop.xlane.xlu0 %2808 }
0x1c1c   :  { %v2813_v45 = vmul.f32 %v2809_v26, %v7120_v11 }
0x1c1e   :  { %v2817_v36 = vrot.slane %v2813_v45, 7  ;;  %v2812_v49 = vpop.xlane.xlu1 %2811 }
0x1c1f   :  { %v2814_v33 = vmul.f32 %v2812_v49, %v7124_v2  ;;  %v2941_v31 = vpop.xlane.xlu0 %2940 }
0x1c20   :  { %v2821_v44 = vsub.f32 %v2797_v17, %v2817_v36  ;;  %v2945_v54 = vmul.f32 %v2941_v31, %v7081_v7 }
0x1c21   :  { %v2818_v60 = vrot.slane %v2814_v33, 7 }
0x1c22   :  { %v2949_v57 = vrot.slane %v2945_v54, 5  ;;  %v2944_v10 = vpop.xlane.xlu1 %2943  ;;  %v2823_v50 = vmul.f32 %v2821_v44, %v2821_v44 }
0x1c23   :  { %v2822_v34 = vsub.f32 %v2798_v22, %v2818_v60  ;;  %v2946_v1 = vmul.f32 %v2944_v10, %v7087_v53 }
0x1c24   :  { %v2953_v35 = vsub.f32 %v2929_v41, %v2949_v57  ;;  %v2825_v62 = vsel %vm8028_vm4, %v2823_v50, 0.0  ;;  %vm8032_vm4 = vmmov %vm8031_vm1 }
0x1c25   :  { %v2950_v56 = vrot.slane %v2946_v1, 5  ;;  %2826 = vadd.xlane.f32.xlu0 %v2825_v62  ;;  %v2824_v23 = vmul.f32 %v2822_v34, %v2822_v34 }
0x1c26   :  { %v2957_v58 = vrot.slane %v2953_v35, 2 }
0x1c27   :  { %v2954_v28 = vsub.f32 %v2930_v21, %v2950_v56  ;;  %v2828_v3 = vsel %vm8029_vm5, %v2824_v23, 0.0  ;;  %vm8033_vm5 = vcmask 261127  }
0x1c28   :  { %2829 = vadd.xlane.f32.xlu1 %v2828_v3  ;;  %v2961_v17 = vmul.f32 %v2957_v58, %v7120_v11 }
0x1c29   :  { %v2958_v16 = vrot.slane %v2954_v28, 2 }
0x1c2a   :  { %v2963_v59 = vsel %vm8026_vm2, %v2961_v17, 0.0  ;;  %vm8034_vm2 = vmmov %vm8033_vm5 }
0x1c2b   :  { %2964 = vadd.xlane.f32.xlu0 %v2963_v59  ;;  %v2962_v22 = vmul.f32 %v2958_v16, %v7124_v2 }
0x1c2d   :  { %v2966_v41 = vsel %vm8030_vm3, %v2962_v22, 0.0  ;;  %vm8035_vm3 = vcmask 261120  }
0x1c2e   :  { %2967 = vadd.xlane.f32.xlu1 %v2966_v41 }
0x1cb2   :  { %v2827_v29 = vpop.xlane.xlu0 %2826 }
0x1cb3   :  { %v2831_v46 = vadd.f32 1e-30, %v2827_v29 }
0x1cb5   :  { %5906 = vrsqrt.f32 %v2831_v46  ;;  %v2830_v14 = vpop.xlane.xlu1 %2829 }
0x1cb6   :  { %v2832_v55 = vadd.f32 1e-30, %v2830_v14 }
0x1cb8   :  { %5908 = vrsqrt.f32 %v2832_v55  ;;  %v2965_v21 = vpop.xlane.xlu0 %2964 }
0x1cb9   :  { %v2969_v6 = vmul.f32 %v2965_v21, %v7120_v11 }
0x1cbb   :  { %v2973_v26 = vrot.slane %v2969_v6, 6  ;;  %v2968_v45 = vpop.xlane.xlu1 %2967 }
0x1cbc   :  { %v2970_v36 = vmul.f32 %v2968_v45, %v7124_v2  ;;  %v3030_v45 = vrot.slane %v6925_v5, %v6410_v61 }
0x1cbd   :  { %v2977_v49 = vsub.f32 %v2953_v35, %v2973_v26  ;;  %v3020_v26 = vrot.slane %v6898_v47, %v6407_v15  ;;  %v3034_v47 = vrot.slane %v6929_v52, %v6410_v61 }
0x1cbe   :  { %v2974_v33 = vrot.slane %v2970_v36, 6  ;;  %v3040_v36 = vrot.slane %v6960_v37, %v6413_v30  ;;  %v3070_v37 = vrot.slane %v7120_v11, %v6430_v39  ;;  %v3064_v11 = vrot.slane %v7087_v53, %v6426_v20 }
0x1cbf   :  { %v5907_v31 = vpop.eup %5906  ;;  %v2981_v54 = vrot.slane %v2977_v49, 1 }
0x1cc0   :  { %v2978_v60 = vsub.f32 %v2954_v28, %v2974_v33  ;;  %v2835_v57 = vmul.f32 %v5907_v31, %v2821_v44  ;;  %v3024_v33 = vrot.slane %v6903_v38, %v6407_v15  ;;  %v3025_v31 = vsel %vm956_vm12, %v3020_v26, 0.0 }
0x1cc1   :  { %v3035_v5 = vsel %vm967_vm13, %v3030_v45, %v3025_v31 }
0x1cc2   :  { %v5909_v10 = vpop.eup %5908  ;;  %v2985_v50 = vmul.f32 %v2981_v54, %v2835_v57  ;;  %v2982_v1 = vrot.slane %v2978_v60, 1  ;;  %v3060_v54 = vrot.slane %v7081_v7, %v6426_v20  ;;  %v3045_v38 = vsel %vm978_vm14, %v3040_v36, %v3035_v5 }
0x1cc3   :  { %v7145_v62 = vmul.f32 %v5909_v10, %v2822_v34  ;;  %v3080_v10 = vrot.slane %v2835_v57, %v6433_v40  ;;  %v3054_v7 = vrot.slane %v7023_v48, %v6418_v32 }
0x1cc4   :  { %v2987_v56 = vsel %vm8031_vm1, %v2985_v50, 0.0  ;;  %vm8036_vm1 = vmmov %vm8035_vm3 }
0x1cc5   :  { %2988 = vadd.xlane.f32.xlu0 %v2987_v56  ;;  %v2986_v23 = vmul.f32 %v2982_v1, %v7145_v62  ;;  %v3026_v1 = vsel %vm956_vm12, %v3024_v33, 0.0  ;;  %v3084_v53 = vrot.slane %v7145_v62, %v6433_v40 }
0x1cc6   :  { %v3036_v56 = vsel %vm967_vm13, %v3034_v47, %v3026_v1 }
0x1cc7   :  { %v2990_v58 = vsel %vm8032_vm4, %v2986_v23, 0.0  ;;  %vm8037_vm4 = vcmask 517121  }
0x1cc8   :  { %2991 = vadd.xlane.f32.xlu1 %v2990_v58 }
0x1d52   :  { %v2989_v3 = vpop.xlane.xlu0 %2988 }
0x1d53   :  { %v2993_v35 = vmul.f32 %v2989_v3, %v2835_v57  ;;  %v3074_v57 = vrot.slane %v7124_v2, %v6430_v39 }
0x1d55   :  { %v2997_v17 = vrot.slane %v2993_v35, 7  ;;  %v2992_v16 = vpop.xlane.xlu1 %2991 }
0x1d56   :  { %v2994_v28 = vmul.f32 %v2992_v16, %v7145_v62 }
0x1d57   :  { %v3001_v44 = vsub.f32 %v2977_v49, %v2997_v17  ;;  %v3050_v49 = vrot.slane %v7017_v27, %v6418_v32  ;;  %v3044_v27 = vrot.slane %v6965_v63, %v6413_v30 }
0x1d58   :  { %v2998_v59 = vrot.slane %v2994_v28, 7 }
0x1d59   :  { %v3003_v22 = vmul.f32 %v3001_v44, %v3001_v44  ;;  %v3055_v52 = vsel %vm989_vm15, %v3050_v49, %v3045_v38  ;;  %v3046_v3 = vsel %vm978_vm14, %v3044_v27, %v3036_v56 }
0x1d5a   :  { %v3002_v41 = vsub.f32 %v2978_v60, %v2998_v59  ;;  %v3065_v63 = vsel %vm1000_vm11, %v3060_v54, %v3055_v52  ;;  %v3056_v16 = vsel %vm989_vm15, %v3054_v7, %v3046_v3 }
0x1d5b   :  { %v3005_v34 = vsel %vm8033_vm5, %v3003_v22, 0.0  ;;  %v3075_v23 = vsel %vm1011_vm8, %v3070_v37, %v3065_v63  ;;  %v3066_v28 = vsel %vm1000_vm11, %v3064_v11, %v3056_v16  ;;  %vm8038_vm5 = vmmov %vm8037_vm4 }
0x1d5c   :  { %3006 = vadd.xlane.f32.xlu0 %v3005_v34  ;;  %v3004_v29 = vmul.f32 %v3002_v41, %v3002_v41  ;;  %v3085_v35 = vsel %vm1022_vm7, %v3080_v10, %v3075_v23 }
0x1d5e   :  { %v3008_v46 = vsel %vm8034_vm2, %v3004_v29, 0.0  ;;  %vm8039_vm2 = vmmov %vm8037_vm4 }
0x1d5f   :  { %3009 = vadd.xlane.f32.xlu1 %v3008_v46 }
0x1de9   :  { %v3007_v14 = vpop.xlane.xlu0 %3006 }
0x1dea   :  { %v3011_v55 = vadd.f32 1e-30, %v3007_v14 }
0x1dec   :  { %5910 = vrsqrt.f32 %v3011_v55  ;;  %v3010_v21 = vpop.xlane.xlu1 %3009 }
0x1ded   :  { %v3012_v6 = vadd.f32 1e-30, %v3010_v21 }
0x1def   :  { %5912 = vrsqrt.f32 %v3012_v6 }
0x1df6   :  { %v5911_v60 = vpop.eup %5910 }
0x1df7   :  { %v3015_v50 = vmul.f32 %v5911_v60, %v3001_v44  ;;  %v3076_v44 = vsel %vm1011_vm8, %v3074_v57, %v3066_v28 }
0x1df8   :  { %v3086_v59 = vsel %vm1022_vm7, %v3084_v53, %v3076_v44 }
0x1df9   :  { %v5913_v48 = vpop.eup %5912  ;;  %v3090_v58 = vrot.slane %v3015_v50, %v6455_v42 }
0x1dfa   :  { %v3016_v17 = vmul.f32 %v5913_v48, %v3002_v41 }
0x1dfb   :  { %v3095_v2 = vsel %vm1033_vm6, %v3090_v58, %v3085_v35 }
0x1dfc   :  { %5550 = vmatmul.mubr.msk.f32.vlgmr.msra.gmra.mrb[6].mxu0 %vm8035_vm3, %v3095_v2  ;;  %v3094_v62 = vrot.slane %v3016_v17, %v6455_v42  ;;  %vm8040_vm3 = vmmov %vm8039_vm2 }
0x1dfd   :  { %5761 = vmatpush3.bf16.msra.mxu0 %v6012_v4  ;;  %5587 = vmatprep.mubr.msk.f32.mxu0 %vm5979_vm0, %v5980_v8 }
0x1dfe   :  { %v3096_v22 = vsel %vm1033_vm6, %v3094_v62, %v3086_v59  ;;  %5762 = vmatprep.subr.bf16.mxu0 %v5978_v0 }
0x1dff   :  { %5569 = vmatmul.mubr.msk.f32.vlgmr.msra.gmra.mrb[6].mxu1 %vm8036_vm1, %v3096_v22  ;;  %vm8041_vm1 = vcmask 518146  }
0x1e00   :  { %5773 = vmatpush3.bf16.msra.mxu1 %v6027_v9  ;;  %5606 = vmatprep.mubr.msk.f32.mxu1 %vm5979_vm0, %v5980_v8 }
0x1e01   :  { %5764 = vmatpush3.bf16.msra.mxu0 %v6036_v12  ;;  %5774 = vmatprep.subr.bf16.mxu1 %v5978_v0 }
0x1e02   :  { %5765 = vmatprep.subr.bf16.mxu0 %v5978_v0 }
0x1e04   :  { %5776 = vmatpush3.bf16.msra.mxu1 %v6040_v13 }
0x1e05   :  { %5767 = vmatpush3.bf16.msra.mxu0 %v6056_v18  ;;  %5777 = vmatprep.subr.bf16.mxu1 %v5978_v0 }
0x1e06   :  { %5768 = vmatprep.subr.bf16.mxu0 %v5978_v0 }
0x1e08   :  { %5779 = vmatpush3.bf16.msra.mxu1 %v6060_v19 }
0x1e09   :  { %5770 = vmatpush3.bf16.msra.mxu0 %v6076_v24  ;;  %5780 = vmatprep.subr.bf16.mxu1 %v5978_v0 }
0x1e0a   :  { %5783 = vmatprep.subr.bf16.mxu0 %v5978_v0 }
0x1e0c   :  { %5782 = vmatpush3.bf16.msra.mxu1 %v6080_v25 }
0x1e0d   :  { %5799 = vmatprep.subr.bf16.mxu1 %v5978_v0 }
0x1ecf   :  { %v7236_v41 = vpop.f32.mrb[6].mxu0 }
0x1ed0   :  { %v5551_v34 = vpop.f32.mrb[7].mxu0  ;;  %v3243_v29 = vmul.f32 %v7236_v41, %v7236_v41  ;;  %v3259_v54 = vrot.slane %v7236_v41, 1  ;;  %v3295_v48 = vrot.slane %v7236_v41, 2 }
0x1ed2   :  { %v7240_v46 = vpop.f32.mrb[6].mxu1  ;;  %v3245_v14 = vsel %vm1241_vm9, %v3243_v29, 0.0 }
0x1ed3   :  { %3246 = vadd.xlane.f32.xlu0 %v3245_v14  ;;  %v5570_v55 = vpop.f32.mrb[7].mxu1  ;;  %v3244_v21 = vmul.f32 %v7240_v46, %v7240_v46  ;;  %v3260_v27 = vrot.slane %v7240_v46, 1  ;;  %v3296_v35 = vrot.slane %v7240_v46, 2 }
0x1ed5   :  { %v3248_v6 = vsel %vm1241_vm9, %v3244_v21, 0.0 }
0x1ed6   :  { %3249 = vadd.xlane.f32.xlu1 %v3248_v6 }
0x1f60   :  { %v3247_v26 = vpop.xlane.xlu0 %3246 }
0x1f61   :  { %v3251_v45 = vadd.f32 1e-30, %v3247_v26 }
0x1f63   :  { %5914 = vrsqrt.f32 %v3251_v45  ;;  %v3250_v36 = vpop.xlane.xlu1 %3249 }
0x1f64   :  { %v3252_v49 = vadd.f32 1e-30, %v3250_v36 }
0x1f66   :  { %5916 = vrsqrt.f32 %v3252_v49 }
0x1f6d   :  { %v5915_v33 = vpop.eup %5914 }
0x1f6e   :  { %v7247_v31 = vmul.f32 %v5915_v33, %v7236_v41 }
0x1f70   :  { %v5917_v47 = vpop.eup %5916  ;;  %v3263_v5 = vmul.f32 %v3259_v54, %v7247_v31  ;;  %v3299_v3 = vmul.f32 %v3295_v48, %v7247_v31 }
0x1f71   :  { %v7252_v37 = vmul.f32 %v5917_v47, %v7240_v46 }
0x1f72   :  { %v3265_v60 = vsel %vm1241_vm9, %v3263_v5, 0.0  ;;  %v3301_v2 = vsel %vm1241_vm9, %v3299_v3, 0.0  ;;  %v3355_v5 = vrot.slane %v7236_v41, 3 }
0x1f73   :  { %3266 = vadd.xlane.f32.xlu0 %v3265_v60  ;;  %v3264_v38 = vmul.f32 %v3260_v27, %v7252_v37  ;;  %v3300_v16 = vmul.f32 %v3296_v35, %v7252_v37 }
0x1f75   :  { %v3268_v10 = vsel %vm1241_vm9, %v3264_v38, 0.0  ;;  %v3304_v28 = vsel %vm1241_vm9, %v3300_v16, 0.0 }
0x1f76   :  { %3269 = vadd.xlane.f32.xlu1 %v3268_v10  ;;  %v3359_v10 = vmul.f32 %v3355_v5, %v7247_v31 }
0x2000   :  { %v3267_v7 = vpop.xlane.xlu0 %3266 }
0x2001   :  { %v3271_v50 = vmul.f32 %v3267_v7, %v7247_v31 }
0x2003   :  { %v3275_v52 = vrot.slane %v3271_v50, 7  ;;  %v3270_v1 = vpop.xlane.xlu1 %3269  ;;  %v3356_v50 = vrot.slane %v7240_v46, 3 }
0x2004   :  { %v3272_v11 = vmul.f32 %v3270_v1, %v7252_v37 }
0x2005   :  { %v3279_v63 = vsub.f32 %v7236_v41, %v3275_v52  ;;  %v3360_v1 = vmul.f32 %v3356_v50, %v7252_v37 }
0x2006   :  { %v3276_v56 = vrot.slane %v3272_v11, 7  ;;  %v3361_v11 = vsel %vm1241_vm9, %v3359_v10, 0.0 }
0x2007   :  { %v3281_v57 = vmul.f32 %v3279_v63, %v3279_v63 }
0x2008   :  { %v3280_v23 = vsub.f32 %v7240_v46, %v3276_v56 }
0x2009   :  { %v3283_v58 = vsel %vm8037_vm4, %v3281_v57, 0.0  ;;  %vm8042_vm4 = vmmov %vm8041_vm1 }
0x200a   :  { %3284 = vadd.xlane.f32.xlu0 %v3283_v58  ;;  %v3282_v53 = vmul.f32 %v3280_v23, %v3280_v23 }
0x200c   :  { %v3286_v17 = vsel %vm8038_vm5, %v3282_v53, 0.0  ;;  %vm8043_vm5 = vmmov %vm8039_vm2 }
0x200d   :  { %3287 = vadd.xlane.f32.xlu1 %v3286_v17 }
0x200e   :  { %3302 = vadd.xlane.f32.xlu0 %v3301_v2 }
0x2011   :  { %3305 = vadd.xlane.f32.xlu1 %v3304_v28 }
0x2097   :  { %v3285_v44 = vpop.xlane.xlu0 %3284 }
0x2098   :  { %v3289_v62 = vadd.f32 1e-30, %v3285_v44 }
0x209a   :  { %5918 = vrsqrt.f32 %v3289_v62  ;;  %v3288_v59 = vpop.xlane.xlu1 %3287 }
0x209b   :  { %v3290_v22 = vadd.f32 1e-30, %v3288_v59  ;;  %v3303_v34 = vpop.xlane.xlu0 %3302 }
0x209c   :  { %v3307_v29 = vmul.f32 %v3303_v34, %v7247_v31 }
0x209d   :  { %5920 = vrsqrt.f32 %v3290_v22 }
0x209e   :  { %v3311_v14 = vrot.slane %v3307_v29, 6  ;;  %v3306_v55 = vpop.xlane.xlu1 %3305 }
0x209f   :  { %v3308_v21 = vmul.f32 %v3306_v55, %v7252_v37 }
0x20a0   :  { %v3315_v6 = vsub.f32 %v7236_v41, %v3311_v14 }
0x20a1   :  { %v3312_v26 = vrot.slane %v3308_v21, 6 }
0x20a2   :  { %v3319_v33 = vrot.slane %v3315_v6, 1 }
0x20a3   :  { %v3316_v36 = vsub.f32 %v7240_v46, %v3312_v26  ;;  %v3439_v26 = vrot.slane %v7236_v41, 4 }
0x20a4   :  { %v5919_v45 = vpop.eup %5918 }
0x20a5   :  { %v7274_v49 = vmul.f32 %v5919_v45, %v3279_v63  ;;  %v3320_v60 = vrot.slane %v3316_v36, 1  ;;  %v3364_v63 = vsel %vm1241_vm9, %v3360_v1, 0.0 }
0x20a7   :  { %v5921_v54 = vpop.eup %5920  ;;  %v3323_v47 = vmul.f32 %v3319_v33, %v7274_v49  ;;  %v3443_v33 = vmul.f32 %v3439_v26, %v7247_v31 }
0x20a8   :  { %v7278_v27 = vmul.f32 %v5921_v54, %v3280_v23 }
0x20a9   :  { %v3325_v38 = vsel %vm8039_vm2, %v3323_v47, 0.0  ;;  %v3440_v47 = vrot.slane %v7240_v46, 4 }
0x20aa   :  { %3326 = vadd.xlane.f32.xlu0 %v3325_v38  ;;  %v3324_v7 = vmul.f32 %v3320_v60, %v7278_v27  ;;  %v3445_v38 = vsel %vm1241_vm9, %v3443_v33, 0.0 }
0x20ab   :  { %v3444_v60 = vmul.f32 %v3440_v47, %v7252_v37  ;;  %v3547_v47 = vrot.slane %v7236_v41, 5 }
0x20ac   :  { %v3328_v52 = vsel %vm8040_vm3, %v3324_v7, 0.0  ;;  %vm8044_vm3 = vmmov %vm8041_vm1 }
0x20ad   :  { %3329 = vadd.xlane.f32.xlu1 %v3328_v52  ;;  %v3448_v10 = vsel %vm1241_vm9, %v3444_v60, 0.0 }
0x20ae   :  { %3362 = vadd.xlane.f32.xlu0 %v3361_v11 }
0x20b1   :  { %3365 = vadd.xlane.f32.xlu1 %v3364_v63 }
0x2137   :  { %v3327_v56 = vpop.xlane.xlu0 %3326 }
0x2138   :  { %v3331_v57 = vmul.f32 %v3327_v56, %v7274_v49 }
0x213a   :  { %v3335_v48 = vrot.slane %v3331_v57, 7  ;;  %v3330_v23 = vpop.xlane.xlu1 %3329 }
0x213b   :  { %v3332_v58 = vmul.f32 %v3330_v23, %v7278_v27  ;;  %v3363_v3 = vpop.xlane.xlu0 %3362 }
0x213c   :  { %v3339_v53 = vsub.f32 %v3315_v6, %v3335_v48  ;;  %v3367_v35 = vmul.f32 %v3363_v3, %v7247_v31 }
0x213d   :  { %v3336_v17 = vrot.slane %v3332_v58, 7 }
0x213e   :  { %v3371_v16 = vrot.slane %v3367_v35, 5  ;;  %v3366_v2 = vpop.xlane.xlu1 %3365  ;;  %v3341_v28 = vmul.f32 %v3339_v53, %v3339_v53 }
0x213f   :  { %v3340_v44 = vsub.f32 %v3316_v36, %v3336_v17  ;;  %v3368_v62 = vmul.f32 %v3366_v2, %v7252_v37 }
0x2140   :  { %v3375_v59 = vsub.f32 %v7236_v41, %v3371_v16  ;;  %v3343_v22 = vsel %vm8041_vm1, %v3341_v28, 0.0 }
0x2141   :  { %v3372_v34 = vrot.slane %v3368_v62, 5  ;;  %3344 = vadd.xlane.f32.xlu0 %v3343_v22  ;;  %v3342_v29 = vmul.f32 %v3340_v44, %v3340_v44 }
0x2142   :  { %v3379_v14 = vrot.slane %v3375_v59, 2 }
0x2143   :  { %v3376_v55 = vsub.f32 %v7240_v46, %v3372_v34  ;;  %v3346_v21 = vsel %vm8042_vm4, %v3342_v29, 0.0  ;;  %vm8045_vm4 = vmmov %vm8039_vm2 }
0x2144   :  { %3347 = vadd.xlane.f32.xlu1 %v3346_v21  ;;  %v3383_v6 = vmul.f32 %v3379_v14, %v7274_v49 }
0x2145   :  { %v3380_v45 = vrot.slane %v3376_v55, 2 }
0x2146   :  { %v3385_v36 = vsel %vm8043_vm5, %v3383_v6, 0.0  ;;  %vm8046_vm5 = vmmov %vm8039_vm2 }
0x2147   :  { %3386 = vadd.xlane.f32.xlu0 %v3385_v36  ;;  %v3384_v54 = vmul.f32 %v3380_v45, %v7278_v27 }
0x2149   :  { %v3388_v5 = vsel %vm8039_vm2, %v3384_v54, 0.0  ;;  %vm8047_vm2 = vcmask 519171  }
0x214a   :  { %3389 = vadd.xlane.f32.xlu1 %v3388_v5 }
0x214b   :  { %3446 = vadd.xlane.f32.xlu0 %v3445_v38  ;;  %v3551_v38 = vmul.f32 %v3547_v47, %v7247_v31 }
0x214e   :  { %3449 = vadd.xlane.f32.xlu1 %v3448_v10  ;;  %v3548_v10 = vrot.slane %v7240_v46, 5 }
0x21ce   :  { %v3345_v7 = vpop.xlane.xlu0 %3344 }
0x21cf   :  { %v3349_v50 = vadd.f32 1e-30, %v3345_v7 }
0x21d1   :  { %5922 = vrsqrt.f32 %v3349_v50  ;;  %v3348_v52 = vpop.xlane.xlu1 %3347  ;;  %v3552_v50 = vmul.f32 %v3548_v10, %v7252_v37 }
0x21d2   :  { %v3350_v1 = vadd.f32 1e-30, %v3348_v52  ;;  %v3553_v52 = vsel %vm1241_vm9, %v3551_v38, 0.0 }
0x21d4   :  { %5924 = vrsqrt.f32 %v3350_v1  ;;  %v3387_v11 = vpop.xlane.xlu0 %3386  ;;  %v3556_v1 = vsel %vm1241_vm9, %v3552_v50, 0.0 }
0x21d5   :  { %v3391_v63 = vmul.f32 %v3387_v11, %v7274_v49 }
0x21d7   :  { %v3395_v56 = vrot.slane %v3391_v63, 6  ;;  %v3390_v57 = vpop.xlane.xlu1 %3389 }
0x21d8   :  { %v3392_v48 = vmul.f32 %v3390_v57, %v7278_v27  ;;  %v3447_v23 = vpop.xlane.xlu0 %3446 }
0x21d9   :  { %v3399_v58 = vsub.f32 %v3375_v59, %v3395_v56  ;;  %v3451_v3 = vmul.f32 %v3447_v23, %v7247_v31 }
0x21da   :  { %v3396_v35 = vrot.slane %v3392_v48, 6 }
0x21db   :  { %v5923_v17 = vpop.eup %5922  ;;  %v3455_v16 = vrot.slane %v3451_v3, 4  ;;  %v3450_v2 = vpop.xlane.xlu1 %3449  ;;  %v3403_v28 = vrot.slane %v3399_v58, 1 }
0x21dc   :  { %v7309_v62 = vmul.f32 %v5923_v17, %v3339_v53  ;;  %v3400_v22 = vsub.f32 %v3376_v55, %v3396_v35  ;;  %v3452_v34 = vmul.f32 %v3450_v2, %v7252_v37 }
0x21dd   :  { %v3459_v29 = vsub.f32 %v7236_v41, %v3455_v16 }
0x21de   :  { %v5925_v14 = vpop.eup %5924  ;;  %v3456_v21 = vrot.slane %v3452_v34, 4  ;;  %v3407_v6 = vmul.f32 %v3403_v28, %v7309_v62  ;;  %v3404_v26 = vrot.slane %v3400_v22, 1 }
0x21df   :  { %v7314_v59 = vmul.f32 %v5925_v14, %v3340_v44  ;;  %v3463_v45 = vrot.slane %v3459_v29, 3 }
0x21e0   :  { %v3460_v36 = vsub.f32 %v7240_v46, %v3456_v21  ;;  %v3409_v33 = vsel %vm8044_vm3, %v3407_v6, 0.0  ;;  %vm8048_vm3 = vmmov %vm8047_vm2 }
0x21e1   :  { %3410 = vadd.xlane.f32.xlu0 %v3409_v33  ;;  %v3408_v53 = vmul.f32 %v3404_v26, %v7314_v59  ;;  %v3467_v55 = vmul.f32 %v3463_v45, %v7274_v49 }
0x21e2   :  { %v3464_v54 = vrot.slane %v3460_v36, 3 }
0x21e3   :  { %v3412_v5 = vsel %vm8041_vm1, %v3408_v53, 0.0  ;;  %v3469_v60 = vsel %vm8045_vm4, %v3467_v55, 0.0  ;;  %vm8049_vm4 = vmmov %vm8041_vm1 }
0x21e4   :  { %3413 = vadd.xlane.f32.xlu1 %v3412_v5  ;;  %v3468_v44 = vmul.f32 %v3464_v54, %v7278_v27 }
0x21e5   :  { %3470 = vadd.xlane.f32.xlu0 %v3469_v60 }
0x21e6   :  { %v3472_v7 = vsel %vm8046_vm5, %v3468_v44, 0.0 }
0x21e8   :  { %3473 = vadd.xlane.f32.xlu1 %v3472_v7 }
0x21e9   :  { %3554 = vadd.xlane.f32.xlu0 %v3553_v52 }
0x21ec   :  { %3557 = vadd.xlane.f32.xlu1 %v3556_v1  ;;  %v3679_v1 = vrot.slane %v7236_v41, 6 }
0x226e   :  { %v3411_v11 = vpop.xlane.xlu0 %3410 }
0x226f   :  { %v3415_v63 = vmul.f32 %v3411_v11, %v7309_v62 }
0x2271   :  { %v3419_v56 = vrot.slane %v3415_v63, 7  ;;  %v3414_v57 = vpop.xlane.xlu1 %3413 }
0x2272   :  { %v3416_v48 = vmul.f32 %v3414_v57, %v7314_v59  ;;  %v3471_v23 = vpop.xlane.xlu0 %3470  ;;  %v3683_v57 = vmul.f32 %v3679_v1, %v7247_v31 }
0x2273   :  { %v7332_v3 = vsub.f32 %v3399_v58, %v3419_v56  ;;  %v3475_v35 = vmul.f32 %v3471_v23, %v7274_v49  ;;  %v3680_v23 = vrot.slane %v7240_v46, 6 }
0x2274   :  { %v3420_v17 = vrot.slane %v3416_v48, 7 }
0x2275   :  { %v3479_v16 = vrot.slane %v3475_v35, 5  ;;  %v3474_v2 = vpop.xlane.xlu1 %3473  ;;  %v3425_v28 = vmul.f32 %v7332_v3, %v7332_v3 }
0x2276   :  { %v7337_v34 = vsub.f32 %v3400_v22, %v3420_v17  ;;  %v3476_v14 = vmul.f32 %v3474_v2, %v7278_v27  ;;  %v3555_v21 = vpop.xlane.xlu0 %3554  ;;  %v3684_v17 = vmul.f32 %v3680_v23, %v7252_v37 }
0x2277   :  { %v3483_v6 = vsub.f32 %v3459_v29, %v3479_v16  ;;  %v3559_v26 = vmul.f32 %v3555_v21, %v7247_v31  ;;  %v3427_v45 = vsel %vm8047_vm2, %v3425_v28, 0.0  ;;  %vm8050_vm2 = vmmov %vm8046_vm5  ;;  %v3685_v16 = vsel %vm1241_vm9, %v3683_v57, 0.0 }
0x2278   :  { %v3480_v58 = vrot.slane %v3476_v14, 5  ;;  %3428 = vadd.xlane.f32.xlu0 %v3427_v45  ;;  %v3426_v33 = vmul.f32 %v7337_v34, %v7337_v34  ;;  %v3688_v2 = vsel %vm1241_vm9, %v3684_v17, 0.0 }
0x2279   :  { %v3563_v53 = vrot.slane %v3559_v26, 3  ;;  %v3558_v55 = vpop.xlane.xlu1 %3557  ;;  %v3487_v54 = vrot.slane %v3483_v6, 2 }
0x227a   :  { %v3484_v47 = vsub.f32 %v3460_v36, %v3480_v58  ;;  %v3560_v22 = vmul.f32 %v3558_v55, %v7252_v37  ;;  %v3430_v5 = vsel %vm8048_vm3, %v3426_v33, 0.0 }
0x227b   :  { %v3567_v60 = vsub.f32 %v7236_v41, %v3563_v53  ;;  %3431 = vadd.xlane.f32.xlu1 %v3430_v5  ;;  %v3491_v29 = vmul.f32 %v3487_v54, %v7309_v62 }
0x227c   :  { %v3564_v44 = vrot.slane %v3560_v22, 3  ;;  %v3488_v38 = vrot.slane %v3484_v47, 2 }
0x227d   :  { %v3493_v10 = vsel %vm8041_vm1, %v3491_v29, 0.0  ;;  %v3571_v7 = vrot.slane %v3567_v60, 4  ;;  %vm8051_vm1 = vmmov %vm8048_vm3 }
0x227e   :  { %v3568_v50 = vsub.f32 %v7240_v46, %v3564_v44  ;;  %3494 = vadd.xlane.f32.xlu0 %v3493_v10  ;;  %v3492_v52 = vmul.f32 %v3488_v38, %v7314_v59 }
0x227f   :  { %v3575_v36 = vmul.f32 %v3571_v7, %v7274_v49 }
0x2280   :  { %v3496_v11 = vsel %vm8049_vm4, %v3492_v52, 0.0  ;;  %v3572_v63 = vrot.slane %v3568_v50, 4 }
0x2281   :  { %3497 = vadd.xlane.f32.xlu1 %v3496_v11  ;;  %v3577_v56 = vsel %vm8046_vm5, %v3575_v36, 0.0  ;;  %vm8052_vm5 = vmmov %vm8049_vm4 }
0x2282   :  { %3578 = vadd.xlane.f32.xlu0 %v3577_v56  ;;  %v3576_v48 = vmul.f32 %v3572_v63, %v7278_v27 }
0x2284   :  { %v3580_v35 = vsel %vm8050_vm2, %v3576_v48, 0.0 }
0x2285   :  { %3581 = vadd.xlane.f32.xlu1 %v3580_v35 }
0x2286   :  { %3686 = vadd.xlane.f32.xlu0 %v3685_v16 }
0x2289   :  { %3689 = vadd.xlane.f32.xlu1 %v3688_v2 }
0x2305   :  { %v3429_v28 = vpop.xlane.xlu0 %3428 }
0x2306   :  { %v3433_v14 = vadd.f32 1e-30, %v3429_v28 }
0x2308   :  { %5926 = vrsqrt.f32 %v3433_v14  ;;  %v3432_v21 = vpop.xlane.xlu1 %3431 }
0x2309   :  { %v3434_v26 = vadd.f32 1e-30, %v3432_v21 }
0x230b   :  { %5928 = vrsqrt.f32 %v3434_v26  ;;  %v3495_v45 = vpop.xlane.xlu0 %3494 }
0x230c   :  { %v3499_v58 = vmul.f32 %v3495_v45, %v7309_v62 }
0x230e   :  { %v3503_v33 = vrot.slane %v3499_v58, 6  ;;  %v3498_v53 = vpop.xlane.xlu1 %3497 }
0x230f   :  { %v3500_v55 = vmul.f32 %v3498_v53, %v7314_v59  ;;  %v3579_v54 = vpop.xlane.xlu0 %3578 }
0x2310   :  { %v3507_v22 = vsub.f32 %v3483_v6, %v3503_v33  ;;  %v3583_v5 = vmul.f32 %v3579_v54, %v7274_v49 }
0x2311   :  { %v3504_v29 = vrot.slane %v3500_v55, 6 }
0x2312   :  { %v5927_v44 = vpop.eup %5926  ;;  %v3587_v38 = vrot.slane %v3583_v5, 4  ;;  %v3582_v10 = vpop.xlane.xlu1 %3581  ;;  %v3511_v7 = vrot.slane %v3507_v22, 1 }
0x2313   :  { %v7366_v52 = vmul.f32 %v5927_v44, %v7332_v3  ;;  %v3508_v36 = vsub.f32 %v3484_v47, %v3504_v29  ;;  %v3584_v1 = vmul.f32 %v3582_v10, %v7278_v27  ;;  %v3687_v11 = vpop.xlane.xlu0 %3686  ;;  %v3835_v29 = vrot.slane %v7236_v41, 7 }
0x2314   :  { %v3591_v63 = vsub.f32 %v3567_v60, %v3587_v38  ;;  %v3691_v56 = vmul.f32 %v3687_v11, %v7247_v31 }
0x2315   :  { %v5929_v57 = vpop.eup %5928  ;;  %v3588_v48 = vrot.slane %v3584_v1, 4  ;;  %v3515_v6 = vmul.f32 %v3511_v7, %v7366_v52  ;;  %v3512_v23 = vrot.slane %v3508_v36, 1  ;;  %v3839_v10 = vmul.f32 %v3835_v29, %v7247_v31 }
0x2316   :  { %v7372_v35 = vmul.f32 %v5929_v57, %v7337_v34  ;;  %v3695_v17 = vrot.slane %v3691_v56, 2  ;;  %v3690_v16 = vpop.xlane.xlu1 %3689  ;;  %v3595_v2 = vrot.slane %v3591_v63, 3  ;;  %v3836_v7 = vrot.slane %v7240_v46, 7 }
0x2317   :  { %v3592_v3 = vsub.f32 %v3568_v50, %v3588_v48  ;;  %v3692_v47 = vmul.f32 %v3690_v16, %v7252_v37  ;;  %v3517_v28 = vsel %vm8048_vm3, %v3515_v6, 0.0  ;;  %vm8053_vm3 = vmmov %vm8050_vm2  ;;  %v3841_v56 = vsel %vm1241_vm9, %v3839_v10, 0.0 }
0x2318   :  { %v3699_v60 = vsub.f32 %v7236_v41, %v3695_v17  ;;  %3518 = vadd.xlane.f32.xlu0 %v3517_v28  ;;  %v3516_v14 = vmul.f32 %v3512_v23, %v7372_v35  ;;  %v3599_v21 = vmul.f32 %v3595_v2, %v7309_v62  ;;  %v3840_v11 = vmul.f32 %v3836_v7, %v7252_v37 }
0x2319   :  { %v3696_v26 = vrot.slane %v3692_v47, 2  ;;  %v3596_v45 = vrot.slane %v3592_v3, 3 }
0x231a   :  { %v3520_v34 = vsel %vm8051_vm1, %v3516_v14, 0.0  ;;  %v3601_v58 = vsel %vm8049_vm4, %v3599_v21, 0.0  ;;  %v3703_v33 = vrot.slane %v3699_v60, 5  ;;  %v3844_v57 = vsel %vm1241_vm9, %v3840_v11, 0.0 }
0x231b   :  { %v3700_v50 = vsub.f32 %v7240_v46, %v3696_v26  ;;  %3521 = vadd.xlane.f32.xlu1 %v3520_v34  ;;  %v3600_v53 = vmul.f32 %v3596_v45, %v7314_v59  ;;  %vm8054_vm9 = vcmask 520196   ;;  %vm8056_vm4 = vcmask 519171  }
0x231c   :  { %3602 = vadd.xlane.f32.xlu0 %v3601_v58  ;;  %v3707_v55 = vmul.f32 %v3703_v33, %v7274_v49  ;;  %vm8055_vm1 = vmmov %vm8054_vm9 }
0x231d   :  { %v3604_v54 = vsel %vm8052_vm5, %v3600_v53, 0.0  ;;  %v3704_v5 = vrot.slane %v3700_v50, 5  ;;  %vm8057_vm5 = vmmov %vm8056_vm4 }
0x231e   :  { %v3709_v44 = vsel %vm8050_vm2, %v3707_v55, 0.0  ;;  %vm8058_vm2 = vcmask 518146  }
0x231f   :  { %3605 = vadd.xlane.f32.xlu1 %v3604_v54  ;;  %v3708_v38 = vmul.f32 %v3704_v5, %v7278_v27 }
0x2320   :  { %3710 = vadd.xlane.f32.xlu0 %v3709_v44 }
0x2321   :  { %v3712_v1 = vsel %vm8053_vm3, %v3708_v38, 0.0  ;;  %vm8059_vm3 = vmmov %vm8058_vm2 }
0x2323   :  { %3713 = vadd.xlane.f32.xlu1 %v3712_v1 }
0x2324   :  { %3842 = vadd.xlane.f32.xlu0 %v3841_v56 }
0x2327   :  { %3845 = vadd.xlane.f32.xlu1 %v3844_v57 }
0x23a5   :  { %v3519_v48 = vpop.xlane.xlu0 %3518 }
0x23a6   :  { %v3523_v6 = vmul.f32 %v3519_v48, %v7366_v52 }
0x23a8   :  { %v3527_v23 = vrot.slane %v3523_v6, 7  ;;  %v3522_v17 = vpop.xlane.xlu1 %3521 }
0x23a9   :  { %v3524_v16 = vmul.f32 %v3522_v17, %v7372_v35  ;;  %v3603_v2 = vpop.xlane.xlu0 %3602 }
0x23aa   :  { %v7396_v47 = vsub.f32 %v3507_v22, %v3527_v23  ;;  %v3607_v28 = vmul.f32 %v3603_v2, %v7309_v62 }
0x23ab   :  { %v3528_v14 = vrot.slane %v3524_v16, 7 }
0x23ac   :  { %v3611_v21 = vrot.slane %v3607_v28, 5  ;;  %v3606_v26 = vpop.xlane.xlu1 %3605  ;;  %v3533_v45 = vmul.f32 %v7396_v47, %v7396_v47 }
0x23ad   :  { %v7401_v34 = vsub.f32 %v3508_v36, %v3528_v14  ;;  %v3608_v58 = vmul.f32 %v3606_v26, %v7314_v59  ;;  %v3711_v33 = vpop.xlane.xlu0 %3710 }
0x23ae   :  { %v3615_v53 = vsub.f32 %v3591_v63, %v3611_v21  ;;  %v3715_v55 = vmul.f32 %v3711_v33, %v7274_v49  ;;  %v3535_v54 = vsel %vm8054_vm9, %v3533_v45, 0.0  ;;  %vm8060_vm9 = vcmask 517121  }
0x23af   :  { %v3612_v22 = vrot.slane %v3608_v58, 5  ;;  %3536 = vadd.xlane.f32.xlu0 %v3535_v54  ;;  %v3534_v5 = vmul.f32 %v7401_v34, %v7401_v34 }
0x23b0   :  { %v3719_v29 = vrot.slane %v3715_v55, 3  ;;  %v3714_v44 = vpop.xlane.xlu1 %3713  ;;  %v3619_v38 = vrot.slane %v3615_v53, 2 }
0x23b1   :  { %v3616_v10 = vsub.f32 %v3592_v3, %v3612_v22  ;;  %v3716_v36 = vmul.f32 %v3714_v44, %v7278_v27  ;;  %v3843_v7 = vpop.xlane.xlu0 %3842  ;;  %v3538_v1 = vsel %vm8055_vm1, %v3534_v5, 0.0  ;;  %vm8061_vm1 = vmmov %vm8060_vm9 }
0x23b2   :  { %v3723_v11 = vsub.f32 %v3699_v60, %v3719_v29  ;;  %v3847_v63 = vmul.f32 %v3843_v7, %v7247_v31  ;;  %3539 = vadd.xlane.f32.xlu1 %v3538_v1  ;;  %v3623_v56 = vmul.f32 %v3619_v38, %v7366_v52 }
0x23b3   :  { %v3720_v57 = vrot.slane %v3716_v36, 3  ;;  %v3620_v48 = vrot.slane %v3616_v10, 2 }
0x23b4   :  { %v3851_v6 = vrot.slane %v3847_v63, 1  ;;  %v3846_v23 = vpop.xlane.xlu1 %3845  ;;  %v3625_v17 = vsel %vm8056_vm4, %v3623_v56, 0.0  ;;  %v3727_v16 = vrot.slane %v3723_v11, 4  ;;  %vm8062_vm4 = vcmask 520196  }
0x23b5   :  { %v3724_v2 = vsub.f32 %v3700_v50, %v3720_v57  ;;  %v3848_v3 = vmul.f32 %v3846_v23, %v7252_v37  ;;  %3626 = vadd.xlane.f32.xlu0 %v3625_v17  ;;  %v3624_v28 = vmul.f32 %v3620_v48, %v7372_v35 }
0x23b6   :  { %v3855_v60 = vsub.f32 %v7236_v41, %v3851_v6  ;;  %v3731_v14 = vmul.f32 %v3727_v16, %v7309_v62 }
0x23b7   :  { %v3852_v21 = vrot.slane %v3848_v3, 1  ;;  %v3628_v26 = vsel %vm8057_vm5, %v3624_v28, 0.0  ;;  %v3728_v45 = vrot.slane %v3724_v2, 4  ;;  %vm8063_vm5 = vmmov %vm8062_vm4 }
0x23b8   :  { %3629 = vadd.xlane.f32.xlu1 %v3628_v26  ;;  %v3733_v58 = vsel %vm8058_vm2, %v3731_v14, 0.0  ;;  %v3859_v33 = vrot.slane %v3855_v60, 6  ;;  %vm8064_vm2 = vcmask 519171  }
0x23b9   :  { %v3856_v55 = vsub.f32 %v7240_v46, %v3852_v21  ;;  %3734 = vadd.xlane.f32.xlu0 %v3733_v58  ;;  %v3732_v50 = vmul.f32 %v3728_v45, %v7314_v59 }
0x23ba   :  { %v3863_v54 = vmul.f32 %v3859_v33, %v7274_v49 }
0x23bb   :  { %v3736_v22 = vsel %vm8059_vm3, %v3732_v50, 0.0  ;;  %v3860_v41 = vrot.slane %v3856_v55, 6  ;;  %vm8065_vm3 = vmmov %vm8064_vm2 }
0x23bc   :  { %3737 = vadd.xlane.f32.xlu1 %v3736_v22  ;;  %v3865_v5 = vsel %vm8060_vm9, %v3863_v54, 0.0  ;;  %vm8066_vm9 = vcmask 518146  }
0x23bd   :  { %3866 = vadd.xlane.f32.xlu0 %v3865_v5  ;;  %v3864_v29 = vmul.f32 %v3860_v41, %v7278_v27 }
0x23bf   :  { %v3868_v44 = vsel %vm8061_vm1, %v3864_v29, 0.0  ;;  %vm8067_vm1 = vmmov %vm8066_vm9 }
0x23c0   :  { %3869 = vadd.xlane.f32.xlu1 %v3868_v44 }
0x243c   :  { %v3537_v38 = vpop.xlane.xlu0 %3536 }
0x243d   :  { %v3541_v36 = vadd.f32 1e-30, %v3537_v38 }
0x243f   :  { %5930 = vrsqrt.f32 %v3541_v36  ;;  %v3540_v46 = vpop.xlane.xlu1 %3539 }
0x2440   :  { %v3542_v7 = vadd.f32 1e-30, %v3540_v46 }
0x2442   :  { %5932 = vrsqrt.f32 %v3542_v7  ;;  %v3627_v1 = vpop.xlane.xlu0 %3626 }
0x2443   :  { %v3631_v63 = vmul.f32 %v3627_v1, %v7366_v52 }
0x2445   :  { %v3635_v56 = vrot.slane %v3631_v63, 6  ;;  %v3630_v57 = vpop.xlane.xlu1 %3629 }
0x2446   :  { %v3632_v48 = vmul.f32 %v3630_v57, %v7372_v35  ;;  %v3735_v6 = vpop.xlane.xlu0 %3734 }
0x2447   :  { %v3639_v23 = vsub.f32 %v3615_v53, %v3635_v56  ;;  %v3739_v17 = vmul.f32 %v3735_v6, %v7309_v62 }
0x2448   :  { %v3636_v16 = vrot.slane %v3632_v48, 6 }
0x2449   :  { %v5931_v3 = vpop.eup %5930  ;;  %v3743_v28 = vrot.slane %v3739_v17, 4  ;;  %v3738_v14 = vpop.xlane.xlu1 %3737  ;;  %v3643_v21 = vrot.slane %v3639_v23, 1 }
0x244a   :  { %v7430_v26 = vmul.f32 %v5931_v3, %v7396_v47  ;;  %v3640_v45 = vsub.f32 %v3616_v10, %v3636_v16  ;;  %v3740_v58 = vmul.f32 %v3738_v14, %v7314_v59  ;;  %v3867_v33 = vpop.xlane.xlu0 %3866 }
0x244b   :  { %v3747_v50 = vsub.f32 %v3723_v11, %v3743_v28  ;;  %v3871_v54 = vmul.f32 %v3867_v33, %v7274_v49 }
0x244c   :  { %v5933_v22 = vpop.eup %5932  ;;  %v3744_v41 = vrot.slane %v3740_v58, 4  ;;  %v3647_v53 = vmul.f32 %v3643_v21, %v7430_v26  ;;  %v3644_v5 = vrot.slane %v3640_v45, 1 }
0x244d   :  { %v7436_v29 = vmul.f32 %v5933_v22, %v7401_v34  ;;  %v3875_v44 = vrot.slane %v3871_v54, 2  ;;  %v3870_v38 = vpop.xlane.xlu1 %3869  ;;  %v3751_v36 = vrot.slane %v3747_v50, 3 }
0x244e   :  { %v3748_v47 = vsub.f32 %v3724_v2, %v3744_v41  ;;  %v3872_v10 = vmul.f32 %v3870_v38, %v7278_v27  ;;  %v3649_v46 = vsel %vm8062_vm4, %v3647_v53, 0.0  ;;  %vm8068_vm4 = vcmask 521221  }
0x244f   :  { %v3879_v7 = vsub.f32 %v3855_v60, %v3875_v44  ;;  %3650 = vadd.xlane.f32.xlu0 %v3649_v46  ;;  %v3648_v11 = vmul.f32 %v3644_v5, %v7436_v29  ;;  %v3755_v1 = vmul.f32 %v3751_v36, %v7366_v52 }
0x2450   :  { %v3876_v63 = vrot.slane %v3872_v10, 2  ;;  %v3752_v56 = vrot.slane %v3748_v47, 3 }
0x2451   :  { %v3883_v57 = vrot.slane %v3879_v7, 5  ;;  %v3652_v34 = vsel %vm8063_vm5, %v3648_v11, 0.0  ;;  %v3757_v48 = vsel %vm8064_vm2, %v3755_v1, 0.0  ;;  %vm8069_vm5 = vmmov %vm8068_vm4  ;;  %vm8070_vm2 = vcmask 520196  }
0x2452   :  { %v3880_v6 = vsub.f32 %v3856_v55, %v3876_v63  ;;  %3653 = vadd.xlane.f32.xlu1 %v3652_v34  ;;  %v3756_v2 = vmul.f32 %v3752_v56, %v7372_v35 }
0x2453   :  { %3758 = vadd.xlane.f32.xlu0 %v3757_v48  ;;  %v3887_v17 = vmul.f32 %v3883_v57, %v7309_v62 }
0x2454   :  { %v3884_v60 = vrot.slane %v3880_v6, 5  ;;  %v3760_v16 = vsel %vm8065_vm3, %v3756_v2, 0.0  ;;  %vm8071_vm3 = vmmov %vm8070_vm2 }
0x2455   :  { %v3889_v3 = vsel %vm8066_vm9, %v3887_v17, 0.0  ;;  %vm8072_vm9 = vcmask 519171  }
0x2456   :  { %3761 = vadd.xlane.f32.xlu1 %v3760_v16  ;;  %v3888_v28 = vmul.f32 %v3884_v60, %v7314_v59 }
0x2457   :  { %3890 = vadd.xlane.f32.xlu0 %v3889_v3 }
0x2458   :  { %v3892_v14 = vsel %vm8067_vm1, %v3888_v28, 0.0  ;;  %vm8073_vm1 = vmmov %vm8072_vm9 }
0x245a   :  { %3893 = vadd.xlane.f32.xlu1 %v3892_v14 }
0x24dc   :  { %v3651_v21 = vpop.xlane.xlu0 %3650 }
0x24dd   :  { %v3655_v55 = vmul.f32 %v3651_v21, %v7430_v26 }
0x24df   :  { %v3659_v58 = vrot.slane %v3655_v55, 7  ;;  %v3654_v33 = vpop.xlane.xlu1 %3653 }
0x24e0   :  { %v3656_v54 = vmul.f32 %v3654_v33, %v7436_v29  ;;  %v3759_v22 = vpop.xlane.xlu0 %3758 }
0x24e1   :  { %v3663_v41 = vsub.f32 %v3639_v23, %v3659_v58  ;;  %v3763_v53 = vmul.f32 %v3759_v22, %v7366_v52 }
0x24e2   :  { %v3660_v5 = vrot.slane %v3656_v54, 7 }
0x24e3   :  { %v3767_v44 = vrot.slane %v3763_v53, 5  ;;  %v3762_v38 = vpop.xlane.xlu1 %3761  ;;  %v3665_v36 = vmul.f32 %v3663_v41, %v3663_v41 }
0x24e4   :  { %v3664_v10 = vsub.f32 %v3640_v45, %v3660_v5  ;;  %v3764_v46 = vmul.f32 %v3762_v38, %v7372_v35  ;;  %v3891_v11 = vpop.xlane.xlu0 %3890 }
0x24e5   :  { %v3771_v1 = vsub.f32 %v3747_v50, %v3767_v44  ;;  %v3895_v63 = vmul.f32 %v3891_v11, %v7309_v62  ;;  %v3667_v56 = vsel %vm8068_vm4, %v3665_v36, 0.0 }
0x24e6   :  { %v3768_v57 = vrot.slane %v3764_v46, 5  ;;  %3668 = vadd.xlane.f32.xlu0 %v3667_v56  ;;  %v3666_v34 = vmul.f32 %v3664_v10, %v3664_v10 }
0x24e7   :  { %v3775_v48 = vrot.slane %v3771_v1, 2  ;;  %v3899_v23 = vrot.slane %v3895_v63, 3  ;;  %v3894_v2 = vpop.xlane.xlu1 %3893 }
0x24e8   :  { %v3772_v17 = vsub.f32 %v3748_v47, %v3768_v57  ;;  %v3896_v60 = vmul.f32 %v3894_v2, %v7314_v59  ;;  %v3670_v16 = vsel %vm8069_vm5, %v3666_v34, 0.0  ;;  %vm8074_vm5 = vmmov %vm8068_vm4 }
0x24e9   :  { %v3903_v45 = vsub.f32 %v3879_v7, %v3899_v23  ;;  %3671 = vadd.xlane.f32.xlu1 %v3670_v16  ;;  %v3779_v3 = vmul.f32 %v3775_v48, %v7430_v26 }
0x24ea   :  { %v3776_v50 = vrot.slane %v3772_v17, 2  ;;  %v3900_v28 = vrot.slane %v3896_v60, 3 }
0x24eb   :  { %v3907_v14 = vrot.slane %v3903_v45, 4  ;;  %v3781_v21 = vsel %vm8070_vm2, %v3779_v3, 0.0 }
0x24ec   :  { %v3904_v55 = vsub.f32 %v3880_v6, %v3900_v28  ;;  %3782 = vadd.xlane.f32.xlu0 %v3781_v21  ;;  %v3780_v58 = vmul.f32 %v3776_v50, %v7436_v29 }
0x24ed   :  { %v3911_v33 = vmul.f32 %v3907_v14, %v7366_v52 }
0x24ee   :  { %v3908_v47 = vrot.slane %v3904_v55, 4  ;;  %v3784_v54 = vsel %vm8071_vm3, %v3780_v58, 0.0  ;;  %vm8075_vm3 = vmmov %vm8070_vm2 }
0x24ef   :  { %3785 = vadd.xlane.f32.xlu1 %v3784_v54  ;;  %v3913_v7 = vsel %vm8072_vm9, %v3911_v33, 0.0  ;;  %vm8076_vm9 = vcmask 522246  }
0x24f0   :  { %3914 = vadd.xlane.f32.xlu0 %v3913_v7  ;;  %v3912_v22 = vmul.f32 %v3908_v47, %v7372_v35 }
0x24f2   :  { %v3916_v53 = vsel %vm8073_vm1, %v3912_v22, 0.0  ;;  %vm8077_vm1 = vmmov %vm8076_vm9 }
0x24f3   :  { %3917 = vadd.xlane.f32.xlu1 %v3916_v53 }
0x2573   :  { %v3669_v5 = vpop.xlane.xlu0 %3668 }
0x2574   :  { %v3673_v44 = vadd.f32 1e-30, %v3669_v5 }
0x2576   :  { %5934 = vrsqrt.f32 %v3673_v44  ;;  %v3672_v6 = vpop.xlane.xlu1 %3671 }
0x2577   :  { %v3674_v38 = vadd.f32 1e-30, %v3672_v6 }
0x2579   :  { %5936 = vrsqrt.f32 %v3674_v38  ;;  %v3783_v36 = vpop.xlane.xlu0 %3782 }
0x257a   :  { %v3787_v46 = vmul.f32 %v3783_v36, %v7430_v26 }
0x257c   :  { %v3791_v11 = vrot.slane %v3787_v46, 6  ;;  %v3786_v63 = vpop.xlane.xlu1 %3785 }
0x257d   :  { %v3788_v56 = vmul.f32 %v3786_v63, %v7436_v29  ;;  %v3915_v57 = vpop.xlane.xlu0 %3914 }
0x257e   :  { %v3795_v34 = vsub.f32 %v3771_v1, %v3791_v11  ;;  %v3919_v48 = vmul.f32 %v3915_v57, %v7366_v52 }
0x257f   :  { %v3792_v23 = vrot.slane %v3788_v56, 6 }
0x2580   :  { %v5935_v2 = vpop.eup %5934  ;;  %v3799_v60 = vrot.slane %v3795_v34, 1  ;;  %v3923_v16 = vrot.slane %v3919_v48, 4  ;;  %v3918_v3 = vpop.xlane.xlu1 %3917 }
0x2581   :  { %v7469_v50 = vmul.f32 %v5935_v2, %v3663_v41  ;;  %v3796_v28 = vsub.f32 %v3772_v17, %v3792_v23  ;;  %v3920_v14 = vmul.f32 %v3918_v3, %v7372_v35 }
0x2582   :  { %v3927_v21 = vsub.f32 %v3903_v45, %v3923_v16 }
0x2583   :  { %v5937_v58 = vpop.eup %5936  ;;  %v3800_v33 = vrot.slane %v3796_v28, 1  ;;  %v3924_v47 = vrot.slane %v3920_v14, 4  ;;  %v3803_v54 = vmul.f32 %v3799_v60, %v7469_v50 }
0x2584   :  { %v7473_v7 = vmul.f32 %v5937_v58, %v3664_v10  ;;  %v3931_v1 = vrot.slane %v3927_v21, 3 }
0x2585   :  { %v3928_v22 = vsub.f32 %v3904_v55, %v3924_v47  ;;  %v3805_v53 = vsel %vm8068_vm4, %v3803_v54, 0.0 }
0x2586   :  { %3806 = vadd.xlane.f32.xlu0 %v3805_v53  ;;  %v3804_v5 = vmul.f32 %v3800_v33, %v7473_v7  ;;  %v3935_v41 = vmul.f32 %v3931_v1, %v7430_v26 }
0x2587   :  { %v3932_v17 = vrot.slane %v3928_v22, 3 }
0x2588   :  { %v3808_v44 = vsel %vm8074_vm5, %v3804_v5, 0.0  ;;  %v3937_v45 = vsel %vm8070_vm2, %v3935_v41, 0.0  ;;  %vm8078_vm5 = vmmov %vm8068_vm4 }
0x2589   :  { %3809 = vadd.xlane.f32.xlu1 %v3808_v44  ;;  %v3936_v6 = vmul.f32 %v3932_v17, %v7436_v29  ;;  %vm8079_vm2 = vmmov %vm8077_vm1 }
0x258a   :  { %3938 = vadd.xlane.f32.xlu0 %v3937_v45 }
0x258b   :  { %v3940_v10 = vsel %vm8075_vm3, %v3936_v6, 0.0  ;;  %vm8080_vm3 = vmmov %vm8077_vm1 }
0x258d   :  { %3941 = vadd.xlane.f32.xlu1 %v3940_v10 }
0x2613   :  { %v3807_v55 = vpop.xlane.xlu0 %3806 }
0x2614   :  { %v3811_v38 = vmul.f32 %v3807_v55, %v7469_v50 }
0x2616   :  { %v3815_v36 = vrot.slane %v3811_v38, 7  ;;  %v3810_v46 = vpop.xlane.xlu1 %3809 }
0x2617   :  { %v3812_v11 = vmul.f32 %v3810_v46, %v7473_v7  ;;  %v3939_v63 = vpop.xlane.xlu0 %3938 }
0x2618   :  { %v3819_v56 = vsub.f32 %v3795_v34, %v3815_v36  ;;  %v3943_v57 = vmul.f32 %v3939_v63, %v7430_v26 }
0x2619   :  { %v3816_v48 = vrot.slane %v3812_v11, 7 }
0x261a   :  { %v3947_v23 = vrot.slane %v3943_v57, 5  ;;  %v3942_v2 = vpop.xlane.xlu1 %3941  ;;  %v3821_v60 = vmul.f32 %v3819_v56, %v3819_v56 }
0x261b   :  { %v3820_v16 = vsub.f32 %v3796_v28, %v3816_v48  ;;  %v3944_v3 = vmul.f32 %v3942_v2, %v7436_v29 }
0x261c   :  { %v3951_v14 = vsub.f32 %v3927_v21, %v3947_v23  ;;  %v3823_v58 = vsel %vm8076_vm9, %v3821_v60, 0.0  ;;  %vm8081_vm9 = vcmask 523271  }
0x261d   :  { %v3948_v33 = vrot.slane %v3944_v3, 5  ;;  %3824 = vadd.xlane.f32.xlu0 %v3823_v58  ;;  %v3822_v47 = vmul.f32 %v3820_v16, %v3820_v16 }
0x261e   :  { %v3955_v54 = vrot.slane %v3951_v14, 2 }
0x261f   :  { %v3952_v1 = vsub.f32 %v3928_v22, %v3948_v33  ;;  %v3826_v53 = vsel %vm8077_vm1, %v3822_v47, 0.0  ;;  %vm8082_vm1 = vmmov %vm8081_vm9 }
0x2620   :  { %3827 = vadd.xlane.f32.xlu1 %v3826_v53  ;;  %v3959_v34 = vmul.f32 %v3955_v54, %v7469_v50 }
0x2621   :  { %v3956_v5 = vrot.slane %v3952_v1, 2 }
0x2622   :  { %v3961_v41 = vsel %vm8068_vm4, %v3959_v34, 0.0  ;;  %vm8083_vm4 = vcmask 523264  }
0x2623   :  { %3962 = vadd.xlane.f32.xlu0 %v3961_v41  ;;  %v3960_v28 = vmul.f32 %v3956_v5, %v7473_v7 }
0x2625   :  { %v3964_v21 = vsel %vm8078_vm5, %v3960_v28, 0.0  ;;  %vm8084_vm5 = vmmov %vm8083_vm4 }
0x2626   :  { %3965 = vadd.xlane.f32.xlu1 %v3964_v21 }
0x26aa   :  { %v3825_v17 = vpop.xlane.xlu0 %3824 }
0x26ab   :  { %v3829_v44 = vadd.f32 1e-30, %v3825_v17 }
0x26ad   :  { %5938 = vrsqrt.f32 %v3829_v44  ;;  %v3828_v45 = vpop.xlane.xlu1 %3827 }
0x26ae   :  { %v3830_v6 = vadd.f32 1e-30, %v3828_v45 }
0x26b0   :  { %5940 = vrsqrt.f32 %v3830_v6  ;;  %v3963_v22 = vpop.xlane.xlu0 %3962 }
0x26b1   :  { %v3967_v10 = vmul.f32 %v3963_v22, %v7469_v50 }
0x26b3   :  { %v3971_v55 = vrot.slane %v3967_v10, 6  ;;  %v3966_v38 = vpop.xlane.xlu1 %3965 }
0x26b4   :  { %v3968_v36 = vmul.f32 %v3966_v38, %v7473_v7  ;;  %v4028_v38 = vrot.slane %v7274_v49, %v6410_v61 }
0x26b5   :  { %v3975_v46 = vsub.f32 %v3951_v14, %v3971_v55  ;;  %v4018_v55 = vrot.slane %v7247_v31, %v6407_v15  ;;  %v4032_v31 = vrot.slane %v7278_v27, %v6410_v61 }
0x26b6   :  { %v3972_v11 = vrot.slane %v3968_v36, 6  ;;  %v4038_v36 = vrot.slane %v7309_v62, %v6413_v30  ;;  %v4068_v62 = vrot.slane %v7469_v50, %v6430_v39  ;;  %v4062_v50 = vrot.slane %v7436_v29, %v6426_v20 }
0x26b7   :  { %v5939_v63 = vpop.eup %5938  ;;  %v3979_v57 = vrot.slane %v3975_v46, 1 }
0x26b8   :  { %v3976_v48 = vsub.f32 %v3952_v1, %v3972_v11  ;;  %v3833_v23 = vmul.f32 %v5939_v63, %v3819_v56  ;;  %v4022_v11 = vrot.slane %v7252_v37, %v6407_v15  ;;  %v4023_v63 = vsel %vm956_vm12, %v4018_v55, 0.0 }
0x26b9   :  { %v4033_v49 = vsel %vm967_vm13, %v4028_v38, %v4023_v63 }
0x26ba   :  { %v5941_v2 = vpop.eup %5940  ;;  %v3980_v60 = vrot.slane %v3976_v48, 1  ;;  %v3983_v3 = vmul.f32 %v3979_v57, %v3833_v23  ;;  %v4058_v57 = vrot.slane %v7430_v26, %v6426_v20  ;;  %v4043_v37 = vsel %vm978_vm14, %v4038_v36, %v4033_v49 }
0x26bb   :  { %v7494_v58 = vmul.f32 %v5941_v2, %v3820_v16  ;;  %v4078_v2 = vrot.slane %v3833_v23, %v6433_v40  ;;  %v4052_v26 = vrot.slane %v7372_v35, %v6418_v32 }
0x26bc   :  { %v3985_v33 = vsel %vm8079_vm2, %v3983_v3, 0.0  ;;  %v4024_v3 = vsel %vm956_vm12, %v4022_v11, 0.0 }
0x26bd   :  { %3986 = vadd.xlane.f32.xlu0 %v3985_v33  ;;  %v3984_v47 = vmul.f32 %v3980_v60, %v7494_v58  ;;  %v4034_v33 = vsel %vm967_vm13, %v4032_v31, %v4024_v3  ;;  %v4082_v29 = vrot.slane %v7494_v58, %v6433_v40 }
0x26bf   :  { %v3988_v54 = vsel %vm8080_vm3, %v3984_v47, 0.0 }
0x26c0   :  { %3989 = vadd.xlane.f32.xlu1 %v3988_v54 }
0x274a   :  { %v3987_v53 = vpop.xlane.xlu0 %3986 }
0x274b   :  { %v3991_v14 = vmul.f32 %v3987_v53, %v3833_v23  ;;  %v4072_v23 = vrot.slane %v7473_v7, %v6430_v39 }
0x274d   :  { %v3995_v34 = vrot.slane %v3991_v14, 7  ;;  %v3990_v5 = vpop.xlane.xlu1 %3989 }
0x274e   :  { %v3992_v1 = vmul.f32 %v3990_v5, %v7494_v58 }
0x274f   :  { %v3999_v56 = vsub.f32 %v3975_v46, %v3995_v34  ;;  %v4048_v46 = vrot.slane %v7366_v52, %v6418_v32  ;;  %v4042_v52 = vrot.slane %v7314_v59, %v6413_v30 }
0x2750   :  { %v3996_v41 = vrot.slane %v3992_v1, 7 }
0x2751   :  { %v4001_v28 = vmul.f32 %v3999_v56, %v3999_v56  ;;  %v4053_v27 = vsel %vm989_vm15, %v4048_v46, %v4043_v37  ;;  %v4044_v53 = vsel %vm978_vm14, %v4042_v52, %v4034_v33 }
0x2752   :  { %v4000_v21 = vsub.f32 %v3976_v48, %v3996_v41  ;;  %v4063_v59 = vsel %vm1000_vm11, %v4058_v57, %v4053_v27  ;;  %v4054_v5 = vsel %vm989_vm15, %v4052_v26, %v4044_v53 }
0x2753   :  { %v4003_v16 = vsel %vm8081_vm9, %v4001_v28, 0.0  ;;  %v4073_v47 = vsel %vm1011_vm8, %v4068_v62, %v4063_v59  ;;  %v4064_v1 = vsel %vm1000_vm11, %v4062_v50, %v4054_v5  ;;  %vm8089_vm9 = vcmask 254977  }
0x2754   :  { %4004 = vadd.xlane.f32.xlu0 %v4003_v16  ;;  %v4002_v17 = vmul.f32 %v4000_v21, %v4000_v21  ;;  %v4083_v34 = vsel %vm1022_vm7, %v4078_v2, %v4073_v47 }
0x2756   :  { %v4006_v44 = vsel %vm8082_vm1, %v4002_v17, 0.0  ;;  %vm8090_vm1 = vmmov %vm8089_vm9 }
0x2757   :  { %4007 = vadd.xlane.f32.xlu1 %v4006_v44 }
0x27e1   :  { %v4005_v45 = vpop.xlane.xlu0 %4004 }
0x27e2   :  { %v4009_v6 = vadd.f32 1e-30, %v4005_v45 }
0x27e4   :  { %5942 = vrsqrt.f32 %v4009_v6  ;;  %v4008_v22 = vpop.xlane.xlu1 %4007 }
0x27e5   :  { %v4010_v10 = vadd.f32 1e-30, %v4008_v22 }
0x27e7   :  { %5944 = vrsqrt.f32 %v4010_v10 }
0x27ee   :  { %v5943_v48 = vpop.eup %5942 }
0x27ef   :  { %v4013_v60 = vmul.f32 %v5943_v48, %v3999_v56  ;;  %v4074_v56 = vsel %vm1011_vm8, %v4072_v23, %v4064_v1 }
0x27f0   :  { %v4084_v41 = vsel %vm1022_vm7, %v4082_v29, %v4074_v56 }
0x27f1   :  { %v5945_v35 = vpop.eup %5944  ;;  %v4088_v54 = vrot.slane %v4013_v60, %v6455_v42 }
0x27f2   :  { %v4014_v14 = vmul.f32 %v5945_v35, %v4000_v21 }
0x27f3   :  { %v4093_v7 = vsel %vm1033_vm6, %v4088_v54, %v4083_v34 }
0x27f4   :  { %5588 = vmatmul.mubr.msk.f32.vlgmr.msra.gmra.mrb[8].mxu0 %vm8083_vm4, %v4093_v7  ;;  %v4092_v58 = vrot.slane %v4014_v14, %v6455_v42 }
0x27f5   :  { %5786 = vmatpush3.bf16.xpose.msk.msra.mxu0 %vm6364_vm10, %v6012_v4  ;;  %5625 = vmatprep.mubr.msk.f32.mxu0 %vm5979_vm0, %v5980_v8 }
0x27f6   :  { %v4094_v28 = vsel %vm1033_vm6, %v4092_v58, %v4084_v41  ;;  %5787 = vmatprep.subr.bf16.mxu0 %v5978_v0 }
0x27f7   :  { %5607 = vmatmul.mubr.msk.f32.vlgmr.msra.gmra.mrb[8].mxu1 %vm8084_vm5, %v4094_v28 }
0x27f8   :  { %5802 = vmatpush3.bf16.xpose.msk.msra.mxu1 %vm6364_vm10, %v6027_v9  ;;  %5644 = vmatprep.mubr.msk.f32.mxu1 %vm5979_vm0, %v5980_v8  ;;  %vm8085_vm0 = vcmask 253952  }
0x27f9   :  { %5803 = vmatprep.subr.bf16.mxu1 %v5978_v0  ;;  %vm8086_vm2 = vmmov %vm8085_vm0 }
0x27fa   :  { %vm8088_vm3 = vmmov %vm8085_vm0 }
0x27fb   :  { %vm8091_vm4 = vmmov %vm8085_vm0 }
0x27fc   :  { %vm8092_vm5 = vmmov %vm8085_vm0 }
0x27fd   :  { %5790 = vmatpush3.bf16.xpose.msk.msra.mxu0 %vm6364_vm10, %v6036_v12 }
0x27fe   :  { %5791 = vmatprep.subr.bf16.mxu0 %v5978_v0 }
0x2800   :  { %5806 = vmatpush3.bf16.xpose.msk.msra.mxu1 %vm6364_vm10, %v6040_v13 }
0x2801   :  { %5807 = vmatprep.subr.bf16.mxu1 %v5978_v0 }
0x2805   :  { %5794 = vmatpush3.bf16.xpose.msk.msra.mxu0 %vm6364_vm10, %v6056_v18 }
0x2806   :  { %5795 = vmatprep.subr.bf16.mxu0 %v5978_v0 }
0x2808   :  { %5810 = vmatpush3.bf16.xpose.msk.msra.mxu1 %vm6364_vm10, %v6060_v19 }
0x2809   :  { %5811 = vmatprep.subr.bf16.mxu1 %v5978_v0 }
0x280d   :  { %5798 = vmatpush3.bf16.xpose.msk.msra.mxu0 %vm6364_vm10, %v6076_v24 }
0x2810   :  { %5814 = vmatpush3.bf16.xpose.msk.msra.mxu1 %vm6364_vm10, %v6080_v25  ;;  %vm8087_vm10 = vmmov %vm8085_vm0 }
0x28c7   :  { %v7599_v4 = vpop.f32.mrb[8].mxu0 }
0x28c8   :  { %v5589_v8 = vpop.f32.mrb[9].mxu0  ;;  %v4241_v9 = vmul.f32 %v7599_v4, %v7599_v4  ;;  %v4257_v44 = vrot.slane %v7599_v4, 1  ;;  %v4293_v48 = vrot.slane %v7599_v4, 2 }
0x28ca   :  { %v7603_v12 = vpop.f32.mrb[8].mxu1  ;;  %v4243_v13 = vsel %vm8085_vm0, %v4241_v9, 0.0  ;;  %vm8093_vm0 = vmmov %vm8090_vm1 }
0x28cb   :  { %4244 = vadd.xlane.f32.xlu0 %v4243_v13  ;;  %v5608_v0 = vpop.f32.mrb[9].mxu1  ;;  %v4242_v18 = vmul.f32 %v7603_v12, %v7603_v12  ;;  %v4258_v10 = vrot.slane %v7603_v12, 1  ;;  %v4294_v27 = vrot.slane %v7603_v12, 2  ;;  %v4353_v13 = vrot.slane %v7599_v4, 3 }
0x28cd   :  { %v4246_v19 = vsel %vm8086_vm2, %v4242_v18, 0.0  ;;  %vm8094_vm2 = vmmov %vm8093_vm0 }
0x28ce   :  { %4247 = vadd.xlane.f32.xlu1 %v4246_v19 }
0x2958   :  { %v4245_v24 = vpop.xlane.xlu0 %4244 }
0x2959   :  { %v4249_v25 = vadd.f32 1e-30, %v4245_v24 }
0x295b   :  { %5946 = vrsqrt.f32 %v4249_v25  ;;  %v4248_v51 = vpop.xlane.xlu1 %4247 }
0x295c   :  { %v4250_v21 = vadd.f32 1e-30, %v4248_v51  ;;  %v4354_v51 = vrot.slane %v7603_v12, 3 }
0x295e   :  { %5948 = vrsqrt.f32 %v4250_v21 }
0x2965   :  { %v5947_v16 = vpop.eup %5946 }
0x2966   :  { %v7610_v17 = vmul.f32 %v5947_v16, %v7599_v4 }
0x2968   :  { %v5949_v45 = vpop.eup %5948  ;;  %v4261_v6 = vmul.f32 %v4257_v44, %v7610_v17  ;;  %v4297_v26 = vmul.f32 %v4293_v48, %v7610_v17  ;;  %v4357_v24 = vmul.f32 %v4353_v13, %v7610_v17 }
0x2969   :  { %v7615_v22 = vmul.f32 %v5949_v45, %v7603_v12 }
0x296a   :  { %v4263_v55 = vsel %vm8087_vm10, %v4261_v6, 0.0  ;;  %v4299_v59 = vsel %vm8091_vm4, %v4297_v26, 0.0  ;;  %vm8095_vm10 = vmmov %vm8088_vm3 }
0x296b   :  { %4264 = vadd.xlane.f32.xlu0 %v4263_v55  ;;  %v4262_v38 = vmul.f32 %v4258_v10, %v7615_v22  ;;  %v4298_v50 = vmul.f32 %v4294_v27, %v7615_v22  ;;  %v4358_v16 = vmul.f32 %v4354_v51, %v7615_v22  ;;  %v4359_v44 = vsel %vm8095_vm10, %v4357_v24, 0.0  ;;  %vm8098_vm4 = vmmov %vm8093_vm0 }
0x296d   :  { %v4266_v36 = vsel %vm8088_vm3, %v4262_v38, 0.0  ;;  %v4302_v33 = vsel %vm8092_vm5, %v4298_v50, 0.0  ;;  %v4362_v45 = vsel %vm8088_vm3, %v4358_v16, 0.0  ;;  %vm8099_vm5 = vmmov %vm8093_vm0 }
0x296e   :  { %4267 = vadd.xlane.f32.xlu1 %v4266_v36 }
0x29f8   :  { %v4265_v46 = vpop.xlane.xlu0 %4264 }
0x29f9   :  { %v4269_v11 = vmul.f32 %v4265_v46, %v7610_v17 }
0x29fb   :  { %v4273_v63 = vrot.slane %v4269_v11, 7  ;;  %v4268_v57 = vpop.xlane.xlu1 %4267 }
0x29fc   :  { %v4270_v31 = vmul.f32 %v4268_v57, %v7615_v22 }
0x29fd   :  { %v4277_v49 = vsub.f32 %v7599_v4, %v4273_v63 }
0x29fe   :  { %v4274_v62 = vrot.slane %v4270_v31, 7 }
0x29ff   :  { %v4279_v52 = vmul.f32 %v4277_v49, %v4277_v49 }
0x2a00   :  { %v4278_v37 = vsub.f32 %v7603_v12, %v4274_v62 }
0x2a01   :  { %v4281_v2 = vsel %vm8089_vm9, %v4279_v52, 0.0  ;;  %vm8096_vm9 = vcmask 256002  }
0x2a02   :  { %4282 = vadd.xlane.f32.xlu0 %v4281_v2  ;;  %v4280_v60 = vmul.f32 %v4278_v37, %v4278_v37 }
0x2a04   :  { %v4284_v3 = vsel %vm8090_vm1, %v4280_v60, 0.0  ;;  %vm8097_vm1 = vmmov %vm8096_vm9 }
0x2a05   :  { %4285 = vadd.xlane.f32.xlu1 %v4284_v3  ;;  %vm8102_vm10 = vmmov %vm8097_vm1 }
0x2a06   :  { %4300 = vadd.xlane.f32.xlu0 %v4299_v59 }
0x2a09   :  { %4303 = vadd.xlane.f32.xlu1 %v4302_v33  ;;  %v4437_v33 = vrot.slane %v7599_v4, 4 }
0x2a8f   :  { %v4283_v23 = vpop.xlane.xlu0 %4282 }
0x2a90   :  { %v4287_v35 = vadd.f32 1e-30, %v4283_v23 }
0x2a92   :  { %5950 = vrsqrt.f32 %v4287_v35  ;;  %v4286_v47 = vpop.xlane.xlu1 %4285 }
0x2a93   :  { %v4288_v54 = vadd.f32 1e-30, %v4286_v47  ;;  %v4301_v53 = vpop.xlane.xlu0 %4300  ;;  %v4441_v47 = vmul.f32 %v4437_v33, %v7610_v17 }
0x2a94   :  { %v4305_v29 = vmul.f32 %v4301_v53, %v7610_v17  ;;  %v4438_v53 = vrot.slane %v7603_v12, 4 }
0x2a95   :  { %5952 = vrsqrt.f32 %v4288_v54 }
0x2a96   :  { %v4309_v14 = vrot.slane %v4305_v29, 6  ;;  %v4304_v34 = vpop.xlane.xlu1 %4303 }
0x2a97   :  { %v4306_v5 = vmul.f32 %v4304_v34, %v7615_v22 }
0x2a98   :  { %v4313_v7 = vsub.f32 %v7599_v4, %v4309_v14  ;;  %v4442_v14 = vmul.f32 %v4438_v53, %v7615_v22 }
0x2a99   :  { %v4310_v1 = vrot.slane %v4306_v5, 6 }
0x2a9a   :  { %v4317_v28 = vrot.slane %v4313_v7, 1 }
0x2a9b   :  { %v4314_v58 = vsub.f32 %v7603_v12, %v4310_v1 }
0x2a9c   :  { %v5951_v56 = vpop.eup %5950 }
0x2a9d   :  { %v7637_v41 = vmul.f32 %v5951_v56, %v4277_v49  ;;  %v4318_v18 = vrot.slane %v4314_v58, 1 }
0x2a9f   :  { %v5953_v8 = vpop.eup %5952  ;;  %v4321_v9 = vmul.f32 %v4317_v28, %v7637_v41 }
0x2aa0   :  { %v7641_v0 = vmul.f32 %v5953_v8, %v4278_v37 }
0x2aa1   :  { %v4323_v19 = vsel %vm8093_vm0, %v4321_v9, 0.0  ;;  %vm8100_vm0 = vmmov %vm8088_vm3 }
0x2aa2   :  { %4324 = vadd.xlane.f32.xlu0 %v4323_v19  ;;  %v4322_v25 = vmul.f32 %v4318_v18, %v7641_v0  ;;  %v4443_v34 = vsel %vm8100_vm0, %v4441_v47, 0.0  ;;  %vm8103_vm3 = vmmov %vm8097_vm1 }
0x2aa4   :  { %v4326_v21 = vsel %vm8094_vm2, %v4322_v25, 0.0  ;;  %vm8101_vm2 = vmmov %vm8100_vm0 }
0x2aa5   :  { %4327 = vadd.xlane.f32.xlu1 %v4326_v21  ;;  %v4446_v5 = vsel %vm8101_vm2, %v4442_v14, 0.0 }
0x2aa6   :  { %4360 = vadd.xlane.f32.xlu0 %v4359_v44 }
0x2aa9   :  { %4363 = vadd.xlane.f32.xlu1 %v4362_v45 }
0x2b2f   :  { %v4325_v6 = vpop.xlane.xlu0 %4324 }
0x2b30   :  { %v4329_v10 = vmul.f32 %v4325_v6, %v7637_v41 }
0x2b32   :  { %v4333_v55 = vrot.slane %v4329_v10, 7  ;;  %v4328_v38 = vpop.xlane.xlu1 %4327 }
0x2b33   :  { %v4330_v36 = vmul.f32 %v4328_v38, %v7641_v0  ;;  %v4361_v46 = vpop.xlane.xlu0 %4360 }
0x2b34   :  { %v4337_v11 = vsub.f32 %v4313_v7, %v4333_v55  ;;  %v4365_v63 = vmul.f32 %v4361_v46, %v7610_v17 }
0x2b35   :  { %v4334_v57 = vrot.slane %v4330_v36, 7 }
0x2b36   :  { %v4369_v31 = vrot.slane %v4365_v63, 5  ;;  %v4364_v49 = vpop.xlane.xlu1 %4363  ;;  %v4339_v62 = vmul.f32 %v4337_v11, %v4337_v11 }
0x2b37   :  { %v4338_v52 = vsub.f32 %v4314_v58, %v4334_v57  ;;  %v4366_v48 = vmul.f32 %v4364_v49, %v7615_v22 }
0x2b38   :  { %v4373_v37 = vsub.f32 %v7599_v4, %v4369_v31  ;;  %v4341_v2 = vsel %vm8096_vm9, %v4339_v62, 0.0  ;;  %vm8104_vm9 = vmmov %vm8098_vm4 }
0x2b39   :  { %v4370_v26 = vrot.slane %v4366_v48, 5  ;;  %4342 = vadd.xlane.f32.xlu0 %v4341_v2  ;;  %v4340_v60 = vmul.f32 %v4338_v52, %v4338_v52 }
0x2b3a   :  { %v4377_v27 = vrot.slane %v4373_v37, 2 }
0x2b3b   :  { %v4374_v3 = vsub.f32 %v7603_v12, %v4370_v26  ;;  %v4344_v50 = vsel %vm8097_vm1, %v4340_v60, 0.0  ;;  %v4545_v26 = vrot.slane %v7599_v4, 5  ;;  %vm8105_vm1 = vmmov %vm8098_vm4 }
0x2b3c   :  { %4345 = vadd.xlane.f32.xlu1 %v4344_v50  ;;  %v4381_v59 = vmul.f32 %v4377_v27, %v7637_v41  ;;  %v4546_v50 = vrot.slane %v7603_v12, 5 }
0x2b3d   :  { %v4378_v23 = vrot.slane %v4374_v3, 2 }
0x2b3e   :  { %v4383_v35 = vsel %vm8098_vm4, %v4381_v59, 0.0  ;;  %v4550_v33 = vmul.f32 %v4546_v50, %v7615_v22  ;;  %vm8106_vm4 = vmmov %vm8100_vm0 }
0x2b3f   :  { %4384 = vadd.xlane.f32.xlu0 %v4383_v35  ;;  %v4382_v54 = vmul.f32 %v4378_v23, %v7641_v0 }
0x2b41   :  { %v4386_v29 = vsel %vm8099_vm5, %v4382_v54, 0.0  ;;  %vm8107_vm5 = vmmov %vm8100_vm0  ;;  %vm8108_vm0 = vcmask 257027  }
0x2b42   :  { %4387 = vadd.xlane.f32.xlu1 %v4386_v29  ;;  %v4554_v35 = vsel %vm8107_vm5, %v4550_v33, 0.0  ;;  %vm8109_vm2 = vmmov %vm8108_vm0 }
0x2b43   :  { %4444 = vadd.xlane.f32.xlu0 %v4443_v34  ;;  %vm8112_vm5 = vmmov %vm8106_vm4 }
0x2b46   :  { %4447 = vadd.xlane.f32.xlu1 %v4446_v5 }
0x2bc6   :  { %v4343_v7 = vpop.xlane.xlu0 %4342 }
0x2bc7   :  { %v4347_v1 = vadd.f32 1e-30, %v4343_v7 }
0x2bc9   :  { %5954 = vrsqrt.f32 %v4347_v1  ;;  %v4346_v56 = vpop.xlane.xlu1 %4345 }
0x2bca   :  { %v4348_v58 = vadd.f32 1e-30, %v4346_v56 }
0x2bcc   :  { %5956 = vrsqrt.f32 %v4348_v58  ;;  %v4385_v28 = vpop.xlane.xlu0 %4384 }
0x2bcd   :  { %v4389_v8 = vmul.f32 %v4385_v28, %v7637_v41 }
0x2bcf   :  { %v4393_v9 = vrot.slane %v4389_v8, 6  ;;  %v4388_v13 = vpop.xlane.xlu1 %4387 }
0x2bd0   :  { %v4390_v18 = vmul.f32 %v4388_v13, %v7641_v0  ;;  %v4445_v19 = vpop.xlane.xlu0 %4444 }
0x2bd1   :  { %v4397_v24 = vsub.f32 %v4373_v37, %v4393_v9  ;;  %v4449_v25 = vmul.f32 %v4445_v19, %v7610_v17 }
0x2bd2   :  { %v4394_v51 = vrot.slane %v4390_v18, 6 }
0x2bd3   :  { %v5955_v21 = vpop.eup %5954  ;;  %v4401_v16 = vrot.slane %v4397_v24, 1  ;;  %v4453_v44 = vrot.slane %v4449_v25, 4  ;;  %v4448_v45 = vpop.xlane.xlu1 %4447 }
0x2bd4   :  { %v7672_v6 = vmul.f32 %v5955_v21, %v4337_v11  ;;  %v4398_v10 = vsub.f32 %v4374_v3, %v4394_v51  ;;  %v4450_v55 = vmul.f32 %v4448_v45, %v7615_v22  ;;  %v4549_v3 = vmul.f32 %v4545_v26, %v7610_v17 }
0x2bd5   :  { %v4457_v38 = vsub.f32 %v7599_v4, %v4453_v44 }
0x2bd6   :  { %v5957_v36 = vpop.eup %5956  ;;  %v4402_v46 = vrot.slane %v4398_v10, 1  ;;  %v4454_v63 = vrot.slane %v4450_v55, 4  ;;  %v4405_v57 = vmul.f32 %v4401_v16, %v7672_v6  ;;  %v4551_v23 = vsel %vm8106_vm4, %v4549_v3, 0.0 }
0x2bd7   :  { %v7677_v31 = vmul.f32 %v5957_v36, %v4338_v52  ;;  %v4461_v49 = vrot.slane %v4457_v38, 3  ;;  %v4678_v3 = vrot.slane %v7603_v12, 6 }
0x2bd8   :  { %v4458_v62 = vsub.f32 %v7603_v12, %v4454_v63  ;;  %v4407_v48 = vsel %vm8102_vm10, %v4405_v57, 0.0  ;;  %vm8110_vm10 = vmmov %vm8103_vm3 }
0x2bd9   :  { %4408 = vadd.xlane.f32.xlu0 %v4407_v48  ;;  %v4406_v11 = vmul.f32 %v4402_v46, %v7677_v31  ;;  %v4465_v37 = vmul.f32 %v4461_v49, %v7637_v41 }
0x2bda   :  { %v4462_v2 = vrot.slane %v4458_v62, 3 }
0x2bdb   :  { %v4410_v60 = vsel %vm8103_vm3, %v4406_v11, 0.0  ;;  %v4467_v27 = vsel %vm8104_vm9, %v4465_v37, 0.0  ;;  %v4677_v37 = vrot.slane %v7599_v4, 6  ;;  %vm8111_vm9 = vmmov %vm8105_vm1 }
0x2bdc   :  { %4411 = vadd.xlane.f32.xlu1 %v4410_v60  ;;  %v4466_v52 = vmul.f32 %v4462_v2, %v7641_v0 }
0x2bdd   :  { %4468 = vadd.xlane.f32.xlu0 %v4467_v27  ;;  %v4681_v27 = vmul.f32 %v4677_v37, %v7610_v17 }
0x2bde   :  { %v4470_v59 = vsel %vm8105_vm1, %v4466_v52, 0.0 }
0x2bdf   :  { %v4683_v33 = vsel %vm8106_vm4, %v4681_v27, 0.0 }
0x2be0   :  { %4471 = vadd.xlane.f32.xlu1 %v4470_v59  ;;  %v4682_v59 = vmul.f32 %v4678_v3, %v7615_v22 }
0x2be1   :  { %4552 = vadd.xlane.f32.xlu0 %v4551_v23 }
0x2be2   :  { %v4686_v23 = vsel %vm8112_vm5, %v4682_v59, 0.0  ;;  %vm8116_vm5 = vmmov %vm8106_vm4 }
0x2be4   :  { %4555 = vadd.xlane.f32.xlu1 %v4554_v35 }
0x2c66   :  { %v4409_v47 = vpop.xlane.xlu0 %4408 }
0x2c67   :  { %v4413_v54 = vmul.f32 %v4409_v47, %v7672_v6 }
0x2c69   :  { %v4417_v53 = vrot.slane %v4413_v54, 7  ;;  %v4412_v29 = vpop.xlane.xlu1 %4411 }
0x2c6a   :  { %v4414_v14 = vmul.f32 %v4412_v29, %v7677_v31  ;;  %v4469_v34 = vpop.xlane.xlu0 %4468 }
0x2c6b   :  { %v7695_v5 = vsub.f32 %v4397_v24, %v4417_v53  ;;  %v4473_v7 = vmul.f32 %v4469_v34, %v7637_v41 }
0x2c6c   :  { %v4418_v1 = vrot.slane %v4414_v14, 7 }
0x2c6d   :  { %v4477_v56 = vrot.slane %v4473_v7, 5  ;;  %v4472_v58 = vpop.xlane.xlu1 %4471  ;;  %v4423_v28 = vmul.f32 %v7695_v5, %v7695_v5 }
0x2c6e   :  { %v7700_v8 = vsub.f32 %v4398_v10, %v4418_v1  ;;  %v4474_v9 = vmul.f32 %v4472_v58, %v7641_v0  ;;  %v4553_v13 = vpop.xlane.xlu0 %4552 }
0x2c6f   :  { %v4481_v18 = vsub.f32 %v4457_v38, %v4477_v56  ;;  %v4557_v19 = vmul.f32 %v4553_v13, %v7610_v17  ;;  %v4425_v25 = vsel %vm8108_vm0, %v4423_v28, 0.0 }
0x2c70   :  { %v4478_v24 = vrot.slane %v4474_v9, 5  ;;  %4426 = vadd.xlane.f32.xlu0 %v4425_v25  ;;  %v4424_v51 = vmul.f32 %v7700_v8, %v7700_v8 }
0x2c71   :  { %v4485_v21 = vrot.slane %v4481_v18, 2  ;;  %v4561_v16 = vrot.slane %v4557_v19, 3  ;;  %v4556_v44 = vpop.xlane.xlu1 %4555 }
0x2c72   :  { %v4482_v45 = vsub.f32 %v4458_v62, %v4478_v24  ;;  %v4558_v10 = vmul.f32 %v4556_v44, %v7615_v22  ;;  %v4428_v55 = vsel %vm8109_vm2, %v4424_v51, 0.0  ;;  %vm8113_vm2 = vmmov %vm8108_vm0 }
0x2c73   :  { %v4565_v36 = vsub.f32 %v7599_v4, %v4561_v16  ;;  %4429 = vadd.xlane.f32.xlu1 %v4428_v55  ;;  %v4489_v38 = vmul.f32 %v4485_v21, %v7672_v6 }
0x2c74   :  { %v4486_v46 = vrot.slane %v4482_v45, 2  ;;  %v4562_v63 = vrot.slane %v4558_v10, 3 }
0x2c75   :  { %v4569_v57 = vrot.slane %v4565_v36, 4  ;;  %v4491_v49 = vsel %vm8110_vm10, %v4489_v38, 0.0  ;;  %vm8114_vm10 = vmmov %vm8103_vm3 }
0x2c76   :  { %v4566_v48 = vsub.f32 %v7603_v12, %v4562_v63  ;;  %4492 = vadd.xlane.f32.xlu0 %v4491_v49  ;;  %v4490_v11 = vmul.f32 %v4486_v46, %v7677_v31 }
0x2c77   :  { %v4573_v62 = vmul.f32 %v4569_v57, %v7637_v41 }
0x2c78   :  { %v4570_v2 = vrot.slane %v4566_v48, 4  ;;  %v4494_v26 = vsel %vm8103_vm3, %v4490_v11, 0.0 }
0x2c79   :  { %4495 = vadd.xlane.f32.xlu1 %v4494_v26  ;;  %v4575_v60 = vsel %vm8111_vm9, %v4573_v62, 0.0  ;;  %vm8115_vm9 = vmmov %vm8105_vm1 }
0x2c7a   :  { %4576 = vadd.xlane.f32.xlu0 %v4575_v60  ;;  %v4574_v52 = vmul.f32 %v4570_v2, %v7641_v0 }
0x2c7c   :  { %v4578_v50 = vsel %vm8105_vm1, %v4574_v52, 0.0 }
0x2c7d   :  { %4579 = vadd.xlane.f32.xlu1 %v4578_v50 }
0x2c7e   :  { %4684 = vadd.xlane.f32.xlu0 %v4683_v33 }
0x2c81   :  { %4687 = vadd.xlane.f32.xlu1 %v4686_v23 }
0x2cfd   :  { %v4427_v35 = vpop.xlane.xlu0 %4426 }
0x2cfe   :  { %v4431_v47 = vadd.f32 1e-30, %v4427_v35  ;;  %v4833_v35 = vrot.slane %v7599_v4, 7 }
0x2d00   :  { %5958 = vrsqrt.f32 %v4431_v47  ;;  %v4430_v54 = vpop.xlane.xlu1 %4429 }
0x2d01   :  { %v4432_v53 = vadd.f32 1e-30, %v4430_v54 }
0x2d03   :  { %5960 = vrsqrt.f32 %v4432_v53  ;;  %v4493_v29 = vpop.xlane.xlu0 %4492  ;;  %v4837_v53 = vmul.f32 %v4833_v35, %v7610_v17 }
0x2d04   :  { %v4497_v14 = vmul.f32 %v4493_v29, %v7672_v6  ;;  %v4834_v29 = vrot.slane %v7603_v12, 7 }
0x2d06   :  { %v4501_v34 = vrot.slane %v4497_v14, 6  ;;  %v4496_v7 = vpop.xlane.xlu1 %4495 }
0x2d07   :  { %v4498_v1 = vmul.f32 %v4496_v7, %v7677_v31  ;;  %v4577_v56 = vpop.xlane.xlu0 %4576  ;;  %v4839_v7 = vsel %vm8106_vm4, %v4837_v53, 0.0  ;;  %vm8123_vm4 = vcmask 254977  }
0x2d08   :  { %v4505_v58 = vsub.f32 %v4481_v18, %v4501_v34  ;;  %v4581_v28 = vmul.f32 %v4577_v56, %v7637_v41  ;;  %v4838_v34 = vmul.f32 %v4834_v29, %v7615_v22 }
0x2d09   :  { %v4502_v9 = vrot.slane %v4498_v1, 6 }
0x2d0a   :  { %v5959_v13 = vpop.eup %5958  ;;  %v4509_v19 = vrot.slane %v4505_v58, 1  ;;  %v4585_v25 = vrot.slane %v4581_v28, 4  ;;  %v4580_v24 = vpop.xlane.xlu1 %4579  ;;  %v4842_v1 = vsel %vm8116_vm5, %v4838_v34, 0.0  ;;  %vm8124_vm5 = vmmov %vm8123_vm4 }
0x2d0b   :  { %v7729_v51 = vmul.f32 %v5959_v13, %v7695_v5  ;;  %v4506_v21 = vsub.f32 %v4482_v45, %v4502_v9  ;;  %v4582_v16 = vmul.f32 %v4580_v24, %v7641_v0  ;;  %v4685_v44 = vpop.xlane.xlu0 %4684 }
0x2d0c   :  { %v4589_v10 = vsub.f32 %v4565_v36, %v4585_v25  ;;  %v4689_v55 = vmul.f32 %v4685_v44, %v7610_v17 }
0x2d0d   :  { %v5961_v38 = vpop.eup %5960  ;;  %v4510_v46 = vrot.slane %v4506_v21, 1  ;;  %v4586_v18 = vrot.slane %v4582_v16, 4  ;;  %v4513_v63 = vmul.f32 %v4509_v19, %v7729_v51 }
0x2d0e   :  { %v7735_v57 = vmul.f32 %v5961_v38, %v7700_v8  ;;  %v4593_v49 = vrot.slane %v4589_v10, 3  ;;  %v4693_v11 = vrot.slane %v4689_v55, 2  ;;  %v4688_v62 = vpop.xlane.xlu1 %4687 }
0x2d0f   :  { %v4590_v5 = vsub.f32 %v4566_v48, %v4586_v18  ;;  %v4690_v45 = vmul.f32 %v4688_v62, %v7615_v22  ;;  %v4515_v37 = vsel %vm8108_vm0, %v4513_v63, 0.0  ;;  %vm8117_vm0 = vcmask 258052  }
0x2d10   :  { %v4697_v36 = vsub.f32 %v7599_v4, %v4693_v11  ;;  %4516 = vadd.xlane.f32.xlu0 %v4515_v37  ;;  %v4514_v2 = vmul.f32 %v4510_v46, %v7735_v57  ;;  %v4597_v26 = vmul.f32 %v4593_v49, %v7672_v6 }
0x2d11   :  { %v4594_v60 = vrot.slane %v4590_v5, 3  ;;  %v4694_v27 = vrot.slane %v4690_v45, 2 }
0x2d12   :  { %v4701_v52 = vrot.slane %v4697_v36, 5  ;;  %v4518_v8 = vsel %vm8113_vm2, %v4514_v2, 0.0  ;;  %v4599_v3 = vsel %vm8114_vm10, %v4597_v26, 0.0  ;;  %vm8118_vm2 = vmmov %vm8117_vm0  ;;  %vm8119_vm10 = vcmask 257027  }
0x2d13   :  { %v4698_v48 = vsub.f32 %v7603_v12, %v4694_v27  ;;  %4519 = vadd.xlane.f32.xlu1 %v4518_v8  ;;  %v4598_v50 = vmul.f32 %v4594_v60, %v7677_v31 }
0x2d14   :  { %4600 = vadd.xlane.f32.xlu0 %v4599_v3  ;;  %v4705_v59 = vmul.f32 %v4701_v52, %v7637_v41 }
0x2d15   :  { %v4702_v33 = vrot.slane %v4698_v48, 5  ;;  %v4602_v23 = vsel %vm8103_vm3, %v4598_v50, 0.0  ;;  %vm8120_vm3 = vmmov %vm8119_vm10 }
0x2d16   :  { %v4707_v47 = vsel %vm8115_vm9, %v4705_v59, 0.0  ;;  %vm8121_vm9 = vcmask 256002  }
0x2d17   :  { %4603 = vadd.xlane.f32.xlu1 %v4602_v23  ;;  %v4706_v54 = vmul.f32 %v4702_v33, %v7641_v0 }
0x2d18   :  { %4708 = vadd.xlane.f32.xlu0 %v4707_v47 }
0x2d19   :  { %v4710_v14 = vsel %vm8105_vm1, %v4706_v54, 0.0  ;;  %vm8122_vm1 = vmmov %vm8121_vm9 }
0x2d1b   :  { %4711 = vadd.xlane.f32.xlu1 %v4710_v14 }
0x2d1c   :  { %4840 = vadd.xlane.f32.xlu0 %v4839_v7 }
0x2d1f   :  { %4843 = vadd.xlane.f32.xlu1 %v4842_v1 }
0x2d9d   :  { %v4517_v56 = vpop.xlane.xlu0 %4516 }
0x2d9e   :  { %v4521_v28 = vmul.f32 %v4517_v56, %v7729_v51 }
0x2da0   :  { %v4525_v9 = vrot.slane %v4521_v28, 7  ;;  %v4520_v13 = vpop.xlane.xlu1 %4519 }
0x2da1   :  { %v4522_v19 = vmul.f32 %v4520_v13, %v7735_v57  ;;  %v4601_v25 = vpop.xlane.xlu0 %4600 }
0x2da2   :  { %v7759_v24 = vsub.f32 %v4505_v58, %v4525_v9  ;;  %v4605_v16 = vmul.f32 %v4601_v25, %v7672_v6 }
0x2da3   :  { %v4526_v44 = vrot.slane %v4522_v19, 7 }
0x2da4   :  { %v4609_v55 = vrot.slane %v4605_v16, 5  ;;  %v4604_v38 = vpop.xlane.xlu1 %4603  ;;  %v4531_v46 = vmul.f32 %v7759_v24, %v7759_v24 }
0x2da5   :  { %v7764_v18 = vsub.f32 %v4506_v21, %v4526_v44  ;;  %v4606_v63 = vmul.f32 %v4604_v38, %v7677_v31  ;;  %v4709_v49 = vpop.xlane.xlu0 %4708 }
0x2da6   :  { %v4613_v11 = vsub.f32 %v4589_v10, %v4609_v55  ;;  %v4713_v62 = vmul.f32 %v4709_v49, %v7637_v41  ;;  %v4533_v45 = vsel %vm8117_vm0, %v4531_v46, 0.0 }
0x2da7   :  { %v4610_v58 = vrot.slane %v4606_v63, 5  ;;  %4534 = vadd.xlane.f32.xlu0 %v4533_v45  ;;  %v4532_v37 = vmul.f32 %v7764_v18, %v7764_v18 }
0x2da8   :  { %v4617_v2 = vrot.slane %v4613_v11, 2  ;;  %v4717_v26 = vrot.slane %v4713_v62, 3  ;;  %v4712_v60 = vpop.xlane.xlu1 %4711 }
0x2da9   :  { %v4614_v27 = vsub.f32 %v4590_v5, %v4610_v58  ;;  %v4714_v21 = vmul.f32 %v4712_v60, %v7641_v0  ;;  %v4841_v52 = vpop.xlane.xlu0 %4840  ;;  %v4536_v8 = vsel %vm8118_vm2, %v4532_v37, 0.0  ;;  %vm8125_vm2 = vmmov %vm8117_vm0 }
0x2daa   :  { %v4721_v3 = vsub.f32 %v4697_v36, %v4717_v26  ;;  %v4845_v10 = vmul.f32 %v4841_v52, %v7610_v17  ;;  %4537 = vadd.xlane.f32.xlu1 %v4536_v8  ;;  %v4621_v50 = vmul.f32 %v4617_v2, %v7729_v51 }
0x2dab   :  { %v4618_v59 = vrot.slane %v4614_v27, 2  ;;  %v4718_v33 = vrot.slane %v4714_v21, 3 }
0x2dac   :  { %v4725_v23 = vrot.slane %v4721_v3, 4  ;;  %v4849_v35 = vrot.slane %v4845_v10, 1  ;;  %v4844_v47 = vpop.xlane.xlu1 %4843  ;;  %v4623_v54 = vsel %vm8119_vm10, %v4621_v50, 0.0  ;;  %vm8126_vm10 = vmmov %vm8120_vm3 }
0x2dad   :  { %v4722_v53 = vsub.f32 %v4698_v48, %v4718_v33  ;;  %v4846_v5 = vmul.f32 %v4844_v47, %v7615_v22  ;;  %4624 = vadd.xlane.f32.xlu0 %v4623_v54  ;;  %v4622_v29 = vmul.f32 %v4618_v59, %v7735_v57 }
0x2dae   :  { %v4853_v36 = vsub.f32 %v7599_v4, %v4849_v35  ;;  %v4729_v14 = vmul.f32 %v4725_v23, %v7672_v6 }
0x2daf   :  { %v4726_v34 = vrot.slane %v4722_v53, 4  ;;  %v4850_v7 = vrot.slane %v4846_v5, 1  ;;  %v4626_v1 = vsel %vm8120_vm3, %v4622_v29, 0.0 }
0x2db0   :  { %v4857_v56 = vrot.slane %v4853_v36, 6  ;;  %4627 = vadd.xlane.f32.xlu1 %v4626_v1  ;;  %v4731_v28 = vsel %vm8121_vm9, %v4729_v14, 0.0  ;;  %vm8127_vm9 = vmmov %vm8122_vm1 }
0x2db1   :  { %v4854_v9 = vsub.f32 %v7603_v12, %v4850_v7  ;;  %4732 = vadd.xlane.f32.xlu0 %v4731_v28  ;;  %v4730_v48 = vmul.f32 %v4726_v34, %v7677_v31 }
0x2db2   :  { %v4861_v13 = vmul.f32 %v4857_v56, %v7637_v41 }
0x2db3   :  { %v4858_v19 = vrot.slane %v4854_v9, 6  ;;  %v4734_v4 = vsel %vm8122_vm1, %v4730_v48, 0.0 }
0x2db4   :  { %4735 = vadd.xlane.f32.xlu1 %v4734_v4  ;;  %v4863_v25 = vsel %vm8123_vm4, %v4861_v13, 0.0  ;;  %vm8128_vm4 = vcmask 259077  }
0x2db5   :  { %4864 = vadd.xlane.f32.xlu0 %v4863_v25  ;;  %v4862_v16 = vmul.f32 %v4858_v19, %v7641_v0 }
0x2db7   :  { %v4866_v44 = vsel %vm8124_vm5, %v4862_v16, 0.0  ;;  %vm8129_vm5 = vmmov %vm8128_vm4 }
0x2db8   :  { %4867 = vadd.xlane.f32.xlu1 %v4866_v44 }
0x2e34   :  { %v4535_v55 = vpop.xlane.xlu0 %4534 }
0x2e35   :  { %v4539_v38 = vadd.f32 1e-30, %v4535_v55 }
0x2e37   :  { %5962 = vrsqrt.f32 %v4539_v38  ;;  %v4538_v12 = vpop.xlane.xlu1 %4537 }
0x2e38   :  { %v4540_v46 = vadd.f32 1e-30, %v4538_v12 }
0x2e3a   :  { %5964 = vrsqrt.f32 %v4540_v46  ;;  %v4625_v63 = vpop.xlane.xlu0 %4624 }
0x2e3b   :  { %v4629_v49 = vmul.f32 %v4625_v63, %v7729_v51 }
0x2e3d   :  { %v4633_v62 = vrot.slane %v4629_v49, 6  ;;  %v4628_v45 = vpop.xlane.xlu1 %4627 }
0x2e3e   :  { %v4630_v58 = vmul.f32 %v4628_v45, %v7735_v57  ;;  %v4733_v37 = vpop.xlane.xlu0 %4732 }
0x2e3f   :  { %v4637_v2 = vsub.f32 %v4613_v11, %v4633_v62  ;;  %v4737_v26 = vmul.f32 %v4733_v37, %v7672_v6 }
0x2e40   :  { %v4634_v60 = vrot.slane %v4630_v58, 6 }
0x2e41   :  { %v5963_v21 = vpop.eup %5962  ;;  %v4641_v52 = vrot.slane %v4637_v2, 1  ;;  %v4741_v8 = vrot.slane %v4737_v26, 4  ;;  %v4736_v10 = vpop.xlane.xlu1 %4735 }
0x2e42   :  { %v7793_v50 = vmul.f32 %v5963_v21, %v7759_v24  ;;  %v4638_v59 = vsub.f32 %v4614_v27, %v4634_v60  ;;  %v4738_v33 = vmul.f32 %v4736_v10, %v7677_v31  ;;  %v4865_v23 = vpop.xlane.xlu0 %4864 }
0x2e43   :  { %v4745_v35 = vsub.f32 %v4721_v3, %v4741_v8  ;;  %v4869_v47 = vmul.f32 %v4865_v23, %v7637_v41 }
0x2e44   :  { %v5965_v54 = vpop.eup %5964  ;;  %v4642_v5 = vrot.slane %v4638_v59, 1  ;;  %v4742_v11 = vrot.slane %v4738_v33, 4  ;;  %v4645_v29 = vmul.f32 %v4641_v52, %v7793_v50 }
0x2e45   :  { %v7799_v14 = vmul.f32 %v5965_v54, %v7764_v18  ;;  %v4749_v34 = vrot.slane %v4745_v35, 3  ;;  %v4873_v7 = vrot.slane %v4869_v47, 2  ;;  %v4868_v1 = vpop.xlane.xlu1 %4867 }
0x2e46   :  { %v4746_v24 = vsub.f32 %v4722_v53, %v4742_v11  ;;  %v4870_v27 = vmul.f32 %v4868_v1, %v7641_v0  ;;  %v4647_v56 = vsel %vm8117_vm0, %v4645_v29, 0.0 }
0x2e47   :  { %v4877_v28 = vsub.f32 %v4853_v36, %v4873_v7  ;;  %4648 = vadd.xlane.f32.xlu0 %v4647_v56  ;;  %v4646_v3 = vmul.f32 %v4642_v5, %v7799_v14  ;;  %v4753_v48 = vmul.f32 %v4749_v34, %v7729_v51 }
0x2e48   :  { %v4750_v13 = vrot.slane %v4746_v24, 3  ;;  %v4874_v19 = vrot.slane %v4870_v27, 2 }
0x2e49   :  { %v4881_v4 = vrot.slane %v4877_v28, 5  ;;  %v4650_v18 = vsel %vm8125_vm2, %v4646_v3, 0.0  ;;  %v4755_v25 = vsel %vm8126_vm10, %v4753_v48, 0.0  ;;  %vm8130_vm2 = vmmov %vm8117_vm0 }
0x2e4a   :  { %v4878_v16 = vsub.f32 %v4854_v9, %v4874_v19  ;;  %4651 = vadd.xlane.f32.xlu1 %v4650_v18  ;;  %v4754_v53 = vmul.f32 %v4750_v13, %v7735_v57  ;;  %vm8131_vm10 = vmmov %vm8120_vm3 }
0x2e4b   :  { %4756 = vadd.xlane.f32.xlu0 %v4755_v25  ;;  %v4885_v44 = vmul.f32 %v4881_v4, %v7672_v6 }
0x2e4c   :  { %v4882_v36 = vrot.slane %v4878_v16, 5  ;;  %v4758_v55 = vsel %vm8120_vm3, %v4754_v53, 0.0 }
0x2e4d   :  { %v4887_v38 = vsel %vm8127_vm9, %v4885_v44, 0.0  ;;  %vm8132_vm9 = vmmov %vm8128_vm4 }
0x2e4e   :  { %4759 = vadd.xlane.f32.xlu1 %v4758_v55  ;;  %v4886_v12 = vmul.f32 %v4882_v36, %v7677_v31 }
0x2e4f   :  { %4888 = vadd.xlane.f32.xlu0 %v4887_v38 }
0x2e50   :  { %v4890_v46 = vsel %vm8122_vm1, %v4886_v12, 0.0  ;;  %vm8133_vm1 = vmmov %vm8128_vm4 }
0x2e52   :  { %4891 = vadd.xlane.f32.xlu1 %v4890_v46 }
0x2ed4   :  { %v4649_v63 = vpop.xlane.xlu0 %4648 }
0x2ed5   :  { %v4653_v9 = vmul.f32 %v4649_v63, %v7793_v50 }
0x2ed7   :  { %v4657_v49 = vrot.slane %v4653_v9, 7  ;;  %v4652_v62 = vpop.xlane.xlu1 %4651 }
0x2ed8   :  { %v4654_v45 = vmul.f32 %v4652_v62, %v7799_v14  ;;  %v4757_v58 = vpop.xlane.xlu0 %4756 }
0x2ed9   :  { %v4661_v37 = vsub.f32 %v4637_v2, %v4657_v49  ;;  %v4761_v26 = vmul.f32 %v4757_v58, %v7729_v51 }
0x2eda   :  { %v4658_v60 = vrot.slane %v4654_v45, 7 }
0x2edb   :  { %v4765_v21 = vrot.slane %v4761_v26, 5  ;;  %v4760_v52 = vpop.xlane.xlu1 %4759  ;;  %v4663_v8 = vmul.f32 %v4661_v37, %v4661_v37 }
0x2edc   :  { %v4662_v10 = vsub.f32 %v4638_v59, %v4658_v60  ;;  %v4762_v33 = vmul.f32 %v4760_v52, %v7735_v57  ;;  %v4889_v23 = vpop.xlane.xlu0 %4888 }
0x2edd   :  { %v4769_v47 = vsub.f32 %v4745_v35, %v4765_v21  ;;  %v4893_v54 = vmul.f32 %v4889_v23, %v7672_v6  ;;  %v4665_v5 = vsel %vm8128_vm4, %v4663_v8, 0.0  ;;  %vm8134_vm4 = vmmov %vm8117_vm0 }
0x2ede   :  { %v4766_v11 = vrot.slane %v4762_v33, 5  ;;  %4666 = vadd.xlane.f32.xlu0 %v4665_v5  ;;  %v4664_v29 = vmul.f32 %v4662_v10, %v4662_v10 }
0x2edf   :  { %v4773_v34 = vrot.slane %v4769_v47, 2  ;;  %v4897_v2 = vrot.slane %v4893_v54, 3  ;;  %v4892_v7 = vpop.xlane.xlu1 %4891 }
0x2ee0   :  { %v4770_v1 = vsub.f32 %v4746_v24, %v4766_v11  ;;  %v4894_v27 = vmul.f32 %v4892_v7, %v7677_v31  ;;  %v4668_v56 = vsel %vm8129_vm5, %v4664_v29, 0.0  ;;  %vm8135_vm5 = vmmov %vm8117_vm0 }
0x2ee1   :  { %v4901_v59 = vsub.f32 %v4877_v28, %v4897_v2  ;;  %4669 = vadd.xlane.f32.xlu1 %v4668_v56  ;;  %v4777_v3 = vmul.f32 %v4773_v34, %v7793_v50 }
0x2ee2   :  { %v4774_v35 = vrot.slane %v4770_v1, 2  ;;  %v4898_v48 = vrot.slane %v4894_v27, 3 }
0x2ee3   :  { %v4905_v13 = vrot.slane %v4901_v59, 4  ;;  %v4779_v19 = vsel %vm8117_vm0, %v4777_v3, 0.0  ;;  %vm8136_vm0 = vcmask 260102  }
0x2ee4   :  { %v4902_v4 = vsub.f32 %v4878_v16, %v4898_v48  ;;  %4780 = vadd.xlane.f32.xlu0 %v4779_v19  ;;  %v4778_v18 = vmul.f32 %v4774_v35, %v7799_v14 }
0x2ee5   :  { %v4909_v25 = vmul.f32 %v4905_v13, %v7729_v51 }
0x2ee6   :  { %v4906_v24 = vrot.slane %v4902_v4, 4  ;;  %v4782_v53 = vsel %vm8130_vm2, %v4778_v18, 0.0  ;;  %vm8137_vm2 = vmmov %vm8136_vm0 }
0x2ee7   :  { %4783 = vadd.xlane.f32.xlu1 %v4782_v53  ;;  %v4911_v28 = vsel %vm8131_vm10, %v4909_v25, 0.0  ;;  %vm8138_vm10 = vmmov %vm8133_vm1 }
0x2ee8   :  { %4912 = vadd.xlane.f32.xlu0 %v4911_v28  ;;  %v4910_v44 = vmul.f32 %v4906_v24, %v7735_v57 }
0x2eea   :  { %v4914_v36 = vsel %vm8120_vm3, %v4910_v44, 0.0  ;;  %vm8139_vm3 = vmmov %vm8133_vm1 }
0x2eeb   :  { %4915 = vadd.xlane.f32.xlu1 %v4914_v36 }
0x2f6b   :  { %v4667_v55 = vpop.xlane.xlu0 %4666 }
0x2f6c   :  { %v4671_v38 = vadd.f32 1e-30, %v4667_v55 }
0x2f6e   :  { %5966 = vrsqrt.f32 %v4671_v38  ;;  %v4670_v16 = vpop.xlane.xlu1 %4669 }
0x2f6f   :  { %v4672_v12 = vadd.f32 1e-30, %v4670_v16 }
0x2f71   :  { %5968 = vrsqrt.f32 %v4672_v12  ;;  %v4781_v46 = vpop.xlane.xlu0 %4780 }
0x2f72   :  { %v4785_v63 = vmul.f32 %v4781_v46, %v7793_v50 }
0x2f74   :  { %v4789_v9 = vrot.slane %v4785_v63, 6  ;;  %v4784_v49 = vpop.xlane.xlu1 %4783 }
0x2f75   :  { %v4786_v62 = vmul.f32 %v4784_v49, %v7799_v14  ;;  %v4913_v45 = vpop.xlane.xlu0 %4912 }
0x2f76   :  { %v4793_v58 = vsub.f32 %v4769_v47, %v4789_v9  ;;  %v4917_v26 = vmul.f32 %v4913_v45, %v7729_v51 }
0x2f77   :  { %v4790_v60 = vrot.slane %v4786_v62, 6 }
0x2f78   :  { %v5967_v21 = vpop.eup %5966  ;;  %v4797_v52 = vrot.slane %v4793_v58, 1  ;;  %v4921_v8 = vrot.slane %v4917_v26, 4  ;;  %v4916_v33 = vpop.xlane.xlu1 %4915 }
0x2f79   :  { %v7832_v23 = vmul.f32 %v5967_v21, %v4661_v37  ;;  %v4794_v54 = vsub.f32 %v4770_v1, %v4790_v60  ;;  %v4918_v5 = vmul.f32 %v4916_v33, %v7735_v57 }
0x2f7a   :  { %v4925_v11 = vsub.f32 %v4901_v59, %v4921_v8 }
0x2f7b   :  { %v5969_v29 = vpop.eup %5968  ;;  %v4798_v34 = vrot.slane %v4794_v54, 1  ;;  %v4922_v2 = vrot.slane %v4918_v5, 4  ;;  %v4801_v7 = vmul.f32 %v4797_v52, %v7832_v23 }
0x2f7c   :  { %v7836_v27 = vmul.f32 %v5969_v29, %v4662_v10  ;;  %v4929_v47 = vrot.slane %v4925_v11, 3 }
0x2f7d   :  { %v4926_v56 = vsub.f32 %v4902_v4, %v4922_v2  ;;  %v4803_v3 = vsel %vm8132_vm9, %v4801_v7, 0.0  ;;  %vm8140_vm9 = vmmov %vm8136_vm0 }
0x2f7e   :  { %4804 = vadd.xlane.f32.xlu0 %v4803_v3  ;;  %v4802_v35 = vmul.f32 %v4798_v34, %v7836_v27  ;;  %v4933_v37 = vmul.f32 %v4929_v47, %v7793_v50 }
0x2f7f   :  { %v4930_v1 = vrot.slane %v4926_v56, 3 }
0x2f80   :  { %v4806_v48 = vsel %vm8133_vm1, %v4802_v35, 0.0  ;;  %v4935_v59 = vsel %vm8134_vm4, %v4933_v37, 0.0  ;;  %vm8141_vm1 = vmmov %vm8136_vm0  ;;  %vm8142_vm4 = vcmask 261127  }
0x2f81   :  { %4807 = vadd.xlane.f32.xlu1 %v4806_v48  ;;  %v4934_v13 = vmul.f32 %v4930_v1, %v7799_v14 }
0x2f82   :  { %4936 = vadd.xlane.f32.xlu0 %v4935_v59 }
0x2f83   :  { %v4938_v10 = vsel %vm8135_vm5, %v4934_v13, 0.0  ;;  %vm8143_vm5 = vmmov %vm8142_vm4 }
0x2f85   :  { %4939 = vadd.xlane.f32.xlu1 %v4938_v10 }
0x300b   :  { %v4805_v19 = vpop.xlane.xlu0 %4804 }
0x300c   :  { %v4809_v4 = vmul.f32 %v4805_v19, %v7832_v23 }
0x300e   :  { %v4813_v18 = vrot.slane %v4809_v4, 7  ;;  %v4808_v25 = vpop.xlane.xlu1 %4807 }
0x300f   :  { %v4810_v24 = vmul.f32 %v4808_v25, %v7836_v27  ;;  %v4937_v53 = vpop.xlane.xlu0 %4936 }
0x3010   :  { %v4817_v28 = vsub.f32 %v4793_v58, %v4813_v18  ;;  %v4941_v44 = vmul.f32 %v4937_v53, %v7793_v50 }
0x3011   :  { %v4814_v36 = vrot.slane %v4810_v24, 7 }
0x3012   :  { %v4945_v55 = vrot.slane %v4941_v44, 5  ;;  %v4940_v38 = vpop.xlane.xlu1 %4939  ;;  %v4819_v16 = vmul.f32 %v4817_v28, %v4817_v28 }
0x3013   :  { %v4818_v12 = vsub.f32 %v4794_v54, %v4814_v36  ;;  %v4942_v46 = vmul.f32 %v4940_v38, %v7799_v14 }
0x3014   :  { %v4949_v63 = vsub.f32 %v4925_v11, %v4945_v55  ;;  %v4821_v9 = vsel %vm8136_vm0, %v4819_v16, 0.0 }
0x3015   :  { %v4946_v49 = vrot.slane %v4942_v46, 5  ;;  %4822 = vadd.xlane.f32.xlu0 %v4821_v9  ;;  %v4820_v62 = vmul.f32 %v4818_v12, %v4818_v12 }
0x3016   :  { %v4953_v45 = vrot.slane %v4949_v63, 2 }
0x3017   :  { %v4950_v26 = vsub.f32 %v4926_v56, %v4946_v49  ;;  %v4824_v60 = vsel %vm8137_vm2, %v4820_v62, 0.0 }
0x3018   :  { %4825 = vadd.xlane.f32.xlu1 %v4824_v60  ;;  %v4957_v58 = vmul.f32 %v4953_v45, %v7832_v23 }
0x3019   :  { %v4954_v21 = vrot.slane %v4950_v26, 2 }
0x301a   :  { %v4959_v52 = vsel %vm8138_vm10, %v4957_v58, 0.0  ;;  %v5016_v58 = vrot.slane %v7610_v17, %v6407_v15  ;;  %v5030_v17 = vrot.slane %v7641_v0, %v6410_v61 }
0x301b   :  { %4960 = vadd.xlane.f32.xlu0 %v4959_v52  ;;  %v4958_v8 = vmul.f32 %v4954_v21, %v7836_v27  ;;  %v5026_v21 = vrot.slane %v7637_v41, %v6410_v61  ;;  %v5036_v52 = vrot.slane %v7672_v6, %v6413_v30  ;;  %v5066_v6 = vrot.slane %v7832_v23, %v6430_v39 }
0x301d   :  { %v4962_v33 = vsel %vm8139_vm3, %v4958_v8, 0.0  ;;  %v5046_v8 = vrot.slane %v7729_v51, %v6418_v32  ;;  %v5040_v51 = vrot.slane %v7677_v31, %v6413_v30 }
0x301e   :  { %4963 = vadd.xlane.f32.xlu1 %v4962_v33  ;;  %v5020_v33 = vrot.slane %v7615_v22, %v6407_v15 }
0x3020   :  { %v5022_v0 = vsel %vm956_vm12, %v5020_v33, 0.0 }
0x3021   :  { %v5032_v31 = vsel %vm967_vm13, %v5030_v17, %v5022_v0 }
0x30a2   :  { %v4823_v54 = vpop.xlane.xlu0 %4822 }
0x30a3   :  { %v4827_v5 = vadd.f32 1e-30, %v4823_v54  ;;  %v5021_v54 = vsel %vm956_vm12, %v5016_v58, 0.0  ;;  %vm8144_vm12 = vcmask 261120  }
0x30a4   :  { %v5031_v41 = vsel %vm967_vm13, %v5026_v21, %v5021_v54  ;;  %vm8145_vm13 = vmmov %vm8144_vm12 }
0x30a5   :  { %5970 = vrsqrt.f32 %v4827_v5  ;;  %v4826_v11 = vpop.xlane.xlu1 %4825  ;;  %v5056_v5 = vrot.slane %v7793_v50, %v6426_v20  ;;  %v5041_v15 = vsel %vm978_vm14, %v5036_v52, %v5031_v41  ;;  %v5050_v50 = vrot.slane %v7735_v57, %v6418_v32 }
0x30a6   :  { %v4828_v29 = vadd.f32 1e-30, %v4826_v11  ;;  %v5051_v61 = vsel %vm989_vm15, %v5046_v8, %v5041_v15 }
0x30a7   :  { %v5061_v30 = vsel %vm1000_vm11, %v5056_v5, %v5051_v61 }
0x30a8   :  { %5972 = vrsqrt.f32 %v4828_v29  ;;  %v4961_v34 = vpop.xlane.xlu0 %4960  ;;  %v5071_v57 = vsel %vm1011_vm8, %v5066_v6, %v5061_v30 }
0x30a9   :  { %v4965_v2 = vmul.f32 %v4961_v34, %v7832_v23  ;;  %v5060_v23 = vrot.slane %v7799_v14, %v6426_v20  ;;  %v5070_v34 = vrot.slane %v7836_v27, %v6430_v39 }
0x30ab   :  { %v4969_v7 = vrot.slane %v4965_v2, 6  ;;  %v4964_v47 = vpop.xlane.xlu1 %4963 }
0x30ac   :  { %v4966_v56 = vmul.f32 %v4964_v47, %v7836_v27 }
0x30ad   :  { %v4973_v3 = vsub.f32 %v4949_v63, %v4969_v7  ;;  %v5042_v7 = vsel %vm978_vm14, %v5040_v51, %v5032_v31  ;;  %vm8146_vm14 = vmmov %vm8144_vm12 }
0x30ae   :  { %v4970_v35 = vrot.slane %v4966_v56, 6  ;;  %v5052_v56 = vsel %vm989_vm15, %v5050_v50, %v5042_v7  ;;  %vm8148_vm15 = vcmask 523264  }
0x30af   :  { %v5971_v37 = vpop.eup %5970  ;;  %v4977_v1 = vrot.slane %v4973_v3, 1  ;;  %v5062_v27 = vsel %vm1000_vm11, %v5060_v23, %v5052_v56  ;;  %vm8147_vm11 = vmmov %vm8144_vm12 }
0x30b0   :  { %v4974_v48 = vsub.f32 %v4950_v26, %v4970_v35  ;;  %v4831_v59 = vmul.f32 %v5971_v37, %v4817_v28 }
0x30b2   :  { %v5973_v13 = vpop.eup %5972  ;;  %v4978_v10 = vrot.slane %v4974_v48, 1  ;;  %v4981_v19 = vmul.f32 %v4977_v1, %v4831_v59  ;;  %v5076_v22 = vrot.slane %v4831_v59, %v6433_v40 }
0x30b3   :  { %v7857_v4 = vmul.f32 %v5973_v13, %v4818_v12 }
0x30b4   :  { %v4983_v18 = vsel %vm8140_vm9, %v4981_v19, 0.0  ;;  %v5081_v47 = vsel %vm1022_vm7, %v5076_v22, %v5071_v57 }
0x30b5   :  { %4984 = vadd.xlane.f32.xlu0 %v4983_v18  ;;  %v4982_v25 = vmul.f32 %v4978_v10, %v7857_v4  ;;  %v5080_v20 = vrot.slane %v7857_v4, %v6433_v40  ;;  %v5072_v40 = vsel %vm1011_vm8, %v5070_v34, %v5062_v27  ;;  %vm8149_vm8 = vmmov %vm8148_vm15 }
0x30b7   :  { %v4986_v24 = vsel %vm8141_vm1, %v4982_v25, 0.0  ;;  %v5082_v35 = vsel %vm1022_vm7, %v5080_v20, %v5072_v40 }
0x30b8   :  { %4987 = vadd.xlane.f32.xlu1 %v4986_v24 }
0x3142   :  { %v4985_v53 = vpop.xlane.xlu0 %4984 }
0x3143   :  { %v4989_v44 = vmul.f32 %v4985_v53, %v4831_v59 }
0x3145   :  { %v4993_v36 = vrot.slane %v4989_v44, 7  ;;  %v4988_v55 = vpop.xlane.xlu1 %4987 }
0x3146   :  { %v4990_v38 = vmul.f32 %v4988_v55, %v7857_v4 }
0x3147   :  { %v4997_v28 = vsub.f32 %v4973_v3, %v4993_v36 }
0x3148   :  { %v4994_v16 = vrot.slane %v4990_v38, 7 }
0x3149   :  { %v4999_v46 = vmul.f32 %v4997_v28, %v4997_v28 }
0x314a   :  { %v4998_v63 = vsub.f32 %v4974_v48, %v4994_v16 }
0x314b   :  { %v5001_v12 = vsel %vm8142_vm4, %v4999_v46, 0.0 }
0x314c   :  { %5002 = vadd.xlane.f32.xlu0 %v5001_v12  ;;  %v5000_v9 = vmul.f32 %v4998_v63, %v4998_v63 }
0x314e   :  { %v5004_v49 = vsel %vm8143_vm5, %v5000_v9, 0.0 }
0x314f   :  { %5005 = vadd.xlane.f32.xlu1 %v5004_v49 }
0x31d9   :  { %v5003_v62 = vpop.xlane.xlu0 %5002 }
0x31da   :  { %v5007_v45 = vadd.f32 1e-30, %v5003_v62 }
0x31dc   :  { %5974 = vrsqrt.f32 %v5007_v45  ;;  %v5006_v26 = vpop.xlane.xlu1 %5005 }
0x31dd   :  { %v5008_v60 = vadd.f32 1e-30, %v5006_v26 }
0x31df   :  { %5976 = vrsqrt.f32 %v5008_v60 }
0x31e6   :  { %v5975_v11 = vpop.eup %5974 }
0x31e7   :  { %v5011_v29 = vmul.f32 %v5975_v11, %v4997_v28 }
0x31e9   :  { %v5977_v32 = vpop.eup %5976  ;;  %v5086_v2 = vrot.slane %v5011_v29, %v6455_v42 }
0x31ea   :  { %v5012_v14 = vmul.f32 %v5977_v32, %v4998_v63 }
0x31eb   :  { %v5091_v39 = vsel %vm1033_vm6, %v5086_v2, %v5081_v47 }
0x31ec   :  { %5093 = vst.msk [vmem:[%s7946_s2] sm:$0xff] %vm8144_vm12, %v5091_v39  ;;  %5626 = vmatmul.mubr.msk.f32.vlgmr.msra.gmra.mrb[10].mxu0 %vm8145_vm13, %v5091_v39  ;;  %v5090_v3 = vrot.slane %v5012_v14, %v6455_v42 }
0x31ee   :  { %v5092_v37 = vsel %vm1033_vm6, %v5090_v3, %v5082_v35 }
0x31ef   :  { %5094 = vst.msk [vmem:[%s7946_s2 + $0x8] sm:$0xff] %vm8146_vm14, %v5092_v37  ;;  %5645 = vmatmul.mubr.msk.f32.vlgmr.msra.gmra.mrb[10].mxu1 %vm8147_vm11, %v5092_v37 }
0x32bf   :  { %v5164_v1 = vpop.f32.mrb[10].mxu0 }
0x32c0   :  { %5241 = vst.msk [vmem:[%s7947_s3] sm:$0xff] %vm8148_vm15, %v5164_v1  ;;  %v5627_v42 = vpop.f32.mrb[11].mxu0 }
0x32c2   :  { %v5237_v48 = vpop.f32.mrb[10].mxu1 }
0x32c3   :  { %5242 = vst.msk [vmem:[%s7947_s3 + $0x8] sm:$0xff] %vm8149_vm8, %v5237_v48  ;;  %v5646_v43 = vpop.f32.mrb[11].mxu1 }

// kernel: svd_init_forward.3
= control target key start
LH: loop header
LB: loop body
LE: loop exit
PB: predicated region body
PF: predicated region fallthrough
CT: control target
= control target key end

     0   :  { %vm79_vm0 = vcmask 64512   ;;  %v356_v0 = vmov 0.0   ;;  %vm357_vm1 = vmmov 0   ;;  %v53_v6 = vlaneseq  ;;  %s566_s3 = inlined_call_operand.vmem [shape: f32[2,8,32], index: 3, kind: input, shape index: {}]   ;;  %s567_s2 = inlined_call_operand.vmem [shape: f32[2,8,8], index: 2, kind: input, shape index: {}]   ;;  %s568_s1 = inlined_call_operand.vmem [shape: f32[2,1,8], index: 1, kind: input, shape index: {}]   ;;  %s569_s0 = inlined_call_operand.vmem [shape: f32[2,64,8], index: 0, kind: input, shape index: {}]   ;;  %s570_s4 = inlined_call_operand.vmem [shape: f32[2,64,8], index: 4, kind: output, shape index: {0}]   ;;  %s571_s5 = inlined_call_operand.vmem [shape: f32[2,32,8], index: 5, kind: output, shape index: {1}]  }
   0x1   :  { %340 = vmatprep.subr.mxu0 %v356_v0  ;;  %v98_v1 = vld [vmem:[%s566_s3] sm:$0xff]  ;;  %342 = vmatprep.mubr.msk.f32.mxu0 %vm357_vm1, %v356_v0  ;;  %v99_v3 = vld [vmem:[%s566_s3 + $0x8] sm:$0xff]  ;;  %v37_v21 = vld [vmem:[%s569_s0 + $0x10] sm:$0xff] }
   0x2   :  { %v96_v2 = vld [vmem:[%s567_s2] sm:$0xff]  ;;  %341 = vmatpush3.msra.mxu0 %v98_v1  ;;  %345 = vmatprep.subr.mxu1 %v356_v0  ;;  %v97_v4 = vld [vmem:[%s567_s2 + $0x8] sm:$0xff]  ;;  %v54_v7 = vshrl.u32 %v53_v6, 7  ;;  %v38_v23 = vld [vmem:[%s569_s0 + $0x18] sm:$0xff] }
   0x3   :  { %343 = vmatmul.mubr.msk.f32.vlgmr.msra.gmra.mrb[0].mxu0 %vm79_vm0, %v96_v2  ;;  %346 = vmatpush3.msra.mxu1 %v99_v3  ;;  %v19_v5 = vld [vmem:[%s568_s1] sm:$0x1]  ;;  %v20_v15 = vld [vmem:[%s568_s1 + $0x1] sm:$0x1]  ;;  %v36_v20 = vld [vmem:[%s569_s0 + $0x8] sm:$0xff] }
   0x4   :  { %347 = vmatprep.mubr.msk.f32.mxu1 %vm357_vm1, %v356_v0  ;;  %352 = vrsqrt.f32 %v19_v5  ;;  %v55_v10 = vsub.s32 0, %v54_v7  ;;  %vm23_vm2 = vcmp.eq.f32.partialorder %v19_v5, inf  ;;  %v26_v11 = vand.u32 2147483648, %v19_v5  ;;  %v35_v19 = vld [vmem:[%s569_s0] sm:$0xff]  ;;  %v40_v25 = vld [vmem:[%s569_s0 + $0x28] sm:$0xff]  ;;  %v41_v29 = vld [vmem:[%s569_s0 + $0x30] sm:$0xff] }
   0x5   :  { %348 = vmatmul.mubr.msk.f32.vlgmr.msra.gmra.mrb[0].mxu1 %vm79_vm0, %v97_v4  ;;  %vm25_vm3 = vcmp.eq.f32.partialorder %v19_v5, 0.0  ;;  %354 = vrsqrt.f32 %v20_v15  ;;  %v39_v24 = vld [vmem:[%s569_s0 + $0x20] sm:$0xff]  ;;  %v42_v30 = vld [vmem:[%s569_s0 + $0x38] sm:$0xff]  ;;  %vm30_vm4 = vcmp.eq.f32.partialorder %v20_v15, inf  ;;  %v33_v38 = vand.u32 2147483648, %v20_v15  ;;  %v44_v43 = vld [vmem:[%s569_s0 + $0x48] sm:$0xff] }
   0x6   :  { %vm32_vm5 = vcmp.eq.f32.partialorder %v20_v15, 0.0  ;;  %v43_v42 = vld [vmem:[%s569_s0 + $0x40] sm:$0xff]  ;;  %v45_v44 = vld [vmem:[%s569_s0 + $0x50] sm:$0xff]  ;;  %v46_v45 = vld [vmem:[%s569_s0 + $0x58] sm:$0xff] }
   0x7   :  { %v47_v46 = vld [vmem:[%s569_s0 + $0x60] sm:$0xff]  ;;  %v48_v47 = vld [vmem:[%s569_s0 + $0x68] sm:$0xff]  ;;  %v49_v51 = vld [vmem:[%s569_s0 + $0x70] sm:$0xff] }
   0x8   :  { %v50_v52 = vld [vmem:[%s569_s0 + $0x78] sm:$0xff] }
   0xe   :  { %v353_v8 = vpop.eup %352 }
   0xf   :  { %v22_v9 = vmul.f32 %v353_v8, %v19_v5  ;;  %v355_v36 = vpop.eup %354 }
  0x10   :  { %v29_v37 = vmul.f32 %v355_v36, %v20_v15 }
  0x11   :  { %v24_v12 = vsel %vm23_vm2, %v19_v5, %v22_v9 }
  0x12   :  { %v27_v13 = vsel %vm25_vm3, %v26_v11, %v24_v12  ;;  %v31_v39 = vsel %vm30_vm4, %v20_v15, %v29_v37 }
  0x13   :  { %v408_v17 = vrot.slane %v27_v13, %v55_v10  ;;  %v34_v40 = vsel %vm32_vm5, %v33_v38, %v31_v39 }
  0x14   :  { %v60_v41 = vrot.slane %v34_v40, %v55_v10 }
  0x15   :  { %v63_v26 = vmul.f32 %v408_v17, %v35_v19  ;;  %v64_v27 = vmul.f32 %v408_v17, %v36_v20  ;;  %v65_v28 = vmul.f32 %v408_v17, %v37_v21  ;;  %v66_v31 = vmul.f32 %v408_v17, %v38_v23 }
  0x16   :  { %v67_v32 = vmul.f32 %v408_v17, %v39_v24  ;;  %v68_v33 = vmul.f32 %v408_v17, %v40_v25  ;;  %v69_v34 = vmul.f32 %v408_v17, %v41_v29  ;;  %v70_v35 = vmul.f32 %v408_v17, %v42_v30 }
  0x17   :  { %80 = vst.msk [vmem:[%s570_s4] sm:$0xff] %vm79_vm0, %v63_v26  ;;  %81 = vst.msk [vmem:[%s570_s4 + $0x8] sm:$0xff] %vm79_vm0, %v64_v27  ;;  %v71_v48 = vmul.f32 %v60_v41, %v43_v42  ;;  %v72_v49 = vmul.f32 %v60_v41, %v44_v43  ;;  %v73_v50 = vmul.f32 %v60_v41, %v45_v44 }
  0x18   :  { %82 = vst.msk [vmem:[%s570_s4 + $0x10] sm:$0xff] %vm79_vm0, %v65_v28  ;;  %83 = vst.msk [vmem:[%s570_s4 + $0x18] sm:$0xff] %vm79_vm0, %v66_v31  ;;  %v74_v53 = vmul.f32 %v60_v41, %v46_v45  ;;  %v75_v54 = vmul.f32 %v60_v41, %v47_v46  ;;  %v76_v55 = vmul.f32 %v60_v41, %v48_v47 }
  0x19   :  { %84 = vst.msk [vmem:[%s570_s4 + $0x20] sm:$0xff] %vm79_vm0, %v67_v32  ;;  %85 = vst.msk [vmem:[%s570_s4 + $0x28] sm:$0xff] %vm79_vm0, %v68_v33  ;;  %v77_v56 = vmul.f32 %v60_v41, %v49_v51  ;;  %v78_v57 = vmul.f32 %v60_v41, %v50_v52 }
  0x1a   :  { %86 = vst.msk [vmem:[%s570_s4 + $0x30] sm:$0xff] %vm79_vm0, %v69_v34  ;;  %87 = vst.msk [vmem:[%s570_s4 + $0x38] sm:$0xff] %vm79_vm0, %v70_v35 }
  0x1b   :  { %88 = vst.msk [vmem:[%s570_s4 + $0x40] sm:$0xff] %vm79_vm0, %v71_v48  ;;  %89 = vst.msk [vmem:[%s570_s4 + $0x48] sm:$0xff] %vm79_vm0, %v72_v49 }
  0x1c   :  { %90 = vst.msk [vmem:[%s570_s4 + $0x50] sm:$0xff] %vm79_vm0, %v73_v50  ;;  %91 = vst.msk [vmem:[%s570_s4 + $0x58] sm:$0xff] %vm79_vm0, %v74_v53 }
  0x1d   :  { %92 = vst.msk [vmem:[%s570_s4 + $0x60] sm:$0xff] %vm79_vm0, %v75_v54  ;;  %93 = vst.msk [vmem:[%s570_s4 + $0x68] sm:$0xff] %vm79_vm0, %v76_v55 }
  0x1e   :  { %94 = vst.msk [vmem:[%s570_s4 + $0x70] sm:$0xff] %vm79_vm0, %v77_v56  ;;  %95 = vst.msk [vmem:[%s570_s4 + $0x78] sm:$0xff] %vm79_vm0, %v78_v57 }
  0xd6   :  { %v169_v14 = vpop.f32.mrb[0].mxu0 }
  0xd7   :  { %246 = vxpose.xlu0.b32.start.end [1/1] (short) (narrow) %v169_v14, 32  ;;  %v344_v16 = vpop.f32.mrb[1].mxu0 }
  0xd8   :  { %v242_v18 = vpop.f32.mrb[0].mxu1 }
  0xd9   :  { %v349_v22 = vpop.f32.mrb[1].mxu1 }
  0xe4   :  { %278 = vxpose.xlu0.b32.start.end [1/1] (short) (narrow) %v242_v18, 32 }
 0x157   :  { %v262_v58 = vpop.trf.xlu0 }
 0x158   :  { %v310_v59 = vmul.f32 %v262_v58, %v408_v17 }
 0x15a   :  { %318 = vst.msk [vmem:[%s571_s5] sm:$0xff] %vm79_vm0, %v310_v59 }
 0x15b   :  { %v263_v60 = vpop.trf.xlu0 }
 0x15c   :  { %v311_v61 = vmul.f32 %v263_v60, %v408_v17 }
 0x15e   :  { %319 = vst.msk [vmem:[%s571_s5 + $0x8] sm:$0xff] %vm79_vm0, %v311_v61 }
 0x15f   :  { %v264_v62 = vpop.trf.xlu0 }
 0x160   :  { %v312_v63 = vmul.f32 %v264_v62, %v408_v17 }
 0x162   :  { %320 = vst.msk [vmem:[%s571_s5 + $0x10] sm:$0xff] %vm79_vm0, %v312_v63 }
 0x163   :  { %v265_v0 = vpop.trf.xlu0 }
 0x164   :  { %v313_v1 = vmul.f32 %v265_v0, %v408_v17 }
 0x166   :  { %321 = vst.msk [vmem:[%s571_s5 + $0x18] sm:$0xff] %vm79_vm0, %v313_v1 }
 0x167   :  { %v294_v2 = vpop.trf.xlu0 }
 0x168   :  { %v314_v3 = vmul.f32 %v294_v2, %v60_v41 }
 0x16a   :  { %322 = vst.msk [vmem:[%s571_s5 + $0x20] sm:$0xff] %vm79_vm0, %v314_v3 }
 0x16b   :  { %v295_v4 = vpop.trf.xlu0 }
 0x16c   :  { %v315_v5 = vmul.f32 %v295_v4, %v60_v41 }
 0x16e   :  { %323 = vst.msk [vmem:[%s571_s5 + $0x28] sm:$0xff] %vm79_vm0, %v315_v5 }
 0x16f   :  { %v296_v6 = vpop.trf.xlu0 }
 0x170   :  { %v316_v7 = vmul.f32 %v296_v6, %v60_v41 }
 0x172   :  { %324 = vst.msk [vmem:[%s571_s5 + $0x30] sm:$0xff] %vm79_vm0, %v316_v7 }
 0x173   :  { %v297_v8 = vpop.trf.xlu0 }
 0x174   :  { %v317_v9 = vmul.f32 %v297_v8, %v60_v41 }
 0x176   :  { %325 = vst.msk [vmem:[%s571_s5 + $0x38] sm:$0xff] %vm79_vm0, %v317_v9 }

</bundles_post_ra>
